<compile_context>
chip_gen: v5e
topology: v5e:2x2
jax: 0.10.0
libtpu: 0.0.40
codegen_flags: <defaults>
</compile_context>

<pallas_src>
import math
import jax
import jax.numpy as jnp
from jax.experimental import pallas as pl
from jax.experimental.pallas import tpu as pltpu

# ----------------------------- constants ------------------------------------
IN_FEATURE_DIM = 128
OUT_FEATURE_DIM = 128
NUM_FREQ = 6
ENC_DIM = 3 * NUM_FREQ * 2 + 3                 # 39  (ScaledNeRFEncoding out dim)
SHARED_DIM = 2 * IN_FEATURE_DIM + ENC_DIM      # 295 (mean | var | posenc)
FP_IN_DIM = ENC_DIM + 3 * IN_FEATURE_DIM       # 423 (feature_pool_mlp in dim)
HIDDEN = 256
POOL_OUT = IN_FEATURE_DIM + 1                  # 129 (128 pooled feats + 1 weight logit)
VOLREND_OUT = OUT_FEATURE_DIM + 4              # 132 (1 density + 3 rgb + 128 feats)
HEAD_DIM = 4                                   # density + rgb
PE_SCALE = math.pi                             # positional_encoding_scale_factor


def _round_up(x, m):
    return (x + m - 1) // m * m


# ----------------------------- Pallas kernel --------------------------------
def _ibrnet_kernel(interp_ref,    # (1, N, Pt, 128)  bf16
                   shared_ref,    # (1, Pt, 295)     bf16
                   w1i_ref, w1s_ref, b1_ref,       # feature_pool layer 1 (W1 split)
                   w2_ref, b2_ref,                 # feature_pool layer 2
                   v1_ref, c1_ref, v2_ref, c2_ref, v3_ref, c3_ref,
                   v4_ref, c4_ref,                 # volrend layer 4, cols = [feats|heads]
                   feat_out_ref,  # (1, Pt, 128) f32
                   head_out_ref):  # (1, Pt, 4)  f32
    _, n, pt, c = interp_ref.shape

    # --- feature_pool layer 1: shared part computed once per point, interp
    #     part fused over all neighbors into a single M = N*Pt matmul.
    h_shared = jnp.dot(shared_ref[0], w1s_ref[...],
                       preferred_element_type=jnp.float32) + b1_ref[...]       # (Pt, 256)
    interp_flat = interp_ref[0].reshape(n * pt, c)                             # (N*Pt, 128) bf16
    h_interp = jnp.dot(interp_flat, w1i_ref[...],
                       preferred_element_type=jnp.float32)                     # (N*Pt, 256)
    h = jnp.maximum(h_interp.reshape(n, pt, HIDDEN) + h_shared[None], 0.0)
    h = h.reshape(n * pt, HIDDEN).astype(jnp.bfloat16)

    # --- feature_pool layer 2 (fused over neighbors).
    pooled = jnp.dot(h, w2_ref[...],
                     preferred_element_type=jnp.float32) + b2_ref[...]         # (N*Pt, 129)
    feats = pooled[:, :POOL_OUT - 1].reshape(n, pt, POOL_OUT - 1)              # (N, Pt, 128)
    logits = pooled[:, POOL_OUT - 1:].reshape(n, pt, 1)                        # (N, Pt, 1)

    # --- softmax over the neighbor axis + weighted pooling (f32).
    m = jnp.max(logits, axis=0)                                                # (Pt, 1)
    e = jnp.exp(logits - m[None])                                              # (N, Pt, 1)
    denom = jnp.sum(e, axis=0)                                                 # (Pt, 1)
    num = jnp.sum(e * feats, axis=0)                                           # (Pt, 128)
    vin = (num * pl.reciprocal(denom, approx=True)).astype(jnp.bfloat16)

    # --- volrend MLP: 128 -> 256 -> 256 -> 256 -> 132 (bf16 matmuls, f32 acc).
    h1 = jnp.maximum(jnp.dot(vin, v1_ref[...], preferred_element_type=jnp.float32)
                     + c1_ref[...], 0.0).astype(jnp.bfloat16)
    h2 = jnp.maximum(jnp.dot(h1, v2_ref[...], preferred_element_type=jnp.float32)
                     + c2_ref[...], 0.0).astype(jnp.bfloat16)
    h3 = jnp.maximum(jnp.dot(h2, v3_ref[...], preferred_element_type=jnp.float32)
                     + c3_ref[...], 0.0).astype(jnp.bfloat16)
    raw = jnp.dot(h3, v4_ref[...],
                  preferred_element_type=jnp.float32) + c4_ref[...]            # (Pt, 132) [feats|density|rgb]

    # lane-dense 128-wide feature store; heads only touch 4 columns.
    feat_out_ref[0] = raw[:, :OUT_FEATURE_DIM]
    head_raw = raw[:, OUT_FEATURE_DIM:]                                        # (Pt, 4)
    softp = jnp.maximum(head_raw, 0.0) + jnp.log1p(jnp.exp(-jnp.abs(head_raw)))
    sigm = 1.0 / (1.0 + jnp.exp(-head_raw))
    col = jax.lax.broadcasted_iota(jnp.int32, head_raw.shape, 1)
    head_out_ref[0] = jnp.where(col < 1, softp, sigm)


def ibrnet_inner_pallas(interp, shared, params, p_tile=256):
    """interp: (B, N, P, 128) f32, shared: (B, P, 295) f32
       -> feats (B, P, 128) f32, heads (B, P, 4) f32 = [softplus(density), sigmoid(rgb)]."""
    B, N, P, C = interp.shape
    Ds = shared.shape[-1]
    assert C == IN_FEATURE_DIM and Ds == SHARED_DIM

    # Point tile: multiple of 16 (bf16 sublane tile); pad P up to a tile multiple.
    pt = min(_round_up(p_tile, 16), _round_up(P, 16))
    P_pad = _round_up(P, pt)
    if P_pad != P:
        interp = jnp.pad(interp, ((0, 0), (0, 0), (0, P_pad - P), (0, 0)))
        shared = jnp.pad(shared, ((0, 0), (0, P_pad - P), (0, 0)))
    interp = interp.astype(jnp.bfloat16)
    shared = shared.astype(jnp.bfloat16)

    bf16 = jnp.bfloat16
    f32 = jnp.float32
    # split W1 into interp-part and shared-part; cast matmul weights to bf16.
    w1i = params["W1"][:C].astype(bf16)                         # (128, 256)
    w1s = params["W1"][C:].astype(bf16)                         # (295, 256)
    b1 = params["b1"].astype(f32)
    w2 = params["W2"].astype(bf16)                              # (256, 129)
    b2 = params["b2"].astype(f32)
    v1 = params["V1"].astype(bf16); c1 = params["c1"].astype(f32)
    v2 = params["V2"].astype(bf16); c2 = params["c2"].astype(f32)
    v3 = params["V3"].astype(bf16); c3 = params["c3"].astype(f32)
    # reorder volrend output columns to [features(128) | density(1) | rgb(3)]
    # so the in-kernel slices land on lane-tile boundaries.
    v4 = jnp.concatenate([params["V4"][:, HEAD_DIM:], params["V4"][:, :HEAD_DIM]],
                         axis=1).astype(bf16)                   # (256, 132)
    c4 = jnp.concatenate([params["c4"][:, HEAD_DIM:], params["c4"][:, :HEAD_DIM]],
                         axis=1).astype(f32)
    weights = [w1i, w1s, b1, w2, b2, v1, c1, v2, c2, v3, c3, v4, c4]

    in_specs = [
        pl.BlockSpec((1, N, pt, C), lambda b, t: (b, 0, t, 0)),
        pl.BlockSpec((1, pt, Ds), lambda b, t: (b, t, 0)),
    ] + [pl.BlockSpec(w.shape, lambda b, t: (0, 0)) for w in weights]

    out_shape = (jax.ShapeDtypeStruct((B, P_pad, OUT_FEATURE_DIM), jnp.float32),
                 jax.ShapeDtypeStruct((B, P_pad, HEAD_DIM), jnp.float32))
    out_specs = (pl.BlockSpec((1, pt, OUT_FEATURE_DIM), lambda b, t: (b, t, 0)),
                 pl.BlockSpec((1, pt, HEAD_DIM), lambda b, t: (b, t, 0)))

    flops = int(2 * B * P_pad * (N * C * HIDDEN + Ds * HIDDEN        # layer 1
                                 + N * HIDDEN * POOL_OUT             # layer 2
                                 + C * HIDDEN + 2 * HIDDEN * HIDDEN
                                 + HIDDEN * VOLREND_OUT))            # volrend
    transcendentals = int(B * P_pad * (N + 2 * HEAD_DIM + 1))
    bytes_accessed = int(interp.size * 2 + shared.size * 2
                         + sum(int(w.size) * w.dtype.itemsize for w in weights)
                         + B * P_pad * (OUT_FEATURE_DIM + HEAD_DIM) * 4)

    feats, heads = pl.pallas_call(
        _ibrnet_kernel,
        out_shape=out_shape,
        grid_spec=pltpu.PrefetchScalarGridSpec(
            num_scalar_prefetch=0,
            grid=(B, P_pad // pt),
            in_specs=in_specs,
            out_specs=out_specs,
        ),
        compiler_params=pltpu.CompilerParams(
            dimension_semantics=("parallel", "parallel"),
            vmem_limit_bytes=32 * 1024 * 1024),
        cost_estimate=pl.CostEstimate(flops=flops,
                                      transcendentals=transcendentals,
                                      bytes_accessed=bytes_accessed),
    )(interp, shared, *weights)
    return feats[:, :P], heads[:, :P]


# ----------------------------- JAX glue --------------------------------------
def repeat_interleave(x, r):
    # pixelNeRF-style: (B, ...) -> (B*r, ...), each row repeated r times.
    return jnp.repeat(x, r, axis=0)


def scaled_nerf_encoding(positions, num_freq=NUM_FREQ, min_exp=0.0, max_exp=5.0,
                         scale=PE_SCALE):
    # ScaledNeRFEncoding(in_dim=3, num_frequencies=6, 0..5, include_input=True)
    scaled = scale * positions
    freqs = 2.0 ** jnp.linspace(min_exp, max_exp, num_freq)
    sp = scaled[..., None] * freqs                                 # (..., 3, 6)
    sp = sp.reshape(*scaled.shape[:-1], -1)                        # (..., 18)
    enc = jnp.sin(jnp.concatenate([sp, sp + jnp.pi / 2.0], axis=-1))  # (..., 36)
    return jnp.concatenate([enc, positions], axis=-1)              # (..., 39)


def get_pixel_aligned_features(image_features, uv, uv_scaling):
    # TODO(synk): exact generfstudio uv->grid normalization is not in the prompt;
    # we assume uv_norm = uv * uv_scaling - 1 with align_corners=True bilinear
    # sampling and border padding (pixelNeRF convention). Data-dependent gather
    # kept in plain JAX (no clean BlockSpec equivalent).
    BN, C, H, W = image_features.shape
    feat = jnp.transpose(image_features, (0, 2, 3, 1))             # NHWC
    uvn = uv * uv_scaling - 1.0
    x = (uvn[..., 0] + 1.0) * 0.5 * (W - 1)
    y = (uvn[..., 1] + 1.0) * 0.5 * (H - 1)
    x0 = jnp.floor(x)
    y0 = jnp.floor(y)
    wx = (x - x0)[..., None]
    wy = (y - y0)[..., None]
    x0i = jnp.clip(x0, 0, W - 1).astype(jnp.int32)
    x1i = jnp.clip(x0 + 1, 0, W - 1).astype(jnp.int32)
    y0i = jnp.clip(y0, 0, H - 1).astype(jnp.int32)
    y1i = jnp.clip(y0 + 1, 0, H - 1).astype(jnp.int32)
    bidx = jnp.arange(BN)[:, None]

    def g(yi, xi):
        return feat[bidx, yi, xi]                                  # (BN, P, C)

    f00, f01 = g(y0i, x0i), g(y0i, x1i)
    f10, f11 = g(y1i, x0i), g(y1i, x1i)
    return (f00 * (1 - wx) * (1 - wy) + f01 * wx * (1 - wy)
            + f10 * (1 - wx) * wy + f11 * wx * wy)                 # (BN, P, C)


def _prepare_pool_inputs(positions, image_features, neighboring_w2c, cameras,
                         uv_scaling):
    """Projection + bilinear sampling + mean/var/posenc -> kernel inputs."""
    B, P, _ = positions.shape
    N = cameras["fx"].shape[-1]

    xyz = repeat_interleave(positions, N)                          # (BN, P, 3)
    xyz_rot = jnp.einsum("bij,bpj->bpi", neighboring_w2c[:, :3, :3], xyz)
    xyz_in = xyz_rot + neighboring_w2c[:, None, :3, 3]
    uv = -xyz_in[:, :, :2] / xyz_in[:, :, 2:]
    focal = jnp.stack([cameras["fx"].reshape(-1), -cameras["fy"].reshape(-1)], -1)
    uv = uv * focal[:, None, :]
    center = jnp.stack([cameras["cx"].reshape(-1), cameras["cy"].reshape(-1)], -1)
    uv = uv + center[:, None, :]

    interp = get_pixel_aligned_features(image_features, uv, uv_scaling)  # (BN,P,C)
    C = interp.shape[-1]
    interp4 = interp.reshape(B, N, P, C)

    # neighbor mean / unbiased var (torch .var default: correction=1), NOT
    # replicated across N -- the kernel de-duplicates the shared block.
    mean = interp4.mean(axis=1)                                    # (B, P, 128)
    var = jnp.var(interp4, axis=1, ddof=1)                         # (B, P, 128)
    enc = scaled_nerf_encoding(positions)                          # (B, P, 39)
    shared = jnp.concatenate([mean, var, enc], axis=-1)            # (B, P, 295)
    return interp4.astype(jnp.float32), shared.astype(jnp.float32)


def ibrnet_inner_field_forward(frustum_shape, positions, image_features,
                               neighboring_w2c, cameras, uv_scaling, params,
                               p_tile=256):
    """Full forward pass matching IBRNetInnerField.forward semantics."""
    interp4, shared = _prepare_pool_inputs(positions, image_features,
                                           neighboring_w2c, cameras, uv_scaling)
    feats, heads = ibrnet_inner_pallas(interp4, shared, params, p_tile=p_tile)
    density = heads[..., 0:1].reshape(*frustum_shape, 1)
    rgb = heads[..., 1:4].reshape(*frustum_shape, 3)
    features = feats.reshape(*frustum_shape, OUT_FEATURE_DIM)
    return density, rgb, features


# ----------------------------- params ----------------------------------------
def init_linear(key, din, dout):
    kw, kb = jax.random.split(key)
    bound = 1.0 / math.sqrt(din)
    W = jax.random.uniform(kw, (din, dout), minval=-bound, maxval=bound,
                           dtype=jnp.float32)
    b = jax.random.uniform(kb, (1, dout), minval=-bound, maxval=bound,
                           dtype=jnp.float32)
    return W, b


def init_params(key):
    keys = jax.random.split(key, 6)
    W1, b1 = init_linear(keys[0], FP_IN_DIM, HIDDEN)
    W2, b2 = init_linear(keys[1], HIDDEN, POOL_OUT)
    V1, c1 = init_linear(keys[2], IN_FEATURE_DIM, HIDDEN)
    V2, c2 = init_linear(keys[3], HIDDEN, HIDDEN)
    V3, c3 = init_linear(keys[4], HIDDEN, HIDDEN)
    V4, c4 = init_linear(keys[5], HIDDEN, VOLREND_OUT)
    return dict(W1=W1, b1=b1, W2=W2, b2=b2, V1=V1, c1=c1, V2=V2, c2=c2,
                V3=V3, c3=c3, V4=V4, c4=c4)


# pure-JAX f32 reference of the Pallas-kernel portion (original column order)
def _reference_kernel_part(interp4, shared, p):
    B, N, P, C = interp4.shape
    shared_b = jnp.broadcast_to(shared[:, None], (B, N, P, shared.shape[-1]))
    x = jnp.concatenate([interp4, shared_b], axis=-1).reshape(-1, FP_IN_DIM)
    h = jax.nn.relu(x @ p["W1"] + p["b1"])
    pooled = (h @ p["W2"] + p["b2"]).reshape(B, N, P, POOL_OUT)
    w = jax.nn.softmax(pooled[..., -1:], axis=1)
    vin = (pooled[..., :-1] * w).sum(1).reshape(-1, IN_FEATURE_DIM)
    h1 = jax.nn.relu(vin @ p["V1"] + p["c1"])
    h2 = jax.nn.relu(h1 @ p["V2"] + p["c2"])
    h3 = jax.nn.relu(h2 @ p["V3"] + p["c3"])
    out = h3 @ p["V4"] + p["c4"]
    out = jnp.concatenate([jax.nn.softplus(out[:, :1]),
                           jax.nn.sigmoid(out[:, 1:4]),
                           out[:, 4:]], axis=-1)
    return out.reshape(B, P, VOLREND_OUT)


# ----------------------------- main -------------------------------------------
if __name__ == "__main__":
    key = jax.random.PRNGKey(0)
    k_pos, k_feat, k_trans, k_param = jax.random.split(key, 4)

    B = 1                     # scene batch
    N = 3                     # neighbor cameras
    RAYS, SAMPLES = 16, 16
    P = RAYS * SAMPLES        # points per scene (256)
    H = W = 16
    C = IN_FEATURE_DIM        # 128
    P_TILE = 128              # demo tile (production default is 256)

    # positions with positive depth so projection is well behaved
    xy = jax.random.uniform(k_pos, (B, P, 2), minval=-1.0, maxval=1.0)
    z = jax.random.uniform(jax.random.fold_in(k_pos, 1), (B, P, 1),
                           minval=1.5, maxval=2.5)
    positions = jnp.concatenate([xy, z], axis=-1).astype(jnp.float32)

    image_features = jax.random.normal(k_feat, (B * N, C, H, W),
                                       dtype=jnp.float32)

    w2c = jnp.tile(jnp.eye(4, dtype=jnp.float32)[None], (B * N, 1, 1))
    trans = 0.1 * jax.random.normal(k_trans, (B * N, 3), dtype=jnp.float32)
    w2c = w2c.at[:, :3, 3].set(trans)

    cameras = dict(
        fx=jnp.full((B, N), 8.0, dtype=jnp.float32),
        fy=jnp.full((B, N), 8.0, dtype=jnp.float32),
        cx=jnp.full((B, N), (W - 1) / 2.0, dtype=jnp.float32),
        cy=jnp.full((B, N), (H - 1) / 2.0, dtype=jnp.float32),
    )
    uv_scaling = jnp.array([2.0 / (W - 1), 2.0 / (H - 1)], dtype=jnp.float32)

    params = init_params(k_param)

    density, rgb, features = ibrnet_inner_field_forward(
        (RAYS, SAMPLES), positions, image_features, w2c, cameras, uv_scaling,
        params, p_tile=P_TILE)
    jax.block_until_ready((density, rgb, features))

    assert density.shape == (RAYS, SAMPLES, 1)
    assert rgb.shape == (RAYS, SAMPLES, 3)
    assert features.shape == (RAYS, SAMPLES, OUT_FEATURE_DIM)

    # sanity check the Pallas hot path against a pure-JAX f32 reference
    # (loose tolerance because the kernel intentionally uses bf16 matmuls)
    interp4, shared = _prepare_pool_inputs(positions, image_features, w2c,
                                           cameras, uv_scaling)
    ref = _reference_kernel_part(interp4, shared, params).reshape(
        RAYS, SAMPLES, VOLREND_OUT)
    got = jnp.concatenate([density, rgb, features], axis=-1)
    max_err = float(jnp.max(jnp.abs(got - ref)))
    assert jnp.allclose(got, ref, atol=1e-1, rtol=1e-1), (
        f"kernel mismatch, max abs err = {max_err}")

    print("KERNEL_OK")
</pallas_src>

<mosaic_0001>
module attributes {stable_mosaic.version = 11 : i64} {
  func.func @_ibrnet_kernel(%arg0: i32, %arg1: i32, %arg2: memref<1x3x128x128xbf16, #tpu.memory_space<vmem>>, %arg3: memref<1x128x295xbf16, #tpu.memory_space<vmem>>, %arg4: memref<128x256xbf16, #tpu.memory_space<vmem>>, %arg5: memref<295x256xbf16, #tpu.memory_space<vmem>>, %arg6: memref<1x256xf32, #tpu.memory_space<vmem>>, %arg7: memref<256x129xbf16, #tpu.memory_space<vmem>>, %arg8: memref<1x129xf32, #tpu.memory_space<vmem>>, %arg9: memref<128x256xbf16, #tpu.memory_space<vmem>>, %arg10: memref<1x256xf32, #tpu.memory_space<vmem>>, %arg11: memref<256x256xbf16, #tpu.memory_space<vmem>>, %arg12: memref<1x256xf32, #tpu.memory_space<vmem>>, %arg13: memref<256x256xbf16, #tpu.memory_space<vmem>>, %arg14: memref<1x256xf32, #tpu.memory_space<vmem>>, %arg15: memref<256x132xbf16, #tpu.memory_space<vmem>>, %arg16: memref<1x132xf32, #tpu.memory_space<vmem>>, %arg17: memref<1x128x128xf32, #tpu.memory_space<vmem>>, %arg18: memref<1x128x4xf32, #tpu.memory_space<vmem>>) attributes {dimension_semantics = [#tpu.dimension_semantics<parallel>, #tpu.dimension_semantics<parallel>], iteration_bounds = array<i64: 1, 2>, scalar_prefetch = 0 : i64, scratch_operands = 0 : i64, tpu.core_type = #tpu.core_type<tc>, window_params = [{transform_indices = @transform_0, window_bounds = array<i64: 1, 3, 128, 128>}, {transform_indices = @transform_1, window_bounds = array<i64: 1, 128, 295>}, {pipeline_mode = #tpu.pipeline_mode<synchronous>, transform_indices = @transform_2, window_bounds = array<i64: 128, 256>}, {pipeline_mode = #tpu.pipeline_mode<synchronous>, transform_indices = @transform_3, window_bounds = array<i64: 295, 256>}, {pipeline_mode = #tpu.pipeline_mode<synchronous>, transform_indices = @transform_4, window_bounds = array<i64: 1, 256>}, {pipeline_mode = #tpu.pipeline_mode<synchronous>, transform_indices = @transform_5, window_bounds = array<i64: 256, 129>}, {pipeline_mode = #tpu.pipeline_mode<synchronous>, transform_indices = @transform_6, window_bounds = array<i64: 1, 129>}, {pipeline_mode = #tpu.pipeline_mode<synchronous>, transform_indices = @transform_7, window_bounds = array<i64: 128, 256>}, {pipeline_mode = #tpu.pipeline_mode<synchronous>, transform_indices = @transform_8, window_bounds = array<i64: 1, 256>}, {pipeline_mode = #tpu.pipeline_mode<synchronous>, transform_indices = @transform_9, window_bounds = array<i64: 256, 256>}, {pipeline_mode = #tpu.pipeline_mode<synchronous>, transform_indices = @transform_10, window_bounds = array<i64: 1, 256>}, {pipeline_mode = #tpu.pipeline_mode<synchronous>, transform_indices = @transform_11, window_bounds = array<i64: 256, 256>}, {pipeline_mode = #tpu.pipeline_mode<synchronous>, transform_indices = @transform_12, window_bounds = array<i64: 1, 256>}, {pipeline_mode = #tpu.pipeline_mode<synchronous>, transform_indices = @transform_13, window_bounds = array<i64: 256, 132>}, {pipeline_mode = #tpu.pipeline_mode<synchronous>, transform_indices = @transform_14, window_bounds = array<i64: 1, 132>}, {transform_indices = @transform_15, window_bounds = array<i64: 1, 128, 128>}, {transform_indices = @transform_16, window_bounds = array<i64: 1, 128, 4>}]} {
    %c0 = arith.constant 0 : index
    %c0_0 = arith.constant 0 : index
    %c0_1 = arith.constant 0 : index
    %0 = vector.load %arg3[%c0, %c0_0, %c0_1] : memref<1x128x295xbf16, #tpu.memory_space<vmem>>, vector<1x128x295xbf16>
    %1 = vector.shape_cast %0 : vector<1x128x295xbf16> to vector<128x295xbf16>
    %c0_2 = arith.constant 0 : index
    %c0_3 = arith.constant 0 : index
    %2 = vector.load %arg5[%c0_2, %c0_3] : memref<295x256xbf16, #tpu.memory_space<vmem>>, vector<295x256xbf16>
    %cst = arith.constant dense<0.000000e+00> : vector<128x256xf32>
    %3 = tpu.matmul %1, %2, %cst {dimension_numbers = #tpu.dot_dimension_numbers<[1], [0], [0], [1], [0, 0, 1, 1], [], []>} : vector<128x295xbf16>, vector<295x256xbf16>, vector<128x256xf32> -> vector<128x256xf32>
    %c0_4 = arith.constant 0 : index
    %c0_5 = arith.constant 0 : index
    %4 = vector.load %arg6[%c0_4, %c0_5] : memref<1x256xf32, #tpu.memory_space<vmem>>, vector<1x256xf32>
    %5 = vector.broadcast %4 : vector<1x256xf32> to vector<128x256xf32>
    %6 = arith.addf %3, %5 : vector<128x256xf32>
    %c0_6 = arith.constant 0 : index
    %c0_7 = arith.constant 0 : index
    %c0_8 = arith.constant 0 : index
    %c0_9 = arith.constant 0 : index
    %7 = vector.load %arg2[%c0_6, %c0_7, %c0_8, %c0_9] : memref<1x3x128x128xbf16, #tpu.memory_space<vmem>>, vector<1x3x128x128xbf16>
    %8 = vector.shape_cast %7 : vector<1x3x128x128xbf16> to vector<3x128x128xbf16>
    %9 = vector.shape_cast %8 : vector<3x128x128xbf16> to vector<384x128xbf16>
    %c0_10 = arith.constant 0 : index
    %c0_11 = arith.constant 0 : index
    %10 = vector.load %arg4[%c0_10, %c0_11] : memref<128x256xbf16, #tpu.memory_space<vmem>>, vector<128x256xbf16>
    %cst_12 = arith.constant dense<0.000000e+00> : vector<384x256xf32>
    %11 = tpu.matmul %9, %10, %cst_12 {dimension_numbers = #tpu.dot_dimension_numbers<[1], [0], [0], [1], [0, 0, 1, 1], [], []>} : vector<384x128xbf16>, vector<128x256xbf16>, vector<384x256xf32> -> vector<384x256xf32>
    %12 = vector.shape_cast %11 : vector<384x256xf32> to vector<3x128x256xf32>
    %13 = vector.shape_cast %6 : vector<128x256xf32> to vector<1x128x256xf32>
    %14 = vector.broadcast %13 : vector<1x128x256xf32> to vector<3x128x256xf32>
    %15 = arith.addf %12, %14 : vector<3x128x256xf32>
    %cst_13 = arith.constant 0.000000e+00 : f32
    %16 = vector.broadcast %cst_13 : f32 to vector<3x128x256xf32>
    %17 = arith.maximumf %15, %16 : vector<3x128x256xf32>
    %18 = vector.shape_cast %17 : vector<3x128x256xf32> to vector<384x256xf32>
    %19 = arith.truncf %18 : vector<384x256xf32> to vector<384x256xbf16>
    %c0_14 = arith.constant 0 : index
    %c0_15 = arith.constant 0 : index
    %20 = vector.load %arg7[%c0_14, %c0_15] : memref<256x129xbf16, #tpu.memory_space<vmem>>, vector<256x129xbf16>
    %cst_16 = arith.constant dense<0.000000e+00> : vector<384x129xf32>
    %21 = tpu.matmul %19, %20, %cst_16 {dimension_numbers = #tpu.dot_dimension_numbers<[1], [0], [0], [1], [0, 0, 1, 1], [], []>} : vector<384x256xbf16>, vector<256x129xbf16>, vector<384x129xf32> -> vector<384x129xf32>
    %c0_17 = arith.constant 0 : index
    %c0_18 = arith.constant 0 : index
    %22 = vector.load %arg8[%c0_17, %c0_18] : memref<1x129xf32, #tpu.memory_space<vmem>>, vector<1x129xf32>
    %23 = vector.broadcast %22 : vector<1x129xf32> to vector<384x129xf32>
    %24 = arith.addf %21, %23 : vector<384x129xf32>
    %25 = vector.extract_strided_slice %24 {offsets = [0, 0], sizes = [384, 128], strides = [1, 1]} : vector<384x129xf32> to vector<384x128xf32>
    %26 = vector.shape_cast %25 : vector<384x128xf32> to vector<3x128x128xf32>
    %27 = vector.extract_strided_slice %24 {offsets = [0, 128], sizes = [384, 1], strides = [1, 1]} : vector<384x129xf32> to vector<384x1xf32>
    %28 = vector.shape_cast %27 : vector<384x1xf32> to vector<3x128x1xf32>
    %cst_19 = arith.constant dense<0xFF800000> : vector<128x1xf32>
    %29 = vector.multi_reduction <maximumf>, %28, %cst_19 [0] : vector<3x128x1xf32> to vector<128x1xf32>
    %30 = vector.shape_cast %29 : vector<128x1xf32> to vector<1x128x1xf32>
    %31 = vector.broadcast %30 : vector<1x128x1xf32> to vector<3x128x1xf32>
    %32 = arith.subf %28, %31 : vector<3x128x1xf32>
    %33 = math.exp %32 : vector<3x128x1xf32>
    %cst_20 = arith.constant dense<0.000000e+00> : vector<128x1xf32>
    %34 = vector.multi_reduction <add>, %33, %cst_20 [0] : vector<3x128x1xf32> to vector<128x1xf32>
    %35 = vector.broadcast %33 : vector<3x128x1xf32> to vector<3x128x128xf32>
    %36 = arith.mulf %35, %26 : vector<3x128x128xf32>
    %cst_21 = arith.constant dense<0.000000e+00> : vector<128x128xf32>
    %37 = vector.multi_reduction <add>, %36, %cst_21 [0] : vector<3x128x128xf32> to vector<128x128xf32>
    %38 = tpu.reciprocal %34 {approx = true} : vector<128x1xf32> -> vector<128x1xf32>
    %39 = vector.broadcast %38 : vector<128x1xf32> to vector<128x128xf32>
    %40 = arith.mulf %37, %39 : vector<128x128xf32>
    %41 = arith.truncf %40 : vector<128x128xf32> to vector<128x128xbf16>
    %c0_22 = arith.constant 0 : index
    %c0_23 = arith.constant 0 : index
    %42 = vector.load %arg9[%c0_22, %c0_23] : memref<128x256xbf16, #tpu.memory_space<vmem>>, vector<128x256xbf16>
    %cst_24 = arith.constant dense<0.000000e+00> : vector<128x256xf32>
    %43 = tpu.matmul %41, %42, %cst_24 {dimension_numbers = #tpu.dot_dimension_numbers<[1], [0], [0], [1], [0, 0, 1, 1], [], []>} : vector<128x128xbf16>, vector<128x256xbf16>, vector<128x256xf32> -> vector<128x256xf32>
    %c0_25 = arith.constant 0 : index
    %c0_26 = arith.constant 0 : index
    %44 = vector.load %arg10[%c0_25, %c0_26] : memref<1x256xf32, #tpu.memory_space<vmem>>, vector<1x256xf32>
    %45 = vector.broadcast %44 : vector<1x256xf32> to vector<128x256xf32>
    %46 = arith.addf %43, %45 : vector<128x256xf32>
    %cst_27 = arith.constant 0.000000e+00 : f32
    %47 = vector.broadcast %cst_27 : f32 to vector<128x256xf32>
    %48 = arith.maximumf %46, %47 : vector<128x256xf32>
    %49 = arith.truncf %48 : vector<128x256xf32> to vector<128x256xbf16>
    %c0_28 = arith.constant 0 : index
    %c0_29 = arith.constant 0 : index
    %50 = vector.load %arg11[%c0_28, %c0_29] : memref<256x256xbf16, #tpu.memory_space<vmem>>, vector<256x256xbf16>
    %cst_30 = arith.constant dense<0.000000e+00> : vector<128x256xf32>
    %51 = tpu.matmul %49, %50, %cst_30 {dimension_numbers = #tpu.dot_dimension_numbers<[1], [0], [0], [1], [0, 0, 1, 1], [], []>} : vector<128x256xbf16>, vector<256x256xbf16>, vector<128x256xf32> -> vector<128x256xf32>
    %c0_31 = arith.constant 0 : index
    %c0_32 = arith.constant 0 : index
    %52 = vector.load %arg12[%c0_31, %c0_32] : memref<1x256xf32, #tpu.memory_space<vmem>>, vector<1x256xf32>
    %53 = vector.broadcast %52 : vector<1x256xf32> to vector<128x256xf32>
    %54 = arith.addf %51, %53 : vector<128x256xf32>
    %cst_33 = arith.constant 0.000000e+00 : f32
    %55 = vector.broadcast %cst_33 : f32 to vector<128x256xf32>
    %56 = arith.maximumf %54, %55 : vector<128x256xf32>
    %57 = arith.truncf %56 : vector<128x256xf32> to vector<128x256xbf16>
    %c0_34 = arith.constant 0 : index
    %c0_35 = arith.constant 0 : index
    %58 = vector.load %arg13[%c0_34, %c0_35] : memref<256x256xbf16, #tpu.memory_space<vmem>>, vector<256x256xbf16>
    %cst_36 = arith.constant dense<0.000000e+00> : vector<128x256xf32>
    %59 = tpu.matmul %57, %58, %cst_36 {dimension_numbers = #tpu.dot_dimension_numbers<[1], [0], [0], [1], [0, 0, 1, 1], [], []>} : vector<128x256xbf16>, vector<256x256xbf16>, vector<128x256xf32> -> vector<128x256xf32>
    %c0_37 = arith.constant 0 : index
    %c0_38 = arith.constant 0 : index
    %60 = vector.load %arg14[%c0_37, %c0_38] : memref<1x256xf32, #tpu.memory_space<vmem>>, vector<1x256xf32>
    %61 = vector.broadcast %60 : vector<1x256xf32> to vector<128x256xf32>
    %62 = arith.addf %59, %61 : vector<128x256xf32>
    %cst_39 = arith.constant 0.000000e+00 : f32
    %63 = vector.broadcast %cst_39 : f32 to vector<128x256xf32>
    %64 = arith.maximumf %62, %63 : vector<128x256xf32>
    %65 = arith.truncf %64 : vector<128x256xf32> to vector<128x256xbf16>
    %c0_40 = arith.constant 0 : index
    %c0_41 = arith.constant 0 : index
    %66 = vector.load %arg15[%c0_40, %c0_41] : memref<256x132xbf16, #tpu.memory_space<vmem>>, vector<256x132xbf16>
    %cst_42 = arith.constant dense<0.000000e+00> : vector<128x132xf32>
    %67 = tpu.matmul %65, %66, %cst_42 {dimension_numbers = #tpu.dot_dimension_numbers<[1], [0], [0], [1], [0, 0, 1, 1], [], []>} : vector<128x256xbf16>, vector<256x132xbf16>, vector<128x132xf32> -> vector<128x132xf32>
    %c0_43 = arith.constant 0 : index
    %c0_44 = arith.constant 0 : index
    %68 = vector.load %arg16[%c0_43, %c0_44] : memref<1x132xf32, #tpu.memory_space<vmem>>, vector<1x132xf32>
    %69 = vector.broadcast %68 : vector<1x132xf32> to vector<128x132xf32>
    %70 = arith.addf %67, %69 : vector<128x132xf32>
    %71 = vector.extract_strided_slice %70 {offsets = [0, 0], sizes = [128, 128], strides = [1, 1]} : vector<128x132xf32> to vector<128x128xf32>
    %c0_45 = arith.constant 0 : index
    %c0_46 = arith.constant 0 : index
    %c0_47 = arith.constant 0 : index
    %72 = vector.load %arg17[%c0_45, %c0_46, %c0_47] : memref<1x128x128xf32, #tpu.memory_space<vmem>>, vector<1x128x128xf32>
    %73 = vector.shape_cast %72 : vector<1x128x128xf32> to vector<128x128xf32>
    %74 = vector.shape_cast %71 : vector<128x128xf32> to vector<1x128x128xf32>
    tpu.vector_store %arg17[%c0_45, %c0_46, %c0_47], %74 {strides = array<i32>} : memref<1x128x128xf32, #tpu.memory_space<vmem>>, vector<1x128x128xf32>,
    %75 = vector.extract_strided_slice %70 {offsets = [0, 128], sizes = [128, 4], strides = [1, 1]} : vector<128x132xf32> to vector<128x4xf32>
    %cst_48 = arith.constant 0.000000e+00 : f32
    %76 = vector.broadcast %cst_48 : f32 to vector<128x4xf32>
    %77 = arith.maximumf %75, %76 : vector<128x4xf32>
    %78 = math.absf %75 : vector<128x4xf32>
    %cst_49 = arith.constant 0.000000e+00 : f32
    %79 = vector.broadcast %cst_49 : f32 to vector<128x4xf32>
    %80 = arith.subf %79, %78 : vector<128x4xf32>
    %81 = math.exp %80 : vector<128x4xf32>
    %82 = math.log1p %81 : vector<128x4xf32>
    %83 = arith.addf %77, %82 : vector<128x4xf32>
    %cst_50 = arith.constant 0.000000e+00 : f32
    %84 = vector.broadcast %cst_50 : f32 to vector<128x4xf32>
    %85 = arith.subf %84, %75 : vector<128x4xf32>
    %86 = math.exp %85 : vector<128x4xf32>
    %cst_51 = arith.constant 1.000000e+00 : f32
    %87 = vector.broadcast %cst_51 : f32 to vector<128x4xf32>
    %88 = arith.addf %87, %86 : vector<128x4xf32>
    %cst_52 = arith.constant 1.000000e+00 : f32
    %89 = vector.broadcast %cst_52 : f32 to vector<128x4xf32>
    %90 = arith.divf %89, %88 : vector<128x4xf32>
    %91 = tpu.iota {dimensions = array<i32: 1>} : vector<128x4xi32>
    %c1_i32 = arith.constant 1 : i32
    %92 = vector.broadcast %c1_i32 : i32 to vector<128x4xi32>
    %93 = arith.cmpi slt, %91, %92 : vector<128x4xi32>
    %94 = arith.select %93, %83, %90 : vector<128x4xi1>, vector<128x4xf32>
    %c0_53 = arith.constant 0 : index
    %c0_54 = arith.constant 0 : index
    %c0_55 = arith.constant 0 : index
    %95 = vector.load %arg18[%c0_53, %c0_54, %c0_55] : memref<1x128x4xf32, #tpu.memory_space<vmem>>, vector<1x128x4xf32>
    %96 = vector.shape_cast %95 : vector<1x128x4xf32> to vector<128x4xf32>
    %97 = vector.shape_cast %94 : vector<128x4xf32> to vector<1x128x4xf32>
    tpu.vector_store %arg18[%c0_53, %c0_54, %c0_55], %97 {strides = array<i32>} : memref<1x128x4xf32, #tpu.memory_space<vmem>>, vector<1x128x4xf32>,
    return
  }
  func.func @transform_0(%arg0: i32, %arg1: i32) -> (i32, i32, i32, i32) {
    %c0_i32 = arith.constant 0 : i32
    %c0_i32_0 = arith.constant 0 : i32
    %c0_i32_1 = arith.constant 0 : i32
    return %arg0, %c0_i32, %arg1, %c0_i32_0 : i32, i32, i32, i32
  }
  func.func @transform_1(%arg0: i32, %arg1: i32) -> (i32, i32, i32) {
    %c0_i32 = arith.constant 0 : i32
    %c0_i32_0 = arith.constant 0 : i32
    return %arg0, %arg1, %c0_i32 : i32, i32, i32
  }
  func.func @transform_2(%arg0: i32, %arg1: i32) -> (i32, i32) {
    %c0_i32 = arith.constant 0 : i32
    %c0_i32_0 = arith.constant 0 : i32
    %c0_i32_1 = arith.constant 0 : i32
    return %c0_i32, %c0_i32_0 : i32, i32
  }
  func.func @transform_3(%arg0: i32, %arg1: i32) -> (i32, i32) {
    %c0_i32 = arith.constant 0 : i32
    %c0_i32_0 = arith.constant 0 : i32
    %c0_i32_1 = arith.constant 0 : i32
    return %c0_i32, %c0_i32_0 : i32, i32
  }
  func.func @transform_4(%arg0: i32, %arg1: i32) -> (i32, i32) {
    %c0_i32 = arith.constant 0 : i32
    %c0_i32_0 = arith.constant 0 : i32
    %c0_i32_1 = arith.constant 0 : i32
    return %c0_i32, %c0_i32_0 : i32, i32
  }
  func.func @transform_5(%arg0: i32, %arg1: i32) -> (i32, i32) {
    %c0_i32 = arith.constant 0 : i32
    %c0_i32_0 = arith.constant 0 : i32
    %c0_i32_1 = arith.constant 0 : i32
    return %c0_i32, %c0_i32_0 : i32, i32
  }
  func.func @transform_6(%arg0: i32, %arg1: i32) -> (i32, i32) {
    %c0_i32 = arith.constant 0 : i32
    %c0_i32_0 = arith.constant 0 : i32
    %c0_i32_1 = arith.constant 0 : i32
    return %c0_i32, %c0_i32_0 : i32, i32
  }
  func.func @transform_7(%arg0: i32, %arg1: i32) -> (i32, i32) {
    %c0_i32 = arith.constant 0 : i32
    %c0_i32_0 = arith.constant 0 : i32
    %c0_i32_1 = arith.constant 0 : i32
    return %c0_i32, %c0_i32_0 : i32, i32
  }
  func.func @transform_8(%arg0: i32, %arg1: i32) -> (i32, i32) {
    %c0_i32 = arith.constant 0 : i32
    %c0_i32_0 = arith.constant 0 : i32
    %c0_i32_1 = arith.constant 0 : i32
    return %c0_i32, %c0_i32_0 : i32, i32
  }
  func.func @transform_9(%arg0: i32, %arg1: i32) -> (i32, i32) {
    %c0_i32 = arith.constant 0 : i32
    %c0_i32_0 = arith.constant 0 : i32
    %c0_i32_1 = arith.constant 0 : i32
    return %c0_i32, %c0_i32_0 : i32, i32
  }
  func.func @transform_10(%arg0: i32, %arg1: i32) -> (i32, i32) {
    %c0_i32 = arith.constant 0 : i32
    %c0_i32_0 = arith.constant 0 : i32
    %c0_i32_1 = arith.constant 0 : i32
    return %c0_i32, %c0_i32_0 : i32, i32
  }
  func.func @transform_11(%arg0: i32, %arg1: i32) -> (i32, i32) {
    %c0_i32 = arith.constant 0 : i32
    %c0_i32_0 = arith.constant 0 : i32
    %c0_i32_1 = arith.constant 0 : i32
    return %c0_i32, %c0_i32_0 : i32, i32
  }
  func.func @transform_12(%arg0: i32, %arg1: i32) -> (i32, i32) {
    %c0_i32 = arith.constant 0 : i32
    %c0_i32_0 = arith.constant 0 : i32
    %c0_i32_1 = arith.constant 0 : i32
    return %c0_i32, %c0_i32_0 : i32, i32
  }
  func.func @transform_13(%arg0: i32, %arg1: i32) -> (i32, i32) {
    %c0_i32 = arith.constant 0 : i32
    %c0_i32_0 = arith.constant 0 : i32
    %c0_i32_1 = arith.constant 0 : i32
    return %c0_i32, %c0_i32_0 : i32, i32
  }
  func.func @transform_14(%arg0: i32, %arg1: i32) -> (i32, i32) {
    %c0_i32 = arith.constant 0 : i32
    %c0_i32_0 = arith.constant 0 : i32
    %c0_i32_1 = arith.constant 0 : i32
    return %c0_i32, %c0_i32_0 : i32, i32
  }
  func.func @transform_15(%arg0: i32, %arg1: i32) -> (i32, i32, i32) {
    %c0_i32 = arith.constant 0 : i32
    %c0_i32_0 = arith.constant 0 : i32
    return %arg0, %arg1, %c0_i32 : i32, i32, i32
  }
  func.func @transform_16(%arg0: i32, %arg1: i32) -> (i32, i32, i32) {
    %c0_i32 = arith.constant 0 : i32
    %c0_i32_0 = arith.constant 0 : i32
    return %arg0, %arg1, %c0_i32 : i32, i32, i32
  }
}

</mosaic_0001>

<bundles_post_ra>
// kernel: tpu_custom_call.1
= control target key start
LH: loop header
LB: loop body
LE: loop exit
PB: predicated region body
PF: predicated region fallthrough
CT: control target
= control target key end

     0   :  { %s11309_s0 = inlined_call_operand.vmem [shape: bf16[1,3,256,128], index: 0, kind: input, shape index: {}]   ;;  %s11310_s1 = inlined_call_operand.vmem [shape: bf16[1,256,295], index: 1, kind: input, shape index: {}]   ;;  %s11311_s2 = inlined_call_operand.hbm [shape: bf16[128,256], index: 2, kind: input, shape index: {}]   ;;  %s11312_s3 = inlined_call_operand.vmem [shape: bf16[295,256], index: 3, kind: input, shape index: {}]   ;;  %s11313_s4 = inlined_call_operand.vmem [shape: f32[1,256], index: 4, kind: input, shape index: {}]   ;;  %s11314_s5 = inlined_call_operand.vmem [shape: bf16[256,129], index: 5, kind: input, shape index: {}]   ;;  %s11315_s6 = inlined_call_operand.vmem [shape: f32[1,129], index: 6, kind: input, shape index: {}]   ;;  %s11316_s7 = inlined_call_operand.hbm [shape: bf16[128,256], index: 7, kind: input, shape index: {}]   ;;  %s11317_s8 = inlined_call_operand.vmem [shape: f32[1,256], index: 8, kind: input, shape index: {}]   ;;  %s11318_s9 = inlined_call_operand.vmem [shape: bf16[256,256], index: 9, kind: input, shape index: {}]   ;;  %s11319_s10 = inlined_call_operand.vmem [shape: f32[1,256], index: 10, kind: input, shape index: {}]   ;;  %s11320_s11 = inlined_call_operand.hbm [shape: bf16[256,256], index: 11, kind: input, shape index: {}]   ;;  %s11321_s12 = inlined_call_operand.vmem [shape: f32[1,256], index: 12, kind: input, shape index: {}]   ;;  %s11322_s13 = inlined_call_operand.vmem [shape: bf16[256,132], index: 13, kind: input, shape index: {}]   ;;  %s11323_s14 = inlined_call_operand.vmem [shape: f32[1,132], index: 14, kind: input, shape index: {}]   ;;  %s11324_s15 = inlined_call_operand.hbm [shape: f32[1,256,128], index: 15, kind: output, shape index: {0}]   ;;  %s11325_s16 = inlined_call_operand.vmem [shape: f32[1,256,4], index: 16, kind: output, shape index: {1}]  }
   0x1   :  { %11368 = sst [smem:[#allocation69_spill]] %s11309_s0 }
   0x2   :  { %11369 = sst [smem:[#allocation70_spill]] %s11316_s7 }
   0x3   :  { %11370 = sst [smem:[#allocation71_spill]] %s11317_s8 }
   0x4   :  { %11371 = sst [smem:[#allocation72_spill]] %s11319_s10 }
   0x5   :  { %11372 = sst [smem:[#allocation73_spill]] %s11321_s12 }
   0x6   :  { %11373 = sst [smem:[#allocation74_spill]] %s11322_s13 }
   0x7   :  { %11374 = sst [smem:[#allocation75_spill]] %s11323_s14 }
   0x8   :  { %11375 = sst [smem:[#allocation76_spill]] %s11324_s15 }
   0x9   :  { %11376 = sst [smem:[#allocation77_spill]] %s11325_s16 }
   0xa   :  { %22 = vsyncpa [#allocation4], 0 }
   0xb   :  { %23 = vsyncpa [#allocation7], 0 }
   0xc   :  { %24 = vsyncpa [#allocation5], 0 }
   0xd   :  { %26 = vsyncpa [#allocation5 + $0x1], 0  ;;  %s8062_s21 = smov 0   ;;  %s8064_s22 = smov 0  }
   0xe   :  { %s8066_s23 = smov 0   ;;  %s8068_s24 = smov 0  }
   0xf   :  { %s8070_s25 = smov 0   ;;  %s8072_s26 = smov 0  }
  0x10 LB: > { %11377 = sst [smem:[#allocation13_spill]] %s7946_s21  ;;  %s6164_s27 = sadd.s32 4294967295, %s7966_s26   ;;  %s7966_s26 = sphi %s8072_s26, %s32_s26   ;;  %s7962_s25 = sphi %s8070_s25, %s11624_s25   ;;  %s7958_s24 = sphi %s8068_s24, %s11623_s24   ;;  %s7954_s23 = sphi %s8066_s23, %s11622_s23   ;;  %s7950_s22 = sphi %s8064_s22, %s11621_s22   ;;  %s7946_s21 = sphi %s8062_s21, %s11620_s21  }
  0x11   : > { %s6165_s28 = sadd.s32 4294967294, %s7966_s26   ;;  %s41_s29 = sadd.s32 1, %s7962_s25 }
  0x12   : > { %s53_s30 = sadd.s32 1, %s7954_s23  ;;  %p42_p0 = scmp.ge.s32.totalorder %s41_s29, 2 }
  0x13   : > { %p60_p1 = scmp.ne.s32.totalorder %s7954_s23, %s7950_s22  ;;  %p61_p2 = scmp.eq.s32.totalorder %s7966_s26, 0 }
  0x14   : > { %p393_p3 = scmp.eq.s32.totalorder %s6164_s27, 1  ;;  %s11626_s29 = smov (%p42_p0, %s41_s29), 0 }
  0x15   : > { %11378 = sst [smem:[#allocation14_spill]] %s11626_s29  ;;  %p8101_p4 = por %p61_p2, %p60_p1 }
  0x16   : > { %p8105_p5 = por %p393_p3, %p60_p1  ;;  %s49_s18 = ssub.s32 %s7962_s25, %s11626_s29 }
  0x17   : > { %p398_p6 = scmp.ne.s32.totalorder %s7950_s22, %s7946_s21  ;;  %p51_p7 = scmp.eq.s32.totalorder %s49_s18, 0 }
  0x18   : > { %s11380_s17 = scalar_select %p8105_p5, 1, 0 }
  0x19   : > { %p399_p8 = scmp.eq.s32.totalorder %s6165_s28, 1  ;;  %p6166_p9 = scmp.ge.s32.totalorder %s7966_s26, 1 }
  0x1a   : > { %11381 = sst [smem:[#allocation15_spill]] %s11380_s17  ;;  %p434_p10 = scmp.lt.s32.totalorder %s7966_s26, 3 }
  0x1b   : > { %s8116_s19 = scalar_select %p51_p7, %s7954_s23, %s53_s30  }
  0x1c   : > { %p8118_p11 = por %p399_p8, %p398_p6  ;;  %p8122_p12 = pnand %p6166_p9, %p434_p10 }
  0x1d   : > { %11382 = sst [smem:[#allocation16_spill]] %s8116_s19  ;;  %p8126_p13 = scmp.eq.s32.totalorder %s6164_s27, 0 }
  0x1e   : > { %s11383_s20 = scalar_select %p8118_p11, 1, 0 }
  0x1f   : > { %p7453_p0 = pneg %p8122_p12  ;;  %s11387_s7 = sld [smem:[#allocation70_spill]] }
  0x20   : > { %11384 = sst [smem:[#allocation17_spill]] %s11383_s20  ;;  %s7968_s19 = smov [#allocation6]  }
  0x21   : > { %p8137_p1 = pnand %p8126_p13, %p7453_p0  ;;  %s473_s27 = sshll.u32 %s7968_s19, 4  ;;  %s474_s27 = int_to_ptr.vmem [resolvable:$true] %s473_s27 }
  0x22   : > { %s7969_s20 = smov 128   ;;  %s7970_s21 = smov 8  }
  0x23   : > { %s445_s28 = sshll.u32 %s11311_s2, 4  ;;  %s7971_s18 = smov [#allocation3]   ;;  %s446_s28 = int_to_ptr.hbm [resolvable:$true] %s445_s28 }
  0x24   : > { %s494_s10 = sshll.u32 %s11320_s11, 4  ;;  %s7972_s19 = smov [#allocation8]   ;;  %s495_s10 = int_to_ptr.hbm [resolvable:$true] %s494_s10 }
  0x25   : > { %s471_s30 = sshll.u32 %s11387_s7, 4  ;;  %s447_s7 = sshll.u32 %s7971_s18, 4  ;;  %s472_s30 = int_to_ptr.hbm [resolvable:$true] %s471_s30  ;;  %s448_s7 = int_to_ptr.vmem [resolvable:$true] %s447_s7 }
  0x26   : > { %7459 = dma.hbm_to_vmem [thread:$0]  (!%p8137_p1), %s472_s30, 2048, %s474_s27, [#allocation7], %s7969_s20, %s7969_s20, %s7970_s21  }
  0x27   : > { %7456 = dma.hbm_to_vmem [thread:$0]  (!%p8137_p1), %s446_s28, 2048, %s448_s7, [#allocation4], %s7969_s20, %s7969_s20, %s7970_s21  }
  0x28   : > { %s496_s8 = sshll.u32 %s7972_s19, 4  ;;  %p6170_p2 = scmp.ge.s32.totalorder %s7966_s26, 2  ;;  %s497_s8 = int_to_ptr.vmem [resolvable:$true] %s496_s8 }
  0x29   : > { %7462 = dma.hbm_to_vmem [thread:$0]  (!%p8137_p1), %s495_s10, 4096, %s497_s8, [#allocation7], %s7969_s20, %s7969_s20, %s7970_s21  }
  0x2a   : > { %515 = sbr.rel (%p6170_p2) target bundleno = 81 (0x51), region = 68 }
  0x2f   : > { %518 = sbr.rel (!%p8101_p4) target bundleno = 81 (0x51), region = 72  ;;  %s520_s12 = sand.u32 (%p8101_p4), 1, %s7954_s23  }
  0x30   : > { %s7179_s13 = sshll.u32 (%p8101_p4), %s7962_s25, 6  ;;  %s7436_s14 = smul.u32 (%p8101_p4), 192, %s520_s12 }
  0x31   : > { %s11389_s30 = sld [smem:[#allocation69_spill]] (%p8101_p4) }
  0x32   : > { %s8168_s8 = scalar_lea.vmem (%p8101_p4), [#allocation2], %s7436_s14 }
  0x37   : > { %s8163_s27 = scalar_lea.vmem %s11389_s30, %s7179_s13 }
  0x38   : > { %v544_v0 = vld [vmem:[%s8163_s27] sm:$0xff]   ;;  %v548_v1 = vld [vmem:[%s8163_s27 + $0x8] sm:$0xff]   ;;  %v552_v2 = vld [vmem:[%s8163_s27 + $0x10] sm:$0xff]  }
  0x39   : > { %545 = vst [vmem:[%s8168_s8] sm:$0xff] %v544_v0   ;;  %v556_v3 = vld [vmem:[%s8163_s27 + $0x18] sm:$0xff]   ;;  %v560_v4 = vld [vmem:[%s8163_s27 + $0x20] sm:$0xff]   ;;  %v564_v5 = vld [vmem:[%s8163_s27 + $0x28] sm:$0xff]  }
  0x3a   : > { %549 = vst [vmem:[%s8168_s8 + $0x8] sm:$0xff] %v548_v1   ;;  %v568_v6 = vld [vmem:[%s8163_s27 + $0x30] sm:$0xff]   ;;  %v572_v7 = vld [vmem:[%s8163_s27 + $0x38] sm:$0xff]   ;;  %v576_v8 = vld [vmem:[%s8163_s27 + $0x80] sm:$0xff]  }
  0x3b   : > { %553 = vst [vmem:[%s8168_s8 + $0x10] sm:$0xff] %v552_v2   ;;  %v580_v9 = vld [vmem:[%s8163_s27 + $0x88] sm:$0xff]   ;;  %v584_v10 = vld [vmem:[%s8163_s27 + $0x90] sm:$0xff]   ;;  %v588_v11 = vld [vmem:[%s8163_s27 + $0x98] sm:$0xff]  }
  0x3c   : > { %557 = vst [vmem:[%s8168_s8 + $0x18] sm:$0xff] %v556_v3   ;;  %v592_v12 = vld [vmem:[%s8163_s27 + $0xa0] sm:$0xff]   ;;  %v596_v13 = vld [vmem:[%s8163_s27 + $0xa8] sm:$0xff]   ;;  %v600_v14 = vld [vmem:[%s8163_s27 + $0xb0] sm:$0xff]  }
  0x3d   : > { %561 = vst [vmem:[%s8168_s8 + $0x20] sm:$0xff] %v560_v4   ;;  %v604_v15 = vld [vmem:[%s8163_s27 + $0xb8] sm:$0xff]   ;;  %v608_v16 = vld [vmem:[%s8163_s27 + $0x100] sm:$0xff]   ;;  %v612_v17 = vld [vmem:[%s8163_s27 + $0x108] sm:$0xff]  }
  0x3e   : > { %565 = vst [vmem:[%s8168_s8 + $0x28] sm:$0xff] %v564_v5   ;;  %v616_v18 = vld [vmem:[%s8163_s27 + $0x110] sm:$0xff]   ;;  %v620_v19 = vld [vmem:[%s8163_s27 + $0x118] sm:$0xff]   ;;  %v624_v20 = vld [vmem:[%s8163_s27 + $0x120] sm:$0xff]  }
  0x3f   : > { %569 = vst [vmem:[%s8168_s8 + $0x30] sm:$0xff] %v568_v6   ;;  %v628_v21 = vld [vmem:[%s8163_s27 + $0x128] sm:$0xff]   ;;  %v632_v22 = vld [vmem:[%s8163_s27 + $0x130] sm:$0xff]   ;;  %v636_v23 = vld [vmem:[%s8163_s27 + $0x138] sm:$0xff]  }
  0x40   : > { %573 = vst [vmem:[%s8168_s8 + $0x38] sm:$0xff] %v572_v7  }
  0x41   : > { %577 = vst [vmem:[%s8168_s8 + $0x40] sm:$0xff] %v576_v8  }
  0x42   : > { %581 = vst [vmem:[%s8168_s8 + $0x48] sm:$0xff] %v580_v9  }
  0x43   : > { %585 = vst [vmem:[%s8168_s8 + $0x50] sm:$0xff] %v584_v10  }
  0x44   : > { %589 = vst [vmem:[%s8168_s8 + $0x58] sm:$0xff] %v588_v11  }
  0x45   : > { %593 = vst [vmem:[%s8168_s8 + $0x60] sm:$0xff] %v592_v12  }
  0x46   : > { %597 = vst [vmem:[%s8168_s8 + $0x68] sm:$0xff] %v596_v13  }
  0x47   : > { %601 = vst [vmem:[%s8168_s8 + $0x70] sm:$0xff] %v600_v14  }
  0x48   : > { %605 = vst [vmem:[%s8168_s8 + $0x78] sm:$0xff] %v604_v15  }
  0x49   : > { %609 = vst [vmem:[%s8168_s8 + $0x80] sm:$0xff] %v608_v16  }
  0x4a   : > { %613 = vst [vmem:[%s8168_s8 + $0x88] sm:$0xff] %v612_v17  }
  0x4b   : > { %617 = vst [vmem:[%s8168_s8 + $0x90] sm:$0xff] %v616_v18  }
  0x4c   : > { %621 = vst [vmem:[%s8168_s8 + $0x98] sm:$0xff] %v620_v19  }
  0x4d   : > { %625 = vst [vmem:[%s8168_s8 + $0xa0] sm:$0xff] %v624_v20  }
  0x4e   : > { %629 = vst [vmem:[%s8168_s8 + $0xa8] sm:$0xff] %v628_v21  }
  0x4f   : > { %633 = vst [vmem:[%s8168_s8 + $0xb0] sm:$0xff] %v632_v22  }
  0x50   : > { %637 = vst [vmem:[%s8168_s8 + $0xb8] sm:$0xff] %v636_v23  }
  0x51 PF: > { %776 = sbr.rel (%p8122_p12) target bundleno = 2164 (0x874), region = 117 }
  0x56   : > { %s8218_s10 = sand.u32 1, %s7950_s22  }
  0x57   : > { %s7437_s21 = smul.u32 192, %s8218_s10 }
  0x59   : > { %s8221_s29 = scalar_lea.vmem [#allocation2], %s7437_s21 }
  0x5a   : > { %7933 = dma.done.wait (%p8126_p13), [#allocation4], 2048  }
  0x5b   : > { %7935 = vsyncadd (%p8126_p13), [#allocation4], 4294965248 }
  0x5c   : > { %7937 = dma.done.wait (%p8126_p13), [#allocation7], 6144  }
  0x5d   : > { %7939 = vsyncadd (%p8126_p13), [#allocation7], 4294961152  ;;  %s6178_s15 = sshll.u32 %s7958_s24, 4  ;;  %vm1291_vm0 = vcmask 1042432   ;;  %vm1292_vm1 = vcmask 1043456   ;;  %v7973_v24 = vmov 65535  }
  0x5e   : > { %p866_p3 = scmp.lt.s32.totalorder %s6178_s15, 31  ;;  %v1293_v25 = vsel %vm1291_vm0, 4294967295, %v7973_v24  ;;  %v6336_v26 = vld [vmem:[%s11312_s3 + $0x70] sm:$0xf]  ;;  %v7219_v27 = vld [vmem:[%s11312_s3 + $0x74] sm:$0xf0] }
  0x5f   : > { %v6328_v28 = vld [vmem:[%s11312_s3 + $0x60] sm:$0xf]  ;;  %v6337_v29 = vor.u32 %v7219_v27, %v6336_v26  ;;  %v7217_v30 = vld [vmem:[%s11312_s3 + $0x64] sm:$0xf0]  ;;  %v8252_v34 = vsel %vm1292_vm1, %v1293_v25, 0  ;;  %vm1266_vm2 = vcmask 318464  }
  0x60   : > { %s11628_s15 = smov (!%p866_p3, %s6178_s15), 31  ;;  %v8249_v31 = vld [vmem:[%s11312_s3 + $0x120] sm:$0xff]  ;;  %v6329_v33 = vor.u32 %v7217_v30, %v6328_v28  ;;  %v6320_v36 = vld [vmem:[%s11312_s3 + $0x50] sm:$0xf]  ;;  %v7215_v37 = vld [vmem:[%s11312_s3 + $0x54] sm:$0xf0] }
  0x61   : > { %v1190_v32 = vunpack.c.l.b16 %v8249_v31  ;;  %7425 = vmatpush.bf16.msra.mxu1 %v6337_v29  ;;  %1301 = vmatpush.bf16.msra.mxu0 %v6337_v29  ;;  %s7438_s21 = smul.u32 12, %s11628_s15  ;;  %v6416_v38 = vld [vmem:[%s11312_s3 + $0x110] sm:$0xf]  ;;  %v7239_v39 = vld [vmem:[%s11312_s3 + $0x114] sm:$0xf0]  ;;  %v6321_v41 = vor.u32 %v7215_v37, %v6320_v36  ;;  %vm3095_vm3 = vcmask 7168  }
  0x62   : > { %v6417_v42 = vor.u32 %v7239_v39, %v6416_v38  ;;  %v6312_v43 = vld [vmem:[%s11312_s3 + $0x40] sm:$0xf]  ;;  %v7213_v44 = vld [vmem:[%s11312_s3 + $0x44] sm:$0xf0]  ;;  %v7218_v49 = vld [vmem:[%s11312_s3 + $0x74] sm:$0xf] }
  0x63   : > { %v1228_v35 = vpack.c.b16 %v1190_v32, %v1190_v32  ;;  %s8277_s17 = scalar_lea.vmem %s11310_s1, %s7438_s21  ;;  %v6408_v45 = vld [vmem:[%s11312_s3 + $0x100] sm:$0xf]  ;;  %v7237_v46 = vld [vmem:[%s11312_s3 + $0x104] sm:$0xf0]  ;;  %v6313_v47 = vor.u32 %v7213_v44, %v6312_v43  ;;  %v6338_v50 = vld [vmem:[%s11312_s3 + $0x78] sm:$0xf0] }
  0x64   : > { %v6192_v48 = vld [vmem:[%s8277_s17 + $0x8] sm:$0xf]  ;;  %v6409_v51 = vor.u32 %v7237_v46, %v6408_v45  ;;  %v7182_v52 = vld [vmem:[%s8277_s17 + $0x10] sm:$0xf0]  ;;  %v6252_v53 = vld [vmem:[%s8277_s17 + $0x80] sm:$0xf]  ;;  %v6341_v57 = vor.u32 %v7218_v49, %v6338_v50 }
  0x65   : > { %v1296_v40 = vand.u32 %v8252_v34, %v1228_v35  ;;  %7426 = vmatpush.bf16.msra.mxu1 %v6329_v33  ;;  %1302 = vmatpush.bf16.msra.mxu0 %v6329_v33  ;;  %v7197_v54 = vld [vmem:[%s8277_s17 + $0x88] sm:$0xf0]  ;;  %v6304_v55 = vld [vmem:[%s11312_s3 + $0x30] sm:$0xf]  ;;  %v7211_v56 = vld [vmem:[%s11312_s3 + $0x34] sm:$0xf0]  ;;  %v8307_v60 = vor.u32 %v7182_v52, %v6192_v48 }
  0x66   : > { %v7216_v58 = vld [vmem:[%s11312_s3 + $0x64] sm:$0xf]  ;;  %v6330_v59 = vld [vmem:[%s11312_s3 + $0x68] sm:$0xf0]  ;;  %v8309_v61 = vor.u32 %v7197_v54, %v6252_v53  ;;  %v6305_v62 = vor.u32 %v7211_v56, %v6304_v55  ;;  %v6296_v63 = vld [vmem:[%s11312_s3 + $0x20] sm:$0xf] }
  0x67   : > { %1404 = vmatpush.bf16.msra.mxu2 %v1296_v40  ;;  %7433 = vmatpush.bf16.msra.mxu3 %v1296_v40  ;;  %v7209_v0 = vld [vmem:[%s11312_s3 + $0x24] sm:$0xf0]  ;;  %v6333_v1 = vor.u32 %v7216_v58, %v6330_v59  ;;  %v7214_v2 = vld [vmem:[%s11312_s3 + $0x54] sm:$0xf]  ;;  %v6322_v3 = vld [vmem:[%s11312_s3 + $0x58] sm:$0xf0] }
  0x68   : > { %v6297_v4 = vor.u32 %v7209_v0, %v6296_v63  ;;  %v6288_v5 = vld [vmem:[%s11312_s3 + $0x10] sm:$0xf]  ;;  %v7207_v6 = vld [vmem:[%s11312_s3 + $0x14] sm:$0xf0]  ;;  %v6325_v7 = vor.u32 %v7214_v2, %v6322_v3  ;;  %v7212_v8 = vld [vmem:[%s11312_s3 + $0x44] sm:$0xf] }
  0x69   : > { %7427 = vmatpush.bf16.msra.mxu1 %v6321_v41  ;;  %1303 = vmatpush.bf16.msra.mxu0 %v6321_v41  ;;  %v6314_v9 = vld [vmem:[%s11312_s3 + $0x48] sm:$0xf0]  ;;  %v6289_v10 = vor.u32 %v7207_v6, %v6288_v5  ;;  %v6280_v11 = vld [vmem:[%s11312_s3] sm:$0xf]  ;;  %v7205_v12 = vld [vmem:[%s11312_s3 + $0x4] sm:$0xf0] }
  0x6a   : > { %v6400_v13 = vld [vmem:[%s11312_s3 + $0xf0] sm:$0xf]  ;;  %v6317_v14 = vor.u32 %v7212_v8, %v6314_v9  ;;  %v7235_v15 = vld [vmem:[%s11312_s3 + $0xf4] sm:$0xf0]  ;;  %v7210_v16 = vld [vmem:[%s11312_s3 + $0x34] sm:$0xf]  ;;  %v6281_v21 = vor.u32 %v7205_v12, %v6280_v11 }
  0x6b   : > { %1405 = vmatpush.bf16.msra.mxu2 %v6417_v42  ;;  %7434 = vmatpush.bf16.msra.mxu3 %v6417_v42  ;;  %v6306_v17 = vld [vmem:[%s11312_s3 + $0x38] sm:$0xf0]  ;;  %v6232_v18 = vld [vmem:[%s8277_s17 + $0x60] sm:$0xf]  ;;  %v7193_v19 = vld [vmem:[%s8277_s17 + $0x68] sm:$0xf0]  ;;  %v6401_v25 = vor.u32 %v7235_v15, %v6400_v13 }
  0x6c   : > { %v6204_v20 = vld [vmem:[%s8277_s17 + $0x20] sm:$0xf]  ;;  %v7185_v22 = vld [vmem:[%s8277_s17 + $0x28] sm:$0xf0]  ;;  %v6264_v23 = vld [vmem:[%s8277_s17 + $0x98] sm:$0xf]  ;;  %v6309_v29 = vor.u32 %v7210_v16, %v6306_v17  ;;  %v8377_v35 = vor.u32 %v7193_v19, %v6232_v18 }
  0x6d   : > { %7428 = vmatpush.bf16.msra.mxu1 %v6313_v47  ;;  %1304 = vmatpush.bf16.msra.mxu0 %v6313_v47  ;;  %v7200_v24 = vld [vmem:[%s8277_s17 + $0xa0] sm:$0xf0]  ;;  %v6184_v26 = vld [vmem:[%s8277_s17] sm:$0xf]  ;;  %v7181_v27 = vld [vmem:[%s8277_s17 + $0x8] sm:$0xf0]  ;;  %v8379_v36 = vor.u32 %v7185_v22, %v6204_v20 }
  0x6e   : > { %v6392_v28 = vld [vmem:[%s11312_s3 + $0xe0] sm:$0xf]  ;;  %v7233_v30 = vld [vmem:[%s11312_s3 + $0xe4] sm:$0xf0]  ;;  %v7208_v32 = vld [vmem:[%s11312_s3 + $0x24] sm:$0xf]  ;;  %v8381_v37 = vor.u32 %v7200_v24, %v6264_v23  ;;  %v8383_v38 = vor.u32 %v7181_v27, %v6184_v26 }
  0x6f   : > { %1406 = vmatpush.bf16.msra.mxu2 %v6409_v51  ;;  %7435 = vmatpush.bf16.msra.mxu3 %v6409_v51  ;;  %v6298_v33 = vld [vmem:[%s11312_s3 + $0x28] sm:$0xf0]  ;;  %v6393_v39 = vor.u32 %v7233_v30, %v6392_v28  ;;  %v6384_v40 = vld [vmem:[%s11312_s3 + $0xd0] sm:$0xf]  ;;  %v7231_v41 = vld [vmem:[%s11312_s3 + $0xd4] sm:$0xf0]  ;;  %v1191_v28 = vunpack.c.h.b16 %v8249_v31 }
  0x70   : > { %v6301_v42 = vor.u32 %v7208_v32, %v6298_v33  ;;  %v7206_v43 = vld [vmem:[%s11312_s3 + $0x14] sm:$0xf]  ;;  %v6290_v44 = vld [vmem:[%s11312_s3 + $0x18] sm:$0xf0]  ;;  %v7232_v48 = vld [vmem:[%s11312_s3 + $0xe4] sm:$0xf]  ;;  %v6385_v50 = vor.u32 %v7231_v41, %v6384_v40 }
  0x71   : > { %7429 = vmatpush.bf16.msra.mxu1 %v6305_v62  ;;  %1305 = vmatpush.bf16.msra.mxu0 %v6305_v62  ;;  %v7234_v45 = vld [vmem:[%s11312_s3 + $0xf4] sm:$0xf]  ;;  %v6402_v46 = vld [vmem:[%s11312_s3 + $0xf8] sm:$0xf0]  ;;  %v6394_v49 = vld [vmem:[%s11312_s3 + $0xe8] sm:$0xf0]  ;;  %v6293_v52 = vor.u32 %v7206_v43, %v6290_v44  ;;  %v1229_v40 = vpack.c.b16 %v1191_v28, %v1191_v28 }
  0x72   : > { %6422 = vmatmul.msk.bf16.vlgmr.msra.gmra.mxu2 %vm1266_vm2, %v8307_v60  ;;  %6427 = vmatmul.msk.bf16.vlgmr.msra.gmra.mxu3 %vm1266_vm2, %v8309_v61  ;;  %v6405_v47 = vor.u32 %v7234_v45, %v6402_v46  ;;  %v6376_v51 = vld [vmem:[%s11312_s3 + $0xc0] sm:$0xf]  ;;  %v7229_v53 = vld [vmem:[%s11312_s3 + $0xc4] sm:$0xf0]  ;;  %v7204_v54 = vld [vmem:[%s11312_s3 + $0x4] sm:$0xf]  ;;  %v6397_v56 = vor.u32 %v7232_v48, %v6394_v49 }
  0x73   : > { %1448 = vmatpush.bf16.msrb.mxu3 %v6341_v57  ;;  %v6282_v55 = vld [vmem:[%s11312_s3 + $0x8] sm:$0xf0]  ;;  %v7230_v57 = vld [vmem:[%s11312_s3 + $0xd4] sm:$0xf]  ;;  %v6386_v58 = vld [vmem:[%s11312_s3 + $0xd8] sm:$0xf0]  ;;  %v6377_v59 = vor.u32 %v7229_v53, %v6376_v51  ;;  %v1299_v44 = vand.u32 %v8252_v34, %v1229_v40 }
  0x74   : > { %1497 = vmatpush.bf16.msrb.mxu2 %v6405_v47  ;;  %v6285_v62 = vor.u32 %v7204_v54, %v6282_v55  ;;  %v6244_v63 = vld [vmem:[%s8277_s17 + $0x78] sm:$0xf]  ;;  %v6368_v0 = vld [vmem:[%s11312_s3 + $0xb0] sm:$0xf]  ;;  %v6389_v2 = vor.u32 %v7230_v57, %v6386_v58  ;;  %v7196_v3 = vld [vmem:[%s8277_s17 + $0x80] sm:$0xf0] }
  0x75   : > { %7430 = vmatpush.bf16.msra.mxu1 %v6297_v4  ;;  %1306 = vmatpush.bf16.msra.mxu0 %v6297_v4  ;;  %v7228_v4 = vld [vmem:[%s11312_s3 + $0xc4] sm:$0xf]  ;;  %v6378_v5 = vld [vmem:[%s11312_s3 + $0xc8] sm:$0xf0]  ;;  %v6216_v6 = vld [vmem:[%s8277_s17 + $0x38] sm:$0xf]  ;;  %v8459_v16 = vor.u32 %v7196_v3, %v6244_v63 }
  0x76   : > { %v6276_v8 = vld [vmem:[%s8277_s17 + $0xb0] sm:$0xf]  ;;  %v7203_v9 = vld [vmem:[%s8277_s17 + $0xb8] sm:$0xf0]  ;;  %v7184_v11 = vld [vmem:[%s8277_s17 + $0x20] sm:$0xf0]  ;;  %v6381_v15 = vor.u32 %v7228_v4, %v6378_v5 }
  0x77   : > { %1449 = vmatpush.bf16.msrb.mxu3 %v6333_v1  ;;  %v7227_v1 = vld [vmem:[%s11312_s3 + $0xb4] sm:$0xf0]  ;;  %v6360_v13 = vld [vmem:[%s11312_s3 + $0xa0] sm:$0xf]  ;;  %v8463_v18 = vor.u32 %v7203_v9, %v6276_v8  ;;  %v6370_v22 = vld [vmem:[%s11312_s3 + $0xb8] sm:$0xf0] }
  0x78   : > { %1498 = vmatpush.bf16.msrb.mxu2 %v6397_v56  ;;  %v6369_v12 = vor.u32 %v7227_v1, %v6368_v0  ;;  %v6352_v23 = vld [vmem:[%s11312_s3 + $0x90] sm:$0xf]  ;;  %v7223_v24 = vld [vmem:[%s11312_s3 + $0x94] sm:$0xf0]  ;;  %v7224_v26 = vld [vmem:[%s11312_s3 + $0xa4] sm:$0xf] }
  0x79   : > { %7431 = vmatpush.bf16.msra.mxu1 %v6289_v10  ;;  %1307 = vmatpush.bf16.msra.mxu0 %v6289_v10  ;;  %v6196_v10 = vld [vmem:[%s8277_s17 + $0x18] sm:$0xf]  ;;  %v6362_v27 = vld [vmem:[%s11312_s3 + $0xa8] sm:$0xf0]  ;;  %v6344_v32 = vld [vmem:[%s11312_s3 + $0x80] sm:$0xf] }
  0x7a   : > { %v8465_v19 = vor.u32 %v7184_v11, %v6196_v10  ;;  %v6365_v30 = vor.u32 %v7224_v26, %v6362_v27  ;;  %v7221_v33 = vld [vmem:[%s11312_s3 + $0x84] sm:$0xf0]  ;;  %v7222_v31 = vld [vmem:[%s11312_s3 + $0x94] sm:$0xf]  ;;  %v6354_v41 = vld [vmem:[%s11312_s3 + $0x98] sm:$0xf0] }
  0x7b   : > { %1450 = vmatpush.bf16.msrb.mxu3 %v6325_v7  ;;  %v7188_v7 = vld [vmem:[%s8277_s17 + $0x40] sm:$0xf0]  ;;  %v6345_v45 = vor.u32 %v7221_v33, %v6344_v32  ;;  %v6357_v46 = vor.u32 %v7222_v31, %v6354_v41  ;;  %v6256_v47 = vld [vmem:[%s8277_s17 + $0x90] sm:$0xf]  ;;  %v6346_v49 = vld [vmem:[%s11312_s3 + $0x88] sm:$0xf0] }
  0x7c   : > { %1499 = vmatpush.bf16.msrb.mxu2 %v6389_v2  ;;  %v8461_v17 = vor.u32 %v7188_v7, %v6216_v6  ;;  %v7220_v48 = vld [vmem:[%s11312_s3 + $0x84] sm:$0xf]  ;;  %v6228_v51 = vld [vmem:[%s8277_s17 + $0x50] sm:$0xf]  ;;  %v7187_v34 = vld [vmem:[%s8277_s17 + $0x38] sm:$0xf0] }
  0x7d   : > { %7432 = vmatpush.bf16.msra.mxu1 %v6281_v21  ;;  %1308 = vmatpush.bf16.msra.mxu0 %v6281_v21  ;;  %v7226_v21 = vld [vmem:[%s11312_s3 + $0xb4] sm:$0xf]  ;;  %v6208_v53 = vld [vmem:[%s8277_s17 + $0x30] sm:$0xf]  ;;  %v6349_v54 = vor.u32 %v7220_v48, %v6346_v49  ;;  %v7279_v0 = vld [vmem:[#allocation3 + $0x74] sm:$0xf0] }
  0x7e   : > { %v6209_v57 = vor.u32 %v7187_v34, %v6208_v53  ;;  %v7238_v58 = vld [vmem:[%s11312_s3 + $0x114] sm:$0xf]  ;;  %v6592_v63 = vld [vmem:[#allocation3 + $0x70] sm:$0xf]  ;;  %v7236_v1 = vld [vmem:[%s11312_s3 + $0x104] sm:$0xf] }
  0x7f   : > { %1451 = vmatpush.bf16.msrb.mxu3 %v6317_v14  ;;  %v7225_v14 = vld [vmem:[%s11312_s3 + $0xa4] sm:$0xf0]  ;;  %v6593_v2 = vor.u32 %v7279_v0, %v6592_v63  ;;  %v6410_v3 = vld [vmem:[%s11312_s3 + $0x108] sm:$0xf0]  ;;  %v7276_v4 = vld [vmem:[#allocation3 + $0x64] sm:$0xf] }
  0x80   : > { %1329 = vmatmul.bf16.vlgmr.msra.gmra.mxu1 %v8377_v35  ;;  %1309 = vmatmul.bf16.vlgmr.msra.gmra.mxu0 %v8383_v38  ;;  %v6361_v20 = vor.u32 %v7225_v14, %v6360_v13  ;;  %v6413_v5 = vor.u32 %v7236_v1, %v6410_v3  ;;  %v6268_v7 = vld [vmem:[%s8277_s17 + $0xa8] sm:$0xf]  ;;  %v7202_v8 = vld [vmem:[%s8277_s17 + $0xb0] sm:$0xf0]  ;;  %v7180_v26 = vld [vmem:[%s8277_s17 + $0x4] sm:$0xf] }
  0x81   : > { %1350 = vmatpush.bf16.msrb.mxu1 %v6401_v25  ;;  %1500 = vmatpush.bf16.msrb.mxu2 %v6381_v15  ;;  %v6373_v25 = vor.u32 %v7226_v21, %v6370_v22  ;;  %v6240_v9 = vld [vmem:[%s8277_s17 + $0x68] sm:$0xf]  ;;  %v7194_v10 = vld [vmem:[%s8277_s17 + $0x70] sm:$0xf0]  ;;  %v8543_v13 = vor.u32 %v7202_v8, %v6268_v7  ;;  %v6186_v27 = vld [vmem:[%s8277_s17 + $0xc] sm:$0xf0] }
  0x82   : > { %6423 = vmatmul.msk.bf16.gmra.mxu2 %vm1266_vm2, %v8379_v36  ;;  %6428 = vmatmul.msk.bf16.gmra.mxu3 %vm1266_vm2, %v8381_v37  ;;  %v6220_v11 = vld [vmem:[%s8277_s17 + $0x48] sm:$0xf]  ;;  %v8545_v14 = vor.u32 %v7194_v10, %v6240_v9  ;;  %v7274_v22 = vld [vmem:[#allocation3 + $0x54] sm:$0xf]  ;;  %v6189_v28 = vor.u32 %v7180_v26, %v6186_v27  ;;  %v6570_v33 = vld [vmem:[#allocation3 + $0x48] sm:$0xf0] }
  0x83   : > { %1452 = vmatpush.bf16.msrb.mxu3 %v6309_v29  ;;  %v6353_v29 = vor.u32 %v7223_v24, %v6352_v23  ;;  %1551 = vmatpush.bf16.msrb.mxu0 %v1299_v44  ;;  %v7277_v21 = vld [vmem:[#allocation3 + $0x64] sm:$0xf0]  ;;  %v6578_v24 = vld [vmem:[#allocation3 + $0x58] sm:$0xf0]  ;;  %v7186_v44 = vld [vmem:[%s8277_s17 + $0x34] sm:$0xf] }
  0x84   : > { %v7183_v40 = vld [vmem:[%s8277_s17 + $0x1c] sm:$0xf]  ;;  %v6198_v31 = vld [vmem:[%s8277_s17 + $0x24] sm:$0xf0]  ;;  %v6222_v53 = vld [vmem:[%s8277_s17 + $0x54] sm:$0xf0] }
  0x85   : > { %1351 = vmatpush.bf16.msrb.mxu1 %v6393_v39  ;;  %1501 = vmatpush.bf16.msrb.mxu2 %v6373_v25  ;;  %v7278_v39 = vld [vmem:[#allocation3 + $0x74] sm:$0xf]  ;;  %v6581_v25 = vor.u32 %v7274_v22, %v6578_v24  ;;  %v6201_v41 = vor.u32 %v7183_v40, %v6198_v31  ;;  %v6546_v0 = vld [vmem:[#allocation3 + $0x18] sm:$0xf0]  ;;  %v8574_v1 = vld [vmem:[%s11313_s4] sm:$0x3] }
  0x86   : > { %v7266_v63 = vld [vmem:[#allocation3 + $0x14] sm:$0xf]  ;;  %v7192_v3 = vld [vmem:[%s8277_s17 + $0x64] sm:$0xf]  ;;  %v6544_v10 = vld [vmem:[#allocation3 + $0x10] sm:$0xf] }
  0x87   : > { %1453 = vmatpush.bf16.msrb.mxu3 %v6301_v42  ;;  %v6594_v42 = vld [vmem:[#allocation3 + $0x78] sm:$0xf0]  ;;  %v7265_v27 = vld [vmem:[#allocation3 + $0x4] sm:$0xf0]  ;;  %s11572_s30 = sld [smem:[#allocation71_spill]]  ;;  %vm5945_vm5 = vcmask 31744  }
  0x88   : > { %v6597_v43 = vor.u32 %v7278_v39, %v6594_v42  ;;  %v7273_v42 = vld [vmem:[#allocation3 + $0x44] sm:$0xf0]  ;;  %v7195_v22 = vld [vmem:[%s8277_s17 + $0x7c] sm:$0xf]  ;;  %s11573_s7 = sld [smem:[#allocation72_spill]]  ;;  %s6181_s27 = sshll.u32 %s11628_s15, 3 }
  0x89   : > { %1352 = vmatpush.bf16.msrb.mxu1 %v6385_v50  ;;  %1502 = vmatpush.bf16.msrb.mxu2 %v6365_v30  ;;  %v7199_v50 = vld [vmem:[%s8277_s17 + $0x98] sm:$0xf0]  ;;  %v7272_v30 = vld [vmem:[#allocation3 + $0x44] sm:$0xf]  ;;  %s11574_s8 = sld [smem:[#allocation74_spill]]  ;;  %s7424_s21 = sshll.u32 %s7958_s24, 7 }
  0x8a   : > { %v8517_v55 = vor.u32 %v7199_v50, %v6256_v47  ;;  %v6573_v39 = vor.u32 %v7272_v30, %v6570_v33  ;;  %v6562_v47 = vld [vmem:[#allocation3 + $0x38] sm:$0xf0]  ;;  %v7271_v50 = vld [vmem:[#allocation3 + $0x34] sm:$0xf0]  ;;  %v6258_v33 = vld [vmem:[%s8277_s17 + $0x9c] sm:$0xf0] }
  0x8b   : > { %1454 = vmatpush.bf16.msrb.mxu3 %v6293_v52  ;;  %v7191_v52 = vld [vmem:[%s8277_s17 + $0x58] sm:$0xf0]  ;;  %s11575_s19 = sld [smem:[#allocation73_spill]]  ;;  %s5963_s13 = scalar_lea.sflag [#allocation5], %s8218_s10 }
  0x8c   : > { %v8519_v56 = vor.u32 %v7191_v52, %v6228_v51  ;;  %v7189_v52 = vld [vmem:[%s8277_s17 + $0x4c] sm:$0xf]  ;;  %s11576_s14 = sld [smem:[#allocation75_spill]] }
  0x8d   : > { %1353 = vmatpush.bf16.msrb.mxu1 %v6377_v59  ;;  %1503 = vmatpush.bf16.msrb.mxu2 %v6357_v46  ;;  %v6418_v59 = vld [vmem:[%s11312_s3 + $0x118] sm:$0xf0]  ;;  %v7270_v46 = vld [vmem:[#allocation3 + $0x34] sm:$0xf]  ;;  %v6225_v34 = vor.u32 %v7189_v52, %v6222_v53  ;;  %s11579_s20 = sld [smem:[#allocation77_spill]] }
  0x8e   : > { %v6565_v49 = vor.u32 %v7270_v46, %v6562_v47 }
  0x8f   : > { %1455 = vmatpush.bf16.msrb.mxu3 %v6285_v62  ;;  %v6421_v62 = vor.u32 %v7238_v58, %v6418_v59 }
  0x90   : > { %1334 = vmatmul.bf16.gmra.mxu1 %v8459_v16  ;;  %1314 = vmatmul.bf16.gmra.mxu0 %v8465_v19 }
  0x91   : > { %1354 = vmatpush.bf16.msrb.mxu1 %v6369_v12  ;;  %1504 = vmatpush.bf16.msrb.mxu2 %v6349_v54  ;;  %v7190_v12 = vld [vmem:[%s8277_s17 + $0x50] sm:$0xf0]  ;;  %v7268_v54 = vld [vmem:[#allocation3 + $0x24] sm:$0xf] }
  0x92   : > { %6424 = vmatmul.msk.bf16.gmra.mxu2 %vm1266_vm2, %v8461_v17  ;;  %6429 = vmatmul.msk.bf16.gmra.mxu3 %vm1266_vm2, %v8463_v18  ;;  %v6221_v15 = vor.u32 %v7190_v12, %v6220_v11  ;;  %v7267_v11 = vld [vmem:[#allocation3 + $0x14] sm:$0xf0] }
  0x93   : > { %2012 = vmatpush.bf16.msra.mxu3 %v6597_v43  ;;  %1552 = vmatpush.bf16.msrb.mxu0 %v6421_v62  ;;  %v6545_v12 = vor.u32 %v7267_v11, %v6544_v10  ;;  %s10813_s28 = scalar_lea.vmem %s11579_s20, %s6181_s27 }
  0x95   : > { %1355 = vmatpush.bf16.msrb.mxu1 %v6361_v20  ;;  %v6584_v20 = vld [vmem:[#allocation3 + $0x60] sm:$0xf] }
  0x96   : > { %v6585_v23 = vor.u32 %v7277_v21, %v6584_v20 }
  0x97   : > { %1553 = vmatpush.bf16.msrb.mxu0 %v6413_v5  ;;  %v6538_v5 = vld [vmem:[#allocation3 + $0x8] sm:$0xf0] }
  0x99   : > { %1356 = vmatpush.bf16.msrb.mxu1 %v6353_v29  ;;  %v7275_v29 = vld [vmem:[#allocation3 + $0x54] sm:$0xf0] }
  0x9d   : > { %1357 = vmatpush.bf16.msrb.mxu1 %v6345_v45  ;;  %v6210_v45 = vld [vmem:[%s8277_s17 + $0x3c] sm:$0xf0] }
  0x9e   : > { %v6213_v48 = vor.u32 %v7186_v44, %v6210_v45  ;;  %v7294_v44 = vld [vmem:[%s11314_s5 + $0x74] sm:$0xf]  ;;  %v6658_v45 = vld [vmem:[%s11314_s5 + $0x78] sm:$0xf0] }
  0x9f   : > { %v6661_v46 = vor.u32 %v7294_v44, %v6658_v45  ;;  %v7244_v44 = vld [vmem:[%s8221_s29 + $0x20] sm:$0xff] }
  0xa0   : > { %1339 = vmatmul.bf16.gmra.mxu1 %v8517_v55  ;;  %1319 = vmatmul.bf16.gmra.mxu0 %v6209_v57 }
  0xa1   : > { %1883 = vmatpush.bf16.msra.mxu1 %v6593_v2  ;;  %v6549_v2 = vor.u32 %v7266_v63, %v6546_v0 }
  0xa2   : > { %6425 = vmatmul.msk.bf16.gmra.mxu2 %vm1266_vm2, %v8519_v56  ;;  %1456 = vmatmul.bf16.vlgmr.msrb.gmra.mxu3 %v8383_v38  ;;  %v6586_v38 = vld [vmem:[#allocation3 + $0x68] sm:$0xf0] }
  0xa3   : > { %v6589_v6 = vor.u32 %v7276_v4, %v6586_v38  ;;  %v6234_v4 = vld [vmem:[%s8277_s17 + $0x6c] sm:$0xf0]  ;;  %v7264_v38 = vld [vmem:[#allocation3 + $0x4] sm:$0xf] }
  0xa4   : > { %v6541_v7 = vor.u32 %v7264_v38, %v6538_v5  ;;  %v7242_v38 = vld [vmem:[%s8221_s29 + $0x10] sm:$0xff] }
  0xa5   : > { %2013 = vmatpush.bf16.msra.mxu3 %v6589_v6  ;;  %1884 = vmatpush.bf16.msra.mxu1 %v6585_v23  ;;  %v6237_v6 = vor.u32 %v7192_v3, %v6234_v4  ;;  %v6246_v23 = vld [vmem:[%s8277_s17 + $0x84] sm:$0xf0] }
  0xa9   : > { %2014 = vmatpush.bf16.msra.mxu3 %v6581_v25  ;;  %v6249_v25 = vor.u32 %v7195_v22, %v6246_v23  ;;  %v7243_v23 = vld [vmem:[%s8221_s29 + $0x18] sm:$0xff] }
  0xad   : > { %2015 = vmatpush.bf16.msra.mxu3 %v6573_v39 }
  0xb0   : > { %1344 = vmatmul.bf16.gmra.mxu1 %v8543_v13  ;;  %1324 = vmatmul.bf16.gmra.mxu0 %v6221_v15 }
  0xb1   : > { %2016 = vmatpush.bf16.msra.mxu3 %v6565_v49 }
  0xb2   : > { %6426 = vmatmul.msk.bf16.gmra.mxu2 %vm1266_vm2, %v8545_v14  ;;  %1461 = vmatmul.bf16.gmra.mxu3 %v8465_v19  ;;  %v6576_v19 = vld [vmem:[#allocation3 + $0x50] sm:$0xf] }
  0xb3   : > { %v6577_v32 = vor.u32 %v7275_v29, %v6576_v19 }
  0xb5   : > { %1885 = vmatpush.bf16.msra.mxu1 %v6577_v32  ;;  %v7198_v32 = vld [vmem:[%s8277_s17 + $0x94] sm:$0xf] }
  0xb6   : > { %v6261_v31 = vor.u32 %v7198_v32, %v6258_v33 }
  0xc0   : > { %1358 = vmatmul.bf16.vlgmr.msrb.gmra.mxu1 %v6189_v28  ;;  %6430 = vmatmul.msk.bf16.vlgmr.msrb.gmra.mxu0 %vm1266_vm2, %v8307_v60  ;;  %v6568_v60 = vld [vmem:[#allocation3 + $0x40] sm:$0xf] }
  0xc1   : > { %v6569_v43 = vor.u32 %v7273_v42, %v6568_v60  ;;  %v6722_v60 = vld [vmem:[%s11314_s5 + $0xf8] sm:$0xf0] }
  0xc2   : > { %1505 = vmatmul.bf16.vlgmr.msrb.gmra.mxu2 %v6189_v28  ;;  %1466 = vmatmul.bf16.gmra.mxu3 %v6209_v57  ;;  %v6554_v57 = vld [vmem:[#allocation3 + $0x28] sm:$0xf0] }
  0xc3   : > { %1886 = vmatpush.bf16.msra.mxu1 %v6569_v43  ;;  %v6557_v58 = vor.u32 %v7268_v54, %v6554_v57  ;;  %v7241_v54 = vld [vmem:[%s8221_s29 + $0x8] sm:$0xff] }
  0xc5   : > { %2017 = vmatpush.bf16.msra.mxu3 %v6557_v58 }
  0xc9   : > { %2018 = vmatpush.bf16.msra.mxu3 %v6549_v2 }
  0xcd   : > { %2019 = vmatpush.bf16.msra.mxu3 %v6541_v7 }
  0xd0   : > { %1363 = vmatmul.bf16.gmra.mxu1 %v6201_v41  ;;  %6431 = vmatmul.msk.bf16.gmra.mxu0 %vm1266_vm2, %v8379_v36  ;;  %v6560_v36 = vld [vmem:[#allocation3 + $0x30] sm:$0xf] }
  0xd1   : > { %v6561_v51 = vor.u32 %v7271_v50, %v6560_v36  ;;  %v6270_v50 = vld [vmem:[%s8277_s17 + $0xb4] sm:$0xf0] }
  0xd2   : > { %1510 = vmatmul.bf16.gmra.mxu2 %v6201_v41  ;;  %1471 = vmatmul.bf16.gmra.mxu3 %v6221_v15 }
  0xd3   : > { %1887 = vmatpush.bf16.msra.mxu1 %v6561_v51 }
  0xe0   : > { %1368 = vmatmul.bf16.gmra.mxu1 %v6213_v48  ;;  %6432 = vmatmul.msk.bf16.gmra.mxu0 %vm1266_vm2, %v8461_v17  ;;  %v7269_v17 = vld [vmem:[#allocation3 + $0x24] sm:$0xf0] }
  0xe2   : > { %1515 = vmatmul.bf16.gmra.mxu2 %v6213_v48  ;;  %1476 = vmatmul.bf16.gmra.mxu3 %v8377_v35  ;;  %v6552_v35 = vld [vmem:[#allocation3 + $0x20] sm:$0xf] }
  0xe3   : > { %v6553_v59 = vor.u32 %v7269_v17, %v6552_v35 }
  0xe5   : > { %1888 = vmatpush.bf16.msra.mxu1 %v6553_v59 }
  0xe9   : > { %1889 = vmatpush.bf16.msra.mxu1 %v6545_v12 }
  0xf0   : > { %1373 = vmatmul.bf16.gmra.mxu1 %v6225_v34  ;;  %6433 = vmatmul.msk.bf16.gmra.mxu0 %vm1266_vm2, %v8519_v56 }
  0xf2   : > { %1520 = vmatmul.bf16.gmra.mxu2 %v6225_v34  ;;  %1481 = vmatmul.bf16.gmra.mxu3 %v8459_v16  ;;  %v8579_v16 = vperm.slane %v8574_v1, 0 }
  0xf5   : > { %v8569_v62 = vpop.f32.mrf.mxu3  ;;  %v8611_v39 = vpop.f32.mrf.mxu2 }
  0xf6   : > { %11390 = vst [vmem:[#allocation18_spill] sm:$0xff] %v8569_v62 }
  0xfd   : > { %v8581_v56 = vpop.f32.mrf.mxu3  ;;  %v1330_v8 = vpop.f32.mrf.mxu1 }
  0xfe   : > { %11391 = vst [vmem:[#allocation19_spill] sm:$0xff] %v8581_v56  ;;  %v8584_v9 = vadd.f32 %v1330_v8, %v8579_v16  ;;  %v8633_v47 = vpop.f32.mrf.mxu2  ;;  %v1310_v53 = vpop.f32.mrf.mxu0 }
  0xff   : > { %v1311_v2 = vadd.f32 %v1310_v53, %v8579_v16 }
 0x100   : > { %1378 = vmatmul.bf16.gmra.mxu1 %v6237_v6  ;;  %6434 = vmatmul.msk.bf16.gmra.mxu0 %vm1266_vm2, %v8545_v14  ;;  %v6536_v14 = vld [vmem:[#allocation3] sm:$0xf] }
 0x101   : > { %v6537_v28 = vor.u32 %v7265_v27, %v6536_v14 }
 0x102   : > { %1525 = vmatmul.bf16.gmra.mxu2 %v6237_v6  ;;  %1486 = vmatmul.bf16.gmra.mxu3 %v8517_v55 }
 0x103   : > { %1890 = vmatpush.bf16.msra.mxu1 %v6537_v28  ;;  %v7292_v28 = vld [vmem:[%s11314_s5 + $0x64] sm:$0xf] }
 0x105   : > { %v8589_v15 = vpop.f32.mrf.mxu3  ;;  %v1332_v20 = vpop.f32.mrf.mxu1 }
 0x106   : > { %11392 = vst [vmem:[#allocation20_spill] sm:$0xff] %v8589_v15  ;;  %v8592_v21 = vadd.f32 %v1332_v20, %v8579_v16  ;;  %v8645_v57 = vpop.f32.mrf.mxu2  ;;  %v8657_v63 = vpop.f32.mrf.mxu0 }
 0x107   : > { %2837 = vmatpush.bf16.msrb.mxu1 %v6661_v46 }
 0x10d   : > { %v8596_v24 = vpop.f32.mrf.mxu3  ;;  %v1335_v26 = vpop.f32.mrf.mxu1 }
 0x10e   : > { %11393 = vst [vmem:[#allocation21_spill] sm:$0xff] %v8596_v24  ;;  %v8599_v55 = vadd.f32 %v1335_v26, %v8579_v16  ;;  %v8659_v0 = vpop.f32.mrf.mxu2  ;;  %v6714_v26 = vld [vmem:[%s11314_s5 + $0xe8] sm:$0xf0] }
 0x110   : > { %1383 = vmatmul.bf16.gmra.mxu1 %v6249_v25  ;;  %6435 = vmatmul.msk.bf16.gmra.mxu0 %vm1266_vm2, %v8309_v61  ;;  %v7310_v61 = vld [vmem:[%s11314_s5 + $0xf4] sm:$0xf] }
 0x111   : > { %v6725_v43 = vor.u32 %v7310_v61, %v6722_v60 }
 0x112   : > { %1530 = vmatmul.bf16.gmra.mxu2 %v6249_v25  ;;  %1491 = vmatmul.bf16.gmra.mxu3 %v8543_v13  ;;  %v7240_v13 = vld [vmem:[%s8221_s29] sm:$0xff] }
 0x113   : > { %2966 = vmatpush.bf16.msrb.mxu3 %v6725_v43  ;;  %v7308_v25 = vld [vmem:[%s11314_s5 + $0xe4] sm:$0xf] }
 0x114   : > { %v6717_v27 = vor.u32 %v7308_v25, %v6714_v26 }
 0x115   : > { %v8604_v19 = vpop.f32.mrf.mxu3  ;;  %v1337_v29 = vpop.f32.mrf.mxu1 }
 0x116   : > { %11394 = vst [vmem:[#allocation22_spill] sm:$0xff] %v8604_v19  ;;  %v8607_v30 = vadd.f32 %v1337_v29, %v8579_v16  ;;  %v8667_v6 = vpop.f32.mrf.mxu2  ;;  %v6650_v29 = vld [vmem:[%s11314_s5 + $0x68] sm:$0xf0]  ;;  %v8819_v19 = vld [vmem:[%s8221_s29 + $0x38] sm:$0xff] }
 0x117   : > { %2967 = vmatpush.bf16.msrb.mxu3 %v6717_v27  ;;  %v6653_v32 = vor.u32 %v7292_v28, %v6650_v29  ;;  %v7309_v27 = vld [vmem:[%s11314_s5 + $0xe4] sm:$0xf0] }
 0x119   : > { %2838 = vmatpush.bf16.msrb.mxu1 %v6653_v32  ;;  %v6704_v32 = vld [vmem:[%s11314_s5 + $0xd0] sm:$0xf] }
 0x11d   : > { %v8613_v40 = vpop.f32.mrf.mxu3  ;;  %v1340_v41 = vpop.f32.mrf.mxu1 }
 0x11e   : > { %11395 = vst [vmem:[#allocation23_spill] sm:$0xff] %v8613_v40  ;;  %v8623_v42 = vadd.f32 %v1340_v41, %v8579_v16  ;;  %v8676_v12 = vpop.f32.mrf.mxu2 }
 0x120   : > { %1388 = vmatmul.bf16.gmra.mxu1 %v6261_v31  ;;  %6436 = vmatmul.msk.bf16.gmra.mxu0 %vm1266_vm2, %v8381_v37  ;;  %v7201_v37 = vld [vmem:[%s8277_s17 + $0xac] sm:$0xf]  ;;  %s11606_s17 = sld [smem:[#allocation76_spill]] }
 0x121   : > { %v6273_v52 = vor.u32 %v7201_v37, %v6270_v50 }
 0x122   : > { %1535 = vmatmul.bf16.gmra.mxu2 %v6261_v31  ;;  %2020 = vmatmul.bf16.vlgmr.msra.gmra.mxu3 %v7240_v13 }
 0x125   : > { %v8635_v48 = vpop.f32.mrf.mxu3  ;;  %v1342_v49 = vpop.f32.mrf.mxu1 }
 0x126   : > { %v8638_v36 = vadd.f32 %v1342_v49, %v8579_v16  ;;  %s5985_s16 = scalar_lea.hbm %s11606_s17, %s7424_s21 }
 0x12d   : > { %v8642_v51 = vpop.f32.mrf.mxu3  ;;  %v1345_v34 = vpop.f32.mrf.mxu1 }
 0x12e   : > { %v8648_v58 = vadd.f32 %v1345_v34, %v8579_v16 }
 0x130   : > { %1393 = vmatmul.bf16.gmra.mxu1 %v6273_v52  ;;  %6437 = vmatmul.msk.bf16.gmra.mxu0 %vm1266_vm2, %v8463_v18  ;;  %v1315_v18 = vpop.f32.mrf.mxu0 }
 0x131   : > { %v1316_v10 = vadd.f32 %v1315_v18, %v8579_v16  ;;  %v7311_v18 = vld [vmem:[%s11314_s5 + $0xf4] sm:$0xf0] }
 0x132   : > { %1540 = vmatmul.bf16.gmra.mxu2 %v6273_v52  ;;  %2025 = vmatmul.bf16.gmra.mxu3 %v7241_v54 }
 0x135   : > { %v8652_v35 = vpop.f32.mrf.mxu3  ;;  %v1347_v17 = vpop.f32.mrf.mxu1 }
 0x136   : > { %v8655_v59 = vadd.f32 %v1347_v17, %v8579_v16 }
 0x138   : > { %v8674_v11 = vpop.f32.mrf.mxu0 }
 0x13d   : > { %v8662_v3 = vpop.f32.mrf.mxu3  ;;  %v1359_v4 = vpop.f32.mrf.mxu1 }
 0x13e   : > { %v8665_v5 = vadd.f32 %v1359_v4, %v1311_v2  ;;  %v8721_v2 = vld [vmem:[%s8221_s29 + $0x28] sm:$0xff] }
 0x140   : > { %1891 = vmatmul.bf16.vlgmr.msra.gmra.mxu1 %v7240_v13  ;;  %v1320_v31 = vpop.f32.mrf.mxu0  ;;  %v8699_v13 = vpop.f32.mrf.mxu2 }
 0x141   : > { %v1321_v61 = vadd.f32 %v1320_v31, %v8579_v16  ;;  %v7307_v31 = vld [vmem:[%s11314_s5 + $0xd4] sm:$0xf0] }
 0x142   : > { %2030 = vmatmul.bf16.gmra.mxu3 %v7242_v38 }
 0x145   : > { %v8669_v7 = vpop.f32.mrf.mxu3  ;;  %v8671_v8 = vpop.f32.mrf.mxu1 }
 0x148   : > { %v8707_v46 = vpop.f32.mrf.mxu0  ;;  %v8709_v49 = vpop.f32.mrf.mxu2 }
 0x14d   : > { %v8678_v20 = vpop.f32.mrf.mxu3  ;;  %v1364_v22 = vpop.f32.mrf.mxu1 }
 0x14e   : > { %v8687_v14 = vadd.f32 %v1364_v22, %v1316_v10 }
 0x150   : > { %1896 = vmatmul.bf16.gmra.mxu1 %v7241_v54  ;;  %v1325_v52 = vpop.f32.mrf.mxu0  ;;  %v8715_v53 = vpop.f32.mrf.mxu2 }
 0x151   : > { %v1326_v34 = vadd.f32 %v1325_v52, %v8579_v16  ;;  %v8755_v52 = vld [vmem:[%s8221_s29 + $0x30] sm:$0xff] }
 0x152   : > { %2035 = vmatmul.bf16.gmra.mxu3 %v7243_v23 }
 0x155   : > { %v8695_v33 = vpop.f32.mrf.mxu3  ;;  %v8697_v41 = vpop.f32.mrf.mxu1 }
 0x158   : > { %v8732_v22 = vpop.f32.mrf.mxu2  ;;  %v8744_v29 = vpop.f32.mrf.mxu0 }
 0x15d   : > { %v8702_v60 = vpop.f32.mrf.mxu3  ;;  %v1369_v43 = vpop.f32.mrf.mxu1 }
 0x15e   : > { %v8705_v45 = vadd.f32 %v1369_v43, %v1321_v61  ;;  %v6705_v61 = vor.u32 %v7307_v31, %v6704_v32  ;;  %v7290_v31 = vld [vmem:[%s11314_s5 + $0x54] sm:$0xf] }
 0x160   : > { %1901 = vmatmul.bf16.gmra.mxu1 %v7242_v38  ;;  %v6720_v38 = vld [vmem:[%s11314_s5 + $0xf0] sm:$0xf] }
 0x161   : > { %v6721_v10 = vor.u32 %v7311_v18, %v6720_v38  ;;  %v6706_v38 = vld [vmem:[%s11314_s5 + $0xd8] sm:$0xf0]  ;;  %v6696_v18 = vld [vmem:[%s11314_s5 + $0xc0] sm:$0xf] }
 0x162   : > { %2040 = vmatmul.bf16.gmra.mxu3 %v7244_v44 }
 0x163   : > { %2708 = vmatpush.bf16.msra.mxu0 %v6721_v10  ;;  %v8766_v10 = vpop.f32.mrf.mxu2 }
 0x165   : > { %v8711_v37 = vpop.f32.mrf.mxu3  ;;  %v8713_v50 = vpop.f32.mrf.mxu1 }
 0x16b   : > { %v8800_v40 = vpop.f32.mrf.mxu2 }
 0x16d   : > { %v8718_v54 = vpop.f32.mrf.mxu3  ;;  %v1374_v17 = vpop.f32.mrf.mxu1 }
 0x16e   : > { %v8723_v4 = vadd.f32 %v1374_v17, %v1326_v34  ;;  %v7306_v17 = vld [vmem:[%s11314_s5 + $0xd4] sm:$0xf] }
 0x170   : > { %1906 = vmatmul.bf16.gmra.mxu1 %v7243_v23  ;;  %v6712_v23 = vld [vmem:[%s11314_s5 + $0xe0] sm:$0xf] }
 0x171   : > { %v6713_v28 = vor.u32 %v7309_v27, %v6712_v23  ;;  %v6709_v27 = vor.u32 %v7306_v17, %v6706_v38 }
 0x172   : > { %2045 = vmatmul.bf16.gmra.mxu3 %v8721_v2 }
 0x173   : > { %2709 = vmatpush.bf16.msra.mxu0 %v6713_v28  ;;  %v7305_v28 = vld [vmem:[%s11314_s5 + $0xc4] sm:$0xf0]  ;;  %2968 = vmatpush.bf16.msrb.mxu3 %v6709_v27  ;;  %v8838_v56 = vpop.f32.mrf.mxu2 }
 0x174   : > { %v6697_v32 = vor.u32 %v7305_v28, %v6696_v18  ;;  %v6680_v28 = vld [vmem:[%s11314_s5 + $0xa0] sm:$0xf] }
 0x175   : > { %v8734_v25 = vpop.f32.mrf.mxu3  ;;  %v8736_v26 = vpop.f32.mrf.mxu1 }
 0x177   : > { %2710 = vmatpush.bf16.msra.mxu0 %v6705_v61  ;;  %v6688_v61 = vld [vmem:[%s11314_s5 + $0xb0] sm:$0xf] }
 0x17b   : > { %2711 = vmatpush.bf16.msra.mxu0 %v6697_v32  ;;  %v7301_v32 = vld [vmem:[%s11314_s5 + $0xa4] sm:$0xf0] }
 0x17d   : > { %v8752_v43 = vpop.f32.mrf.mxu3  ;;  %v1379_v34 = vpop.f32.mrf.mxu1 }
 0x17e   : > { %v8769_v23 = vadd.f32 %v1379_v34, %v8584_v9  ;;  %v6642_v9 = vld [vmem:[%s11314_s5 + $0x58] sm:$0xf0]  ;;  %v8784_v34 = vpop.f32.mrf.mxu0 }
 0x17f   : > { %v6645_v17 = vor.u32 %v7290_v31, %v6642_v9  ;;  %v6681_v9 = vor.u32 %v7301_v32, %v6680_v28 }
 0x180   : > { %1911 = vmatmul.bf16.gmra.mxu1 %v7244_v44  ;;  %v7303_v44 = vld [vmem:[%s11314_s5 + $0xb4] sm:$0xf0] }
 0x181   : > { %v6689_v38 = vor.u32 %v7303_v44, %v6688_v61  ;;  %2839 = vmatpush.bf16.msrb.mxu1 %v6645_v17  ;;  %v6672_v61 = vld [vmem:[%s11314_s5 + $0x90] sm:$0xf]  ;;  %v7299_v17 = vld [vmem:[%s11314_s5 + $0x94] sm:$0xf0] }
 0x182   : > { %2050 = vmatmul.bf16.gmra.mxu3 %v8755_v52  ;;  %v6673_v44 = vor.u32 %v7299_v17, %v6672_v61  ;;  %v6664_v61 = vld [vmem:[%s11314_s5 + $0x80] sm:$0xf]  ;;  %v7297_v17 = vld [vmem:[%s11314_s5 + $0x84] sm:$0xf0] }
 0x183   : > { %2712 = vmatpush.bf16.msra.mxu0 %v6689_v38  ;;  %v6656_v38 = vld [vmem:[%s11314_s5 + $0x70] sm:$0xf]  ;;  %v6665_v15 = vor.u32 %v7297_v17, %v6664_v61 }
 0x185   : > { %v8789_v18 = vpop.f32.mrf.mxu3  ;;  %v1381_v27 = vpop.f32.mrf.mxu1 }
 0x186   : > { %v8798_v31 = vadd.f32 %v1381_v27, %v8592_v21  ;;  %v7295_v21 = vld [vmem:[%s11314_s5 + $0x74] sm:$0xf0]  ;;  %v8814_v27 = vpop.f32.mrf.mxu0 }
 0x187   : > { %2713 = vmatpush.bf16.msra.mxu0 %v6681_v9  ;;  %v6657_v32 = vor.u32 %v7295_v21, %v6656_v38  ;;  %v6648_v38 = vld [vmem:[%s11314_s5 + $0x60] sm:$0xf] }
 0x189   : > { %2579 = vmatpush.bf16.msra.mxu2 %v6657_v32  ;;  %v7291_v32 = vld [vmem:[%s11314_s5 + $0x54] sm:$0xf0] }
 0x18b   : > { %2714 = vmatpush.bf16.msra.mxu0 %v6673_v44  ;;  %v7293_v44 = vld [vmem:[%s11314_s5 + $0x64] sm:$0xf0] }
 0x18c   : > { %v6649_v21 = vor.u32 %v7293_v44, %v6648_v38  ;;  %v6632_v38 = vld [vmem:[%s11314_s5 + $0x40] sm:$0xf]  ;;  %v7289_v44 = vld [vmem:[%s11314_s5 + $0x44] sm:$0xf0] }
 0x18d   : > { %v8816_v28 = vpop.f32.mrf.mxu3  ;;  %v1384_v9 = vpop.f32.mrf.mxu1 }
 0x18e   : > { %v8828_v24 = vadd.f32 %v1384_v9, %v8599_v55  ;;  %2580 = vmatpush.bf16.msra.mxu2 %v6649_v21  ;;  %v6640_v55 = vld [vmem:[%s11314_s5 + $0x50] sm:$0xf]  ;;  %v8848_v17 = vpop.f32.mrf.mxu0  ;;  %v6633_v21 = vor.u32 %v7289_v44, %v6632_v38  ;;  %v8874_v38 = vperm.slane %v8574_v1, 1  ;;  %v6616_v44 = vld [vmem:[%s11314_s5 + $0x20] sm:$0xf] }
 0x18f   : > { %2715 = vmatpush.bf16.msra.mxu0 %v6665_v15  ;;  %v6641_v61 = vor.u32 %v7291_v32, %v6640_v55  ;;  %v6624_v55 = vld [vmem:[%s11314_s5 + $0x30] sm:$0xf]  ;;  %v1513_v32 = vpop.f32.mrf.mxu2 }
 0x190   : > { %11396 = vst [vmem:[#allocation24_spill] sm:$0xff] %v8828_v24  ;;  %1916 = vmatmul.bf16.gmra.mxu1 %v8721_v2  ;;  %v6608_v1 = vld [vmem:[%s11314_s5 + $0x10] sm:$0xf]  ;;  %v6600_v24 = vld [vmem:[%s11314_s5] sm:$0xf] }
 0x192   : > { %2055 = vmatmul.bf16.gmra.mxu3 %v8819_v19  ;;  %2581 = vmatpush.bf16.msra.mxu2 %v6641_v61 }
 0x195   : > { %v8846_v9 = vpop.f32.mrf.mxu3  ;;  %v1386_v2 = vpop.f32.mrf.mxu1 }
 0x196   : > { %11397 = vst [vmem:[#allocation25_spill] sm:$0xff] %v8846_v9  ;;  %v8851_v15 = vadd.f32 %v1386_v2, %v8607_v30  ;;  %2582 = vmatpush.bf16.msra.mxu2 %v6633_v21  ;;  %v7287_v30 = vld [vmem:[%s11314_s5 + $0x34] sm:$0xf0]  ;;  %v8868_v9 = vld [vmem:[%s8221_s29 + $0x40] sm:$0xff]  ;;  %v7285_v21 = vld [vmem:[%s11314_s5 + $0x24] sm:$0xf0] }
 0x197   : > { %v6625_v2 = vor.u32 %v7287_v30, %v6624_v55  ;;  %v6617_v55 = vor.u32 %v7285_v21, %v6616_v44 }
 0x198   : > { %11398 = vst [vmem:[#allocation26_spill] sm:$0xff] %v8851_v15 }
 0x19a   : > { %2583 = vmatpush.bf16.msra.mxu2 %v6625_v2 }
 0x19d   : > { %v8865_v61 = vpop.f32.mrf.mxu3  ;;  %v1389_v15 = vpop.f32.mrf.mxu1 }
 0x19e   : > { %11399 = vst [vmem:[#allocation27_spill] sm:$0xff] %v8865_v61  ;;  %v8871_v62 = vadd.f32 %v1389_v15, %v8623_v42  ;;  %v1562_v61 = vpop.f32.mrf.mxu0  ;;  %2584 = vmatpush.bf16.msra.mxu2 %v6617_v55  ;;  %v1458_v42 = vadd.f32 %v8635_v48, %v8874_v38  ;;  %v7283_v15 = vld [vmem:[%s11314_s5 + $0x14] sm:$0xf0]  ;;  %v8895_v55 = vpop.f32.mrf.mxu2 }
 0x19f   : > { %v6609_v2 = vor.u32 %v7283_v15, %v6608_v1 }
 0x1a0   : > { %11400 = vst [vmem:[#allocation28_spill] sm:$0xff] %v8871_v62  ;;  %1921 = vmatmul.bf16.gmra.mxu1 %v8755_v52  ;;  %v1460_v52 = vadd.f32 %v8642_v51, %v8874_v38  ;;  %v1507_v44 = vadd.f32 %v8766_v10, %v1458_v42  ;;  %v7281_v51 = vld [vmem:[%s11314_s5 + $0x4] sm:$0xf0] }
 0x1a1   : > { %v6601_v1 = vor.u32 %v7281_v51, %v6600_v24 }
 0x1a2   : > { %2060 = vmatmul.bf16.gmra.mxu3 %v8868_v9  ;;  %2585 = vmatpush.bf16.msra.mxu2 %v6609_v2  ;;  %v1509_v62 = vadd.f32 %v8800_v40, %v1460_v52  ;;  %v8908_v10 = vadd.f32 %v8784_v34, %v1507_v44  ;;  %v7304_v44 = vld [vmem:[%s11314_s5 + $0xc4] sm:$0xf] }
 0x1a5   : > { %v2021_v30 = vpop.f32.mrf.mxu3  ;;  %v1391_v21 = vpop.f32.mrf.mxu1 }
 0x1a6   : > { %v8898_v48 = vadd.f32 %v1391_v21, %v8638_v36  ;;  %v8910_v42 = vpop.f32.mrf.mxu0  ;;  %2586 = vmatpush.bf16.msra.mxu2 %v6601_v1  ;;  %v8913_v36 = vadd.f32 %v8814_v27, %v1509_v62  ;;  %v2142_v40 = vadd.f32 %v2021_v30, %v8908_v10  ;;  %v8918_v21 = vld [vmem:[%s8221_s29 + $0x48] sm:$0xff]  ;;  %v1518_v27 = vpop.f32.mrf.mxu2 }
 0x1a7   : > { %v6698_v62 = vld [vmem:[%s11314_s5 + $0xc8] sm:$0xf0] }
 0x1a8   : > { %11401 = vst [vmem:[#allocation29_spill] sm:$0xff] %v8898_v48  ;;  %v2238_v24 = vmax.f32 %v2142_v40, 0.0  ;;  %v6701_v30 = vor.u32 %v7304_v44, %v6698_v62  ;;  %v6634_v1 = vld [vmem:[%s11314_s5 + $0x48] sm:$0xf0] }
 0x1aa   : > { %2969 = vmatpush.bf16.msrb.mxu3 %v6701_v30 }
 0x1ad   : > { %v2023_v15 = vpop.f32.mrf.mxu3  ;;  %v1394_v52 = vpop.f32.mrf.mxu1 }
 0x1ae   : > { %v2144_v2 = vadd.f32 %v2023_v15, %v8913_v36  ;;  %v8921_v48 = vadd.f32 %v1394_v52, %v8648_v58  ;;  %v7288_v58 = vld [vmem:[%s11314_s5 + $0x44] sm:$0xf]  ;;  %v1463_v15 = vadd.f32 %v8652_v35, %v8874_v38  ;;  %v1465_v52 = vadd.f32 %v8662_v3, %v8874_v38  ;;  %v1521_v35 = vpop.f32.mrf.mxu2 }
 0x1af   : > { %v6637_v40 = vor.u32 %v7288_v58, %v6634_v1 }
 0x1b0   : > { %v2240_v34 = vmax.f32 %v2144_v2, 0.0  ;;  %1926 = vmatmul.bf16.gmra.mxu1 %v8819_v19  ;;  %v1567_v19 = vpop.f32.mrf.mxu0  ;;  %v1514_v62 = vadd.f32 %v1513_v32, %v1465_v52 }
 0x1b1   : > { %2840 = vmatpush.bf16.msrb.mxu1 %v6637_v40  ;;  %v1313_v40 = vadd.f32 %v8657_v63, %v8579_v16  ;;  %v8967_v63 = vadd.f32 %v8611_v39, %v8665_v5 }
 0x1b2   : > { %v8930_v51 = vpack.c.bf16 %v2240_v34, %v2238_v24  ;;  %2065 = vmatmul.bf16.gmra.mxu3 %v8918_v21  ;;  %v1512_v24 = vadd.f32 %v8838_v56, %v1463_v15  ;;  %v8951_v58 = vadd.f32 %v1562_v61, %v1514_v62  ;;  %v8958_v15 = vld [vmem:[%s8221_s29 + $0x50] sm:$0xff] }
 0x1b4   : > { %11402 = vst [vmem:[#allocation30_spill] sm:$0xff] %v8930_v51  ;;  %2716 = vmatmul.bf16.vlgmr.msra.gmra.mxu0 %v8930_v51  ;;  %v8949_v30 = vadd.f32 %v8848_v17, %v1512_v24  ;;  %v1362_v17 = vadd.f32 %v8671_v8, %v1313_v40  ;;  %v1470_v24 = vadd.f32 %v8678_v20, %v8874_v38 }
 0x1b5   : > { %v2026_v2 = vpop.f32.mrf.mxu3  ;;  %v1396_v34 = vpop.f32.mrf.mxu1  ;;  %v1318_v20 = vadd.f32 %v8674_v11, %v8579_v16  ;;  %v9002_v11 = vadd.f32 %v8645_v57, %v8687_v14 }
 0x1b6   : > { %v8946_v44 = vadd.f32 %v1396_v34, %v8655_v59  ;;  %v2146_v1 = vadd.f32 %v2026_v2, %v8949_v30  ;;  %v8973_v2 = vadd.f32 %v8633_v47, %v1362_v17  ;;  %v1523_v52 = vpop.f32.mrf.mxu2 }
 0x1b8   : > { %v1570_v59 = vpop.f32.mrf.mxu0  ;;  %v2242_v34 = vmax.f32 %v2146_v1, 0.0  ;;  %v1519_v1 = vadd.f32 %v1518_v27, %v1470_v24 }
 0x1bd   : > { %v2028_v51 = vpop.f32.mrf.mxu3  ;;  %v1892_v56 = vpop.f32.mrf.mxu1 }
 0x1be   : > { %v2148_v3 = vadd.f32 %v2028_v51, %v8951_v58  ;;  %v1468_v51 = vadd.f32 %v8669_v7, %v8874_v38  ;;  %v2141_v8 = vadd.f32 %v1892_v56, %v8967_v63  ;;  %v8985_v56 = vadd.f32 %v1567_v19, %v1519_v1 }
 0x1bf   : > { %v1475_v1 = vadd.f32 %v8702_v60, %v8874_v38  ;;  %v1323_v60 = vadd.f32 %v8707_v46, %v8579_v16 }
 0x1c0   : > { %v2244_v32 = vmax.f32 %v2148_v3, 0.0  ;;  %1931 = vmatmul.bf16.gmra.mxu1 %v8868_v9  ;;  %v1517_v62 = vadd.f32 %v8895_v55, %v1468_v51  ;;  %v1572_v7 = vpop.f32.mrf.mxu0  ;;  %v2237_v40 = vmax.f32 %v2141_v8, 0.0  ;;  %v8993_v51 = vld [vmem:[%s8221_s29 + $0x58] sm:$0xff]  ;;  %v1526_v8 = vpop.f32.mrf.mxu2 }
 0x1c1   : > { %v1524_v14 = vadd.f32 %v1523_v52, %v1475_v1  ;;  %v1372_v46 = vadd.f32 %v8713_v50, %v1323_v60  ;;  %v1480_v60 = vadd.f32 %v8718_v54, %v8874_v38  ;;  %v1328_v54 = vadd.f32 %v8744_v29, %v8579_v16 }
 0x1c2   : > { %2070 = vmatmul.bf16.gmra.mxu3 %v8958_v15  ;;  %v8963_v61 = vpack.c.bf16 %v2244_v32, %v2242_v34  ;;  %v8981_v47 = vadd.f32 %v8910_v42, %v1517_v62  ;;  %v1367_v62 = vadd.f32 %v8697_v41, %v1318_v20  ;;  %v9080_v16 = vadd.f32 %v8699_v13, %v8723_v4 }
 0x1c3   : > { %v1483_v29 = vadd.f32 %v8734_v25, %v8874_v38 }
 0x1c4   : > { %2721 = vmatmul.bf16.gmra.mxu0 %v8963_v61 }
 0x1c5   : > { %v2031_v9 = vpop.f32.mrf.mxu3  ;;  %v1894_v39 = vpop.f32.mrf.mxu1 }
 0x1c6   : > { %v2143_v5 = vadd.f32 %v1894_v39, %v8973_v2  ;;  %v2150_v32 = vadd.f32 %v2031_v9, %v8981_v47  ;;  %v1473_v39 = vadd.f32 %v8695_v33, %v8874_v38 }
 0x1c8   : > { %v2239_v3 = vmax.f32 %v2143_v5, 0.0  ;;  %v2246_v42 = vmax.f32 %v2150_v32, 0.0  ;;  %v1575_v9 = vpop.f32.mrf.mxu0  ;;  %v9008_v5 = vadd.f32 %v8659_v0, %v1367_v62  ;;  %v1528_v32 = vpop.f32.mrf.mxu2  ;;  %v9018_v0 = vadd.f32 %v1572_v7, %v1524_v14  ;;  %v9026_v62 = vld [vmem:[%s8221_s29 + $0x60] sm:$0xff]  ;;  %v7302_v7 = vld [vmem:[%s11314_s5 + $0xb4] sm:$0xf] }
 0x1c9   : > { %v1478_v14 = vadd.f32 %v8711_v37, %v8874_v38 }
 0x1ca   : > { %v8983_v34 = vpack.c.bf16 %v2239_v3, %v2237_v40  ;;  %v1522_v40 = vadd.f32 %v1521_v35, %v1473_v39 }
 0x1cc   : > { %2587 = vmatmul.bf16.vlgmr.msra.gmra.mxu2 %v8983_v34 }
 0x1cd   : > { %v2033_v55 = vpop.f32.mrf.mxu3  ;;  %v1897_v17 = vpop.f32.mrf.mxu1 }
 0x1ce   : > { %v2152_v27 = vadd.f32 %v2033_v55, %v8985_v56  ;;  %v2145_v41 = vadd.f32 %v1897_v17, %v9002_v11  ;;  %v9014_v55 = vadd.f32 %v1570_v59, %v1522_v40  ;;  %v7286_v40 = vld [vmem:[%s11314_s5 + $0x34] sm:$0xf] }
 0x1d0   : > { %v2248_v24 = vmax.f32 %v2152_v27, 0.0  ;;  %1936 = vmatmul.bf16.gmra.mxu1 %v8918_v21  ;;  %v2241_v20 = vmax.f32 %v2145_v41, 0.0  ;;  %v1577_v35 = vpop.f32.mrf.mxu0  ;;  %v6690_v41 = vld [vmem:[%s11314_s5 + $0xb8] sm:$0xf0]  ;;  %v1531_v50 = vpop.f32.mrf.mxu2 }
 0x1d2   : > { %2075 = vmatmul.bf16.gmra.mxu3 %v8993_v51  ;;  %v8998_v19 = vpack.c.bf16 %v2248_v24, %v2246_v42 }
 0x1d4   : > { %2726 = vmatmul.bf16.gmra.mxu0 %v8998_v19 }
 0x1d5   : > { %v2036_v21 = vpop.f32.mrf.mxu3  ;;  %v1899_v3 = vpop.f32.mrf.mxu1 }
 0x1d6   : > { %v2147_v57 = vadd.f32 %v1899_v3, %v9008_v5  ;;  %v2154_v17 = vadd.f32 %v2036_v21, %v9014_v55  ;;  %v6693_v21 = vor.u32 %v7302_v7, %v6690_v41  ;;  %v6626_v3 = vld [vmem:[%s11314_s5 + $0x38] sm:$0xf0] }
 0x1d8   : > { %v2243_v33 = vmax.f32 %v2147_v57, 0.0  ;;  %v2250_v59 = vmax.f32 %v2154_v17, 0.0  ;;  %v9047_v57 = vadd.f32 %v8667_v6, %v8705_v45  ;;  %2970 = vmatpush.bf16.msrb.mxu3 %v6693_v21  ;;  %v1527_v6 = vadd.f32 %v1526_v8, %v1478_v14  ;;  %v1533_v8 = vpop.f32.mrf.mxu2 }
 0x1da   : > { %v9016_v27 = vpack.c.bf16 %v2243_v33, %v2241_v20  ;;  %v9053_v20 = vadd.f32 %v8676_v12, %v1372_v46  ;;  %v9059_v7 = vadd.f32 %v1575_v9, %v1527_v6 }
 0x1dc   : > { %2592 = vmatmul.bf16.gmra.mxu2 %v9016_v27 }
 0x1dd   : > { %v2038_v42 = vpop.f32.mrf.mxu3  ;;  %v1902_v24 = vpop.f32.mrf.mxu1 }
 0x1de   : > { %v2156_v52 = vadd.f32 %v2038_v42, %v9018_v0  ;;  %v2149_v33 = vadd.f32 %v1902_v24, %v9047_v57  ;;  %v1580_v42 = vpop.f32.mrf.mxu0 }
 0x1e0   : > { %v2252_v39 = vmax.f32 %v2156_v52, 0.0  ;;  %1941 = vmatmul.bf16.gmra.mxu1 %v8958_v15  ;;  %v6629_v15 = vor.u32 %v7286_v40, %v6626_v3  ;;  %v2245_v37 = vmax.f32 %v2149_v33, 0.0  ;;  %v9071_v40 = vld [vmem:[%s8221_s29 + $0x68] sm:$0xff] }
 0x1e2   : > { %2080 = vmatmul.bf16.gmra.mxu3 %v9026_v62  ;;  %v9037_v1 = vpack.c.bf16 %v2252_v39, %v2250_v59  ;;  %2841 = vmatpush.bf16.msrb.mxu1 %v6629_v15  ;;  %v1529_v59 = vadd.f32 %v1528_v32, %v1480_v60  ;;  %v1377_v15 = vadd.f32 %v8736_v26, %v1328_v54 }
 0x1e3   : > { %v1532_v60 = vadd.f32 %v1531_v50, %v1483_v29 }
 0x1e4   : > { %2731 = vmatmul.bf16.gmra.mxu0 %v9037_v1  ;;  %v9063_v41 = vadd.f32 %v1577_v35, %v1529_v59  ;;  %v9086_v33 = vadd.f32 %v8709_v49, %v1377_v15  ;;  %v9117_v15 = vadd.f32 %v8732_v22, %v8798_v31 }
 0x1e5   : > { %v2041_v17 = vpop.f32.mrf.mxu3  ;;  %v1904_v45 = vpop.f32.mrf.mxu1  ;;  %v9092_v59 = vadd.f32 %v1580_v42, %v1532_v60 }
 0x1e6   : > { %v2151_v52 = vadd.f32 %v1904_v45, %v9053_v20  ;;  %v2158_v24 = vadd.f32 %v2041_v17, %v9059_v7  ;;  %v1582_v35 = vpop.f32.mrf.mxu0  ;;  %v1536_v45 = vpop.f32.mrf.mxu2 }
 0x1e8   : > { %v2247_v39 = vmax.f32 %v2151_v52, 0.0  ;;  %v2254_v9 = vmax.f32 %v2158_v24, 0.0 }
 0x1ea   : > { %v9061_v12 = vpack.c.bf16 %v2247_v39, %v2245_v37 }
 0x1ec   : > { %2597 = vmatmul.bf16.gmra.mxu2 %v9061_v12 }
 0x1ed   : > { %v2043_v46 = vpop.f32.mrf.mxu3  ;;  %v1907_v32 = vpop.f32.mrf.mxu1 }
 0x1ee   : > { %v2160_v21 = vadd.f32 %v2043_v46, %v9063_v41  ;;  %v2153_v26 = vadd.f32 %v1907_v32, %v9080_v16  ;;  %v1585_v37 = vpop.f32.mrf.mxu0  ;;  %v9102_v46 = vld [vmem:[%s8221_s29 + $0x70] sm:$0xff]  ;;  %v1538_v32 = vpop.f32.mrf.mxu2 }
 0x1f0   : > { %v2256_v3 = vmax.f32 %v2160_v21, 0.0  ;;  %1946 = vmatmul.bf16.gmra.mxu1 %v8993_v51  ;;  %v1485_v51 = vadd.f32 %v8752_v43, %v8874_v38  ;;  %v2249_v52 = vmax.f32 %v2153_v26, 0.0  ;;  %v1490_v26 = vadd.f32 %v8816_v28, %v8874_v38 }
 0x1f2   : > { %2085 = vmatmul.bf16.gmra.mxu3 %v9071_v40  ;;  %v9076_v14 = vpack.c.bf16 %v2256_v3, %v2254_v9  ;;  %v1534_v4 = vadd.f32 %v1533_v8, %v1485_v51  ;;  %v9110_v9 = vadd.f32 %v8715_v53, %v8769_v23  ;;  %v1488_v3 = vadd.f32 %v8789_v18, %v8874_v38 }
 0x1f3   : > { %v1539_v51 = vadd.f32 %v1538_v32, %v1490_v26  ;;  %v7284_v32 = vld [vmem:[%s11314_s5 + $0x24] sm:$0xf] }
 0x1f4   : > { %2736 = vmatmul.bf16.gmra.mxu0 %v9076_v14  ;;  %v9096_v39 = vadd.f32 %v1582_v35, %v1534_v4 }
 0x1f5   : > { %v2046_v17 = vpop.f32.mrf.mxu3  ;;  %v1909_v6 = vpop.f32.mrf.mxu1 }
 0x1f6   : > { %v2155_v13 = vadd.f32 %v1909_v6, %v9086_v33  ;;  %v2162_v24 = vadd.f32 %v2046_v17, %v9092_v59  ;;  %v1587_v35 = vpop.f32.mrf.mxu0  ;;  %v1537_v17 = vadd.f32 %v1536_v45, %v1488_v3  ;;  %v6618_v3 = vld [vmem:[%s11314_s5 + $0x28] sm:$0xf0] }
 0x1f7   : > { %v9127_v31 = vadd.f32 %v1587_v35, %v1539_v51  ;;  %v11406_v35 = vld [vmem:[#allocation24_spill] sm:$0xff]  ;;  %v6621_v26 = vor.u32 %v7284_v32, %v6618_v3 }
 0x1f8   : > { %v2251_v25 = vmax.f32 %v2155_v13, 0.0  ;;  %v2258_v8 = vmax.f32 %v2162_v24, 0.0  ;;  %v9123_v6 = vadd.f32 %v1585_v37, %v1537_v17  ;;  %v1541_v13 = vpop.f32.mrf.mxu2  ;;  %v7300_v37 = vld [vmem:[%s11314_s5 + $0xa4] sm:$0xf] }
 0x1f9   : > { %2842 = vmatpush.bf16.msrb.mxu1 %v6621_v26 }
 0x1fa   : > { %v9094_v49 = vpack.c.bf16 %v2251_v25, %v2249_v52  ;;  %v7255_v25 = vld [vmem:[%s8221_s29 + $0x78] sm:$0xff] }
 0x1fc   : > { %2602 = vmatmul.bf16.gmra.mxu2 %v9094_v49 }
 0x1fd   : > { %v2048_v54 = vpop.f32.mrf.mxu3  ;;  %v1912_v50 = vpop.f32.mrf.mxu1 }
 0x1fe   : > { %v2164_v43 = vadd.f32 %v2048_v54, %v9096_v39  ;;  %v1590_v24 = vpop.f32.mrf.mxu0 }
 0x200   : > { %v2260_v21 = vmax.f32 %v2164_v43, 0.0  ;;  %1951 = vmatmul.bf16.gmra.mxu1 %v9026_v62  ;;  %v2157_v62 = vadd.f32 %v1912_v50, %v9110_v9  ;;  %v6682_v50 = vld [vmem:[%s11314_s5 + $0xa8] sm:$0xf0] }
 0x202   : > { %2090 = vmatmul.bf16.gmra.mxu3 %v9102_v46  ;;  %v9106_v42 = vpack.c.bf16 %v2260_v21, %v2258_v8  ;;  %v2253_v18 = vmax.f32 %v2157_v62, 0.0  ;;  %v6685_v8 = vor.u32 %v7300_v37, %v6682_v50  ;;  %v11407_v62 = vld [vmem:[#allocation18_spill] sm:$0xff] }
 0x204   : > { %11403 = vst [vmem:[#allocation31_spill] sm:$0xff] %v9106_v42  ;;  %2741 = vmatmul.bf16.gmra.mxu0 %v9106_v42  ;;  %2971 = vmatpush.bf16.msrb.mxu3 %v6685_v8 }
 0x205   : > { %v2051_v29 = vpop.f32.mrf.mxu3  ;;  %v1914_v53 = vpop.f32.mrf.mxu1 }
 0x206   : > { %v2159_v23 = vadd.f32 %v1914_v53, %v9117_v15  ;;  %v2166_v4 = vadd.f32 %v2051_v29, %v9123_v6  ;;  %v9150_v29 = vadd.f32 %v11407_v62, %v11406_v35  ;;  %v11409_v53 = vld [vmem:[#allocation26_spill] sm:$0xff]  ;;  %v1592_v8 = vpop.f32.mrf.mxu0 }
 0x208   : > { %v2255_v60 = vmax.f32 %v2159_v23, 0.0  ;;  %v2262_v54 = vmax.f32 %v2166_v4, 0.0  ;;  %v11410_v23 = vld [vmem:[#allocation19_spill] sm:$0xff] }
 0x209   : > { %v9157_v51 = vadd.f32 %v11410_v23, %v11409_v53 }
 0x20a   : > { %v9125_v22 = vpack.c.bf16 %v2255_v60, %v2253_v18  ;;  %v1543_v18 = vpop.f32.mrf.mxu2 }
 0x20c   : > { %11404 = vst [vmem:[#allocation32_spill] sm:$0xff] %v9125_v22  ;;  %2607 = vmatmul.bf16.gmra.mxu2 %v9125_v22 }
 0x20d   : > { %v2053_v52 = vpop.f32.mrf.mxu3  ;;  %v1917_v45 = vpop.f32.mrf.mxu1 }
 0x20e   : > { %v2168_v28 = vadd.f32 %v2053_v52, %v9127_v31  ;;  %v2161_v60 = vadd.f32 %v1917_v45, %v9150_v29  ;;  %v11411_v52 = vld [vmem:[#allocation27_spill] sm:$0xff] }
 0x210   : > { %v2264_v43 = vmax.f32 %v2168_v28, 0.0  ;;  %1956 = vmatmul.bf16.gmra.mxu1 %v9071_v40  ;;  %v11408_v40 = vld [vmem:[#allocation25_spill] sm:$0xff]  ;;  %v1495_v28 = vadd.f32 %v11411_v52, %v8874_v38  ;;  %v2257_v32 = vmax.f32 %v2161_v60, 0.0  ;;  %v11415_v60 = vld [vmem:[#allocation20_spill] sm:$0xff] }
 0x211   : > { %v1493_v17 = vadd.f32 %v11408_v40, %v8874_v38 }
 0x212   : > { %2095 = vmatmul.bf16.gmra.mxu3 %v7255_v25  ;;  %v9140_v21 = vpack.c.bf16 %v2264_v43, %v2262_v54  ;;  %v1544_v50 = vadd.f32 %v1543_v18, %v1495_v28  ;;  %v11414_v18 = vld [vmem:[#allocation28_spill] sm:$0xff]  ;;  %v11417_v28 = vld [vmem:[#allocation21_spill] sm:$0xff] }
 0x213   : > { %v1542_v54 = vadd.f32 %v1541_v13, %v1493_v17  ;;  %v7256_v17 = vld [vmem:[%s8221_s29 + $0x80] sm:$0xff]  ;;  %v9178_v52 = vadd.f32 %v11415_v60, %v11414_v18 }
 0x214   : > { %11405 = vst [vmem:[#allocation33_spill] sm:$0xff] %v9140_v21  ;;  %2746 = vmatmul.bf16.gmra.mxu0 %v9140_v21  ;;  %v9167_v40 = vadd.f32 %v1592_v8, %v1544_v50 }
 0x215   : > { %v2056_v4 = vpop.f32.mrf.mxu3  ;;  %v1919_v43 = vpop.f32.mrf.mxu1  ;;  %v9163_v35 = vadd.f32 %v1590_v24, %v1542_v54 }
 0x216   : > { %v2163_v37 = vadd.f32 %v1919_v43, %v9157_v51 }
 0x217   : > { %v2170_v45 = vadd.f32 %v2056_v4, %v9163_v35  ;;  %v11416_v4 = vld [vmem:[#allocation29_spill] sm:$0xff] }
 0x218   : > { %v2259_v3 = vmax.f32 %v2163_v37, 0.0  ;;  %v9183_v54 = vadd.f32 %v11417_v28, %v11416_v4  ;;  %v11420_v28 = vld [vmem:[#allocation22_spill] sm:$0xff] }
 0x219   : > { %v2266_v53 = vmax.f32 %v2170_v45, 0.0 }
 0x21a   : > { %v9165_v62 = vpack.c.bf16 %v2259_v3, %v2257_v32 }
 0x21c   : > { %11412 = vst [vmem:[#allocation24_spill] sm:$0xff] %v9165_v62  ;;  %2612 = vmatmul.bf16.gmra.mxu2 %v9165_v62 }
 0x21d   : > { %v2058_v26 = vpop.f32.mrf.mxu3  ;;  %v1922_v13 = vpop.f32.mrf.mxu1 }
 0x21e   : > { %v2172_v38 = vadd.f32 %v2058_v26, %v9167_v40  ;;  %v2165_v43 = vadd.f32 %v1922_v13, %v9178_v52 }
 0x220   : > { %v2268_v23 = vmax.f32 %v2172_v38, 0.0  ;;  %1961 = vmatmul.bf16.gmra.mxu1 %v9102_v46  ;;  %v2261_v8 = vmax.f32 %v2165_v43, 0.0  ;;  %v9197_v43 = vadd.f32 %v11420_v28, %v8921_v48 }
 0x222   : > { %2100 = vmatmul.bf16.gmra.mxu3 %v7256_v17  ;;  %v9174_v24 = vpack.c.bf16 %v2268_v23, %v2266_v53  ;;  %v7257_v23 = vld [vmem:[%s8221_s29 + $0x88] sm:$0xff] }
 0x224   : > { %11413 = vst [vmem:[#allocation18_spill] sm:$0xff] %v9174_v24  ;;  %2751 = vmatmul.bf16.gmra.mxu0 %v9174_v24 }
 0x225   : > { %v2061_v37 = vpop.f32.mrf.mxu3  ;;  %v1924_v50 = vpop.f32.mrf.mxu1 }
 0x226   : > { %v2167_v46 = vadd.f32 %v1924_v50, %v9183_v54  ;;  %v2174_v45 = vadd.f32 %v2061_v37, %v8908_v10  ;;  %v11421_v37 = vld [vmem:[#allocation23_spill] sm:$0xff] }
 0x227   : > { %v9202_v50 = vadd.f32 %v11421_v37, %v8946_v44  ;;  %v9212_v37 = vld [vmem:[%s8221_s29 + $0x90] sm:$0xff] }
 0x228   : > { %v2263_v32 = vmax.f32 %v2167_v46, 0.0  ;;  %v2270_v18 = vmax.f32 %v2174_v45, 0.0 }
 0x22a   : > { %v9187_v3 = vpack.c.bf16 %v2263_v32, %v2261_v8 }
 0x22c   : > { %11418 = vst [vmem:[#allocation25_spill] sm:$0xff] %v9187_v3  ;;  %2617 = vmatmul.bf16.gmra.mxu2 %v9187_v3  ;;  %v9235_v3 = vld [vmem:[%s11315_s6] sm:$0x3] }
 0x22d   : > { %v2063_v26 = vpop.f32.mrf.mxu3  ;;  %v1927_v53 = vpop.f32.mrf.mxu1  ;;  %11424 = vst [vmem:[#allocation28_spill] sm:$0xff] %v9235_v3 }
 0x22e   : > { %v2176_v38 = vadd.f32 %v2063_v26, %v8913_v36  ;;  %v2169_v46 = vadd.f32 %v1927_v53, %v9197_v43 }
 0x230   : > { %v2272_v60 = vmax.f32 %v2176_v38, 0.0  ;;  %1966 = vmatmul.bf16.gmra.mxu1 %v7255_v25  ;;  %v2265_v45 = vmax.f32 %v2169_v46, 0.0  ;;  %v7298_v46 = vld [vmem:[%s11314_s5 + $0x94] sm:$0xf] }
 0x231   : > { %v2717_v13 = vpop.f32.mrf.mxu0 }
 0x232   : > { %2105 = vmatmul.bf16.gmra.mxu3 %v7257_v23  ;;  %v9193_v4 = vpack.c.bf16 %v2272_v60, %v2270_v18 }
 0x234   : > { %11419 = vst [vmem:[#allocation26_spill] sm:$0xff] %v9193_v4  ;;  %2756 = vmatmul.bf16.gmra.mxu0 %v9193_v4 }
 0x235   : > { %v2066_v8 = vpop.f32.mrf.mxu3  ;;  %v1929_v32 = vpop.f32.mrf.mxu1 }
 0x236   : > { %v2171_v25 = vadd.f32 %v1929_v32, %v9202_v50  ;;  %v2178_v48 = vadd.f32 %v2066_v8, %v8949_v30  ;;  %v6674_v32 = vld [vmem:[%s11314_s5 + $0x98] sm:$0xf0] }
 0x237   : > { %v6677_v8 = vor.u32 %v7298_v46, %v6674_v32 }
 0x238   : > { %v2267_v26 = vmax.f32 %v2171_v25, 0.0  ;;  %v2274_v53 = vmax.f32 %v2178_v48, 0.0  ;;  %v6610_v48 = vld [vmem:[%s11314_s5 + $0x18] sm:$0xf0] }
 0x239   : > { %v2719_v38 = vpop.f32.mrf.mxu0  ;;  %2972 = vmatpush.bf16.msrb.mxu3 %v6677_v8 }
 0x23a   : > { %v9206_v18 = vpack.c.bf16 %v2267_v26, %v2265_v45  ;;  %v7282_v26 = vld [vmem:[%s11314_s5 + $0x14] sm:$0xf] }
 0x23c   : > { %11422 = vst [vmem:[#allocation19_spill] sm:$0xff] %v9206_v18  ;;  %2622 = vmatmul.bf16.gmra.mxu2 %v9206_v18 }
 0x23d   : > { %v2068_v60 = vpop.f32.mrf.mxu3  ;;  %v1932_v44 = vpop.f32.mrf.mxu1 }
 0x23e   : > { %v2180_v28 = vadd.f32 %v2068_v60, %v8951_v58  ;;  %v6613_v60 = vor.u32 %v7282_v26, %v6610_v48 }
 0x240   : > { %v2276_v4 = vmax.f32 %v2180_v28, 0.0  ;;  %1971 = vmatmul.bf16.gmra.mxu1 %v7256_v17  ;;  %v2173_v28 = vadd.f32 %v1932_v44, %v8967_v63  ;;  %v9242_v44 = vperm.slane %v9235_v3, 0 }
 0x241   : > { %v2722_v25 = vpop.f32.mrf.mxu0  ;;  %2843 = vmatpush.bf16.msrb.mxu1 %v6613_v60 }
 0x242   : > { %2110 = vmatmul.bf16.gmra.mxu3 %v9212_v37  ;;  %v9221_v45 = vpack.c.bf16 %v2276_v4, %v2274_v53  ;;  %v2269_v53 = vmax.f32 %v2173_v28, 0.0  ;;  %11426 = vst [vmem:[#allocation29_spill] sm:$0xff] %v9242_v44 }
 0x244   : > { %11423 = vst [vmem:[#allocation27_spill] sm:$0xff] %v9221_v45  ;;  %2761 = vmatmul.bf16.gmra.mxu0 %v9221_v45 }
 0x245   : > { %v2071_v17 = vpop.f32.mrf.mxu3  ;;  %v1934_v46 = vpop.f32.mrf.mxu1 }
 0x246   : > { %v2175_v4 = vadd.f32 %v1934_v46, %v8973_v2  ;;  %v2182_v26 = vadd.f32 %v2071_v17, %v8981_v47  ;;  %v7259_v46 = vld [vmem:[%s8221_s29 + $0x98] sm:$0xff] }
 0x248   : > { %v2271_v32 = vmax.f32 %v2175_v4, 0.0  ;;  %v2278_v4 = vmax.f32 %v2182_v26, 0.0 }
 0x249   : > { %v2724_v18 = vpop.f32.mrf.mxu0 }
 0x24a   : > { %v9237_v8 = vpack.c.bf16 %v2271_v32, %v2269_v53 }
 0x24c   : > { %11425 = vst [vmem:[#allocation20_spill] sm:$0xff] %v9237_v8  ;;  %2627 = vmatmul.bf16.gmra.mxu2 %v9237_v8 }
 0x24d   : > { %v2073_v48 = vpop.f32.mrf.mxu3  ;;  %v1937_v28 = vpop.f32.mrf.mxu1 }
 0x24e   : > { %v2184_v60 = vadd.f32 %v2073_v48, %v8985_v56  ;;  %v2177_v32 = vadd.f32 %v1937_v28, %v9002_v11 }
 0x24f   : > { %v2588_v24 = vpop.f32.mrf.mxu2 }
 0x250   : > { %v2280_v45 = vmax.f32 %v2184_v60, 0.0  ;;  %v2589_v62 = vadd.f32 %v2588_v24, %v9242_v44  ;;  %1976 = vmatmul.bf16.gmra.mxu1 %v7257_v23  ;;  %v2273_v3 = vmax.f32 %v2177_v32, 0.0 }
 0x251   : > { %v9247_v21 = vpop.f32.mrf.mxu0 }
 0x252   : > { %2115 = vmatmul.bf16.gmra.mxu3 %v7259_v46  ;;  %v9249_v17 = vpack.c.bf16 %v2280_v45, %v2278_v4  ;;  %v9251_v53 = vadd.f32 %v2717_v13, %v2589_v62 }
 0x254   : > { %11427 = vst [vmem:[#allocation21_spill] sm:$0xff] %v9249_v17  ;;  %2766 = vmatmul.bf16.gmra.mxu0 %v9249_v17 }
 0x255   : > { %11428 = vst [vmem:[#allocation22_spill] sm:$0xff] %v9251_v53  ;;  %v2076_v48 = vpop.f32.mrf.mxu3  ;;  %v1939_v8 = vpop.f32.mrf.mxu1 }
 0x256   : > { %v2179_v26 = vadd.f32 %v1939_v8, %v9008_v5  ;;  %v2186_v13 = vadd.f32 %v2076_v48, %v9014_v55  ;;  %v9267_v8 = vld [vmem:[%s8221_s29 + $0xa0] sm:$0xff] }
 0x257   : > { %v2590_v60 = vpop.f32.mrf.mxu2 }
 0x258   : > { %v2275_v24 = vmax.f32 %v2179_v26, 0.0  ;;  %v2591_v22 = vadd.f32 %v2590_v60, %v9242_v44  ;;  %v2282_v32 = vmax.f32 %v2186_v13, 0.0 }
 0x259   : > { %v9257_v23 = vpop.f32.mrf.mxu0 }
 0x25a   : > { %v9259_v45 = vpack.c.bf16 %v2275_v24, %v2273_v3  ;;  %v9261_v62 = vadd.f32 %v2719_v38, %v2591_v22 }
 0x25c   : > { %11429 = vst [vmem:[#allocation23_spill] sm:$0xff] %v9259_v45  ;;  %2632 = vmatmul.bf16.gmra.mxu2 %v9259_v45 }
 0x25d   : > { %11430 = vst [vmem:[#allocation34_spill] sm:$0xff] %v9261_v62  ;;  %v2078_v4 = vpop.f32.mrf.mxu3  ;;  %v1942_v53 = vpop.f32.mrf.mxu1 }
 0x25e   : > { %v2188_v28 = vadd.f32 %v2078_v4, %v9018_v0  ;;  %v2181_v38 = vadd.f32 %v1942_v53, %v9047_v57 }
 0x25f   : > { %v2593_v17 = vpop.f32.mrf.mxu2 }
 0x260   : > { %v2284_v26 = vmax.f32 %v2188_v28, 0.0  ;;  %v2594_v60 = vadd.f32 %v2593_v17, %v9242_v44  ;;  %1981 = vmatmul.bf16.gmra.mxu1 %v9212_v37  ;;  %v2277_v4 = vmax.f32 %v2181_v38, 0.0 }
 0x261   : > { %v9270_v42 = vpop.f32.mrf.mxu0 }
 0x262   : > { %2120 = vmatmul.bf16.gmra.mxu3 %v9267_v8  ;;  %v9274_v22 = vpack.c.bf16 %v2284_v26, %v2282_v32  ;;  %v9276_v3 = vadd.f32 %v2722_v25, %v2594_v60 }
 0x264   : > { %11431 = vst [vmem:[#allocation35_spill] sm:$0xff] %v9274_v22  ;;  %2771 = vmatmul.bf16.gmra.mxu0 %v9274_v22 }
 0x265   : > { %11432 = vst [vmem:[#allocation36_spill] sm:$0xff] %v9276_v3  ;;  %v2081_v48 = vpop.f32.mrf.mxu3  ;;  %v1944_v24 = vpop.f32.mrf.mxu1 }
 0x266   : > { %v2183_v13 = vadd.f32 %v1944_v24, %v9053_v20  ;;  %v2190_v26 = vadd.f32 %v2081_v48, %v9059_v7  ;;  %v9292_v24 = vld [vmem:[%s8221_s29 + $0xa8] sm:$0xff] }
 0x267   : > { %v2595_v17 = vpop.f32.mrf.mxu2 }
 0x268   : > { %v2279_v28 = vmax.f32 %v2183_v13, 0.0  ;;  %v2596_v37 = vadd.f32 %v2595_v17, %v9242_v44  ;;  %v2286_v38 = vmax.f32 %v2190_v26, 0.0  ;;  %v7296_v17 = vld [vmem:[%s11314_s5 + $0x84] sm:$0xf] }
 0x269   : > { %v9282_v62 = vpop.f32.mrf.mxu0  ;;  %v7280_v26 = vld [vmem:[%s11314_s5 + $0x4] sm:$0xf] }
 0x26a   : > { %v9284_v32 = vpack.c.bf16 %v2279_v28, %v2277_v4  ;;  %v9286_v25 = vadd.f32 %v2724_v18, %v2596_v37  ;;  %v6666_v18 = vld [vmem:[%s11314_s5 + $0x88] sm:$0xf0] }
 0x26b   : > { %v6669_v28 = vor.u32 %v7296_v17, %v6666_v18 }
 0x26c   : > { %11433 = vst [vmem:[#allocation37_spill] sm:$0xff] %v9284_v32  ;;  %2637 = vmatmul.bf16.gmra.mxu2 %v9284_v32 }
 0x26d   : > { %11434 = vst [vmem:[#allocation38_spill] sm:$0xff] %v9286_v25  ;;  %v2083_v60 = vpop.f32.mrf.mxu3  ;;  %v1947_v3 = vpop.f32.mrf.mxu1  ;;  %2973 = vmatpush.bf16.msrb.mxu3 %v6669_v28 }
 0x26e   : > { %v2192_v53 = vadd.f32 %v2083_v60, %v9063_v41  ;;  %v6602_v60 = vld [vmem:[%s11314_s5 + $0x8] sm:$0xf0] }
 0x26f   : > { %v2598_v22 = vpop.f32.mrf.mxu2 }
 0x270   : > { %v2288_v13 = vmax.f32 %v2192_v53, 0.0  ;;  %v2599_v48 = vadd.f32 %v2598_v22, %v9242_v44  ;;  %1986 = vmatmul.bf16.gmra.mxu1 %v7259_v46  ;;  %v6605_v53 = vor.u32 %v7280_v26, %v6602_v60  ;;  %v2185_v46 = vadd.f32 %v1947_v3, %v9080_v16 }
 0x271   : > { %v9301_v4 = vpop.f32.mrf.mxu0 }
 0x272   : > { %2125 = vmatmul.bf16.gmra.mxu3 %v9292_v24  ;;  %v9304_v37 = vpack.c.bf16 %v2288_v13, %v2286_v38  ;;  %v9313_v22 = vadd.f32 %v9247_v21, %v2599_v48  ;;  %2844 = vmatpush.bf16.msrb.mxu1 %v6605_v53  ;;  %v2281_v25 = vmax.f32 %v2185_v46, 0.0 }
 0x274   : > { %11435 = vst [vmem:[#allocation39_spill] sm:$0xff] %v9304_v37  ;;  %2776 = vmatmul.bf16.gmra.mxu0 %v9304_v37 }
 0x275   : > { %11436 = vst [vmem:[#allocation40_spill] sm:$0xff] %v9313_v22  ;;  %v2086_v17 = vpop.f32.mrf.mxu3  ;;  %v1949_v38 = vpop.f32.mrf.mxu1 }
 0x276   : > { %v2187_v13 = vadd.f32 %v1949_v38, %v9086_v33  ;;  %v2194_v48 = vadd.f32 %v2086_v17, %v9092_v59  ;;  %v7262_v38 = vld [vmem:[%s8221_s29 + $0xb0] sm:$0xff] }
 0x277   : > { %v2600_v18 = vpop.f32.mrf.mxu2 }
 0x278   : > { %v2283_v32 = vmax.f32 %v2187_v13, 0.0  ;;  %v2601_v45 = vadd.f32 %v2600_v18, %v9242_v44  ;;  %v2290_v22 = vmax.f32 %v2194_v48, 0.0 }
 0x279   : > { %v2739_v28 = vpop.f32.mrf.mxu0 }
 0x27a   : > { %v9319_v26 = vpack.c.bf16 %v2283_v32, %v2281_v25  ;;  %v9322_v21 = vadd.f32 %v9257_v23, %v2601_v45 }
 0x27c   : > { %11437 = vst [vmem:[#allocation41_spill] sm:$0xff] %v9319_v26  ;;  %2642 = vmatmul.bf16.gmra.mxu2 %v9319_v26 }
 0x27d   : > { %11438 = vst [vmem:[#allocation42_spill] sm:$0xff] %v9322_v21  ;;  %v2088_v3 = vpop.f32.mrf.mxu3  ;;  %v1952_v53 = vpop.f32.mrf.mxu1 }
 0x27e   : > { %v2196_v60 = vadd.f32 %v2088_v3, %v9096_v39  ;;  %v2189_v32 = vadd.f32 %v1952_v53, %v9110_v9 }
 0x27f   : > { %v2603_v13 = vpop.f32.mrf.mxu2 }
 0x280   : > { %v2292_v46 = vmax.f32 %v2196_v60, 0.0  ;;  %v2604_v18 = vadd.f32 %v2603_v13, %v9242_v44  ;;  %1991 = vmatmul.bf16.gmra.mxu1 %v9267_v8  ;;  %v2285_v60 = vmax.f32 %v2189_v32, 0.0 }
 0x281   : > { %v2742_v37 = vpop.f32.mrf.mxu0 }
 0x282   : > { %2130 = vmatmul.bf16.gmra.mxu3 %v7262_v38  ;;  %v9330_v23 = vpack.c.bf16 %v2292_v46, %v2290_v22  ;;  %v9333_v45 = vadd.f32 %v9270_v42, %v2604_v18 }
 0x284   : > { %11439 = vst [vmem:[#allocation43_spill] sm:$0xff] %v9330_v23  ;;  %2781 = vmatmul.bf16.gmra.mxu0 %v9330_v23 }
 0x285   : > { %11440 = vst [vmem:[#allocation44_spill] sm:$0xff] %v9333_v45  ;;  %v2091_v25 = vpop.f32.mrf.mxu3  ;;  %v1954_v17 = vpop.f32.mrf.mxu1 }
 0x286   : > { %v2191_v48 = vadd.f32 %v1954_v17, %v9117_v15  ;;  %v2198_v46 = vadd.f32 %v2091_v25, %v9123_v6  ;;  %v7263_v17 = vld [vmem:[%s8221_s29 + $0xb8] sm:$0xff] }
 0x287   : > { %v2605_v3 = vpop.f32.mrf.mxu2 }
 0x288   : > { %v2287_v13 = vmax.f32 %v2191_v48, 0.0  ;;  %v2606_v8 = vadd.f32 %v2605_v3, %v9242_v44  ;;  %v2294_v23 = vmax.f32 %v2198_v46, 0.0 }
 0x289   : > { %v2744_v21 = vpop.f32.mrf.mxu0 }
 0x28a   : > { %v9339_v22 = vpack.c.bf16 %v2287_v13, %v2285_v60  ;;  %v9342_v42 = vadd.f32 %v9282_v62, %v2606_v8 }
 0x28c   : > { %11441 = vst [vmem:[#allocation45_spill] sm:$0xff] %v9339_v22  ;;  %2647 = vmatmul.bf16.gmra.mxu2 %v9339_v22 }
 0x28d   : > { %11442 = vst [vmem:[#allocation46_spill] sm:$0xff] %v9342_v42  ;;  %v2093_v18 = vpop.f32.mrf.mxu3  ;;  %v1957_v45 = vpop.f32.mrf.mxu1 }
 0x28e   : > { %v2200_v53 = vadd.f32 %v2093_v18, %v9127_v31  ;;  %v2193_v60 = vadd.f32 %v1957_v45, %v9150_v29 }
 0x28f   : > { %v2608_v48 = vpop.f32.mrf.mxu2 }
 0x290   : > { %v2296_v32 = vmax.f32 %v2200_v53, 0.0  ;;  %v2609_v3 = vadd.f32 %v2608_v48, %v9242_v44  ;;  %1996 = vmatmul.bf16.gmra.mxu1 %v9292_v24  ;;  %v2289_v53 = vmax.f32 %v2193_v60, 0.0 }
 0x291   : > { %v2747_v26 = vpop.f32.mrf.mxu0 }
 0x292   : > { %2135 = vmatmul.bf16.gmra.mxu3 %v7263_v17  ;;  %v9350_v62 = vpack.c.bf16 %v2296_v32, %v2294_v23  ;;  %v9353_v25 = vadd.f32 %v9301_v4, %v2609_v3 }
 0x294   : > { %11443 = vst [vmem:[#allocation47_spill] sm:$0xff] %v9350_v62  ;;  %2786 = vmatmul.bf16.gmra.mxu0 %v9350_v62 }
 0x295   : > { %11444 = vst [vmem:[#allocation48_spill] sm:$0xff] %v9353_v25  ;;  %v2096_v13 = vpop.f32.mrf.mxu3  ;;  %v1959_v8 = vpop.f32.mrf.mxu1 }
 0x296   : > { %v2195_v46 = vadd.f32 %v1959_v8, %v9157_v51  ;;  %v2202_v4 = vadd.f32 %v2096_v13, %v9163_v35 }
 0x297   : > { %v2610_v18 = vpop.f32.mrf.mxu2 }
 0x298   : > { %v2291_v48 = vmax.f32 %v2195_v46, 0.0  ;;  %v2611_v42 = vadd.f32 %v2610_v18, %v9242_v44  ;;  %v2298_v25 = vmax.f32 %v2202_v4, 0.0  ;;  %v11446_v18 = vld [vmem:[#allocation30_spill] sm:$0xff] }
 0x299   : > { %v2749_v24 = vpop.f32.mrf.mxu0 }
 0x29a   : > { %v9359_v22 = vpack.c.bf16 %v2291_v48, %v2289_v53  ;;  %v9361_v23 = vadd.f32 %v2739_v28, %v2611_v42 }
 0x29c   : > { %11445 = vst [vmem:[#allocation49_spill] sm:$0xff] %v9361_v23  ;;  %2652 = vmatmul.bf16.gmra.mxu2 %v9359_v22 }
 0x29d   : > { %v2098_v32 = vpop.f32.mrf.mxu3  ;;  %v1962_v3 = vpop.f32.mrf.mxu1 }
 0x29e   : > { %v2204_v45 = vadd.f32 %v2098_v32, %v9167_v40  ;;  %v2197_v42 = vadd.f32 %v1962_v3, %v9178_v52 }
 0x29f   : > { %v2613_v62 = vpop.f32.mrf.mxu2 }
 0x2a0   : > { %v2300_v8 = vmax.f32 %v2204_v45, 0.0  ;;  %v2614_v60 = vadd.f32 %v2613_v62, %v9242_v44  ;;  %2001 = vmatmul.bf16.gmra.mxu1 %v7262_v38  ;;  %v2293_v45 = vmax.f32 %v2197_v42, 0.0 }
 0x2a1   : > { %v2752_v46 = vpop.f32.mrf.mxu0 }
 0x2a2   : > { %2974 = vmatmul.bf16.vlgmr.msrb.gmra.mxu3 %v11446_v18  ;;  %v9368_v53 = vpack.c.bf16 %v2300_v8, %v2298_v25  ;;  %v9370_v28 = vadd.f32 %v2742_v37, %v2614_v60 }
 0x2a4   : > { %11447 = vst [vmem:[#allocation30_spill] sm:$0xff] %v9368_v53  ;;  %2791 = vmatmul.bf16.gmra.mxu0 %v9368_v53 }
 0x2a5   : > { %11448 = vst [vmem:[#allocation50_spill] sm:$0xff] %v9370_v28  ;;  %v2101_v13 = vpop.f32.mrf.mxu3  ;;  %v1964_v48 = vpop.f32.mrf.mxu1 }
 0x2a6   : > { %v2199_v4 = vadd.f32 %v1964_v48, %v9183_v54  ;;  %v2206_v37 = vadd.f32 %v2101_v13, %v8908_v10 }
 0x2a7   : > { %v2615_v32 = vpop.f32.mrf.mxu2 }
 0x2a8   : > { %v2295_v23 = vmax.f32 %v2199_v4, 0.0  ;;  %v2616_v38 = vadd.f32 %v2615_v32, %v9242_v44  ;;  %v2302_v28 = vmax.f32 %v2206_v37, 0.0 }
 0x2a9   : > { %v2754_v25 = vpop.f32.mrf.mxu0 }
 0x2aa   : > { %v9376_v62 = vpack.c.bf16 %v2295_v23, %v2293_v45  ;;  %v9378_v18 = vadd.f32 %v2744_v21, %v2616_v38 }
 0x2ac   : > { %11449 = vst [vmem:[#allocation51_spill] sm:$0xff] %v9378_v18  ;;  %2657 = vmatmul.bf16.gmra.mxu2 %v9376_v62 }
 0x2ad   : > { %v2103_v8 = vpop.f32.mrf.mxu3  ;;  %v1967_v60 = vpop.f32.mrf.mxu1 }
 0x2ae   : > { %v2208_v3 = vadd.f32 %v2103_v8, %v8913_v36  ;;  %v2201_v10 = vadd.f32 %v1967_v60, %v9197_v43 }
 0x2af   : > { %v2618_v53 = vpop.f32.mrf.mxu2 }
 0x2b0   : > { %v2304_v48 = vmax.f32 %v2208_v3, 0.0  ;;  %v2619_v42 = vadd.f32 %v2618_v53, %v9242_v44  ;;  %2006 = vmatmul.bf16.gmra.mxu1 %v7263_v17  ;;  %v2297_v38 = vmax.f32 %v2201_v10, 0.0 }
 0x2b1   : > { %v2757_v4 = vpop.f32.mrf.mxu0 }
 0x2b2   : > { %2979 = vmatmul.bf16.gmra.mxu3 %v8963_v61  ;;  %v9385_v23 = vpack.c.bf16 %v2304_v48, %v2302_v28  ;;  %v9387_v21 = vadd.f32 %v2747_v26, %v2619_v42 }
 0x2b4   : > { %11450 = vst [vmem:[#allocation52_spill] sm:$0xff] %v9387_v21  ;;  %2796 = vmatmul.bf16.gmra.mxu0 %v9385_v23 }
 0x2b5   : > { %v2106_v13 = vpop.f32.mrf.mxu3  ;;  %v1969_v36 = vpop.f32.mrf.mxu1 }
 0x2b6   : > { %v2203_v32 = vadd.f32 %v1969_v36, %v9202_v50  ;;  %v2210_v26 = vadd.f32 %v2106_v13, %v8949_v30 }
 0x2b7   : > { %v2620_v45 = vpop.f32.mrf.mxu2 }
 0x2b8   : > { %v2299_v37 = vmax.f32 %v2203_v32, 0.0  ;;  %v2621_v17 = vadd.f32 %v2620_v45, %v9242_v44  ;;  %v2306_v60 = vmax.f32 %v2210_v26, 0.0 }
 0x2b9   : > { %v2759_v48 = vpop.f32.mrf.mxu0 }
 0x2ba   : > { %v9393_v53 = vpack.c.bf16 %v2299_v37, %v2297_v38  ;;  %v9395_v61 = vadd.f32 %v2749_v24, %v2621_v17 }
 0x2bc   : > { %11451 = vst [vmem:[#allocation53_spill] sm:$0xff] %v9395_v61  ;;  %2662 = vmatmul.bf16.gmra.mxu2 %v9393_v53 }
 0x2bd   : > { %v2108_v28 = vpop.f32.mrf.mxu3  ;;  %v1972_v3 = vpop.f32.mrf.mxu1 }
 0x2be   : > { %v2212_v8 = vadd.f32 %v2108_v28, %v8951_v58  ;;  %v2205_v30 = vadd.f32 %v1972_v3, %v8967_v63 }
 0x2bf   : > { %v2623_v36 = vpop.f32.mrf.mxu2 }
 0x2c0   : > { %v2308_v42 = vmax.f32 %v2212_v8, 0.0  ;;  %v2624_v10 = vadd.f32 %v2623_v36, %v9242_v44  ;;  %2845 = vmatmul.bf16.vlgmr.msrb.gmra.mxu1 %v8983_v34  ;;  %v2301_v37 = vmax.f32 %v2205_v30, 0.0 }
 0x2c1   : > { %v2762_v34 = vpop.f32.mrf.mxu0 }
 0x2c2   : > { %2984 = vmatmul.bf16.gmra.mxu3 %v8998_v19  ;;  %v9403_v24 = vpack.c.bf16 %v2308_v42, %v2306_v60  ;;  %v9405_v32 = vadd.f32 %v2752_v46, %v2624_v10 }
 0x2c4   : > { %11452 = vst [vmem:[#allocation54_spill] sm:$0xff] %v9405_v32  ;;  %2801 = vmatmul.bf16.gmra.mxu0 %v9403_v24  ;;  %v6786_v32 = vld [vmem:[#allocation6 + $0x78] sm:$0xf0] }
 0x2c5   : > { %v2111_v58 = vpop.f32.mrf.mxu3  ;;  %v1974_v13 = vpop.f32.mrf.mxu1 }
 0x2c6   : > { %v2207_v45 = vadd.f32 %v1974_v13, %v8973_v2  ;;  %v2214_v46 = vadd.f32 %v2111_v58, %v8981_v47 }
 0x2c7   : > { %v2625_v38 = vpop.f32.mrf.mxu2 }
 0x2c8   : > { %v2303_v17 = vmax.f32 %v2207_v45, 0.0  ;;  %v2626_v26 = vadd.f32 %v2625_v38, %v9242_v44  ;;  %v2310_v60 = vmax.f32 %v2214_v46, 0.0 }
 0x2c9   : > { %v2764_v47 = vpop.f32.mrf.mxu0 }
 0x2ca   : > { %v9411_v28 = vpack.c.bf16 %v2303_v17, %v2301_v37  ;;  %v9413_v19 = vadd.f32 %v2754_v25, %v2626_v26 }
 0x2cc   : > { %11453 = vst [vmem:[#allocation55_spill] sm:$0xff] %v9413_v19  ;;  %2667 = vmatmul.bf16.gmra.mxu2 %v9411_v28 }
 0x2cd   : > { %v2113_v8 = vpop.f32.mrf.mxu3  ;;  %v1977_v3 = vpop.f32.mrf.mxu1 }
 0x2ce   : > { %v2216_v63 = vadd.f32 %v2113_v8, %v8985_v56  ;;  %v2209_v30 = vadd.f32 %v1977_v3, %v9002_v11 }
 0x2cf   : > { %v2628_v42 = vpop.f32.mrf.mxu2 }
 0x2d0   : > { %v2312_v2 = vmax.f32 %v2216_v63, 0.0  ;;  %v2629_v36 = vadd.f32 %v2628_v42, %v9242_v44  ;;  %2850 = vmatmul.bf16.gmra.mxu1 %v9016_v27  ;;  %v2305_v38 = vmax.f32 %v2209_v30, 0.0 }
 0x2d1   : > { %v2767_v46 = vpop.f32.mrf.mxu0 }
 0x2d2   : > { %2989 = vmatmul.bf16.gmra.mxu3 %v9037_v1  ;;  %v9421_v10 = vpack.c.bf16 %v2312_v2, %v2310_v60  ;;  %v9423_v25 = vadd.f32 %v2757_v4, %v2629_v36 }
 0x2d4   : > { %11454 = vst [vmem:[#allocation56_spill] sm:$0xff] %v9423_v25  ;;  %2806 = vmatmul.bf16.gmra.mxu0 %v9421_v10 }
 0x2d5   : > { %v2116_v56 = vpop.f32.mrf.mxu3  ;;  %v1979_v58 = vpop.f32.mrf.mxu1 }
 0x2d6   : > { %v2211_v13 = vadd.f32 %v1979_v58, %v9008_v5  ;;  %v2218_v4 = vadd.f32 %v2116_v56, %v9014_v55 }
 0x2d7   : > { %v2630_v45 = vpop.f32.mrf.mxu2 }
 0x2d8   : > { %v2307_v37 = vmax.f32 %v2211_v13, 0.0  ;;  %v2631_v27 = vadd.f32 %v2630_v45, %v9242_v44  ;;  %v2314_v63 = vmax.f32 %v2218_v4, 0.0 }
 0x2d9   : > { %v2769_v30 = vpop.f32.mrf.mxu0 }
 0x2da   : > { %v9429_v17 = vpack.c.bf16 %v2307_v37, %v2305_v38  ;;  %v9431_v1 = vadd.f32 %v2759_v48, %v2631_v27 }
 0x2dc   : > { %11455 = vst [vmem:[#allocation57_spill] sm:$0xff] %v9431_v1  ;;  %2672 = vmatmul.bf16.gmra.mxu2 %v9429_v17 }
 0x2dd   : > { %v2118_v26 = vpop.f32.mrf.mxu3  ;;  %v1982_v8 = vpop.f32.mrf.mxu1 }
 0x2de   : > { %v2220_v11 = vadd.f32 %v2118_v26, %v9018_v0  ;;  %v2213_v55 = vadd.f32 %v1982_v8, %v9047_v57  ;;  %v11458_v8 = vld [vmem:[#allocation31_spill] sm:$0xff] }
 0x2df   : > { %v2633_v3 = vpop.f32.mrf.mxu2 }
 0x2e0   : > { %v2316_v5 = vmax.f32 %v2220_v11, 0.0  ;;  %v2634_v60 = vadd.f32 %v2633_v3, %v9242_v44  ;;  %2855 = vmatmul.bf16.gmra.mxu1 %v9061_v12  ;;  %v2309_v58 = vmax.f32 %v2213_v55, 0.0 }
 0x2e1   : > { %v2772_v11 = vpop.f32.mrf.mxu0 }
 0x2e2   : > { %2994 = vmatmul.bf16.gmra.mxu3 %v9076_v14  ;;  %v9439_v48 = vpack.c.bf16 %v2316_v5, %v2314_v63  ;;  %v9441_v2 = vadd.f32 %v2762_v34, %v2634_v60 }
 0x2e4   : > { %11456 = vst [vmem:[#allocation58_spill] sm:$0xff] %v9441_v2  ;;  %2811 = vmatmul.bf16.gmra.mxu0 %v9439_v48 }
 0x2e5   : > { %v2121_v42 = vpop.f32.mrf.mxu3  ;;  %v1984_v0 = vpop.f32.mrf.mxu1 }
 0x2e6   : > { %v2215_v36 = vadd.f32 %v1984_v0, %v9053_v20  ;;  %v2222_v34 = vadd.f32 %v2121_v42, %v9059_v7 }
 0x2e7   : > { %v2635_v56 = vpop.f32.mrf.mxu2 }
 0x2e8   : > { %v2311_v13 = vmax.f32 %v2215_v36, 0.0  ;;  %v2636_v12 = vadd.f32 %v2635_v56, %v9242_v44  ;;  %v2318_v27 = vmax.f32 %v2222_v34, 0.0 }
 0x2e9   : > { %v2774_v56 = vpop.f32.mrf.mxu0 }
 0x2ea   : > { %v9447_v45 = vpack.c.bf16 %v2311_v13, %v2309_v58  ;;  %v9449_v14 = vadd.f32 %v2764_v47, %v2636_v12 }
 0x2ec   : > { %11457 = vst [vmem:[#allocation59_spill] sm:$0xff] %v9449_v14  ;;  %2677 = vmatmul.bf16.gmra.mxu2 %v9447_v45 }
 0x2ed   : > { %v2123_v38 = vpop.f32.mrf.mxu3  ;;  %v1987_v37 = vpop.f32.mrf.mxu1 }
 0x2ee   : > { %v2224_v57 = vadd.f32 %v2123_v38, %v9063_v41  ;;  %v2217_v7 = vadd.f32 %v1987_v37, %v9080_v16  ;;  %v11462_v37 = vld [vmem:[#allocation33_spill] sm:$0xff] }
 0x2ef   : > { %v2638_v4 = vpop.f32.mrf.mxu2 }
 0x2f0   : > { %v2320_v20 = vmax.f32 %v2224_v57, 0.0  ;;  %v2639_v26 = vadd.f32 %v2638_v4, %v9242_v44  ;;  %2860 = vmatmul.bf16.gmra.mxu1 %v9094_v49  ;;  %v2313_v55 = vmax.f32 %v2217_v7, 0.0  ;;  %v11461_v57 = vld [vmem:[#allocation32_spill] sm:$0xff] }
 0x2f2   : > { %2999 = vmatmul.bf16.gmra.mxu3 %v11458_v8  ;;  %v9457_v47 = vpack.c.bf16 %v2320_v20, %v2318_v27  ;;  %v9459_v63 = vadd.f32 %v2767_v46, %v2639_v26 }
 0x2f4   : > { %11459 = vst [vmem:[#allocation31_spill] sm:$0xff] %v9459_v63  ;;  %2816 = vmatmul.bf16.gmra.mxu0 %v9457_v47  ;;  %v6762_v63 = vld [vmem:[#allocation6 + $0x48] sm:$0xf0] }
 0x2f5   : > { %v2126_v41 = vpop.f32.mrf.mxu3  ;;  %v1989_v5 = vpop.f32.mrf.mxu1 }
 0x2f6   : > { %v2219_v3 = vadd.f32 %v1989_v5, %v9086_v33  ;;  %v2226_v46 = vadd.f32 %v2126_v41, %v9092_v59 }
 0x2f7   : > { %v2640_v60 = vpop.f32.mrf.mxu2 }
 0x2f8   : > { %v2315_v42 = vmax.f32 %v2219_v3, 0.0  ;;  %v2641_v49 = vadd.f32 %v2640_v60, %v9242_v44  ;;  %v2322_v12 = vmax.f32 %v2226_v46, 0.0 }
 0x2fa   : > { %v9465_v0 = vpack.c.bf16 %v2315_v42, %v2313_v55  ;;  %v9467_v36 = vadd.f32 %v2769_v30, %v2641_v49 }
 0x2fc   : > { %11460 = vst [vmem:[#allocation60_spill] sm:$0xff] %v9467_v36  ;;  %2682 = vmatmul.bf16.gmra.mxu2 %v9465_v0 }
 0x2fd   : > { %v2128_v58 = vpop.f32.mrf.mxu3  ;;  %v1992_v13 = vpop.f32.mrf.mxu1 }
 0x2fe   : > { %v2228_v16 = vadd.f32 %v2128_v58, %v9096_v39  ;;  %v2221_v59 = vadd.f32 %v1992_v13, %v9110_v9  ;;  %v2777_v39 = vpop.f32.mrf.mxu0  ;;  %v11466_v13 = vld [vmem:[#allocation24_spill] sm:$0xff] }
 0x2ff   : > { %v2643_v34 = vpop.f32.mrf.mxu2 }
 0x300   : > { %v2324_v33 = vmax.f32 %v2228_v16, 0.0  ;;  %v2644_v38 = vadd.f32 %v2643_v34, %v9242_v44  ;;  %2865 = vmatmul.bf16.gmra.mxu1 %v11461_v57  ;;  %v2317_v7 = vmax.f32 %v2221_v59, 0.0 }
 0x302   : > { %3004 = vmatmul.bf16.gmra.mxu3 %v11462_v37  ;;  %v9475_v30 = vpack.c.bf16 %v2324_v33, %v2322_v12  ;;  %v9477_v27 = vadd.f32 %v2772_v11, %v2644_v38  ;;  %v11467_v12 = vld [vmem:[#allocation18_spill] sm:$0xff] }
 0x304   : > { %11463 = vst [vmem:[#allocation32_spill] sm:$0xff] %v9477_v27  ;;  %2821 = vmatmul.bf16.gmra.mxu0 %v9475_v30 }
 0x305   : > { %v2131_v20 = vpop.f32.mrf.mxu3  ;;  %v1994_v4 = vpop.f32.mrf.mxu1 }
 0x306   : > { %v2223_v26 = vadd.f32 %v1994_v4, %v9117_v15  ;;  %v2230_v11 = vadd.f32 %v2131_v20, %v9123_v6  ;;  %v9490_v49 = vpop.f32.mrf.mxu0 }
 0x307   : > { %v2645_v8 = vpop.f32.mrf.mxu2  ;;  %11465 = vst [vmem:[#allocation61_spill] sm:$0xff] %v9490_v49 }
 0x308   : > { %v2319_v41 = vmax.f32 %v2223_v26, 0.0  ;;  %v2646_v5 = vadd.f32 %v2645_v8, %v9242_v44  ;;  %v2326_v15 = vmax.f32 %v2230_v11, 0.0  ;;  %v11470_v11 = vld [vmem:[#allocation25_spill] sm:$0xff] }
 0x30a   : > { %v9483_v3 = vpack.c.bf16 %v2319_v41, %v2317_v7  ;;  %v9485_v60 = vadd.f32 %v2774_v56, %v2646_v5 }
 0x30c   : > { %11464 = vst [vmem:[#allocation33_spill] sm:$0xff] %v9485_v60  ;;  %2687 = vmatmul.bf16.gmra.mxu2 %v9483_v3 }
 0x30d   : > { %v2133_v55 = vpop.f32.mrf.mxu3  ;;  %v1997_v42 = vpop.f32.mrf.mxu1 }
 0x30e   : > { %v2232_v9 = vadd.f32 %v2133_v55, %v9127_v31  ;;  %v2225_v31 = vadd.f32 %v1997_v42, %v9150_v29  ;;  %v2782_v20 = vpop.f32.mrf.mxu0  ;;  %v11471_v55 = vld [vmem:[#allocation26_spill] sm:$0xff] }
 0x30f   : > { %v2648_v58 = vpop.f32.mrf.mxu2 }
 0x310   : > { %v2328_v46 = vmax.f32 %v2232_v9, 0.0  ;;  %v2649_v16 = vadd.f32 %v2648_v58, %v9242_v44  ;;  %2870 = vmatmul.bf16.gmra.mxu1 %v11466_v13  ;;  %v2321_v37 = vmax.f32 %v2225_v31, 0.0 }
 0x312   : > { %3009 = vmatmul.bf16.gmra.mxu3 %v11467_v12  ;;  %v9495_v56 = vpack.c.bf16 %v2328_v46, %v2326_v15  ;;  %v9497_v6 = vadd.f32 %v2777_v39, %v2649_v16 }
 0x314   : > { %11468 = vst [vmem:[#allocation24_spill] sm:$0xff] %v9497_v6  ;;  %2826 = vmatmul.bf16.gmra.mxu0 %v9495_v56  ;;  %v7321_v6 = vld [vmem:[#allocation6 + $0x44] sm:$0xf0] }
 0x315   : > { %v2136_v33 = vpop.f32.mrf.mxu3  ;;  %v1999_v34 = vpop.f32.mrf.mxu1 }
 0x316   : > { %v2227_v38 = vadd.f32 %v1999_v34, %v9157_v51  ;;  %v2234_v26 = vadd.f32 %v2136_v33, %v9163_v35  ;;  %v9516_v35 = vpop.f32.mrf.mxu0 }
 0x317   : > { %v9502_v57 = vpop.f32.mrf.mxu2  ;;  %11473 = vst [vmem:[#allocation26_spill] sm:$0xff] %v9516_v35 }
 0x318   : > { %11469 = vst [vmem:[#allocation18_spill] sm:$0xff] %v9502_v57  ;;  %v2323_v59 = vmax.f32 %v2227_v38, 0.0  ;;  %v2330_v29 = vmax.f32 %v2234_v26, 0.0 }
 0x31a   : > { %v9504_v4 = vpack.c.bf16 %v2323_v59, %v2321_v37 }
 0x31c   : > { %2692 = vmatmul.bf16.gmra.mxu2 %v9504_v4 }
 0x31d   : > { %v2138_v8 = vpop.f32.mrf.mxu3  ;;  %v2002_v7 = vpop.f32.mrf.mxu1 }
 0x31e   : > { %v2236_v39 = vadd.f32 %v2138_v8, %v9167_v40  ;;  %v2229_v40 = vadd.f32 %v2002_v7, %v9178_v52  ;;  %v2787_v34 = vpop.f32.mrf.mxu0  ;;  %v11476_v52 = vld [vmem:[#allocation27_spill] sm:$0xff] }
 0x31f   : > { %v2653_v5 = vpop.f32.mrf.mxu2 }
 0x320   : > { %v2332_v41 = vmax.f32 %v2236_v39, 0.0  ;;  %v2654_v51 = vadd.f32 %v2653_v5, %v9242_v44  ;;  %2875 = vmatmul.bf16.gmra.mxu1 %v11470_v11  ;;  %v2325_v13 = vmax.f32 %v2229_v40, 0.0 }
 0x322   : > { %3014 = vmatmul.bf16.gmra.mxu3 %v11471_v55  ;;  %v9512_v9 = vpack.c.bf16 %v2332_v41, %v2330_v29  ;;  %v9514_v42 = vadd.f32 %v2782_v20, %v2654_v51  ;;  %v11475_v20 = vld [vmem:[#allocation19_spill] sm:$0xff]  ;;  %v11480_v55 = vld [vmem:[#allocation28_spill] sm:$0xff] }
 0x323   : > { %v9540_v40 = vperm.slane %v11480_v55, 1  ;;  %v11484_v55 = vld [vmem:[#allocation23_spill] sm:$0xff] }
 0x324   : > { %11472 = vst [vmem:[#allocation25_spill] sm:$0xff] %v9514_v42  ;;  %2831 = vmatmul.bf16.gmra.mxu0 %v9512_v9 }
 0x325   : > { %v2975_v15 = vpop.f32.mrf.mxu3  ;;  %v2004_v46 = vpop.f32.mrf.mxu1 }
 0x326   : > { %v2231_v58 = vadd.f32 %v2004_v46, %v9183_v54  ;;  %v9533_v29 = vpop.f32.mrf.mxu0 }
 0x327   : > { %v9521_v16 = vpop.f32.mrf.mxu2  ;;  %11478 = vst [vmem:[#allocation27_spill] sm:$0xff] %v9533_v29 }
 0x328   : > { %11474 = vst [vmem:[#allocation62_spill] sm:$0xff] %v9521_v16  ;;  %v2327_v12 = vmax.f32 %v2231_v58, 0.0 }
 0x32a   : > { %v9523_v31 = vpack.c.bf16 %v2327_v12, %v2325_v13 }
 0x32c   : > { %2697 = vmatmul.bf16.gmra.mxu2 %v9523_v31 }
 0x32d   : > { %v2977_v33 = vpop.f32.mrf.mxu3  ;;  %v2007_v38 = vpop.f32.mrf.mxu1 }
 0x32e   : > { %v2233_v54 = vadd.f32 %v2007_v38, %v9197_v43  ;;  %v2792_v38 = vpop.f32.mrf.mxu0 }
 0x32f   : > { %v2658_v37 = vpop.f32.mrf.mxu2 }
 0x330   : > { %v2659_v59 = vadd.f32 %v2658_v37, %v9242_v44  ;;  %2880 = vmatmul.bf16.gmra.mxu1 %v11475_v20  ;;  %v2329_v5 = vmax.f32 %v2233_v54, 0.0  ;;  %v11482_v37 = vld [vmem:[#allocation21_spill] sm:$0xff] }
 0x332   : > { %3019 = vmatmul.bf16.gmra.mxu3 %v11476_v52  ;;  %v9529_v26 = vadd.f32 %v2787_v34, %v2659_v59  ;;  %v11481_v34 = vld [vmem:[#allocation20_spill] sm:$0xff] }
 0x334   : > { %11477 = vst [vmem:[#allocation19_spill] sm:$0xff] %v9529_v26 }
 0x335   : > { %v2980_v8 = vpop.f32.mrf.mxu3  ;;  %v2009_v39 = vpop.f32.mrf.mxu1 }
 0x336   : > { %v2235_v7 = vadd.f32 %v2009_v39, %v9202_v50 }
 0x337   : > { %v9535_v41 = vpop.f32.mrf.mxu2 }
 0x338   : > { %11479 = vst [vmem:[#allocation63_spill] sm:$0xff] %v9535_v41  ;;  %v2331_v51 = vmax.f32 %v2235_v7, 0.0 }
 0x33a   : > { %v9537_v11 = vpack.c.bf16 %v2331_v51, %v2329_v5 }
 0x33c   : > { %2702 = vmatmul.bf16.gmra.mxu2 %v9537_v11 }
 0x33d   : > { %v2982_v46 = vpop.f32.mrf.mxu3  ;;  %v2846_v58 = vpop.f32.mrf.mxu1 }
 0x33e   : > { %v2847_v43 = vadd.f32 %v2846_v58, %v9540_v40  ;;  %v11485_v58 = vld [vmem:[#allocation35_spill] sm:$0xff] }
 0x33f   : > { %v2663_v13 = vpop.f32.mrf.mxu2 }
 0x340   : > { %v9544_v12 = vadd.f32 %v2975_v15, %v2847_v43  ;;  %v2664_v50 = vadd.f32 %v2663_v13, %v9242_v44  ;;  %2885 = vmatmul.bf16.gmra.mxu1 %v11481_v34 }
 0x342   : > { %3024 = vmatmul.bf16.gmra.mxu3 %v11482_v37  ;;  %v9549_v59 = vadd.f32 %v2792_v38, %v2664_v50 }
 0x344   : > { %11483 = vst [vmem:[#allocation28_spill] sm:$0xff] %v9549_v59 }
 0x345   : > { %v2985_v20 = vpop.f32.mrf.mxu3  ;;  %v2848_v52 = vpop.f32.mrf.mxu1 }
 0x346   : > { %v2849_v54 = vadd.f32 %v2848_v52, %v9540_v40 }
 0x348   : > { %v9552_v39 = vadd.f32 %v2977_v33, %v2849_v54  ;;  %v11486_v54 = vld [vmem:[#allocation37_spill] sm:$0xff] }
 0x34d   : > { %v2987_v7 = vpop.f32.mrf.mxu3  ;;  %v2851_v5 = vpop.f32.mrf.mxu1 }
 0x34e   : > { %v2852_v15 = vadd.f32 %v2851_v5, %v9540_v40  ;;  %v6784_v5 = vld [vmem:[#allocation6 + $0x70] sm:$0xf] }
 0x350   : > { %v9555_v51 = vadd.f32 %v2980_v8, %v2852_v15  ;;  %2890 = vmatmul.bf16.gmra.mxu1 %v11484_v55  ;;  %v11487_v8 = vld [vmem:[#allocation39_spill] sm:$0xff]  ;;  %v7327_v15 = vld [vmem:[#allocation6 + $0x74] sm:$0xf0] }
 0x351   : > { %v6785_v55 = vor.u32 %v7327_v15, %v6784_v5 }
 0x352   : > { %3029 = vmatmul.bf16.gmra.mxu3 %v11485_v58 }
 0x353   : > { %3942 = vmatpush.bf16.msrb.mxu2 %v6785_v55 }
 0x355   : > { %v2990_v43 = vpop.f32.mrf.mxu3  ;;  %v2853_v13 = vpop.f32.mrf.mxu1 }
 0x356   : > { %v2854_v50 = vadd.f32 %v2853_v13, %v9540_v40 }
 0x358   : > { %v9560_v34 = vadd.f32 %v2982_v46, %v2854_v50 }
 0x35a   : > { %v9658_v26 = vsel %vm3095_vm3, %v9560_v34, -inf }
 0x35d   : > { %v2992_v38 = vpop.f32.mrf.mxu3  ;;  %v2856_v37 = vpop.f32.mrf.mxu1 }
 0x35e   : > { %v2857_v33 = vadd.f32 %v2856_v37, %v9540_v40 }
 0x360   : > { %v9563_v52 = vadd.f32 %v2985_v20, %v2857_v33  ;;  %2895 = vmatmul.bf16.gmra.mxu1 %v11486_v54  ;;  %v11488_v33 = vld [vmem:[#allocation41_spill] sm:$0xff]  ;;  %v11489_v54 = vld [vmem:[#allocation43_spill] sm:$0xff] }
 0x362   : > { %3034 = vmatmul.bf16.gmra.mxu3 %v11487_v8  ;;  %v7326_v8 = vld [vmem:[#allocation6 + $0x74] sm:$0xf] }
 0x363   : > { %v6789_v5 = vor.u32 %v7326_v8, %v6786_v32 }
 0x365   : > { %v2995_v58 = vpop.f32.mrf.mxu3  ;;  %v2858_v19 = vpop.f32.mrf.mxu1  ;;  %3991 = vmatpush.bf16.msrb.mxu0 %v6789_v5 }
 0x366   : > { %v2859_v13 = vadd.f32 %v2858_v19, %v9540_v40 }
 0x368   : > { %v9568_v46 = vadd.f32 %v2987_v7, %v2859_v13 }
 0x36d   : > { %v2997_v50 = vpop.f32.mrf.mxu3  ;;  %v2861_v59 = vpop.f32.mrf.mxu1 }
 0x36e   : > { %v2862_v37 = vadd.f32 %v2861_v59, %v9540_v40 }
 0x370   : > { %v9571_v20 = vadd.f32 %v2990_v43, %v2862_v37  ;;  %2900 = vmatmul.bf16.gmra.mxu1 %v11488_v33  ;;  %v11490_v37 = vld [vmem:[#allocation45_spill] sm:$0xff]  ;;  %v11491_v33 = vld [vmem:[#allocation47_spill] sm:$0xff] }
 0x372   : > { %3039 = vmatmul.bf16.gmra.mxu3 %v11489_v54 }
 0x375   : > { %v3000_v15 = vpop.f32.mrf.mxu3  ;;  %v2863_v61 = vpop.f32.mrf.mxu1 }
 0x376   : > { %v2864_v19 = vadd.f32 %v2863_v61, %v9540_v40 }
 0x378   : > { %v9576_v7 = vadd.f32 %v2992_v38, %v2864_v19 }
 0x37a   : > { %v9716_v60 = vsel %vm3095_vm3, %v9576_v7, -inf }
 0x37d   : > { %v3002_v55 = vpop.f32.mrf.mxu3  ;;  %v2866_v13 = vpop.f32.mrf.mxu1 }
 0x37e   : > { %v2867_v59 = vadd.f32 %v2866_v13, %v9540_v40  ;;  %v6776_v13 = vld [vmem:[#allocation6 + $0x60] sm:$0xf] }
 0x380   : > { %v9579_v43 = vadd.f32 %v2995_v58, %v2867_v59  ;;  %2905 = vmatmul.bf16.gmra.mxu1 %v11490_v37  ;;  %v11492_v58 = vld [vmem:[#allocation30_spill] sm:$0xff]  ;;  %v7325_v59 = vld [vmem:[#allocation6 + $0x64] sm:$0xf0] }
 0x381   : > { %v6777_v37 = vor.u32 %v7325_v59, %v6776_v13 }
 0x382   : > { %3044 = vmatmul.bf16.gmra.mxu3 %v11491_v33 }
 0x383   : > { %3943 = vmatpush.bf16.msrb.mxu2 %v6777_v37 }
 0x385   : > { %v3005_v54 = vpop.f32.mrf.mxu3  ;;  %v2868_v29 = vpop.f32.mrf.mxu1 }
 0x386   : > { %v2869_v32 = vadd.f32 %v2868_v29, %v9540_v40 }
 0x388   : > { %v9584_v8 = vadd.f32 %v2997_v50, %v2869_v32 }
 0x38d   : > { %v3007_v5 = vpop.f32.mrf.mxu3  ;;  %v2871_v61 = vpop.f32.mrf.mxu1 }
 0x38e   : > { %v2872_v38 = vadd.f32 %v2871_v61, %v9540_v40 }
 0x390   : > { %v9587_v19 = vadd.f32 %v3000_v15, %v2872_v38  ;;  %2910 = vmatmul.bf16.gmra.mxu1 %v9359_v22  ;;  %v7324_v22 = vld [vmem:[#allocation6 + $0x64] sm:$0xf]  ;;  %v6778_v38 = vld [vmem:[#allocation6 + $0x68] sm:$0xf0] }
 0x391   : > { %v6781_v13 = vor.u32 %v7324_v22, %v6778_v38 }
 0x392   : > { %3049 = vmatmul.bf16.gmra.mxu3 %v11492_v58 }
 0x393   : > { %3992 = vmatpush.bf16.msrb.mxu0 %v6781_v13 }
 0x395   : > { %v3010_v33 = vpop.f32.mrf.mxu3  ;;  %v2873_v41 = vpop.f32.mrf.mxu1 }
 0x396   : > { %v2874_v29 = vadd.f32 %v2873_v41, %v9540_v40 }
 0x398   : > { %v9592_v50 = vadd.f32 %v3002_v55, %v2874_v29 }
 0x39a   : > { %11493 = vst [vmem:[#allocation20_spill] sm:$0xff] %v9592_v50  ;;  %v7974_v50 = vmov 0  }
 0x39b   : > { %7533 = vset.pattern.permute.xlu2 %v7974_v50  ;;  %7532 = vset.pattern.permute.xlu1 %v7974_v50 }
 0x39c   : > { %7531 = vset.pattern.permute.xlu0 %v7974_v50 }
 0x39d   : > { %v3012_v32 = vpop.f32.mrf.mxu3  ;;  %v2876_v21 = vpop.f32.mrf.mxu1 }
 0x39e   : > { %v2877_v61 = vadd.f32 %v2876_v21, %v9540_v40 }
 0x3a0   : > { %v9595_v15 = vadd.f32 %v3005_v54, %v2877_v61  ;;  %2915 = vmatmul.bf16.gmra.mxu1 %v9376_v62 }
 0x3a2   : > { %11494 = vst [vmem:[#allocation21_spill] sm:$0xff] %v9595_v15  ;;  %3054 = vmatmul.bf16.gmra.mxu3 %v9385_v23 }
 0x3a5   : > { %v3015_v58 = vpop.f32.mrf.mxu3  ;;  %v2878_v59 = vpop.f32.mrf.mxu1 }
 0x3a6   : > { %v2879_v37 = vadd.f32 %v2878_v59, %v9540_v40 }
 0x3a8   : > { %v9600_v41 = vadd.f32 %v3007_v5, %v2879_v37  ;;  %v7323_v37 = vld [vmem:[#allocation6 + $0x54] sm:$0xf0] }
 0x3aa   : > { %11495 = vst [vmem:[#allocation23_spill] sm:$0xff] %v9600_v41  ;;  %v7319_v41 = vld [vmem:[#allocation6 + $0x34] sm:$0xf0] }
 0x3ad   : > { %v3017_v55 = vpop.f32.mrf.mxu3  ;;  %v2881_v29 = vpop.f32.mrf.mxu1 }
 0x3ae   : > { %v2882_v21 = vadd.f32 %v2881_v29, %v9540_v40 }
 0x3b0   : > { %v9603_v54 = vadd.f32 %v3010_v33, %v2882_v21  ;;  %2920 = vmatmul.bf16.gmra.mxu1 %v9393_v53  ;;  %v9617_v53 = vsel %vm3095_vm3, %v9544_v12, -inf }
 0x3b2   : > { %11496 = vst [vmem:[#allocation35_spill] sm:$0xff] %v9603_v54  ;;  %3059 = vmatmul.bf16.gmra.mxu3 %v9403_v24 }
 0x3b5   : > { %v3020_v62 = vpop.f32.mrf.mxu3  ;;  %v2883_v23 = vpop.f32.mrf.mxu1 }
 0x3b6   : > { %v2884_v61 = vadd.f32 %v2883_v23, %v9540_v40  ;;  %v9630_v23 = vsel %vm3095_vm3, %v9552_v39, -inf }
 0x3b8   : > { %v9608_v22 = vadd.f32 %v3012_v32, %v2884_v61  ;;  %v6768_v32 = vld [vmem:[#allocation6 + $0x50] sm:$0xf] }
 0x3ba   : > { %11497 = vst [vmem:[#allocation37_spill] sm:$0xff] %v9608_v22 }
 0x3bd   : > { %v3022_v38 = vpop.f32.mrf.mxu3  ;;  %v2886_v13 = vpop.f32.mrf.mxu1 }
 0x3be   : > { %v2887_v5 = vadd.f32 %v2886_v13, %v9540_v40  ;;  %v6770_v13 = vld [vmem:[#allocation6 + $0x58] sm:$0xf0] }
 0x3c0   : > { %v9611_v59 = vadd.f32 %v3015_v58, %v2887_v5  ;;  %2925 = vmatmul.bf16.gmra.mxu1 %v9411_v28  ;;  %v6769_v58 = vor.u32 %v7323_v37, %v6768_v32 }
 0x3c2   : > { %3064 = vmatmul.bf16.gmra.mxu3 %v9421_v10  ;;  %v9621_v24 = vsel %vm3095_vm3, %v9611_v59, -inf  ;;  %3944 = vmatpush.bf16.msrb.mxu2 %v6769_v58 }
 0x3c5   : > { %v3025_v29 = vpop.f32.mrf.mxu3  ;;  %v2888_v21 = vpop.f32.mrf.mxu1 }
 0x3c6   : > { %v2889_v28 = vadd.f32 %v2888_v21, %v9540_v40 }
 0x3c8   : > { %v9626_v10 = vadd.f32 %v3017_v55, %v2889_v28  ;;  %v9645_v55 = vsel %vm3095_vm3, %v9555_v51, -inf  ;;  %v7322_v28 = vld [vmem:[#allocation6 + $0x54] sm:$0xf] }
 0x3ca   : > { %v9634_v61 = vsel %vm3095_vm3, %v9626_v10, -inf }
 0x3cd   : > { %v3027_v5 = vpop.f32.mrf.mxu3  ;;  %v2891_v33 = vpop.f32.mrf.mxu1 }
 0x3ce   : > { %v2892_v32 = vadd.f32 %v2891_v33, %v9540_v40 }
 0x3d0   : > { %v9639_v37 = vadd.f32 %v3020_v62, %v2892_v32  ;;  %2930 = vmatmul.bf16.gmra.mxu1 %v9429_v17  ;;  %v6773_v62 = vor.u32 %v7322_v28, %v6770_v13 }
 0x3d2   : > { %3069 = vmatmul.bf16.gmra.mxu3 %v9439_v48  ;;  %v9649_v58 = vsel %vm3095_vm3, %v9639_v37, -inf  ;;  %3993 = vmatpush.bf16.msrb.mxu0 %v6773_v62 }
 0x3d5   : > { %v3030_v33 = vpop.f32.mrf.mxu3  ;;  %v2893_v32 = vpop.f32.mrf.mxu1 }
 0x3d6   : > { %v2894_v17 = vadd.f32 %v2893_v32, %v9540_v40 }
 0x3d8   : > { %v9654_v48 = vadd.f32 %v3022_v38, %v2894_v17  ;;  %v9673_v38 = vsel %vm3095_vm3, %v9563_v52, -inf }
 0x3da   : > { %v9662_v18 = vsel %vm3095_vm3, %v9654_v48, -inf }
 0x3dd   : > { %v3032_v35 = vpop.f32.mrf.mxu3  ;;  %v2896_v16 = vpop.f32.mrf.mxu1 }
 0x3de   : > { %v2897_v13 = vadd.f32 %v2896_v16, %v9540_v40 }
 0x3e0   : > { %v9667_v28 = vadd.f32 %v3025_v29, %v2897_v13  ;;  %2935 = vmatmul.bf16.gmra.mxu1 %v9447_v45  ;;  %v9686_v45 = vsel %vm3095_vm3, %v9568_v46, -inf  ;;  %v6760_v13 = vld [vmem:[#allocation6 + $0x40] sm:$0xf] }
 0x3e2   : > { %3074 = vmatmul.bf16.gmra.mxu3 %v9457_v47  ;;  %v9677_v62 = vsel %vm3095_vm3, %v9667_v28, -inf }
 0x3e5   : > { %v3035_v17 = vpop.f32.mrf.mxu3  ;;  %v2898_v21 = vpop.f32.mrf.mxu1 }
 0x3e6   : > { %v2899_v16 = vadd.f32 %v2898_v21, %v9540_v40 }
 0x3e8   : > { %v9682_v29 = vadd.f32 %v3027_v5, %v2899_v16  ;;  %v9703_v5 = vsel %vm3095_vm3, %v9571_v20, -inf  ;;  %v7320_v16 = vld [vmem:[#allocation6 + $0x44] sm:$0xf] }
 0x3ea   : > { %v9690_v47 = vsel %vm3095_vm3, %v9682_v29, -inf }
 0x3ed   : > { %v9694_v42 = vpop.f32.mrf.mxu3  ;;  %v2901_v32 = vpop.f32.mrf.mxu1 }
 0x3ee   : > { %v2902_v49 = vadd.f32 %v2901_v32, %v9540_v40 }
 0x3f0   : > { %v9697_v57 = vadd.f32 %v3030_v33, %v2902_v49  ;;  %2940 = vmatmul.bf16.gmra.mxu1 %v9465_v0  ;;  %v6761_v49 = vor.u32 %v7321_v6, %v6760_v13 }
 0x3f2   : > { %3079 = vmatmul.bf16.gmra.mxu3 %v9475_v30  ;;  %v9707_v21 = vsel %vm3095_vm3, %v9697_v57, -inf  ;;  %3945 = vmatpush.bf16.msrb.mxu2 %v6761_v49 }
 0x3f5   : > { %v3040_v32 = vpop.f32.mrf.mxu3  ;;  %v2903_v33 = vpop.f32.mrf.mxu1 }
 0x3f6   : > { %v2904_v0 = vadd.f32 %v2903_v33, %v9540_v40 }
 0x3f8   : > { %v9712_v30 = vadd.f32 %v3032_v35, %v2904_v0  ;;  %v9733_v35 = vsel %vm3095_vm3, %v9579_v43, -inf  ;;  %v9752_v0 = vsel %vm3095_vm3, %v9587_v19, -inf }
 0x3fa   : > { %v9720_v27 = vsel %vm3095_vm3, %v9712_v30, -inf }
 0x3fd   : > { %v9724_v36 = vpop.f32.mrf.mxu3  ;;  %v2906_v6 = vpop.f32.mrf.mxu1 }
 0x3fe   : > { %11498 = vst [vmem:[#allocation39_spill] sm:$0xff] %v9724_v36  ;;  %v2907_v13 = vadd.f32 %v2906_v6, %v9540_v40 }
 0x400   : > { %v9727_v33 = vadd.f32 %v3035_v17, %v2907_v13  ;;  %2945 = vmatmul.bf16.gmra.mxu1 %v9483_v3  ;;  %v6765_v17 = vor.u32 %v7320_v16, %v6762_v63  ;;  %v9786_v16 = vsel %vm3095_vm3, %v9603_v54, -inf }
 0x401   : > { %11506 = vst [vmem:[#allocation66_spill] sm:$0xff] %v9786_v16 }
 0x402   : > { %3084 = vmatmul.bf16.gmra.mxu3 %v9495_v56  ;;  %v9737_v49 = vsel %vm3095_vm3, %v9727_v33, -inf  ;;  %3994 = vmatpush.bf16.msrb.mxu0 %v6765_v17 }
 0x405   : > { %v3045_v6 = vpop.f32.mrf.mxu3  ;;  %v9741_v13 = vpop.f32.mrf.mxu1 }
 0x40d   : > { %v9743_v3 = vpop.f32.mrf.mxu3  ;;  %v2911_v56 = vpop.f32.mrf.mxu1 }
 0x40e   : > { %11499 = vst [vmem:[#allocation41_spill] sm:$0xff] %v9743_v3  ;;  %v2912_v14 = vadd.f32 %v2911_v56, %v9540_v40  ;;  %v9770_v56 = vsel %vm3095_vm3, %v9595_v15, -inf  ;;  %v11509_v15 = vmax.f32 %v9617_v53, %v9621_v24 }
 0x40f   : > { %11502 = vst [vmem:[#allocation47_spill] sm:$0xff] %v9770_v56 }
 0x410   : > { %v9746_v2 = vadd.f32 %v3040_v32, %v2912_v14  ;;  %2950 = vmatmul.bf16.gmra.mxu1 %v9504_v4 }
 0x412   : > { %3089 = vmatmul.bf16.gmra.mxu3 %v9512_v9  ;;  %v9756_v63 = vsel %vm3095_vm3, %v9746_v2, -inf }
 0x415   : > { %v3050_v17 = vpop.f32.mrf.mxu3  ;;  %v9760_v44 = vpop.f32.mrf.mxu1 }
 0x41d   : > { %v9762_v14 = vpop.f32.mrf.mxu3  ;;  %v2916_v32 = vpop.f32.mrf.mxu1 }
 0x41e   : > { %11500 = vst [vmem:[#allocation43_spill] sm:$0xff] %v9762_v14  ;;  %v2917_v4 = vadd.f32 %v2916_v32, %v9540_v40 }
 0x420   : > { %v9765_v9 = vadd.f32 %v3045_v6, %v2917_v4  ;;  %2955 = vmatmul.bf16.gmra.mxu1 %v9523_v31  ;;  %v6752_v31 = vld [vmem:[#allocation6 + $0x30] sm:$0xf] }
 0x421   : > { %v6753_v3 = vor.u32 %v7319_v41, %v6752_v31 }
 0x422   : > { %11501 = vst [vmem:[#allocation45_spill] sm:$0xff] %v9765_v9  ;;  %v9774_v22 = vsel %vm3095_vm3, %v9765_v9, -inf }
 0x423   : > { %11503 = vst [vmem:[#allocation30_spill] sm:$0xff] %v9774_v22  ;;  %3946 = vmatpush.bf16.msrb.mxu2 %v6753_v3 }
 0x425   : > { %v3055_v1 = vpop.f32.mrf.mxu3  ;;  %v9778_v14 = vpop.f32.mrf.mxu1 }
 0x426   : > { %11504 = vst [vmem:[#allocation64_spill] sm:$0xff] %v9778_v14 }
 0x42d   : > { %v3057_v25 = vpop.f32.mrf.mxu3  ;;  %v2921_v32 = vpop.f32.mrf.mxu1 }
 0x42e   : > { %v2922_v6 = vadd.f32 %v2921_v32, %v9540_v40 }
 0x430   : > { %v9781_v4 = vadd.f32 %v3050_v17, %v2922_v6  ;;  %2960 = vmatmul.bf16.gmra.mxu1 %v9537_v11 }
 0x432   : > { %11505 = vst [vmem:[#allocation65_spill] sm:$0xff] %v9781_v4  ;;  %v9790_v14 = vsel %vm3095_vm3, %v9781_v4, -inf }
 0x433   : > { %11507 = vst [vmem:[#allocation67_spill] sm:$0xff] %v9790_v14  ;;  %v6754_v14 = vld [vmem:[#allocation6 + $0x38] sm:$0xf0] }
 0x435   : > { %v9794_v11 = vpop.f32.mrf.mxu1  ;;  %v3060_v32 = vpop.f32.mrf.mxu3 }
 0x436   : > { %11508 = vst [vmem:[#allocation68_spill] sm:$0xff] %v9794_v11  ;;  %v7318_v11 = vld [vmem:[#allocation6 + $0x34] sm:$0xf] }
 0x43d   : > { %v2926_v41 = vpop.f32.mrf.mxu1  ;;  %v3062_v9 = vpop.f32.mrf.mxu3 }
 0x43e   : > { %v2927_v6 = vadd.f32 %v2926_v41, %v9540_v40  ;;  %v6757_v41 = vor.u32 %v7318_v11, %v6754_v14 }
 0x440   : > { %v3056_v31 = vadd.f32 %v3055_v1, %v2927_v6  ;;  %3995 = vmatpush.bf16.msrb.mxu0 %v6757_v41 }
 0x442   : > { %v3099_v54 = vsel %vm3095_vm3, %v3056_v31, -inf }
 0x443   : > { %v3100_v4 = vmax.f32 %v11509_v15, %v3099_v54  ;;  %v11510_v54 = vmax.f32 %v9630_v23, %v9634_v61 }
 0x445   : > { %v3208_v22 = vsub.f32 %v3056_v31, %v3100_v4  ;;  %v2928_v50 = vpop.f32.mrf.mxu1  ;;  %v3192_v56 = vsub.f32 %v9611_v59, %v3100_v4  ;;  %v3176_v3 = vsub.f32 %v9544_v12, %v3100_v4  ;;  %v9805_v15 = vpop.f32.mrf.mxu3 }
 0x446   : > { %v2929_v17 = vadd.f32 %v2928_v50, %v9540_v40 }
 0x447   : > { %v3288_v16 = vmul.f32 1.442695, %v3208_v22  ;;  %v3256_v1 = vmul.f32 1.442695, %v3192_v56  ;;  %v3224_v6 = vmul.f32 1.442695, %v3176_v3 }
 0x448   : > { %v3058_v36 = vadd.f32 %v3057_v25, %v2929_v17 }
 0x449   : > { %7534 = vpow2.f32 %v3288_v16 }
 0x44a   : > { %v3104_v53 = vsel %vm3095_vm3, %v3058_v36, -inf  ;;  %7536 = vpow2.f32 %v3256_v1 }
 0x44b   : > { %v3105_v12 = vmax.f32 %v11510_v54, %v3104_v53  ;;  %7538 = vpow2.f32 %v3224_v6 }
 0x44d   : > { %v3177_v59 = vsub.f32 %v9552_v39, %v3105_v12  ;;  %v3193_v22 = vsub.f32 %v9626_v10, %v3105_v12  ;;  %v3209_v24 = vsub.f32 %v3058_v36, %v3105_v12  ;;  %v2931_v14 = vpop.f32.mrf.mxu1  ;;  %v11511_v10 = vmax.f32 %v9645_v55, %v9649_v58  ;;  %v9820_v41 = vpop.f32.mrf.mxu3 }
 0x44e   : > { %v2932_v25 = vadd.f32 %v2931_v14, %v9540_v40 }
 0x44f   : > { %v7535_v16 = vpop.eup %7534  ;;  %v3226_v56 = vmul.f32 1.442695, %v3177_v59  ;;  %v3258_v4 = vmul.f32 1.442695, %v3193_v22  ;;  %v3290_v17 = vmul.f32 1.442695, %v3209_v24 }
 0x450   : > { %v7537_v11 = vpop.eup %7536  ;;  %v3061_v31 = vadd.f32 %v3060_v32, %v2932_v25  ;;  %3562 = vperm.xlu2 %7533, %v7535_v16   ;;  %v3323_v32 = vsel %vm3095_vm3, %v7535_v16, 0.0 }
 0x451   : > { %v7539_v50 = vpop.eup %7538  ;;  %7540 = vpow2.f32 %v3226_v56  ;;  %3482 = vperm.xlu1 %7532, %v7537_v11   ;;  %v3321_v23 = vsel %vm3095_vm3, %v7537_v11, 0.0  ;;  %v11512_v11 = vmax.f32 %v9658_v26, %v9662_v18 }
 0x452   : > { %7542 = vpow2.f32 %v3258_v4  ;;  %v3109_v39 = vsel %vm3095_vm3, %v3061_v31, -inf  ;;  %3402 = vperm.xlu0 %7531, %v7539_v50   ;;  %v3320_v36 = vsel %vm3095_vm3, %v7539_v50, 0.0 }
 0x453   : > { %7544 = vpow2.f32 %v3290_v17  ;;  %v3110_v61 = vmax.f32 %v11511_v10, %v3109_v39  ;;  %v3322_v3 = vadd.f32 %v3321_v23, %v3320_v36 }
 0x455   : > { %v3178_v1 = vsub.f32 %v9555_v51, %v3110_v61  ;;  %v3194_v6 = vsub.f32 %v9639_v37, %v3110_v61  ;;  %v3210_v53 = vsub.f32 %v3061_v31, %v3110_v61  ;;  %v2933_v54 = vpop.f32.mrf.mxu1  ;;  %v3324_v12 = vadd.f32 %v3323_v32, %v3322_v3  ;;  %v9835_v32 = vpop.f32.mrf.mxu3 }
 0x456   : > { %v2934_v59 = vadd.f32 %v2933_v54, %v9540_v40 }
 0x457   : > { %v7541_v22 = vpop.eup %7540  ;;  %v3228_v24 = vmul.f32 1.442695, %v3178_v1  ;;  %v3260_v14 = vmul.f32 1.442695, %v3194_v6  ;;  %v3292_v25 = vmul.f32 1.442695, %v3210_v53  ;;  %7546 = vrcp.f32 %v3324_v12 }
 0x458   : > { %v7543_v55 = vpop.eup %7542  ;;  %v3325_v58 = vsel %vm3095_vm3, %v7541_v22, 0.0  ;;  %v3063_v56 = vadd.f32 %v3062_v9, %v2934_v59 }
 0x459   : > { %v7545_v16 = vpop.eup %7544  ;;  %v3326_v4 = vsel %vm3095_vm3, %v7543_v55, 0.0  ;;  %7548 = vpow2.f32 %v3228_v24  ;;  %3487 = vperm.xlu1 %7532, %v7543_v55   ;;  %v11513_v24 = vmax.f32 %v9673_v38, %v9677_v62 }
 0x45a   : > { %v3327_v51 = vadd.f32 %v3326_v4, %v3325_v58  ;;  %7550 = vpow2.f32 %v3260_v14  ;;  %v3114_v37 = vsel %vm3095_vm3, %v3063_v56, -inf  ;;  %3567 = vperm.xlu2 %7533, %v7545_v16   ;;  %3407 = vperm.xlu0 %7531, %v7541_v22   ;;  %v3328_v17 = vsel %vm3095_vm3, %v7545_v16, 0.0 }
 0x45b   : > { %7552 = vpow2.f32 %v3292_v25  ;;  %v3115_v31 = vmax.f32 %v11512_v11, %v3114_v37  ;;  %v7317_v37 = vld [vmem:[#allocation6 + $0x24] sm:$0xf0] }
 0x45c   : > { %v3329_v9 = vadd.f32 %v3328_v17, %v3327_v51  ;;  %v6744_v51 = vld [vmem:[#allocation6 + $0x20] sm:$0xf] }
 0x45d   : > { %v3179_v50 = vsub.f32 %v9560_v34, %v3115_v31  ;;  %v3195_v23 = vsub.f32 %v9654_v48, %v3115_v31  ;;  %v3211_v39 = vsub.f32 %v3063_v56, %v3115_v31  ;;  %v2936_v36 = vpop.f32.mrf.mxu1  ;;  %v7547_v10 = vpop.eup %7546 }
 0x45e   : > { %v2937_v61 = vadd.f32 %v2936_v36, %v9540_v40  ;;  %7554 = vrcp.f32 %v3329_v9 }
 0x45f   : > { %v7549_v3 = vpop.eup %7548  ;;  %v3230_v1 = vmul.f32 1.442695, %v3179_v50  ;;  %v3262_v6 = vmul.f32 1.442695, %v3195_v23  ;;  %v3294_v53 = vmul.f32 1.442695, %v3211_v39  ;;  %v6745_v50 = vor.u32 %v7317_v37, %v6744_v51  ;;  %v3072_v39 = vpop.f32.mrf.mxu3 }
 0x460   : > { %v7551_v54 = vpop.eup %7550  ;;  %v3330_v18 = vsel %vm3095_vm3, %v7549_v3, 0.0  ;;  %v3066_v26 = vadd.f32 %v9805_v15, %v2937_v61 }
 0x461   : > { %v7553_v34 = vpop.eup %7552  ;;  %v3331_v48 = vsel %vm3095_vm3, %v7551_v54, 0.0  ;;  %7556 = vpow2.f32 %v3230_v1  ;;  %3492 = vperm.xlu1 %7532, %v7551_v54   ;;  %3947 = vmatpush.bf16.msrb.mxu2 %v6745_v50 }
 0x462   : > { %v3332_v12 = vadd.f32 %v3331_v48, %v3330_v18  ;;  %7558 = vpow2.f32 %v3262_v6  ;;  %v3119_v59 = vsel %vm3095_vm3, %v3066_v26, -inf  ;;  %3412 = vperm.xlu2 %7533, %v7549_v3   ;;  %3738 = vperm.xlu0 %7531, %v7547_v10   ;;  %v3333_v22 = vsel %vm3095_vm3, %v7553_v34, 0.0 }
 0x463   : > { %7560 = vpow2.f32 %v3294_v53  ;;  %v3120_v14 = vmax.f32 %v11513_v24, %v3119_v59  ;;  %v11514_v3 = vmax.f32 %v9686_v45, %v9690_v47 }
 0x464   : > { %v3334_v15 = vadd.f32 %v3333_v22, %v3332_v12  ;;  %v7555_v16 = vpop.eup %7554 }
 0x465   : > { %v3180_v25 = vsub.f32 %v9563_v52, %v3120_v14  ;;  %v3196_v55 = vsub.f32 %v9667_v28, %v3120_v14  ;;  %v3212_v58 = vsub.f32 %v3066_v26, %v3120_v14  ;;  %v2938_v56 = vpop.f32.mrf.mxu1 }
 0x466   : > { %v2939_v4 = vadd.f32 %v2938_v56, %v9540_v40  ;;  %7562 = vrcp.f32 %v3334_v15 }
 0x467   : > { %v7557_v17 = vpop.eup %7556  ;;  %v3232_v11 = vmul.f32 1.442695, %v3180_v25  ;;  %v3264_v31 = vmul.f32 1.442695, %v3196_v55  ;;  %v3296_v9 = vmul.f32 1.442695, %v3212_v58  ;;  %v3075_v55 = vpop.f32.mrf.mxu3  ;;  %v11515_v58 = vmax.f32 %v9703_v5, %v9707_v21 }
 0x468   : > { %v7559_v23 = vpop.eup %7558  ;;  %v3335_v38 = vsel %vm3095_vm3, %v7557_v17, 0.0  ;;  %v3068_v52 = vadd.f32 %v9820_v41, %v2939_v4 }
 0x469   : > { %v7561_v62 = vpop.eup %7560  ;;  %v3336_v28 = vsel %vm3095_vm3, %v7559_v23, 0.0  ;;  %7564 = vpow2.f32 %v3232_v11  ;;  %3743 = vperm.xlu1 %7532, %v7555_v16  }
 0x46a   : > { %v3337_v36 = vadd.f32 %v3336_v28, %v3335_v38  ;;  %7566 = vpow2.f32 %v3264_v31  ;;  %v3124_v10 = vsel %vm3095_vm3, %v3068_v52, -inf  ;;  %3497 = vperm.xlu2 %7533, %v7559_v23   ;;  %3572 = vperm.xlu0 %7531, %v7553_v34   ;;  %v3338_v61 = vsel %vm3095_vm3, %v7561_v62, 0.0  ;;  %v7316_v31 = vld [vmem:[#allocation6 + $0x24] sm:$0xf] }
 0x46b   : > { %7568 = vpow2.f32 %v3296_v9  ;;  %v3125_v41 = vmax.f32 %v11514_v3, %v3124_v10  ;;  %v6746_v9 = vld [vmem:[#allocation6 + $0x28] sm:$0xf0] }
 0x46c   : > { %v3339_v1 = vadd.f32 %v3338_v61, %v3337_v36  ;;  %v7563_v26 = vpop.eup %7562  ;;  %v11516_v61 = vmax.f32 %v9716_v60, %v9720_v27 }
 0x46d   : > { %v3181_v6 = vsub.f32 %v9568_v46, %v3125_v41  ;;  %v3197_v53 = vsub.f32 %v9682_v29, %v3125_v41  ;;  %v3213_v54 = vsub.f32 %v3068_v52, %v3125_v41  ;;  %v2941_v18 = vpop.f32.mrf.mxu1  ;;  %v6749_v52 = vor.u32 %v7316_v31, %v6746_v9 }
 0x46e   : > { %v2942_v48 = vadd.f32 %v2941_v18, %v9540_v40 }
 0x46f   : > { %v7565_v12 = vpop.eup %7564  ;;  %v3234_v59 = vmul.f32 1.442695, %v3181_v6  ;;  %v3266_v34 = vmul.f32 1.442695, %v3197_v53  ;;  %v3298_v22 = vmul.f32 1.442695, %v3213_v54  ;;  %3996 = vmatpush.bf16.msrb.mxu0 %v6749_v52  ;;  %v3077_v41 = vpop.f32.mrf.mxu3 }
 0x470   : > { %v7567_v24 = vpop.eup %7566  ;;  %v3340_v14 = vsel %vm3095_vm3, %v7565_v12, 0.0  ;;  %v3071_v45 = vadd.f32 %v9835_v32, %v2942_v48 }
 0x471   : > { %v7569_v47 = vpop.eup %7568  ;;  %v3341_v15 = vsel %vm3095_vm3, %v7567_v24, 0.0  ;;  %7570 = vpow2.f32 %v3234_v59  ;;  %3577 = vperm.xlu1 %7532, %v7561_v62  }
 0x472   : > { %v3342_v46 = vadd.f32 %v3341_v15, %v3340_v14  ;;  %7572 = vpow2.f32 %v3266_v34  ;;  %v3129_v29 = vsel %vm3095_vm3, %v3071_v45, -inf  ;;  %3748 = vperm.xlu2 %7533, %v7563_v26   ;;  %3417 = vperm.xlu0 %7531, %v7557_v17   ;;  %v3343_v25 = vsel %vm3095_vm3, %v7569_v47, 0.0 }
 0x473   : > { %7574 = vpow2.f32 %v3298_v22  ;;  %v3130_v56 = vmax.f32 %v11515_v58, %v3129_v29 }
 0x474   : > { %v3344_v32 = vadd.f32 %v3343_v25, %v3342_v46  ;;  %7576 = vrcp.f32 %v3339_v1 }
 0x475   : > { %v3182_v16 = vsub.f32 %v9571_v20, %v3130_v56  ;;  %v3198_v4 = vsub.f32 %v9697_v57, %v3130_v56  ;;  %v3214_v51 = vsub.f32 %v3071_v45, %v3130_v56  ;;  %v2943_v37 = vpop.f32.mrf.mxu1 }
 0x476   : > { %v2944_v11 = vadd.f32 %v2943_v37, %v9540_v40 }
 0x477   : > { %v7571_v17 = vpop.eup %7570  ;;  %v3236_v50 = vmul.f32 1.442695, %v3182_v16  ;;  %v3268_v23 = vmul.f32 1.442695, %v3198_v4  ;;  %v3300_v38 = vmul.f32 1.442695, %v3214_v51  ;;  %v3080_v16 = vpop.f32.mrf.mxu3 }
 0x478   : > { %v7573_v62 = vpop.eup %7572  ;;  %v3345_v5 = vsel %vm3095_vm3, %v7571_v17, 0.0  ;;  %v3073_v21 = vadd.f32 %v3072_v39, %v2944_v11 }
 0x479   : > { %v7575_v28 = vpop.eup %7574  ;;  %v3346_v20 = vsel %vm3095_vm3, %v7573_v62, 0.0  ;;  %7578 = vpow2.f32 %v3236_v50  ;;  %3422 = vperm.xlu1 %7532, %v7565_v12  }
 0x47a   : > { %v3347_v57 = vadd.f32 %v3346_v20, %v3345_v5  ;;  %7580 = vpow2.f32 %v3268_v23  ;;  %v3134_v36 = vsel %vm3095_vm3, %v3073_v21, -inf  ;;  %3582 = vperm.xlu2 %7533, %v7569_v47   ;;  %3502 = vperm.xlu0 %7531, %v7567_v24   ;;  %v3348_v10 = vsel %vm3095_vm3, %v7575_v28, 0.0  ;;  %v7577_v18 = vpop.eup %7576 }
 0x47b   : > { %7582 = vpow2.f32 %v3300_v38  ;;  %v3135_v39 = vmax.f32 %v11516_v61, %v3134_v36  ;;  %v11517_v47 = vmax.f32 %v9733_v35, %v9737_v49  ;;  %v2909_v35 = vadd.f32 %v9741_v13, %v9540_v40 }
 0x47c   : > { %v3349_v3 = vadd.f32 %v3348_v10, %v3347_v57  ;;  %7584 = vrcp.f32 %v3344_v32 }
 0x47d   : > { %v3183_v1 = vsub.f32 %v9576_v7, %v3135_v39  ;;  %v3199_v6 = vsub.f32 %v9712_v30, %v3135_v39  ;;  %v3215_v53 = vsub.f32 %v3073_v21, %v3135_v39  ;;  %v2946_v54 = vpop.f32.mrf.mxu1  ;;  %v3038_v23 = vadd.f32 %v9694_v42, %v2909_v35  ;;  %v11520_v35 = vld [vmem:[#allocation47_spill] sm:$0xff] }
 0x47e   : > { %v2947_v26 = vadd.f32 %v2946_v54, %v9540_v40 }
 0x47f   : > { %v9880_v48 = vpop.eup %7578  ;;  %v3238_v12 = vmul.f32 1.442695, %v3183_v1  ;;  %v3270_v59 = vmul.f32 1.442695, %v3199_v6  ;;  %v3302_v34 = vmul.f32 1.442695, %v3215_v53  ;;  %v3082_v10 = vpop.f32.mrf.mxu3  ;;  %v11518_v6 = vmax.f32 %v9752_v0, %v9756_v63 }
 0x480   : > { %v7581_v22 = vpop.eup %7580  ;;  %v3350_v27 = vsel %vm3095_vm3, %v9880_v48, 0.0  ;;  %v3076_v60 = vadd.f32 %v3075_v55, %v2947_v26  ;;  %v3142_v36 = vsel %vm3095_vm3, %v3038_v23, -inf  ;;  %v2914_v63 = vadd.f32 %v9760_v44, %v9540_v40  ;;  %v11519_v44 = vld [vmem:[#allocation39_spill] sm:$0xff] }
 0x481   : > { %v7583_v24 = vpop.eup %7582  ;;  %v3351_v7 = vsel %vm3095_vm3, %v7581_v22, 0.0  ;;  %7586 = vpow2.f32 %v3238_v12  ;;  %3507 = vperm.xlu1 %7532, %v7573_v62  }
 0x482   : > { %v3352_v30 = vadd.f32 %v3351_v7, %v3350_v27  ;;  %7588 = vpow2.f32 %v3270_v59  ;;  %v3139_v14 = vsel %vm3095_vm3, %v3076_v60, -inf  ;;  %3427 = vperm.xlu2 %7533, %v7571_v17   ;;  %3753 = vperm.xlu0 %7531, %v7577_v18   ;;  %v3353_v45 = vsel %vm3095_vm3, %v7583_v24, 0.0  ;;  %v7585_v56 = vpop.eup %7584  ;;  %v7315_v27 = vld [vmem:[#allocation6 + $0x14] sm:$0xf0] }
 0x483   : > { %7590 = vpow2.f32 %v3302_v34  ;;  %v3140_v15 = vmax.f32 %v11517_v47, %v3139_v14 }
 0x484   : > { %v3354_v46 = vadd.f32 %v3353_v45, %v3352_v30  ;;  %7592 = vrcp.f32 %v3349_v3  ;;  %v3141_v3 = vsel %vm3095_vm3, %v9584_v8, -inf }
 0x485   : > { %v3184_v29 = vsub.f32 %v9579_v43, %v3140_v15  ;;  %v3200_v25 = vsub.f32 %v9727_v33, %v3140_v15  ;;  %v3216_v55 = vsub.f32 %v3076_v60, %v3140_v15  ;;  %v2948_v58 = vpop.f32.mrf.mxu1  ;;  %v3143_v54 = vmax.f32 %v3141_v3, %v3142_v36 }
 0x486   : > { %v2949_v17 = vadd.f32 %v2948_v58, %v9540_v40 }
 0x487   : > { %v7587_v32 = vpop.eup %7586  ;;  %v3240_v4 = vmul.f32 1.442695, %v3184_v29  ;;  %v3272_v51 = vmul.f32 1.442695, %v3200_v25  ;;  %v3304_v37 = vmul.f32 1.442695, %v3216_v55  ;;  %v3085_v0 = vpop.f32.mrf.mxu3 }
 0x488   : > { %v7589_v11 = vpop.eup %7588  ;;  %v3355_v31 = vsel %vm3095_vm3, %v7587_v32, 0.0  ;;  %v3078_v5 = vadd.f32 %v3077_v41, %v2949_v17 }
 0x489   : > { %v7591_v9 = vpop.eup %7590  ;;  %v3356_v43 = vsel %vm3095_vm3, %v7589_v11, 0.0  ;;  %7594 = vpow2.f32 %v3240_v4  ;;  %3758 = vperm.xlu1 %7532, %v7585_v56  }
 0x48a   : > { %v3357_v33 = vadd.f32 %v3356_v43, %v3355_v31  ;;  %7596 = vpow2.f32 %v3272_v51  ;;  %3512 = vperm.xlu2 %7533, %v7581_v22   ;;  %3587 = vperm.xlu0 %7531, %v7575_v28   ;;  %v3358_v49 = vsel %vm3095_vm3, %v7591_v9, 0.0  ;;  %v7593_v52 = vpop.eup %7592  ;;  %v3144_v1 = vsel %vm3095_vm3, %v3078_v5, -inf  ;;  %v6736_v22 = vld [vmem:[#allocation6 + $0x10] sm:$0xf]  ;;  %v11521_v43 = vld [vmem:[#allocation30_spill] sm:$0xff] }
 0x48b   : > { %7598 = vpow2.f32 %v3304_v37  ;;  %v3145_v34 = vmax.f32 %v3143_v54, %v3144_v1  ;;  %v6737_v30 = vor.u32 %v7315_v27, %v6736_v22  ;;  %v11526_v54 = vld [vmem:[#allocation64_spill] sm:$0xff]  ;;  %v11527_v22 = vld [vmem:[#allocation41_spill] sm:$0xff] }
 0x48c   : > { %v3359_v50 = vadd.f32 %v3358_v49, %v3357_v33  ;;  %7600 = vrcp.f32 %v3354_v46  ;;  %v11522_v33 = vmax.f32 %v11520_v35, %v11521_v43  ;;  %v11528_v43 = vld [vmem:[#allocation66_spill] sm:$0xff] }
 0x48d   : > { %v2951_v38 = vpop.f32.mrf.mxu1  ;;  %3948 = vmatpush.bf16.msrb.mxu2 %v6737_v30  ;;  %v3217_v47 = vsub.f32 %v3078_v5, %v3145_v34 }
 0x48e   : > { %v2952_v13 = vadd.f32 %v2951_v38, %v9540_v40  ;;  %v11523_v38 = vld [vmem:[#allocation21_spill] sm:$0xff] }
 0x48f   : > { %v9900_v62 = vpop.eup %7594  ;;  %v3306_v51 = vmul.f32 1.442695, %v3217_v47 }
 0x490   : > { %v7597_v21 = vpop.eup %7596  ;;  %v3360_v20 = vsel %vm3095_vm3, %v9900_v62, 0.0  ;;  %v3081_v28 = vadd.f32 %v3080_v16, %v2952_v13  ;;  %v9936_v16 = vadd.f32 %v11519_v44, %v2914_v63  ;;  %v11524_v13 = vld [vmem:[#allocation45_spill] sm:$0xff] }
 0x491   : > { %v9904_v57 = vpop.eup %7598  ;;  %v3361_v61 = vsel %vm3095_vm3, %v7597_v21, 0.0  ;;  %3592 = vperm.xlu1 %7532, %v7583_v24  }
 0x492   : > { %v3362_v42 = vadd.f32 %v3361_v61, %v3360_v20  ;;  %v3149_v39 = vsel %vm3095_vm3, %v3081_v28, -inf  ;;  %3763 = vperm.xlu2 %7533, %v7593_v52   ;;  %3432 = vperm.xlu0 %7531, %v9880_v48   ;;  %v3363_v41 = vsel %vm3095_vm3, %v9904_v57, 0.0  ;;  %v7601_v45 = vpop.eup %7600  ;;  %v11525_v20 = vld [vmem:[#allocation20_spill] sm:$0xff]  ;;  %v6738_v61 = vld [vmem:[#allocation6 + $0x18] sm:$0xf0] }
 0x493   : > { %v3150_v53 = vmax.f32 %v11518_v6, %v3149_v39 }
 0x494   : > { %v9918_v18 = vadd.f32 %v3363_v41, %v3362_v42 }
 0x495   : > { %v3186_v26 = vsub.f32 %v9587_v19, %v3150_v53  ;;  %v3202_v12 = vsub.f32 %v9746_v2, %v3150_v53  ;;  %v3218_v48 = vsub.f32 %v3081_v28, %v3150_v53  ;;  %v2953_v59 = vpop.f32.mrf.mxu1  ;;  %v3201_v19 = vsub.f32 %v3038_v23, %v3145_v34  ;;  %v3087_v23 = vpop.f32.mrf.mxu3 }
 0x496   : > { %v3185_v2 = vsub.f32 %v9584_v8, %v3145_v34  ;;  %v2954_v15 = vadd.f32 %v2953_v59, %v9540_v40  ;;  %v3151_v28 = vsel %vm3095_vm3, %v11525_v20, -inf }
 0x497   : > { %v3244_v60 = vmul.f32 1.442695, %v3186_v26  ;;  %v3276_v24 = vmul.f32 1.442695, %v3202_v12  ;;  %v3308_v7 = vmul.f32 1.442695, %v3218_v48  ;;  %v2919_v26 = vadd.f32 %v11526_v54, %v9540_v40 }
 0x498   : > { %v3274_v25 = vmul.f32 1.442695, %v3201_v19  ;;  %v3242_v58 = vmul.f32 1.442695, %v3185_v2  ;;  %v6730_v54 = vld [vmem:[#allocation6 + $0x8] sm:$0xf0] }
 0x499   : > { %7602 = vpow2.f32 %v3244_v60  ;;  %3437 = vperm.xlu1 %7532, %v7587_v32   ;;  %v9966_v27 = vadd.f32 %v11527_v22, %v2919_v26 }
 0x49a   : > { %7604 = vpow2.f32 %v3276_v24  ;;  %3597 = vperm.xlu2 %7533, %v7591_v9   ;;  %3517 = vperm.xlu0 %7531, %v7589_v11   ;;  %v9940_v11 = vadd.f32 %v3082_v10, %v2954_v15  ;;  %v7314_v10 = vld [vmem:[#allocation6 + $0x14] sm:$0xf] }
 0x49b   : > { %7606 = vpow2.f32 %v3308_v7  ;;  %v6741_v1 = vor.u32 %v7314_v10, %v6738_v61 }
 0x49c   : > { %7608 = vrcp.f32 %v3359_v50  ;;  %v3152_v50 = vsel %vm3095_vm3, %v9936_v16, -inf  ;;  %v3154_v36 = vsel %vm3095_vm3, %v9940_v11, -inf }
 0x49d   : > { %v2956_v14 = vpop.f32.mrf.mxu1  ;;  %7610 = vpow2.f32 %v3274_v25  ;;  %v3153_v6 = vmax.f32 %v3151_v28, %v3152_v50  ;;  %3997 = vmatpush.bf16.msrb.mxu0 %v6741_v1  ;;  %v3090_v2 = vpop.f32.mrf.mxu3  ;;  %v7313_v25 = vld [vmem:[#allocation6 + $0x4] sm:$0xf0]  ;;  %v11533_v28 = vld [vmem:[#allocation65_spill] sm:$0xff] }
 0x49e   : > { %v2957_v46 = vadd.f32 %v2956_v14, %v9540_v40  ;;  %7612 = vpow2.f32 %v3242_v58 }
 0x49f   : > { %v9927_v29 = vpop.eup %7602  ;;  %7614 = vpow2.f32 %v3306_v51  ;;  %v3155_v48 = vmax.f32 %v3153_v6, %v3154_v36 }
 0x4a0   : > { %v9929_v55 = vpop.eup %7604  ;;  %v3370_v56 = vsel %vm3095_vm3, %v9927_v29, 0.0  ;;  %v3086_v8 = vadd.f32 %v3085_v0, %v2957_v46  ;;  %7616 = vrcp.f32 %v9918_v18  ;;  %v6728_v46 = vld [vmem:[#allocation6] sm:$0xf] }
 0x4a1   : > { %v9933_v32 = vpop.eup %7606  ;;  %v3371_v4 = vsel %vm3095_vm3, %v9929_v55, 0.0  ;;  %3522 = vperm.xlu1 %7532, %v7597_v21   ;;  %v3187_v30 = vsub.f32 %v11525_v20, %v3155_v48  ;;  %v3203_v63 = vsub.f32 %v9936_v16, %v3155_v48  ;;  %v6729_v44 = vor.u32 %v7313_v25, %v6728_v46 }
 0x4a2   : > { %v3372_v37 = vadd.f32 %v3371_v4, %v3370_v56  ;;  %v3159_v31 = vsel %vm3095_vm3, %v3086_v8, -inf  ;;  %3442 = vperm.xlu2 %7533, %v9900_v62   ;;  %3768 = vperm.xlu0 %7531, %v7601_v45   ;;  %v3373_v9 = vsel %vm3095_vm3, %v9933_v32, 0.0  ;;  %v7609_v42 = vpop.eup %7608  ;;  %v3162_v56 = vsel %vm3095_vm3, %v9966_v27, -inf }
 0x4a3   : > { %v3160_v49 = vmax.f32 %v11522_v33, %v3159_v31  ;;  %v7611_v53 = vpop.eup %7610  ;;  %v3246_v16 = vmul.f32 1.442695, %v3187_v30  ;;  %v11529_v33 = vld [vmem:[#allocation67_spill] sm:$0xff]  ;;  %3949 = vmatpush.bf16.msrb.mxu2 %v6729_v44 }
 0x4a4   : > { %v9949_v17 = vadd.f32 %v3373_v9, %v3372_v37  ;;  %v7613_v12 = vpop.eup %7612  ;;  %v3366_v60 = vsel %vm3095_vm3, %v7611_v53, 0.0  ;;  %v3278_v9 = vmul.f32 1.442695, %v3203_v63 }
 0x4a5   : > { %v3188_v52 = vsub.f32 %v11523_v38, %v3160_v49  ;;  %v3204_v62 = vsub.f32 %v11524_v13, %v3160_v49  ;;  %v3220_v5 = vsub.f32 %v3086_v8, %v3160_v49  ;;  %v2958_v21 = vpop.f32.mrf.mxu1  ;;  %v7615_v34 = vpop.eup %7614  ;;  %v3365_v18 = vsel %vm3095_vm3, %v7613_v12, 0.0  ;;  %v11531_v38 = vld [vmem:[#allocation23_spill] sm:$0xff] }
 0x4a6   : > { %v7617_v7 = vpop.eup %7616  ;;  %v2959_v0 = vadd.f32 %v2958_v21, %v9540_v40  ;;  %v3367_v45 = vadd.f32 %v3366_v60, %v3365_v18  ;;  %v3368_v31 = vsel %vm3095_vm3, %v7615_v34, 0.0  ;;  %v11530_v49 = vmax.f32 %v11528_v43, %v11529_v33  ;;  %v11532_v21 = vld [vmem:[#allocation35_spill] sm:$0xff] }
 0x4a7   : > { %v3248_v39 = vmul.f32 1.442695, %v3188_v52  ;;  %v3280_v3 = vmul.f32 1.442695, %v3204_v62  ;;  %v3312_v41 = vmul.f32 1.442695, %v3220_v5  ;;  %v3219_v5 = vsub.f32 %v9940_v11, %v3155_v48 }
 0x4a8   : > { %v9986_v51 = vadd.f32 %v3087_v23, %v2959_v0  ;;  %v3161_v52 = vsel %vm3095_vm3, %v11531_v38, -inf  ;;  %v3369_v23 = vadd.f32 %v3368_v31, %v3367_v45  ;;  %v7312_v11 = vld [vmem:[#allocation6 + $0x4] sm:$0xf]  ;;  %v11535_v31 = vld [vmem:[#allocation68_spill] sm:$0xff] }
 0x4a9   : > { %7618 = vpow2.f32 %v3248_v39  ;;  %3773 = vperm.xlu1 %7532, %v7609_v42   ;;  %v3163_v61 = vmax.f32 %v3161_v52, %v3162_v56  ;;  %v10006_v39 = vpop.f32.mrf.mxu2  ;;  %v3310_v6 = vmul.f32 1.442695, %v3219_v5  ;;  %v11537_v5 = vld [vmem:[#allocation43_spill] sm:$0xff] }
 0x4aa   : > { %7620 = vpow2.f32 %v3280_v3  ;;  %3527 = vperm.xlu2 %7533, %v7611_v53   ;;  %3602 = vperm.xlu0 %7531, %v9904_v57   ;;  %v9963_v59 = vpop.permute.xlu2 %3562  ;;  %v3164_v42 = vsel %vm3095_vm3, %v9986_v51, -inf }
 0x4ab   : > { %7622 = vpow2.f32 %v3312_v41  ;;  %v3165_v53 = vmax.f32 %v3163_v61, %v3164_v42 }
 0x4ac   : > { %7624 = vpow2.f32 %v3246_v16 }
 0x4ad   : > { %v2961_v24 = vpop.f32.mrf.mxu1  ;;  %7626 = vpow2.f32 %v3278_v9  ;;  %v3189_v18 = vsub.f32 %v11531_v38, %v3165_v53  ;;  %v2924_v9 = vadd.f32 %v11535_v31, %v9540_v40 }
 0x4ae   : > { %v2962_v19 = vadd.f32 %v2961_v24, %v9540_v40  ;;  %7628 = vrcp.f32 %v3369_v23 }
 0x4af   : > { %v9973_v57 = vpop.eup %7618 }
 0x4b0   : > { %v9976_v14 = vpop.eup %7620  ;;  %v3380_v47 = vsel %vm3095_vm3, %v9973_v57, 0.0  ;;  %v3091_v15 = vadd.f32 %v3090_v2, %v2962_v19  ;;  %v3250_v2 = vmul.f32 1.442695, %v3189_v18 }
 0x4b1   : > { %v9980_v58 = vpop.eup %7622  ;;  %v3381_v8 = vsel %vm3095_vm3, %v9976_v14, 0.0  ;;  %3607 = vperm.xlu1 %7532, %v7615_v34   ;;  %v6733_v34 = vor.u32 %v7312_v11, %v6730_v54  ;;  %v2668_v19 = vpop.f32.mrf.mxu2  ;;  %v11540_v54 = vld [vmem:[#allocation37_spill] sm:$0xff] }
 0x4b2   : > { %v3382_v4 = vadd.f32 %v3381_v8, %v3380_v47  ;;  %v3169_v37 = vsel %vm3095_vm3, %v3091_v15, -inf  ;;  %3778 = vperm.xlu2 %7533, %v7617_v7   ;;  %3447 = vperm.xlu0 %7531, %v7613_v12   ;;  %v3383_v35 = vsel %vm3095_vm3, %v9980_v58, 0.0  ;;  %v7625_v26 = vpop.eup %7624  ;;  %v10011_v12 = vpop.f32.mrf.mxu0  ;;  %v3221_v8 = vsub.f32 %v9986_v51, %v3165_v53 }
 0x4b3   : > { %v3170_v50 = vmax.f32 %v11530_v49, %v3169_v37  ;;  %v7627_v22 = vpop.eup %7626  ;;  %3998 = vmatpush.bf16.msrb.mxu0 %v6733_v34  ;;  %v3375_v24 = vsel %vm3095_vm3, %v7625_v26, 0.0 }
 0x4b4   : > { %v9997_v13 = vadd.f32 %v3383_v35, %v3382_v4  ;;  %v9999_v62 = vpop.permute.xlu2 %3567  ;;  %v7629_v60 = vpop.eup %7628  ;;  %v3376_v7 = vsel %vm3095_vm3, %v7627_v22, 0.0  ;;  %v11534_v4 = vld [vmem:[#allocation56_spill] sm:$0xff]  ;;  %v11536_v35 = vld [vmem:[#allocation22_spill] sm:$0xff]  ;;  %v3314_v23 = vmul.f32 1.442695, %v3221_v8 }
 0x4b5   : > { %v3190_v20 = vsub.f32 %v11532_v21, %v3170_v50  ;;  %v3206_v36 = vsub.f32 %v11533_v28, %v3170_v50  ;;  %v3222_v10 = vsub.f32 %v3091_v15, %v3170_v50  ;;  %v3377_v15 = vadd.f32 %v3376_v7, %v3375_v24  ;;  %v2963_v25 = vpop.f32.mrf.mxu1  ;;  %v11541_v7 = vld [vmem:[#allocation29_spill] sm:$0xff] }
 0x4b6   : > { %v2964_v51 = vadd.f32 %v2963_v25, %v9540_v40  ;;  %v3053_v21 = vadd.f32 %v11537_v5, %v2924_v9  ;;  %v11538_v40 = vld [vmem:[#allocation57_spill] sm:$0xff] }
 0x4b7   : > { %v3252_v3 = vmul.f32 1.442695, %v3190_v20  ;;  %v3284_v41 = vmul.f32 1.442695, %v3206_v36  ;;  %v3316_v1 = vmul.f32 1.442695, %v3222_v10  ;;  %v3092_v20 = vpop.f32.mrf.mxu3 }
 0x4b8   : > { %v10045_v10 = vadd.f32 %v3092_v20, %v2964_v51 }
 0x4b9   : > { %7630 = vpow2.f32 %v3252_v3  ;;  %3452 = vperm.xlu1 %7532, %v9927_v29   ;;  %v3205_v29 = vsub.f32 %v9966_v27, %v3165_v53  ;;  %v2670_v36 = vpop.f32.mrf.mxu2  ;;  %v11539_v53 = vld [vmem:[#allocation34_spill] sm:$0xff] }
 0x4ba   : > { %7632 = vpow2.f32 %v3284_v41  ;;  %3612 = vperm.xlu2 %7533, %v9933_v32   ;;  %3532 = vperm.xlu0 %7531, %v9929_v55   ;;  %v2797_v33 = vpop.f32.mrf.mxu0 }
 0x4bb   : > { %7634 = vpow2.f32 %v3316_v1  ;;  %v3282_v27 = vmul.f32 1.442695, %v3205_v29 }
 0x4bc   : > { %v10013_v48 = vpop.permute.xlu2 %3412  ;;  %7636 = vpow2.f32 %v3310_v6  ;;  %v3172_v6 = vsel %vm3095_vm3, %v3053_v21, -inf }
 0x4bd   : > { %7638 = vrcp.f32 %v9949_v17 }
 0x4be   : > { %7640 = vpow2.f32 %v3250_v2 }
 0x4bf   : > { %v10017_v32 = vpop.eup %7630  ;;  %7642 = vpow2.f32 %v3282_v27 }
 0x4c0   : > { %v10019_v55 = vpop.eup %7632  ;;  %v3390_v30 = vsel %vm3095_vm3, %v10017_v32, 0.0 }
 0x4c1   : > { %v10025_v0 = vpop.eup %7634  ;;  %v3391_v63 = vsel %vm3095_vm3, %v10019_v55, 0.0  ;;  %3537 = vperm.xlu1 %7532, %v7627_v22   ;;  %v3174_v22 = vsel %vm3095_vm3, %v10045_v10, -inf }
 0x4c2   : > { %v3392_v45 = vadd.f32 %v3391_v63, %v3390_v30  ;;  %3457 = vperm.xlu2 %7533, %v7625_v26   ;;  %3783 = vperm.xlu0 %7531, %v7629_v60   ;;  %v7637_v47 = vpop.eup %7636  ;;  %v3393_v46 = vsel %vm3095_vm3, %v10025_v0, 0.0  ;;  %v2799_v60 = vpop.f32.mrf.mxu0  ;;  %v2669_v30 = vadd.f32 %v2668_v19, %v11541_v7  ;;  %v2671_v63 = vadd.f32 %v2670_v36, %v11541_v7 }
 0x4c3   : > { %v3483_v56 = vpop.permute.xlu1 %3482  ;;  %v3378_v49 = vsel %vm3095_vm3, %v7637_v47, 0.0  ;;  %v7639_v52 = vpop.eup %7638 }
 0x4c4   : > { %v10033_v44 = vadd.f32 %v3393_v46, %v3392_v45  ;;  %v10035_v16 = vpop.permute.xlu2 %3497  ;;  %v3656_v37 = vmul.f32 %v3483_v56, %v11534_v4  ;;  %v3403_v17 = vpop.permute.xlu0 %3402  ;;  %v3379_v50 = vadd.f32 %v3378_v49, %v3377_v15  ;;  %v11542_v15 = vld [vmem:[#allocation36_spill] sm:$0xff]  ;;  %v11543_v56 = vld [vmem:[#allocation58_spill] sm:$0xff]  ;;  %v2800_v31 = vadd.f32 %v2799_v60, %v2671_v63 }
 0x4c5   : > { %v3640_v43 = vmul.f32 %v3403_v17, %v11536_v35  ;;  %v7641_v28 = vpop.eup %7640  ;;  %v3642_v46 = vmul.f32 %v10013_v48, %v11542_v15 }
 0x4c6   : > { %7644 = vrcp.f32 %v3379_v50  ;;  %v7643_v42 = vpop.eup %7642  ;;  %v3385_v26 = vsel %vm3095_vm3, %v7641_v28, 0.0  ;;  %v3673_v48 = vmul.f32 %v9999_v62, %v2800_v31 }
 0x4c7   : > { %v3688_v38 = vadd.f32 %v3656_v37, %v3640_v43  ;;  %7646 = vpow2.f32 %v3314_v23  ;;  %v3386_v34 = vsel %vm3095_vm3, %v7643_v42, 0.0  ;;  %v2673_v37 = vpop.f32.mrf.mxu2 }
 0x4c8   : > { %v3387_v27 = vadd.f32 %v3386_v34, %v3385_v26  ;;  %v2674_v26 = vadd.f32 %v2673_v37, %v11541_v7 }
 0x4c9   : > { %3788 = vperm.xlu1 %7532, %v7639_v52  }
 0x4ca   : > { %3542 = vperm.xlu2 %7533, %v9976_v14   ;;  %3617 = vperm.xlu0 %7531, %v7637_v47   ;;  %v3171_v14 = vsel %vm3095_vm3, %v11540_v54, -inf  ;;  %v2802_v49 = vpop.f32.mrf.mxu0 }
 0x4cb   : > { %v3488_v61 = vpop.permute.xlu1 %3487  ;;  %v3173_v29 = vmax.f32 %v3171_v14, %v3172_v6 }
 0x4cc   : > { %v10047_v3 = vpop.permute.xlu2 %3748  ;;  %v3657_v41 = vmul.f32 %v3488_v61, %v11538_v40  ;;  %v3408_v1 = vpop.permute.xlu0 %3407 }
 0x4cd   : > { %v3641_v11 = vmul.f32 %v3408_v1, %v11539_v53  ;;  %v7645_v24 = vpop.eup %7644  ;;  %v3175_v45 = vmax.f32 %v3173_v29, %v3174_v22 }
 0x4ce   : > { %v7647_v2 = vpop.eup %7646 }
 0x4cf   : > { %v3690_v18 = vadd.f32 %v3657_v41, %v3641_v11  ;;  %v3388_v19 = vsel %vm3095_vm3, %v7647_v2, 0.0  ;;  %v3191_v9 = vsub.f32 %v11540_v54, %v3175_v45  ;;  %v11545_v11 = vld [vmem:[#allocation38_spill] sm:$0xff] }
 0x4d0   : > { %v3389_v17 = vadd.f32 %v3388_v19, %v3387_v27 }
 0x4d1   : > { %3622 = vperm.xlu1 %7532, %v9980_v58   ;;  %v2798_v58 = vadd.f32 %v2797_v33, %v2669_v30  ;;  %v3254_v50 = vmul.f32 1.442695, %v3191_v9  ;;  %v3691_v52 = vadd.f32 %v3690_v18, %v3673_v48  ;;  %v11548_v48 = vld [vmem:[#allocation42_spill] sm:$0xff] }
 0x4d2   : > { %3793 = vperm.xlu2 %7533, %v7645_v24   ;;  %3462 = vperm.xlu0 %7531, %v9973_v57   ;;  %v3207_v57 = vsub.f32 %v3053_v21, %v3175_v45  ;;  %7648 = vrcp.f32 %v3389_v17  ;;  %v2804_v41 = vpop.f32.mrf.mxu0  ;;  %v2803_v24 = vadd.f32 %v2802_v49, %v2674_v26 }
 0x4d3   : > { %v3493_v47 = vpop.permute.xlu1 %3492  ;;  %v3672_v43 = vmul.f32 %v9963_v59, %v2798_v58  ;;  %7650 = vrcp.f32 %v9997_v13  ;;  %v3223_v59 = vsub.f32 %v10045_v10, %v3175_v45  ;;  %v11544_v10 = vld [vmem:[#allocation59_spill] sm:$0xff] }
 0x4d4   : > { %v10064_v25 = vpop.permute.xlu2 %3582  ;;  %v3658_v8 = vmul.f32 %v3493_v47, %v11543_v56  ;;  %v3739_v4 = vpop.permute.xlu0 %3738  ;;  %v3286_v33 = vmul.f32 1.442695, %v3207_v57  ;;  %7652 = vpow2.f32 %v3254_v50  ;;  %v3659_v53 = vmul.f32 %v10035_v16, %v11544_v10  ;;  %v11547_v47 = vld [vmem:[#allocation31_spill] sm:$0xff]  ;;  %v11549_v50 = vld [vmem:[#allocation60_spill] sm:$0xff] }
 0x4d5   : > { %v3689_v51 = vadd.f32 %v3688_v38, %v3672_v43  ;;  %v2675_v38 = vpop.f32.mrf.mxu2 }
 0x4d6   : > { %v10069_v35 = vadd.f32 %v3658_v8, %v3642_v46  ;;  %7654 = vpow2.f32 %v3286_v33  ;;  %v2676_v16 = vadd.f32 %v2675_v38, %v11541_v7 }
 0x4d7   : > { %v3816_v5 = vmul.f32 %v3739_v4, %v3689_v51  ;;  %v6848_v4 = vld [vmem:[%s11318_s9 + $0x70] sm:$0xf] }
 0x4d8   : > { %v2805_v8 = vadd.f32 %v2804_v41, %v2676_v16 }
 0x4d9   : > { %3467 = vperm.xlu1 %7532, %v7641_v28   ;;  %v7649_v28 = vpop.eup %7648 }
 0x4da   : > { %3627 = vperm.xlu2 %7533, %v7647_v2   ;;  %3547 = vperm.xlu0 %7531, %v7643_v42   ;;  %v7651_v61 = vpop.eup %7650  ;;  %v3318_v42 = vmul.f32 1.442695, %v3223_v59  ;;  %v11546_v2 = vld [vmem:[#allocation40_spill] sm:$0xff]  ;;  %v2807_v46 = vpop.f32.mrf.mxu0 }
 0x4db   : > { %v3744_v23 = vpop.permute.xlu1 %3743  ;;  %v7653_v40 = vpop.eup %7652 }
 0x4dc   : > { %v10074_v20 = vpop.permute.xlu2 %3427  ;;  %v3817_v21 = vmul.f32 %v3744_v23, %v3691_v52  ;;  %v3573_v36 = vpop.permute.xlu0 %3572  ;;  %7656 = vpow2.f32 %v3318_v42  ;;  %v3395_v22 = vsel %vm3095_vm3, %v7653_v40, 0.0 }
 0x4dd   : > { %v7655_v6 = vpop.eup %7654  ;;  %v2678_v18 = vpop.f32.mrf.mxu2  ;;  %7658 = vrcp.f32 %v10033_v44  ;;  %v3674_v45 = vmul.f32 %v3573_v36, %v2803_v24  ;;  %v7343_v44 = vld [vmem:[%s11318_s9 + $0x74] sm:$0xf0]  ;;  %v3645_v49 = vmul.f32 %v10074_v20, %v11548_v48 }
 0x4de   : > { %v3832_v62 = vpack.c.bf16 %v3817_v21, %v3816_v5  ;;  %v6849_v58 = vor.u32 %v7343_v44, %v6848_v4  ;;  %v7359_v21 = vld [vmem:[%s11318_s9 + $0xf4] sm:$0xf0]  ;;  %v2679_v36 = vadd.f32 %v2678_v18, %v11541_v7 }
 0x4df   : > { %v3693_v17 = vadd.f32 %v10069_v35, %v3674_v45  ;;  %v6912_v35 = vld [vmem:[%s11318_s9 + $0xf0] sm:$0xf]  ;;  %v7391_v45 = vld [vmem:[#allocation8 + $0xf4] sm:$0xf0] }
 0x4e0   : > { %3950 = vmatmul.bf16.vlgmr.msrb.gmra.mxu2 %v3832_v62  ;;  %3999 = vmatmul.bf16.vlgmr.msrb.gmra.mxu0 %v3832_v62  ;;  %v6913_v62 = vor.u32 %v7359_v21, %v6912_v35  ;;  %v7339_v48 = vld [vmem:[%s11318_s9 + $0x54] sm:$0xf0] }
 0x4e1   : > { %3803 = vperm.xlu1 %7532, %v7649_v28   ;;  %4286 = vmatpush.bf16.msra.mxu2 %v6849_v58  ;;  %v3818_v33 = vmul.f32 %v10047_v3, %v3693_v17  ;;  %v11553_v17 = vld [vmem:[#allocation33_spill] sm:$0xff] }
 0x4e2   : > { %3472 = vperm.xlu2 %7533, %v10017_v32   ;;  %3798 = vperm.xlu0 %7531, %v7651_v61   ;;  %v3396_v32 = vsel %vm3095_vm3, %v7655_v6, 0.0  ;;  %v7657_v60 = vpop.eup %7656  ;;  %v2809_v28 = vpop.f32.mrf.mxu0  ;;  %v2808_v61 = vadd.f32 %v2807_v46, %v2679_v36  ;;  %v7357_v46 = vld [vmem:[%s11318_s9 + $0xe4] sm:$0xf0] }
 0x4e3   : > { %v3578_v13 = vpop.permute.xlu1 %3577  ;;  %v3397_v29 = vadd.f32 %v3396_v32, %v3395_v22  ;;  %v7659_v37 = vpop.eup %7658  ;;  %4335 = vmatpush.bf16.msra.mxu0 %v6913_v62 }
 0x4e4   : > { %v3418_v1 = vpop.permute.xlu0 %3417  ;;  %v10081_v14 = vpop.permute.xlu2 %3512  ;;  %v3675_v31 = vmul.f32 %v3578_v13, %v2805_v8  ;;  %v3676_v41 = vmul.f32 %v10064_v25, %v2808_v61 }
 0x4e5   : > { %v3643_v54 = vmul.f32 %v3418_v1, %v11545_v11  ;;  %v2680_v43 = vpop.f32.mrf.mxu2  ;;  %v7341_v11 = vld [vmem:[%s11318_s9 + $0x64] sm:$0xf0] }
 0x4e6   : > { %v2681_v59 = vadd.f32 %v2680_v43, %v11541_v7  ;;  %v6832_v43 = vld [vmem:[%s11318_s9 + $0x50] sm:$0xf] }
 0x4e7   : > { %v3694_v34 = vadd.f32 %v3659_v53, %v3643_v54  ;;  %v6840_v53 = vld [vmem:[%s11318_s9 + $0x60] sm:$0xf] }
 0x4e8   : > { %v2810_v13 = vadd.f32 %v2809_v28, %v2681_v59  ;;  %v6841_v22 = vor.u32 %v7341_v11, %v6840_v53 }
 0x4e9   : > { %3552 = vperm.xlu1 %7532, %v10019_v55   ;;  %v3398_v55 = vsel %vm3095_vm3, %v7657_v60, 0.0  ;;  %v3695_v57 = vadd.f32 %v3694_v34, %v3675_v31 }
 0x4ea   : > { %3557 = vperm.xlu2 %7533, %v7655_v6   ;;  %3632 = vperm.xlu0 %7531, %v10025_v0   ;;  %v3399_v56 = vadd.f32 %v3398_v55, %v3397_v29  ;;  %v2812_v32 = vpop.f32.mrf.mxu0  ;;  %v11550_v29 = vld [vmem:[#allocation32_spill] sm:$0xff] }
 0x4eb   : > { %v3423_v30 = vpop.permute.xlu1 %3422  ;;  %4287 = vmatpush.bf16.msra.mxu2 %v6841_v22  ;;  %v3662_v24 = vmul.f32 %v10081_v14, %v11550_v29  ;;  %v6976_v55 = vld [vmem:[#allocation8 + $0x70] sm:$0xf]  ;;  %v6824_v22 = vld [vmem:[%s11318_s9 + $0x40] sm:$0xf] }
 0x4ec   : > { %v3644_v63 = vmul.f32 %v3423_v30, %v11546_v2  ;;  %v3503_v27 = vpop.permute.xlu0 %3502  ;;  %v3764_v19 = vpop.permute.xlu2 %3763  ;;  %7660 = vrcp.f32 %v3399_v56  ;;  %v11551_v30 = vld [vmem:[#allocation44_spill] sm:$0xff]  ;;  %v7375_v56 = vld [vmem:[#allocation8 + $0x74] sm:$0xf0]  ;;  %v11556_v29 = vld [vmem:[#allocation18_spill] sm:$0xff] }
 0x4ed   : > { %v3660_v15 = vmul.f32 %v3503_v27, %v11547_v47  ;;  %v2683_v54 = vpop.f32.mrf.mxu2  ;;  %v7040_v27 = vld [vmem:[#allocation8 + $0xf0] sm:$0xf]  ;;  %v6904_v47 = vld [vmem:[%s11318_s9 + $0xe0] sm:$0xf]  ;;  %v6977_v14 = vor.u32 %v7375_v56, %v6976_v55 }
 0x4ee   : > { %v6905_v8 = vor.u32 %v7357_v46, %v6904_v47  ;;  %v11557_v46 = vld [vmem:[#allocation61_spill] sm:$0xff] }
 0x4ef   : > { %v3696_v0 = vadd.f32 %v3660_v15, %v3644_v63  ;;  %v7041_v15 = vor.u32 %v7391_v45, %v7040_v27  ;;  %4728 = vmatpush.bf16.msra.mxu1 %v6977_v14  ;;  %v7353_v27 = vld [vmem:[%s11318_s9 + $0xc4] sm:$0xf0] }
 0x4f0   : > { %4336 = vmatpush.bf16.msra.mxu0 %v6905_v8  ;;  %v11558_v8 = vld [vmem:[#allocation49_spill] sm:$0xff] }
 0x4f1   : > { %3637 = vperm.xlu1 %7532, %v7657_v60   ;;  %v3697_v6 = vadd.f32 %v3696_v0, %v3676_v41  ;;  %4777 = vmatpush.bf16.msra.mxu3 %v7041_v15 }
 0x4f2   : > { %3808 = vperm.xlu2 %7533, %v7659_v37   ;;  %3477 = vperm.xlu0 %7531, %v7653_v40   ;;  %v7661_v38 = vpop.eup %7660  ;;  %v2814_v44 = vpop.f32.mrf.mxu0 }
 0x4f3   : > { %v3508_v9 = vpop.permute.xlu1 %3507 }
 0x4f4   : > { %v3661_v51 = vmul.f32 %v3508_v9, %v11549_v50  ;;  %v3754_v52 = vpop.permute.xlu0 %3753  ;;  %v10112_v3 = vpop.permute.xlu2 %3597  ;;  %v2684_v50 = vadd.f32 %v2683_v54, %v11541_v7 }
 0x4f5   : > { %v3819_v23 = vmul.f32 %v3754_v52, %v3695_v57  ;;  %v2685_v0 = vpop.f32.mrf.mxu2 }
 0x4f6   : > { %v3698_v5 = vadd.f32 %v3661_v51, %v3645_v49  ;;  %v6833_v49 = vor.u32 %v7339_v48, %v6832_v43  ;;  %v2686_v51 = vadd.f32 %v2685_v0, %v11541_v7  ;;  %v2813_v62 = vadd.f32 %v2812_v32, %v2684_v50  ;;  %v7337_v32 = vld [vmem:[%s11318_s9 + $0x44] sm:$0xf0]  ;;  %v6816_v50 = vld [vmem:[%s11318_s9 + $0x30] sm:$0xf] }
 0x4f7   : > { %v3833_v20 = vpack.c.bf16 %v3819_v23, %v3818_v33  ;;  %v11554_v33 = vld [vmem:[#allocation48_spill] sm:$0xff] }
 0x4f8   : > { %4288 = vmatpush.bf16.msra.mxu2 %v6833_v49 }
 0x4f9   : > { %3955 = vmatmul.bf16.gmra.mxu2 %v3833_v20  ;;  %4004 = vmatmul.bf16.gmra.mxu0 %v3833_v20  ;;  %v2815_v20 = vadd.f32 %v2814_v44, %v2686_v51  ;;  %v11559_v44 = vld [vmem:[#allocation50_spill] sm:$0xff]  ;;  %v7335_v51 = vld [vmem:[%s11318_s9 + $0x34] sm:$0xf0] }
 0x4fa   : > { %3813 = vperm.xlu0 %7531, %v7661_v38   ;;  %v2817_v59 = vpop.f32.mrf.mxu0 }
 0x4fb   : > { %v3759_v42 = vpop.permute.xlu1 %3758  ;;  %v3679_v38 = vmul.f32 %v10112_v3, %v2815_v20 }
 0x4fc   : > { %v3588_v40 = vpop.permute.xlu0 %3587  ;;  %v3820_v26 = vmul.f32 %v3759_v42, %v3697_v6  ;;  %v3443_v25 = vpop.permute.xlu2 %3442 }
 0x4fd   : > { %v3677_v1 = vmul.f32 %v3588_v40, %v2810_v13  ;;  %v3648_v23 = vmul.f32 %v3443_v25, %v11554_v33  ;;  %v2688_v36 = vpop.f32.mrf.mxu2  ;;  %v6896_v13 = vld [vmem:[%s11318_s9 + $0xd0] sm:$0xf]  ;;  %v7355_v40 = vld [vmem:[%s11318_s9 + $0xd4] sm:$0xf0] }
 0x4fe   : > { %v6897_v6 = vor.u32 %v7355_v40, %v6896_v13 }
 0x4ff   : > { %v3699_v10 = vadd.f32 %v3698_v5, %v3677_v1  ;;  %v11555_v5 = vld [vmem:[#allocation24_spill] sm:$0xff] }
 0x500   : > { %4337 = vmatpush.bf16.msra.mxu0 %v6897_v6  ;;  %v7032_v6 = vld [vmem:[#allocation8 + $0xe0] sm:$0xf] }
 0x501   : > { %v3821_v34 = vmul.f32 %v3764_v19, %v3699_v10  ;;  %v11552_v19 = vld [vmem:[#allocation46_spill] sm:$0xff] }
 0x503   : > { %v3593_v18 = vpop.permute.xlu1 %3592  ;;  %v3834_v60 = vpack.c.bf16 %v3821_v34, %v3820_v26  ;;  %v2819_v34 = vpop.f32.mrf.mxu0 }
 0x504   : > { %v3433_v16 = vpop.permute.xlu0 %3432  ;;  %v3528_v9 = vpop.permute.xlu2 %3527  ;;  %v3678_v61 = vmul.f32 %v3593_v18, %v2813_v62 }
 0x505   : > { %v3646_v2 = vmul.f32 %v3433_v16, %v11551_v30  ;;  %v2690_v3 = vpop.f32.mrf.mxu2  ;;  %v2689_v30 = vadd.f32 %v2688_v36, %v11541_v7 }
 0x506   : > { %v2691_v15 = vadd.f32 %v2690_v3, %v11541_v7 }
 0x507   : > { %v3700_v63 = vadd.f32 %v3662_v24, %v3646_v2  ;;  %v2651_v24 = vadd.f32 %v11556_v29, %v11541_v7  ;;  %v2818_v56 = vadd.f32 %v2817_v59, %v2689_v30 }
 0x508   : > { %v2820_v43 = vadd.f32 %v2819_v34, %v2691_v15  ;;  %v7373_v34 = vld [vmem:[#allocation8 + $0x64] sm:$0xf0] }
 0x509   : > { %3960 = vmatmul.bf16.gmra.mxu2 %v3834_v60  ;;  %4009 = vmatmul.bf16.gmra.mxu0 %v3834_v60  ;;  %v3701_v41 = vadd.f32 %v3700_v63, %v3678_v61  ;;  %v6825_v60 = vor.u32 %v7337_v32, %v6824_v22  ;;  %v6888_v63 = vld [vmem:[%s11318_s9 + $0xc0] sm:$0xf]  ;;  %v2780_v55 = vadd.f32 %v11557_v46, %v2651_v24  ;;  %v11563_v32 = vld [vmem:[#allocation51_spill] sm:$0xff] }
 0x50a   : > { %v6889_v47 = vor.u32 %v7353_v27, %v6888_v63 }
 0x50b   : > { %v3438_v4 = vpop.permute.xlu1 %3437  ;;  %4289 = vmatpush.bf16.msra.mxu2 %v6825_v60  ;;  %v2822_v45 = vpop.f32.mrf.mxu0 }
 0x50c   : > { %v3647_v58 = vmul.f32 %v3438_v4, %v11552_v19  ;;  %v3518_v37 = vpop.permute.xlu0 %3517  ;;  %v3779_v42 = vpop.permute.xlu2 %3778  ;;  %4338 = vmatpush.bf16.msra.mxu0 %v6889_v47 }
 0x50d   : > { %v3663_v31 = vmul.f32 %v3518_v37, %v11553_v17  ;;  %v2693_v2 = vpop.f32.mrf.mxu2  ;;  %v3665_v37 = vmul.f32 %v3528_v9, %v2780_v55  ;;  %v11561_v9 = vld [vmem:[#allocation62_spill] sm:$0xff] }
 0x50e   : > { %v2694_v13 = vadd.f32 %v2693_v2, %v11541_v7 }
 0x50f   : > { %v3702_v57 = vadd.f32 %v3663_v31, %v3647_v58  ;;  %v11560_v31 = vld [vmem:[#allocation25_spill] sm:$0xff] }
 0x510   : > { %v2823_v22 = vadd.f32 %v2822_v45, %v2694_v13  ;;  %v6808_v45 = vld [vmem:[%s11318_s9 + $0x20] sm:$0xf] }
 0x511   : > { %v3703_v1 = vadd.f32 %v3702_v57, %v3679_v38 }
 0x513   : > { %v3523_v52 = vpop.permute.xlu1 %3522  ;;  %v2824_v59 = vpop.f32.mrf.mxu0 }
 0x514   : > { %v3664_v35 = vmul.f32 %v3523_v52, %v11555_v5  ;;  %v3769_v21 = vpop.permute.xlu0 %3768  ;;  %v10155_v18 = vpop.permute.xlu2 %3612  ;;  %v6817_v52 = vor.u32 %v7335_v51, %v6816_v50  ;;  %v2656_v5 = vadd.f32 %v11561_v9, %v11541_v7  ;;  %v6872_v51 = vld [vmem:[%s11318_s9 + $0xa0] sm:$0xf]  ;;  %v11567_v9 = vld [vmem:[#allocation27_spill] sm:$0xff] }
 0x515   : > { %v3822_v53 = vmul.f32 %v3769_v21, %v3701_v41  ;;  %v11562_v41 = vld [vmem:[#allocation26_spill] sm:$0xff]  ;;  %v3682_v2 = vmul.f32 %v10155_v18, %v2823_v22 }
 0x516   : > { %v3704_v28 = vadd.f32 %v3664_v35, %v3648_v23  ;;  %4290 = vmatpush.bf16.msra.mxu2 %v6817_v52  ;;  %v2695_v35 = vpop.f32.mrf.mxu2  ;;  %v7349_v52 = vld [vmem:[%s11318_s9 + $0xa4] sm:$0xf0] }
 0x517   : > { %v2696_v40 = vadd.f32 %v2695_v35, %v11541_v7  ;;  %v6873_v35 = vor.u32 %v7349_v52, %v6872_v51 }
 0x51b   : > { %v3774_v10 = vpop.permute.xlu1 %3773  ;;  %v2827_v47 = vpop.f32.mrf.mxu0 }
 0x51c   : > { %v3823_v11 = vmul.f32 %v3774_v10, %v3703_v1  ;;  %v3603_v54 = vpop.permute.xlu0 %3602  ;;  %v3458_v4 = vpop.permute.xlu2 %3457  ;;  %v2785_v1 = vadd.f32 %v11562_v41, %v2656_v5  ;;  %v7389_v10 = vld [vmem:[#allocation8 + $0xe4] sm:$0xf0] }
 0x51d   : > { %v3680_v17 = vmul.f32 %v3603_v54, %v2818_v56  ;;  %v6880_v54 = vld [vmem:[%s11318_s9 + $0xb0] sm:$0xf]  ;;  %v3651_v60 = vmul.f32 %v3458_v4, %v11563_v32  ;;  %v7333_v56 = vld [vmem:[%s11318_s9 + $0x24] sm:$0xf0] }
 0x51e   : > { %v3835_v26 = vpack.c.bf16 %v3823_v11, %v3822_v53  ;;  %v7033_v53 = vor.u32 %v7389_v10, %v7032_v6  ;;  %v2698_v30 = vpop.f32.mrf.mxu2  ;;  %v6864_v32 = vld [vmem:[%s11318_s9 + $0x90] sm:$0xf] }
 0x51f   : > { %v3705_v33 = vadd.f32 %v3704_v28, %v3680_v17 }
 0x520   : > { %3965 = vmatmul.bf16.gmra.mxu2 %v3835_v26  ;;  %4014 = vmatmul.bf16.gmra.mxu0 %v3835_v26  ;;  %v6968_v26 = vld [vmem:[#allocation8 + $0x60] sm:$0xf] }
 0x521   : > { %v3824_v62 = vmul.f32 %v3779_v42, %v3705_v33  ;;  %v7351_v42 = vld [vmem:[%s11318_s9 + $0xb4] sm:$0xf0]  ;;  %4778 = vmatpush.bf16.msra.mxu3 %v7033_v53  ;;  %v6969_v29 = vor.u32 %v7373_v34, %v6968_v26  ;;  %v2699_v33 = vadd.f32 %v2698_v30, %v11541_v7  ;;  %v7329_v30 = vld [vmem:[%s11318_s9 + $0x4] sm:$0xf0] }
 0x522   : > { %v6881_v3 = vor.u32 %v7351_v42, %v6880_v54 }
 0x523   : > { %v3608_v25 = vpop.permute.xlu1 %3607  ;;  %4729 = vmatpush.bf16.msra.mxu1 %v6969_v29 }
 0x524   : > { %v3448_v16 = vpop.permute.xlu0 %3447  ;;  %v3681_v23 = vmul.f32 %v3608_v25, %v2820_v43  ;;  %v3543_v61 = vpop.permute.xlu2 %3542  ;;  %4339 = vmatpush.bf16.msra.mxu0 %v6881_v3 }
 0x525   : > { %v3649_v14 = vmul.f32 %v3448_v16, %v11558_v8  ;;  %v2825_v16 = vadd.f32 %v2824_v59, %v2696_v40 }
 0x526   : > { %v2700_v43 = vpop.f32.mrf.mxu2 }
 0x527   : > { %v3706_v48 = vadd.f32 %v3665_v37, %v3649_v14  ;;  %v11565_v37 = vld [vmem:[#allocation52_spill] sm:$0xff]  ;;  %v2701_v50 = vadd.f32 %v2700_v43, %v11541_v7  ;;  %v11571_v43 = vld [vmem:[#allocation55_spill] sm:$0xff] }
 0x528   : > { %4340 = vmatpush.bf16.msra.mxu0 %v6873_v35 }
 0x529   : > { %v3707_v36 = vadd.f32 %v3706_v48, %v3681_v23 }
 0x52b   : > { %v3453_v0 = vpop.permute.xlu1 %3452 }
 0x52c   : > { %v3650_v19 = vmul.f32 %v3453_v0, %v11559_v44  ;;  %v3533_v58 = vpop.permute.xlu0 %3532  ;;  %v3794_v55 = vpop.permute.xlu2 %3793  ;;  %v6809_v0 = vor.u32 %v7333_v56, %v6808_v45  ;;  %v7345_v56 = vld [vmem:[%s11318_s9 + $0x84] sm:$0xf0] }
 0x52d   : > { %v3666_v57 = vmul.f32 %v3533_v58, %v11560_v31  ;;  %v11566_v31 = vld [vmem:[#allocation63_spill] sm:$0xff] }
 0x52e   : > { %4291 = vmatpush.bf16.msra.mxu2 %v6809_v0  ;;  %v2703_v34 = vpop.f32.mrf.mxu2  ;;  %v2666_v0 = vadd.f32 %v10006_v39, %v11541_v7 }
 0x52f   : > { %v3708_v49 = vadd.f32 %v3666_v57, %v3650_v19  ;;  %v11564_v19 = vld [vmem:[#allocation19_spill] sm:$0xff]  ;;  %v2661_v57 = vadd.f32 %v11566_v31, %v11541_v7 }
 0x530   : > { %v3668_v58 = vmul.f32 %v3543_v61, %v11564_v19  ;;  %v2828_v61 = vadd.f32 %v2827_v47, %v2699_v33 }
 0x531   : > { %v3709_v15 = vadd.f32 %v3708_v49, %v3682_v2  ;;  %v2829_v49 = vpop.f32.mrf.mxu0  ;;  %v2790_v5 = vadd.f32 %v11567_v9, %v2661_v57  ;;  %v6856_v2 = vld [vmem:[%s11318_s9 + $0x80] sm:$0xf]  ;;  %v7387_v9 = vld [vmem:[#allocation8 + $0xd4] sm:$0xf0] }
 0x533   : > { %v3538_v21 = vpop.permute.xlu1 %3537 }
 0x534   : > { %v3784_v20 = vpop.permute.xlu0 %3783  ;;  %v3667_v11 = vmul.f32 %v3538_v21, %v2785_v1  ;;  %v11568_v21 = vld [vmem:[#allocation53_spill] sm:$0xff]  ;;  %v6800_v1 = vld [vmem:[%s11318_s9 + $0x10] sm:$0xf] }
 0x535   : > { %v3825_v38 = vmul.f32 %v3784_v20, %v3707_v36  ;;  %v3628_v20 = vpop.permute.xlu2 %3627 }
 0x536   : > { %v3710_v63 = vadd.f32 %v3667_v11, %v3651_v60  ;;  %v7347_v60 = vld [vmem:[%s11318_s9 + $0x94] sm:$0xf0] }
 0x537   : > { %v3836_v28 = vpack.c.bf16 %v3825_v38, %v3824_v62  ;;  %v2830_v38 = vadd.f32 %v2829_v49, %v2701_v50 }
 0x539   : > { %3970 = vmatmul.bf16.gmra.mxu2 %v3836_v28  ;;  %4019 = vmatmul.bf16.gmra.mxu0 %v3836_v28  ;;  %v3685_v40 = vmul.f32 %v3628_v20, %v2830_v38  ;;  %v7331_v28 = vld [vmem:[%s11318_s9 + $0x14] sm:$0xf0]  ;;  %v2832_v6 = vpop.f32.mrf.mxu0 }
 0x53a   : > { %v6801_v53 = vor.u32 %v7331_v28, %v6800_v1  ;;  %v3856_v1 = vld [vmem:[%s11572_s30] sm:$0x3] }
 0x53b   : > { %v3789_v25 = vpop.permute.xlu1 %3788 }
 0x53c   : > { %v3618_v24 = vpop.permute.xlu0 %3617  ;;  %v3826_v8 = vmul.f32 %v3789_v25, %v3709_v15  ;;  %4292 = vmatpush.bf16.msra.mxu2 %v6801_v53  ;;  %v11570_v15 = vld [vmem:[#allocation28_spill] sm:$0xff]  ;;  %v10253_v53 = vperm.slane %v3856_v1, 0 }
 0x53d   : > { %v3683_v27 = vmul.f32 %v3618_v24, %v2825_v16  ;;  %v3473_v25 = vpop.permute.xlu2 %3472  ;;  %v6865_v16 = vor.u32 %v7347_v60, %v6864_v32  ;;  %v6792_v24 = vld [vmem:[%s11318_s9] sm:$0xf] }
 0x53e   : > { %v6793_v45 = vor.u32 %v7329_v30, %v6792_v24 }
 0x53f   : > { %v3711_v46 = vadd.f32 %v3710_v63, %v3683_v27  ;;  %4341 = vmatpush.bf16.msra.mxu0 %v6865_v16  ;;  %v11569_v27 = vld [vmem:[#allocation54_spill] sm:$0xff] }
 0x540   : > { %v3654_v47 = vmul.f32 %v3473_v25, %v11569_v27  ;;  %4293 = vmatpush.bf16.msra.mxu2 %v6793_v45  ;;  %v7340_v27 = vld [vmem:[%s11318_s9 + $0x64] sm:$0xf] }
 0x541   : > { %v3827_v14 = vmul.f32 %v3794_v55, %v3711_v46  ;;  %v2834_v63 = vpop.f32.mrf.mxu0 }
 0x543   : > { %v3623_v4 = vpop.permute.xlu1 %3622  ;;  %v3837_v18 = vpack.c.bf16 %v3827_v14, %v3826_v8  ;;  %v6857_v8 = vor.u32 %v7345_v56, %v6856_v2  ;;  %v7356_v56 = vld [vmem:[%s11318_s9 + $0xe4] sm:$0xf] }
 0x544   : > { %v3463_v44 = vpop.permute.xlu0 %3462  ;;  %v3684_v41 = vmul.f32 %v3623_v4, %v2828_v61  ;;  %v2705_v4 = vpop.f32.mrf.mxu2 }
 0x545   : > { %v3652_v17 = vmul.f32 %v3463_v44, %v11565_v37  ;;  %4342 = vmatpush.bf16.msra.mxu0 %v6857_v8  ;;  %v3558_v44 = vpop.permute.xlu2 %3557  ;;  %v2706_v19 = vadd.f32 %v2705_v4, %v11541_v7  ;;  %v6906_v8 = vld [vmem:[%s11318_s9 + $0xe8] sm:$0xf0] }
 0x546   : > { %v6909_v4 = vor.u32 %v7356_v56, %v6906_v8  ;;  %v7350_v8 = vld [vmem:[%s11318_s9 + $0xb4] sm:$0xf] }
 0x547   : > { %v3712_v48 = vadd.f32 %v3668_v58, %v3652_v17  ;;  %v2795_v58 = vadd.f32 %v10011_v12, %v2666_v0  ;;  %v2835_v51 = vadd.f32 %v2834_v63, %v2706_v19 }
 0x549   : > { %3975 = vmatmul.bf16.gmra.mxu2 %v3837_v18  ;;  %4024 = vmatmul.bf16.gmra.mxu0 %v3837_v18  ;;  %v3713_v54 = vadd.f32 %v3712_v48, %v3684_v41  ;;  %v2704_v18 = vadd.f32 %v2703_v34, %v11541_v7  ;;  %v3671_v31 = vmul.f32 %v3558_v44, %v2795_v58  ;;  %v7371_v7 = vld [vmem:[#allocation8 + $0x54] sm:$0xf0]  ;;  %v6850_v41 = vld [vmem:[%s11318_s9 + $0x78] sm:$0xf0] }
 0x54b   : > { %v3468_v23 = vpop.permute.xlu1 %3467  ;;  %v2833_v57 = vadd.f32 %v2832_v6, %v2704_v18 }
 0x54c   : > { %v3653_v36 = vmul.f32 %v3468_v23, %v11568_v21  ;;  %v3548_v59 = vpop.permute.xlu0 %3547  ;;  %v7024_v23 = vld [vmem:[#allocation8 + $0xd0] sm:$0xf] }
 0x54d   : > { %v3669_v62 = vmul.f32 %v3548_v59, %v2790_v5  ;;  %v6960_v5 = vld [vmem:[#allocation8 + $0x50] sm:$0xf]  ;;  %v7025_v21 = vor.u32 %v7387_v9, %v7024_v23  ;;  %v3809_v59 = vpop.permute.xlu2 %3808  ;;  %v7016_v9 = vld [vmem:[#allocation8 + $0xc0] sm:$0xf] }
 0x54e   : > { %v6961_v12 = vor.u32 %v7371_v7, %v6960_v5  ;;  %v7385_v5 = vld [vmem:[#allocation8 + $0xc4] sm:$0xf0]  ;;  %v6898_v7 = vld [vmem:[%s11318_s9 + $0xd8] sm:$0xf0] }
 0x54f   : > { %v3714_v13 = vadd.f32 %v3669_v62, %v3653_v36  ;;  %4779 = vmatpush.bf16.msra.mxu3 %v7025_v21  ;;  %v7017_v21 = vor.u32 %v7385_v5, %v7016_v9  ;;  %v7008_v9 = vld [vmem:[#allocation8 + $0xb0] sm:$0xf]  ;;  %v7383_v5 = vld [vmem:[#allocation8 + $0xb4] sm:$0xf0] }
 0x550   : > { %4730 = vmatpush.bf16.msra.mxu1 %v6961_v12  ;;  %v7369_v12 = vld [vmem:[#allocation8 + $0x44] sm:$0xf0] }
 0x551   : > { %v3715_v10 = vadd.f32 %v3714_v13, %v3685_v40  ;;  %v7342_v40 = vld [vmem:[%s11318_s9 + $0x74] sm:$0xf] }
 0x552   : > { %v6853_v28 = vor.u32 %v7342_v40, %v6850_v41 }
 0x553   : > { %v3804_v11 = vpop.permute.xlu1 %3803  ;;  %4780 = vmatpush.bf16.msra.mxu3 %v7017_v21 }
 0x554   : > { %v3829_v42 = vmul.f32 %v3804_v11, %v3715_v10  ;;  %v3799_v26 = vpop.permute.xlu0 %3798  ;;  %4384 = vmatpush.bf16.msrb.mxu2 %v6853_v28  ;;  %v10251_v10 = vperm.slane %v3856_v1, 1  ;;  %v7336_v28 = vld [vmem:[%s11318_s9 + $0x44] sm:$0xf] }
 0x555   : > { %v3828_v3 = vmul.f32 %v3799_v26, %v3713_v54  ;;  %v7358_v26 = vld [vmem:[%s11318_s9 + $0xf4] sm:$0xf] }
 0x557   : > { %v3838_v22 = vpack.c.bf16 %v3829_v42, %v3828_v3  ;;  %v6914_v3 = vld [vmem:[%s11318_s9 + $0xf8] sm:$0xf0] }
 0x558   : > { %v6917_v34 = vor.u32 %v7358_v26, %v6914_v3 }
 0x559   : > { %3980 = vmatmul.bf16.gmra.mxu2 %v3838_v22  ;;  %4029 = vmatmul.bf16.gmra.mxu0 %v3838_v22 }
 0x55a   : > { %4433 = vmatpush.bf16.msrb.mxu0 %v6917_v34 }
 0x55b   : > { %v3553_v29 = vpop.permute.xlu1 %3552 }
 0x55c   : > { %v3670_v46 = vmul.f32 %v3553_v29, %v11570_v15  ;;  %v3633_v55 = vpop.permute.xlu0 %3632 }
 0x55d   : > { %v4000_v37 = vpop.f32.mrf.mxu0  ;;  %v3686_v50 = vmul.f32 %v3633_v55, %v2833_v57 }
 0x55e   : > { %v3716_v14 = vadd.f32 %v3670_v46, %v3654_v47  ;;  %v4001_v22 = vadd.f32 %v4000_v37, %v10251_v10  ;;  %v6842_v47 = vld [vmem:[%s11318_s9 + $0x68] sm:$0xf0]  ;;  %4434 = vmatpush.bf16.msrb.mxu0 %v6909_v4 }
 0x55f   : > { %v6845_v15 = vor.u32 %v7340_v27, %v6842_v47 }
 0x560   : > { %v3717_v39 = vadd.f32 %v3716_v14, %v3686_v50  ;;  %v4041_v29 = vmax.f32 %v4001_v22, 0.0 }
 0x561   : > { %4385 = vmatpush.bf16.msrb.mxu2 %v6845_v15 }
 0x562   : > { %v3830_v62 = vmul.f32 %v3809_v59, %v3717_v39 }
 0x563   : > { %v3638_v49 = vpop.permute.xlu1 %3637  ;;  %v3951_v35 = vpop.f32.mrf.mxu2 }
 0x564   : > { %v3478_v17 = vpop.permute.xlu0 %3477  ;;  %v3687_v33 = vmul.f32 %v3638_v49, %v2835_v51  ;;  %v3952_v32 = vadd.f32 %v3951_v35, %v10253_v53  ;;  %v7354_v35 = vld [vmem:[%s11318_s9 + $0xd4] sm:$0xf] }
 0x565   : > { %v3655_v48 = vmul.f32 %v3478_v17, %v11571_v43  ;;  %v4002_v61 = vpop.f32.mrf.mxu0  ;;  %v7338_v43 = vld [vmem:[%s11318_s9 + $0x54] sm:$0xf] }
 0x566   : > { %v4003_v54 = vadd.f32 %v4002_v61, %v10251_v10  ;;  %v4040_v24 = vmax.f32 %v3952_v32, 0.0 }
 0x567   : > { %v3718_v52 = vadd.f32 %v3671_v31, %v3655_v48  ;;  %v6834_v48 = vld [vmem:[%s11318_s9 + $0x58] sm:$0xf0] }
 0x568   : > { %v4043_v60 = vmax.f32 %v4003_v54, 0.0  ;;  %v6837_v49 = vor.u32 %v7338_v43, %v6834_v48  ;;  %v6810_v43 = vld [vmem:[%s11318_s9 + $0x28] sm:$0xf0] }
 0x569   : > { %v3719_v36 = vadd.f32 %v3718_v52, %v3687_v33 }
 0x56a   : > { %v10265_v30 = vpack.c.bf16 %v4043_v60, %v4041_v29  ;;  %4386 = vmatpush.bf16.msrb.mxu2 %v6837_v49  ;;  %v7352_v60 = vld [vmem:[%s11318_s9 + $0xc4] sm:$0xf] }
 0x56b   : > { %v3953_v6 = vpop.f32.mrf.mxu2 }
 0x56c   : > { %v3814_v20 = vpop.permute.xlu0 %3813  ;;  %v3954_v42 = vadd.f32 %v3953_v6, %v10253_v53  ;;  %v6826_v6 = vld [vmem:[%s11318_s9 + $0x48] sm:$0xf0] }
 0x56d   : > { %v3831_v38 = vmul.f32 %v3814_v20, %v3719_v36  ;;  %v6952_v36 = vld [vmem:[#allocation8 + $0x40] sm:$0xf] }
 0x56e   : > { %v4042_v25 = vmax.f32 %v3954_v42, 0.0 }
 0x56f   : > { %v3839_v13 = vpack.c.bf16 %v3831_v38, %v3830_v62  ;;  %v6901_v62 = vor.u32 %v7354_v35, %v6898_v7  ;;  %v6953_v38 = vor.u32 %v7369_v12, %v6952_v36  ;;  %v7009_v35 = vor.u32 %v7383_v5, %v7008_v9  ;;  %v7348_v7 = vld [vmem:[%s11318_s9 + $0xa4] sm:$0xf]  ;;  %v6874_v36 = vld [vmem:[%s11318_s9 + $0xa8] sm:$0xf0]  ;;  %v6944_v12 = vld [vmem:[#allocation8 + $0x30] sm:$0xf] }
 0x570   : > { %v10267_v2 = vpack.c.bf16 %v4042_v25, %v4040_v24  ;;  %v6890_v25 = vld [vmem:[%s11318_s9 + $0xc8] sm:$0xf0]  ;;  %v7363_v9 = vld [vmem:[#allocation8 + $0x14] sm:$0xf0] }
 0x571   : > { %3985 = vmatmul.bf16.gmra.mxu2 %v3839_v13  ;;  %4034 = vmatmul.bf16.gmra.mxu0 %v3839_v13  ;;  %v6893_v29 = vor.u32 %v7352_v60, %v6890_v25 }
 0x572   : > { %4435 = vmatpush.bf16.msrb.mxu0 %v6901_v62  ;;  %4731 = vmatpush.bf16.msra.mxu1 %v6953_v38  ;;  %v7367_v62 = vld [vmem:[#allocation8 + $0x34] sm:$0xf0] }
 0x573   : > { %4781 = vmatpush.bf16.msra.mxu3 %v7009_v35 }
 0x576   : > { %v4005_v11 = vpop.f32.mrf.mxu0  ;;  %4436 = vmatpush.bf16.msrb.mxu0 %v6893_v29  ;;  %v7346_v29 = vld [vmem:[%s11318_s9 + $0x94] sm:$0xf] }
 0x577   : > { %v4006_v14 = vadd.f32 %v4005_v11, %v10251_v10  ;;  %v6829_v11 = vor.u32 %v7336_v28, %v6826_v6 }
 0x579   : > { %v4045_v37 = vmax.f32 %v4006_v14, 0.0  ;;  %4387 = vmatpush.bf16.msrb.mxu2 %v6829_v11  ;;  %v6882_v14 = vld [vmem:[%s11318_s9 + $0xb8] sm:$0xf0]  ;;  %v7330_v11 = vld [vmem:[%s11318_s9 + $0x14] sm:$0xf] }
 0x57a   : > { %v6885_v4 = vor.u32 %v7350_v8, %v6882_v14 }
 0x57c   : > { %v3956_v16 = vpop.f32.mrf.mxu2  ;;  %4437 = vmatpush.bf16.msrb.mxu0 %v6885_v4  ;;  %v7328_v4 = vld [vmem:[%s11318_s9 + $0x4] sm:$0xf] }
 0x57d   : > { %v3957_v0 = vadd.f32 %v3956_v16, %v10253_v53 }
 0x57e   : > { %v4007_v63 = vpop.f32.mrf.mxu0 }
 0x57f   : > { %v4008_v55 = vadd.f32 %v4007_v63, %v10251_v10  ;;  %v4044_v17 = vmax.f32 %v3957_v0, 0.0 }
 0x581   : > { %4294 = vmatmul.bf16.vlgmr.msra.gmra.mxu2 %v10267_v2  ;;  %4343 = vmatmul.bf16.vlgmr.msra.gmra.mxu0 %v10265_v30  ;;  %v4047_v44 = vmax.f32 %v4008_v55, 0.0  ;;  %v6818_v55 = vld [vmem:[%s11318_s9 + $0x38] sm:$0xf0] }
 0x583   : > { %v10289_v57 = vpack.c.bf16 %v4047_v44, %v4045_v37 }
 0x584   : > { %v3958_v46 = vpop.f32.mrf.mxu2 }
 0x585   : > { %v3959_v45 = vadd.f32 %v3958_v46, %v10253_v53  ;;  %v7334_v46 = vld [vmem:[%s11318_s9 + $0x34] sm:$0xf] }
 0x586   : > { %v4010_v18 = vpop.f32.mrf.mxu0 }
 0x587   : > { %v4046_v19 = vmax.f32 %v3959_v45, 0.0  ;;  %v4011_v33 = vadd.f32 %v4010_v18, %v10251_v10  ;;  %v6821_v45 = vor.u32 %v7334_v46, %v6818_v55 }
 0x589   : > { %v10287_v31 = vpack.c.bf16 %v4046_v19, %v4044_v17  ;;  %v4049_v61 = vmax.f32 %v4011_v33, 0.0  ;;  %4388 = vmatpush.bf16.msrb.mxu2 %v6821_v45  ;;  %v7332_v17 = vld [vmem:[%s11318_s9 + $0x24] sm:$0xf] }
 0x58a   : > { %v6813_v48 = vor.u32 %v7332_v17, %v6810_v43  ;;  %v7344_v43 = vld [vmem:[%s11318_s9 + $0x84] sm:$0xf] }
 0x58c   : > { %v3961_v58 = vpop.f32.mrf.mxu2 }
 0x58d   : > { %v3962_v23 = vadd.f32 %v3961_v58, %v10253_v53  ;;  %4389 = vmatpush.bf16.msrb.mxu2 %v6813_v48  ;;  %v6858_v48 = vld [vmem:[%s11318_s9 + $0x88] sm:$0xf0] }
 0x58e   : > { %v4012_v50 = vpop.f32.mrf.mxu0 }
 0x58f   : > { %v4013_v52 = vadd.f32 %v4012_v50, %v10251_v10  ;;  %v4048_v13 = vmax.f32 %v3962_v23, 0.0 }
 0x591   : > { %4299 = vmatmul.bf16.gmra.mxu2 %v10287_v31  ;;  %4348 = vmatmul.bf16.gmra.mxu0 %v10289_v57  ;;  %v4051_v59 = vmax.f32 %v4013_v52, 0.0 }
 0x593   : > { %v10311_v1 = vpack.c.bf16 %v4051_v59, %v4049_v61  ;;  %v6945_v61 = vor.u32 %v7367_v62, %v6944_v12 }
 0x594   : > { %v3963_v51 = vpop.f32.mrf.mxu2 }
 0x595   : > { %v3964_v39 = vadd.f32 %v3963_v51, %v10253_v53  ;;  %4732 = vmatpush.bf16.msra.mxu1 %v6945_v61 }
 0x597   : > { %v4050_v20 = vmax.f32 %v3964_v39, 0.0 }
 0x599   : > { %v10309_v41 = vpack.c.bf16 %v4050_v20, %v4048_v13  ;;  %v6877_v20 = vor.u32 %v7348_v7, %v6874_v36  ;;  %v6920_v7 = vld [vmem:[#allocation8] sm:$0xf]  ;;  %v7361_v36 = vld [vmem:[#allocation8 + $0x4] sm:$0xf0] }
 0x59a   : > { %v6921_v12 = vor.u32 %v7361_v36, %v6920_v7  ;;  %v7388_v36 = vld [vmem:[#allocation8 + $0xe4] sm:$0xf] }
 0x59b   : > { %4438 = vmatpush.bf16.msrb.mxu0 %v6877_v20 }
 0x59d   : > { %v4015_v40 = vpop.f32.mrf.mxu0 }
 0x59e   : > { %v4016_v3 = vadd.f32 %v4015_v40, %v10251_v10 }
 0x5a0   : > { %v4053_v24 = vmax.f32 %v4016_v3, 0.0 }
 0x5a1   : > { %4304 = vmatmul.bf16.gmra.mxu2 %v10309_v41  ;;  %4353 = vmatmul.bf16.gmra.mxu0 %v10311_v1 }
 0x5a3   : > { %v3966_v54 = vpop.f32.mrf.mxu2 }
 0x5a4   : > { %v3967_v34 = vadd.f32 %v3966_v54, %v10253_v53  ;;  %v6802_v54 = vld [vmem:[%s11318_s9 + $0x18] sm:$0xf0] }
 0x5a5   : > { %v4017_v42 = vpop.f32.mrf.mxu0 }
 0x5a6   : > { %v4018_v26 = vadd.f32 %v4017_v42, %v10251_v10  ;;  %v4052_v63 = vmax.f32 %v3967_v34, 0.0  ;;  %v6805_v42 = vor.u32 %v7330_v11, %v6802_v54 }
 0x5a8   : > { %v4055_v22 = vmax.f32 %v4018_v26, 0.0  ;;  %4390 = vmatpush.bf16.msrb.mxu2 %v6805_v42 }
 0x5aa   : > { %v10331_v47 = vpack.c.bf16 %v4055_v22, %v4053_v24  ;;  %v6866_v24 = vld [vmem:[%s11318_s9 + $0x98] sm:$0xf0] }
 0x5ab   : > { %v3968_v32 = vpop.f32.mrf.mxu2 }
 0x5ac   : > { %v3969_v16 = vadd.f32 %v3968_v32, %v10253_v53 }
 0x5ae   : > { %v4054_v27 = vmax.f32 %v3969_v16, 0.0 }
 0x5b0   : > { %v10333_v15 = vpack.c.bf16 %v4054_v27, %v4052_v63  ;;  %v6869_v63 = vor.u32 %v7346_v29, %v6866_v24 }
 0x5b1   : > { %4358 = vmatmul.bf16.gmra.mxu0 %v10331_v47 }
 0x5b2   : > { %4309 = vmatmul.bf16.gmra.mxu2 %v10333_v15  ;;  %4439 = vmatpush.bf16.msrb.mxu0 %v6869_v63 }
 0x5b6   : > { %v4020_v56 = vpop.f32.mrf.mxu0 }
 0x5b7   : > { %v4021_v18 = vadd.f32 %v4020_v56, %v10251_v10 }
 0x5b9   : > { %v4057_v58 = vmax.f32 %v4021_v18, 0.0  ;;  %v6794_v18 = vld [vmem:[%s11318_s9 + $0x8] sm:$0xf0] }
 0x5bc   : > { %v3971_v0 = vpop.f32.mrf.mxu2 }
 0x5bd   : > { %v3972_v49 = vadd.f32 %v3971_v0, %v10253_v53 }
 0x5be   : > { %v4022_v44 = vpop.f32.mrf.mxu0 }
 0x5bf   : > { %v4023_v19 = vadd.f32 %v4022_v44, %v10251_v10  ;;  %v4056_v33 = vmax.f32 %v3972_v49, 0.0  ;;  %v6861_v49 = vor.u32 %v7344_v43, %v6858_v48 }
 0x5c1   : > { %v4059_v37 = vmax.f32 %v4023_v19, 0.0  ;;  %v6797_v19 = vor.u32 %v7328_v4, %v6794_v18  ;;  %4440 = vmatpush.bf16.msrb.mxu0 %v6861_v49  ;;  %v6978_v4 = vld [vmem:[#allocation8 + $0x78] sm:$0xf0] }
 0x5c3   : > { %v10358_v50 = vpack.c.bf16 %v4059_v37, %v4057_v58  ;;  %4391 = vmatpush.bf16.msrb.mxu2 %v6797_v19 }
 0x5c4   : > { %v3973_v51 = vpop.f32.mrf.mxu2 }
 0x5c5   : > { %v3974_v52 = vadd.f32 %v3973_v51, %v10253_v53  ;;  %4363 = vmatmul.bf16.gmra.mxu0 %v10358_v50  ;;  %v6936_v51 = vld [vmem:[#allocation8 + $0x20] sm:$0xf] }
 0x5c6   : > { %v4025_v39 = vpop.f32.mrf.mxu0 }
 0x5c7   : > { %v4058_v23 = vmax.f32 %v3974_v52, 0.0  ;;  %v4026_v38 = vadd.f32 %v4025_v39, %v10251_v10  ;;  %v7365_v52 = vld [vmem:[#allocation8 + $0x24] sm:$0xf0] }
 0x5c9   : > { %v10362_v21 = vpack.c.bf16 %v4058_v23, %v4056_v33  ;;  %v4061_v28 = vmax.f32 %v4026_v38, 0.0  ;;  %v6937_v33 = vor.u32 %v7365_v52, %v6936_v51  ;;  %v6928_v23 = vld [vmem:[#allocation8 + $0x10] sm:$0xf]  ;;  %v7372_v52 = vld [vmem:[#allocation8 + $0x64] sm:$0xf] }
 0x5ca   : > { %v6929_v5 = vor.u32 %v7363_v9, %v6928_v23 }
 0x5cb   : > { %4314 = vmatmul.bf16.gmra.mxu2 %v10362_v21  ;;  %4733 = vmatpush.bf16.msra.mxu1 %v6937_v33  ;;  %v6970_v33 = vld [vmem:[#allocation8 + $0x68] sm:$0xf0] }
 0x5cc   : > { %v3976_v59 = vpop.f32.mrf.mxu2  ;;  %v6973_v23 = vor.u32 %v7372_v52, %v6970_v33 }
 0x5cd   : > { %v3977_v26 = vadd.f32 %v3976_v59, %v10253_v53 }
 0x5ce   : > { %v4027_v13 = vpop.f32.mrf.mxu0 }
 0x5cf   : > { %v4028_v40 = vadd.f32 %v4027_v13, %v10251_v10  ;;  %v4060_v60 = vmax.f32 %v3977_v26, 0.0  ;;  %4734 = vmatpush.bf16.msra.mxu1 %v6929_v5 }
 0x5d1   : > { %v4063_v6 = vmax.f32 %v4028_v40, 0.0  ;;  %v7000_v40 = vld [vmem:[#allocation8 + $0xa0] sm:$0xf] }
 0x5d3   : > { %v10380_v3 = vpack.c.bf16 %v4063_v6, %v4061_v28  ;;  %4735 = vmatpush.bf16.msra.mxu1 %v6921_v12  ;;  %v7381_v28 = vld [vmem:[#allocation8 + $0xa4] sm:$0xf0]  ;;  %v7034_v12 = vld [vmem:[#allocation8 + $0xe8] sm:$0xf0] }
 0x5d4   : > { %v3978_v34 = vpop.f32.mrf.mxu2  ;;  %v7001_v6 = vor.u32 %v7381_v28, %v7000_v40 }
 0x5d5   : > { %v3979_v22 = vadd.f32 %v3978_v34, %v10253_v53  ;;  %4368 = vmatmul.bf16.gmra.mxu0 %v10380_v3 }
 0x5d6   : > { %v4030_v32 = vpop.f32.mrf.mxu0  ;;  %4782 = vmatpush.bf16.msra.mxu3 %v7001_v6  ;;  %v7370_v6 = vld [vmem:[#allocation8 + $0x54] sm:$0xf] }
 0x5d7   : > { %v4062_v25 = vmax.f32 %v3979_v22, 0.0  ;;  %v4031_v46 = vadd.f32 %v4030_v32, %v10251_v10 }
 0x5d9   : > { %v10384_v16 = vpack.c.bf16 %v4062_v25, %v4060_v60  ;;  %v4065_v56 = vmax.f32 %v4031_v46, 0.0 }
 0x5db   : > { %4319 = vmatmul.bf16.gmra.mxu2 %v10384_v16 }
 0x5dc   : > { %v3981_v27 = vpop.f32.mrf.mxu2 }
 0x5dd   : > { %v3982_v14 = vadd.f32 %v3981_v27, %v10253_v53 }
 0x5de   : > { %v4032_v55 = vpop.f32.mrf.mxu0 }
 0x5df   : > { %v4033_v45 = vadd.f32 %v4032_v55, %v10251_v10  ;;  %v4064_v37 = vmax.f32 %v3982_v14, 0.0  ;;  %v7374_v14 = vld [vmem:[#allocation8 + $0x74] sm:$0xf] }
 0x5e0   : > { %v6981_v18 = vor.u32 %v7374_v14, %v6978_v4 }
 0x5e1   : > { %v4067_v8 = vmax.f32 %v4033_v45, 0.0 }
 0x5e2   : > { %4826 = vmatpush.bf16.msra.mxu2 %v6981_v18 }
 0x5e3   : > { %v10396_v0 = vpack.c.bf16 %v4067_v8, %v4065_v56 }
 0x5e4   : > { %v3983_v44 = vpop.f32.mrf.mxu2 }
 0x5e5   : > { %v3984_v58 = vadd.f32 %v3983_v44, %v10253_v53  ;;  %4373 = vmatmul.bf16.gmra.mxu0 %v10396_v0 }
 0x5e6   : > { %4827 = vmatpush.bf16.msra.mxu2 %v6973_v23 }
 0x5e7   : > { %v4066_v17 = vmax.f32 %v3984_v58, 0.0  ;;  %v7390_v58 = vld [vmem:[#allocation8 + $0xf4] sm:$0xf] }
 0x5e9   : > { %v10412_v39 = vpack.c.bf16 %v4066_v17, %v4064_v37  ;;  %v7042_v37 = vld [vmem:[#allocation8 + $0xf8] sm:$0xf0] }
 0x5ea   : > { %v7045_v43 = vor.u32 %v7390_v58, %v7042_v37  ;;  %v7384_v37 = vld [vmem:[#allocation8 + $0xc4] sm:$0xf] }
 0x5eb   : > { %4324 = vmatmul.bf16.gmra.mxu2 %v10412_v39 }
 0x5ec   : > { %4875 = vmatpush.bf16.msra.mxu0 %v7045_v43 }
 0x5ee   : > { %v4035_v35 = vpop.f32.mrf.mxu0 }
 0x5ef   : > { %v4036_v20 = vadd.f32 %v4035_v35, %v10251_v10 }
 0x5f1   : > { %v4069_v61 = vmax.f32 %v4036_v20, 0.0  ;;  %v7037_v20 = vor.u32 %v7388_v36, %v7034_v12 }
 0x5f3   : > { %4876 = vmatpush.bf16.msra.mxu0 %v7037_v20  ;;  %v6984_v20 = vld [vmem:[#allocation8 + $0x80] sm:$0xf] }
 0x5f4   : > { %v3986_v59 = vpop.f32.mrf.mxu2 }
 0x5f5   : > { %v3987_v11 = vadd.f32 %v3986_v59, %v10253_v53 }
 0x5f6   : > { %v4037_v62 = vpop.f32.mrf.mxu0 }
 0x5f7   : > { %v4038_v38 = vadd.f32 %v4037_v62, %v10251_v10  ;;  %v4068_v22 = vmax.f32 %v3987_v11, 0.0  ;;  %v10427_v10 = vld [vmem:[%s11573_s7] sm:$0x3]  ;;  %v6962_v11 = vld [vmem:[#allocation8 + $0x58] sm:$0xf0]  ;;  %s6177_s7 = sshll.u32 %s8218_s10, 7 }
 0x5f8   : > { %v10431_v29 = vperm.slane %v10427_v10, 0  ;;  %s10756_s30 = scalar_lea.vmem [#allocation9], %s6177_s7 }
 0x5f9   : > { %v4071_v13 = vmax.f32 %v4038_v38, 0.0  ;;  %v7379_v38 = vld [vmem:[#allocation8 + $0x94] sm:$0xf0]  ;;  %s5986_s29 = sshll.u32 %s10756_s30, 4  ;;  %s11166_s29 = int_to_ptr.vmem [resolvable:$true] %s5986_s29 }
 0x5fb   : > { %v10418_v54 = vpack.c.bf16 %v4071_v13, %v4069_v61 }
 0x5fc   : > { %v3988_v42 = vpop.f32.mrf.mxu2 }
 0x5fd   : > { %v3989_v26 = vadd.f32 %v3988_v42, %v10253_v53  ;;  %4378 = vmatmul.bf16.gmra.mxu0 %v10418_v54  ;;  %v6965_v42 = vor.u32 %v7370_v6, %v6962_v11  ;;  %v7380_v6 = vld [vmem:[#allocation8 + $0xa4] sm:$0xf]  ;;  %v7002_v11 = vld [vmem:[#allocation8 + $0xa8] sm:$0xf0] }
 0x5fe   : > { %v4344_v34 = vpop.f32.mrf.mxu0 }
 0x5ff   : > { %v4070_v32 = vmax.f32 %v3989_v26, 0.0  ;;  %4828 = vmatpush.bf16.msra.mxu2 %v6965_v42  ;;  %v7005_v42 = vor.u32 %v7380_v6, %v7002_v11  ;;  %v7422_v6 = vld [vmem:[%s11574_s8 + $0xf4] sm:$0xf]  ;;  %v7170_v11 = vld [vmem:[%s11574_s8 + $0xf8] sm:$0xf0] }
 0x601   : > { %v10422_v60 = vpack.c.bf16 %v4070_v32, %v4068_v22 }
 0x603   : > { %4329 = vmatmul.bf16.gmra.mxu2 %v10422_v60 }
 0x604   : > { %v4295_v25 = vpop.f32.mrf.mxu2 }
 0x605   : > { %v4296_v53 = vadd.f32 %v4295_v25, %v10431_v29 }
 0x606   : > { %v4346_v24 = vpop.f32.mrf.mxu0 }
 0x607   : > { %v4345_v27 = vadd.f32 %v4344_v34, %v4296_v53  ;;  %v7026_v53 = vld [vmem:[#allocation8 + $0xd8] sm:$0xf0] }
 0x609   : > { %v4482_v56 = vmax.f32 %v4345_v27, 0.0 }
 0x60c   : > { %v4297_v63 = vpop.f32.mrf.mxu2 }
 0x60d   : > { %v4298_v46 = vadd.f32 %v4297_v63, %v10431_v29  ;;  %4441 = vmatmul.bf16.vlgmr.msrb.gmra.mxu0 %v10265_v30 }
 0x60e   : > { %v4349_v55 = vpop.f32.mrf.mxu0 }
 0x60f   : > { %v4347_v45 = vadd.f32 %v4346_v24, %v4298_v46  ;;  %v7386_v24 = vld [vmem:[#allocation8 + $0xd4] sm:$0xf] }
 0x610   : > { %v7029_v63 = vor.u32 %v7386_v24, %v7026_v53  ;;  %v7362_v24 = vld [vmem:[#allocation8 + $0x14] sm:$0xf]  ;;  %v6930_v53 = vld [vmem:[#allocation8 + $0x18] sm:$0xf0] }
 0x611   : > { %v4484_v8 = vmax.f32 %v4347_v45, 0.0  ;;  %v7368_v45 = vld [vmem:[#allocation8 + $0x44] sm:$0xf] }
 0x612   : > { %4877 = vmatpush.bf16.msra.mxu0 %v7029_v63  ;;  %v6933_v63 = vor.u32 %v7362_v24, %v6930_v53 }
 0x613   : > { %v10436_v44 = vpack.c.bf16 %v4484_v8, %v4482_v56  ;;  %4392 = vmatmul.bf16.vlgmr.msrb.gmra.mxu2 %v10267_v2  ;;  %v6954_v56 = vld [vmem:[#allocation8 + $0x48] sm:$0xf0] }
 0x614   : > { %v4300_v19 = vpop.f32.mrf.mxu2  ;;  %v6957_v14 = vor.u32 %v7368_v45, %v6954_v56 }
 0x615   : > { %4736 = vmatmul.bf16.vlgmr.msra.gmra.mxu1 %v10436_v44  ;;  %v4301_v30 = vadd.f32 %v4300_v19, %v10431_v29 }
 0x616   : > { %v4351_v17 = vpop.f32.mrf.mxu0  ;;  %4829 = vmatpush.bf16.msra.mxu2 %v6957_v14  ;;  %v7378_v14 = vld [vmem:[#allocation8 + $0x94] sm:$0xf] }
 0x617   : > { %v4350_v49 = vadd.f32 %v4349_v55, %v4301_v30 }
 0x619   : > { %v4486_v5 = vmax.f32 %v4350_v49, 0.0  ;;  %v6946_v49 = vld [vmem:[#allocation8 + $0x38] sm:$0xf0] }
 0x61c   : > { %v4302_v48 = vpop.f32.mrf.mxu2 }
 0x61d   : > { %v4303_v51 = vadd.f32 %v4302_v48, %v10431_v29  ;;  %4446 = vmatmul.bf16.gmra.mxu0 %v10289_v57  ;;  %v6992_v57 = vld [vmem:[#allocation8 + $0x90] sm:$0xf]  ;;  %v7366_v48 = vld [vmem:[#allocation8 + $0x34] sm:$0xf] }
 0x61e   : > { %v4354_v2 = vpop.f32.mrf.mxu0  ;;  %v6993_v61 = vor.u32 %v7379_v38, %v6992_v57  ;;  %v6949_v52 = vor.u32 %v7366_v48, %v6946_v49  ;;  %v7376_v49 = vld [vmem:[#allocation8 + $0x84] sm:$0xf] }
 0x61f   : > { %v4352_v9 = vadd.f32 %v4351_v17, %v4303_v51  ;;  %v7018_v17 = vld [vmem:[#allocation8 + $0xc8] sm:$0xf0] }
 0x620   : > { %4783 = vmatpush.bf16.msra.mxu3 %v6993_v61  ;;  %v7021_v30 = vor.u32 %v7384_v37, %v7018_v17  ;;  %4830 = vmatpush.bf16.msra.mxu2 %v6949_v52  ;;  %v6938_v61 = vld [vmem:[#allocation8 + $0x28] sm:$0xf0] }
 0x621   : > { %v4488_v35 = vmax.f32 %v4352_v9, 0.0 }
 0x622   : > { %4878 = vmatpush.bf16.msra.mxu0 %v7021_v30 }
 0x623   : > { %4397 = vmatmul.bf16.gmra.mxu2 %v10287_v31  ;;  %v10444_v7 = vpack.c.bf16 %v4488_v35, %v4486_v5 }
 0x624   : > { %v4305_v59 = vpop.f32.mrf.mxu2 }
 0x625   : > { %4741 = vmatmul.bf16.gmra.mxu1 %v10444_v7  ;;  %v4306_v13 = vadd.f32 %v4305_v59, %v10431_v29 }
 0x626   : > { %v4356_v62 = vpop.f32.mrf.mxu0 }
 0x627   : > { %v4355_v28 = vadd.f32 %v4354_v2, %v4306_v13  ;;  %v7010_v2 = vld [vmem:[#allocation8 + $0xb8] sm:$0xf0] }
 0x629   : > { %v4490_v22 = vmax.f32 %v4355_v28, 0.0 }
 0x62c   : > { %v4307_v40 = vpop.f32.mrf.mxu2 }
 0x62d   : > { %v4308_v31 = vadd.f32 %v4307_v40, %v10431_v29  ;;  %4451 = vmatmul.bf16.gmra.mxu0 %v10311_v1 }
 0x62e   : > { %v4359_v34 = vpop.f32.mrf.mxu0 }
 0x62f   : > { %v4357_v26 = vadd.f32 %v4356_v62, %v4308_v31  ;;  %v7377_v62 = vld [vmem:[#allocation8 + $0x84] sm:$0xf0] }
 0x630   : > { %v6985_v57 = vor.u32 %v7377_v62, %v6984_v20 }
 0x631   : > { %v4492_v32 = vmax.f32 %v4357_v26, 0.0 }
 0x632   : > { %4784 = vmatpush.bf16.msra.mxu3 %v6985_v57  ;;  %v7106_v57 = vld [vmem:[%s11574_s8 + $0x78] sm:$0xf0] }
 0x633   : > { %4402 = vmatmul.bf16.gmra.mxu2 %v10309_v41  ;;  %v10451_v25 = vpack.c.bf16 %v4492_v32, %v4490_v22 }
 0x635   : > { %4746 = vmatmul.bf16.gmra.mxu1 %v10451_v25  ;;  %v4310_v27 = vpop.f32.mrf.mxu2 }
 0x636   : > { %v4311_v1 = vadd.f32 %v4310_v27, %v10431_v29  ;;  %v4361_v46 = vpop.f32.mrf.mxu0 }
 0x638   : > { %v4360_v8 = vadd.f32 %v4359_v34, %v4311_v1 }
 0x63a   : > { %v4494_v18 = vmax.f32 %v4360_v8, 0.0 }
 0x63d   : > { %4456 = vmatmul.bf16.gmra.mxu0 %v10331_v47  ;;  %v4312_v55 = vpop.f32.mrf.mxu2 }
 0x63e   : > { %v4313_v41 = vadd.f32 %v4312_v55, %v10431_v29  ;;  %v6922_v55 = vld [vmem:[#allocation8 + $0x8] sm:$0xf0] }
 0x640   : > { %v4362_v4 = vadd.f32 %v4361_v46, %v4313_v41 }
 0x642   : > { %v4496_v19 = vmax.f32 %v4362_v4, 0.0  ;;  %v4364_v58 = vpop.f32.mrf.mxu0  ;;  %v6994_v4 = vld [vmem:[#allocation8 + $0x98] sm:$0xf0] }
 0x643   : > { %4407 = vmatmul.bf16.gmra.mxu2 %v10333_v15  ;;  %v7382_v15 = vld [vmem:[#allocation8 + $0xb4] sm:$0xf] }
 0x644   : > { %v10458_v43 = vpack.c.bf16 %v4496_v19, %v4494_v18  ;;  %v7013_v9 = vor.u32 %v7382_v15, %v7010_v2  ;;  %v6997_v18 = vor.u32 %v7378_v14, %v6994_v4 }
 0x646   : > { %4751 = vmatmul.bf16.gmra.mxu1 %v10458_v43  ;;  %4879 = vmatpush.bf16.msra.mxu0 %v7013_v9 }
 0x64a   : > { %v4366_v47 = vpop.f32.mrf.mxu0  ;;  %4880 = vmatpush.bf16.msra.mxu0 %v7005_v42  ;;  %v7173_v42 = vor.u32 %v7422_v6, %v7170_v11 }
 0x64d   : > { %4461 = vmatmul.bf16.gmra.mxu0 %v10358_v50 }
 0x64e   : > { %v4315_v51 = vpop.f32.mrf.mxu2  ;;  %4881 = vmatpush.bf16.msra.mxu0 %v6997_v18 }
 0x64f   : > { %v4316_v33 = vadd.f32 %v4315_v51, %v10431_v29 }
 0x651   : > { %v4365_v35 = vadd.f32 %v4364_v58, %v4316_v33 }
 0x652   : > { %v4369_v23 = vpop.f32.mrf.mxu0 }
 0x653   : > { %4412 = vmatmul.bf16.gmra.mxu2 %v10362_v21  ;;  %v4498_v50 = vmax.f32 %v4365_v35, 0.0  ;;  %v7364_v21 = vld [vmem:[#allocation8 + $0x24] sm:$0xf] }
 0x654   : > { %v6941_v28 = vor.u32 %v7364_v21, %v6938_v61 }
 0x656   : > { %v4317_v5 = vpop.f32.mrf.mxu2  ;;  %4831 = vmatpush.bf16.msra.mxu2 %v6941_v28 }
 0x657   : > { %v4318_v36 = vadd.f32 %v4317_v5, %v10431_v29 }
 0x659   : > { %v4367_v12 = vadd.f32 %v4366_v47, %v4318_v36 }
 0x65a   : > { %v4371_v13 = vpop.f32.mrf.mxu0  ;;  %4832 = vmatpush.bf16.msra.mxu2 %v6933_v63 }
 0x65b   : > { %v4500_v59 = vmax.f32 %v4367_v12, 0.0 }
 0x65d   : > { %4466 = vmatmul.bf16.gmra.mxu0 %v10380_v3  ;;  %v10466_v38 = vpack.c.bf16 %v4500_v59, %v4498_v50 }
 0x65e   : > { %v4320_v40 = vpop.f32.mrf.mxu2 }
 0x65f   : > { %4756 = vmatmul.bf16.gmra.mxu1 %v10466_v38  ;;  %v4321_v31 = vadd.f32 %v4320_v40, %v10431_v29 }
 0x661   : > { %v4370_v3 = vadd.f32 %v4369_v23, %v4321_v31 }
 0x662   : > { %v4374_v22 = vpop.f32.mrf.mxu0 }
 0x663   : > { %4417 = vmatmul.bf16.gmra.mxu2 %v10384_v16  ;;  %v4502_v27 = vmax.f32 %v4370_v3, 0.0  ;;  %v7360_v16 = vld [vmem:[#allocation8 + $0x4] sm:$0xf] }
 0x664   : > { %v6925_v56 = vor.u32 %v7360_v16, %v6922_v55 }
 0x666   : > { %v4322_v26 = vpop.f32.mrf.mxu2  ;;  %4833 = vmatpush.bf16.msra.mxu2 %v6925_v56  ;;  %v7420_v56 = vld [vmem:[%s11574_s8 + $0xe4] sm:$0xf] }
 0x667   : > { %v4323_v34 = vadd.f32 %v4322_v26, %v10431_v29 }
 0x669   : > { %v4372_v32 = vadd.f32 %v4371_v13, %v4323_v34 }
 0x66a   : > { %v4376_v8 = vpop.f32.mrf.mxu0 }
 0x66b   : > { %v4504_v1 = vmax.f32 %v4372_v32, 0.0  ;;  %v7098_v32 = vld [vmem:[%s11574_s8 + $0x68] sm:$0xf0] }
 0x66d   : > { %4471 = vmatmul.bf16.gmra.mxu0 %v10396_v0  ;;  %v10473_v46 = vpack.c.bf16 %v4504_v1, %v4502_v27 }
 0x66e   : > { %v4325_v45 = vpop.f32.mrf.mxu2 }
 0x66f   : > { %4761 = vmatmul.bf16.gmra.mxu1 %v10473_v46  ;;  %v4326_v41 = vadd.f32 %v4325_v45, %v10431_v29 }
 0x671   : > { %v4375_v0 = vadd.f32 %v4374_v22, %v4326_v41 }
 0x673   : > { %4422 = vmatmul.bf16.gmra.mxu2 %v10412_v39  ;;  %v4506_v30 = vmax.f32 %v4375_v0, 0.0  ;;  %v6986_v39 = vld [vmem:[#allocation8 + $0x88] sm:$0xf0]  ;;  %v7423_v0 = vld [vmem:[%s11574_s8 + $0xf4] sm:$0xf0] }
 0x674   : > { %v6989_v52 = vor.u32 %v7376_v49, %v6986_v39  ;;  %v7407_v49 = vld [vmem:[%s11574_s8 + $0x74] sm:$0xf0] }
 0x676   : > { %v4327_v19 = vpop.f32.mrf.mxu2  ;;  %4882 = vmatpush.bf16.msra.mxu0 %v6989_v52 }
 0x677   : > { %v4328_v58 = vadd.f32 %v4327_v19, %v10431_v29 }
 0x679   : > { %v4377_v37 = vadd.f32 %v4376_v8, %v4328_v58  ;;  %v7162_v8 = vld [vmem:[%s11574_s8 + $0xe8] sm:$0xf0] }
 0x67a   : > { %v4379_v17 = vpop.f32.mrf.mxu0  ;;  %5317 = vmatpush.bf16.msrb.mxu0 %v7173_v42  ;;  %v7165_v41 = vor.u32 %v7420_v56, %v7162_v8 }
 0x67b   : > { %v4508_v47 = vmax.f32 %v4377_v37, 0.0  ;;  %v7402_v37 = vld [vmem:[%s11574_s8 + $0x54] sm:$0xf] }
 0x67d   : > { %4476 = vmatmul.bf16.gmra.mxu0 %v10418_v54  ;;  %v10480_v48 = vpack.c.bf16 %v4508_v47, %v4506_v30  ;;  %v7104_v47 = vld [vmem:[%s11574_s8 + $0x70] sm:$0xf] }
 0x67e   : > { %5318 = vmatpush.bf16.msrb.mxu0 %v7165_v41 }
 0x67f   : > { %4766 = vmatmul.bf16.gmra.mxu1 %v10480_v48 }
 0x682   : > { %v4381_v51 = vpop.f32.mrf.mxu0 }
 0x683   : > { %4427 = vmatmul.bf16.gmra.mxu2 %v10422_v60  ;;  %v10490_v60 = vperm.slane %v10427_v10, 1 }
 0x686   : > { %v4330_v33 = vpop.f32.mrf.mxu2 }
 0x687   : > { %v4331_v2 = vadd.f32 %v4330_v33, %v10431_v29 }
 0x689   : > { %v4380_v9 = vadd.f32 %v4379_v17, %v4331_v2  ;;  %v7090_v17 = vld [vmem:[%s11574_s8 + $0x58] sm:$0xf0] }
 0x68a   : > { %v4442_v15 = vpop.f32.mrf.mxu0  ;;  %v7093_v30 = vor.u32 %v7402_v37, %v7090_v17 }
 0x68b   : > { %v4510_v36 = vmax.f32 %v4380_v9, 0.0 }
 0x68e   : > { %v4332_v23 = vpop.f32.mrf.mxu2 }
 0x68f   : > { %v4333_v5 = vadd.f32 %v4332_v23, %v10431_v29  ;;  %v7406_v29 = vld [vmem:[%s11574_s8 + $0x74] sm:$0xf] }
 0x691   : > { %v4382_v54 = vadd.f32 %v4381_v51, %v4333_v5  ;;  %v7105_v51 = vor.u32 %v7407_v49, %v7104_v47  ;;  %v7418_v5 = vld [vmem:[%s11574_s8 + $0xd4] sm:$0xf] }
 0x692   : > { %v4444_v35 = vpop.f32.mrf.mxu0 }
 0x693   : > { %v4512_v12 = vmax.f32 %v4382_v54, 0.0  ;;  %4834 = vmatmul.bf16.vlgmr.msra.gmra.mxu2 %v10436_v44  ;;  %v7109_v44 = vor.u32 %v7406_v29, %v7106_v57  ;;  %5170 = vmatpush.bf16.msrb.mxu1 %v7105_v51  ;;  %v7154_v54 = vld [vmem:[%s11574_s8 + $0xd8] sm:$0xf0]  ;;  %v7400_v57 = vld [vmem:[%s11574_s8 + $0x44] sm:$0xf] }
 0x695   : > { %v10487_v50 = vpack.c.bf16 %v4512_v12, %v4510_v36  ;;  %5268 = vmatpush.bf16.msrb.mxu2 %v7109_v44  ;;  %v7082_v44 = vld [vmem:[%s11574_s8 + $0x48] sm:$0xf0] }
 0x696   : > { %v4393_v59 = vpop.f32.mrf.mxu2 }
 0x697   : > { %4771 = vmatmul.bf16.gmra.mxu1 %v10487_v50  ;;  %v4394_v62 = vadd.f32 %v4393_v59, %v10490_v60 }
 0x699   : > { %v4443_v61 = vadd.f32 %v4442_v15, %v4394_v62  ;;  %v7421_v62 = vld [vmem:[%s11574_s8 + $0xe4] sm:$0xf0] }
 0x69a   : > { %v4447_v20 = vpop.f32.mrf.mxu0 }
 0x69b   : > { %v4483_v28 = vmax.f32 %v4443_v61, 0.0  ;;  %v7096_v61 = vld [vmem:[%s11574_s8 + $0x60] sm:$0xf] }
 0x69e   : > { %v4395_v21 = vpop.f32.mrf.mxu2 }
 0x69f   : > { %v4396_v10 = vadd.f32 %v4395_v21, %v10490_v60  ;;  %v7085_v21 = vor.u32 %v7400_v57, %v7082_v44 }
 0x6a1   : > { %v4445_v13 = vadd.f32 %v4444_v35, %v4396_v10  ;;  %v7157_v35 = vor.u32 %v7418_v5, %v7154_v54  ;;  %v7405_v10 = vld [vmem:[%s11574_s8 + $0x64] sm:$0xf0] }
 0x6a2   : > { %v4449_v40 = vpop.f32.mrf.mxu0 }
 0x6a3   : > { %v4485_v31 = vmax.f32 %v4445_v13, 0.0  ;;  %4839 = vmatmul.bf16.gmra.mxu2 %v10444_v7  ;;  %v7404_v7 = vld [vmem:[%s11574_s8 + $0x64] sm:$0xf]  ;;  %5319 = vmatpush.bf16.msrb.mxu0 %v7157_v35 }
 0x6a4   : > { %v7101_v24 = vor.u32 %v7404_v7, %v7098_v32 }
 0x6a5   : > { %v4515_v26 = vpack.c.bf16 %v4485_v31, %v4483_v28 }
 0x6a6   : > { %v4398_v3 = vpop.f32.mrf.mxu2  ;;  %5269 = vmatpush.bf16.msrb.mxu2 %v7101_v24 }
 0x6a7   : > { %4785 = vmatmul.bf16.vlgmr.msra.gmra.mxu3 %v4515_v26  ;;  %4883 = vmatmul.bf16.vlgmr.msra.gmra.mxu0 %v4515_v26  ;;  %v4399_v22 = vadd.f32 %v4398_v3, %v10490_v60  ;;  %v7416_v26 = vld [vmem:[%s11574_s8 + $0xc4] sm:$0xf]  ;;  %v7146_v3 = vld [vmem:[%s11574_s8 + $0xc8] sm:$0xf0] }
 0x6a9   : > { %v4448_v63 = vadd.f32 %v4447_v20, %v4399_v22  ;;  %v7149_v22 = vor.u32 %v7416_v26, %v7146_v3 }
 0x6aa   : > { %v4452_v34 = vpop.f32.mrf.mxu0  ;;  %5270 = vmatpush.bf16.msrb.mxu2 %v7093_v30 }
 0x6ab   : > { %v4487_v55 = vmax.f32 %v4448_v63, 0.0  ;;  %5320 = vmatpush.bf16.msrb.mxu0 %v7149_v22  ;;  %v7410_v22 = vld [vmem:[%s11574_s8 + $0x94] sm:$0xf] }
 0x6ae   : > { %v4400_v53 = vpop.f32.mrf.mxu2  ;;  %5271 = vmatpush.bf16.msrb.mxu2 %v7085_v21  ;;  %v7136_v21 = vld [vmem:[%s11574_s8 + $0xb0] sm:$0xf] }
 0x6af   : > { %v4401_v27 = vadd.f32 %v4400_v53, %v10490_v60  ;;  %v7419_v53 = vld [vmem:[%s11574_s8 + $0xd4] sm:$0xf0] }
 0x6b1   : > { %v4450_v1 = vadd.f32 %v4449_v40, %v4401_v27  ;;  %v7097_v40 = vor.u32 %v7405_v10, %v7096_v61  ;;  %v7398_v27 = vld [vmem:[%s11574_s8 + $0x34] sm:$0xf] }
 0x6b2   : > { %v4454_v16 = vpop.f32.mrf.mxu0  ;;  %v7394_v61 = vld [vmem:[%s11574_s8 + $0x14] sm:$0xf] }
 0x6b3   : > { %v4489_v45 = vmax.f32 %v4450_v1, 0.0  ;;  %4844 = vmatmul.bf16.gmra.mxu2 %v10451_v25  ;;  %v7168_v25 = vld [vmem:[%s11574_s8 + $0xf0] sm:$0xf]  ;;  %5171 = vmatpush.bf16.msrb.mxu1 %v7097_v40  ;;  %v7074_v1 = vld [vmem:[%s11574_s8 + $0x38] sm:$0xf0] }
 0x6b4   : > { %v7169_v58 = vor.u32 %v7423_v0, %v7168_v25  ;;  %v7414_v0 = vld [vmem:[%s11574_s8 + $0xb4] sm:$0xf] }
 0x6b5   : > { %v4517_v14 = vpack.c.bf16 %v4489_v45, %v4487_v55  ;;  %v7088_v55 = vld [vmem:[%s11574_s8 + $0x50] sm:$0xf]  ;;  %v7403_v45 = vld [vmem:[%s11574_s8 + $0x54] sm:$0xf0] }
 0x6b6   : > { %v4403_v4 = vpop.f32.mrf.mxu2  ;;  %5219 = vmatpush.bf16.msrb.mxu3 %v7169_v58  ;;  %v7089_v41 = vor.u32 %v7403_v45, %v7088_v55  ;;  %v7138_v58 = vld [vmem:[%s11574_s8 + $0xb8] sm:$0xf0] }
 0x6b7   : > { %4790 = vmatmul.bf16.gmra.mxu3 %v4517_v14  ;;  %4888 = vmatmul.bf16.gmra.mxu0 %v4517_v14  ;;  %v4404_v19 = vadd.f32 %v4403_v4, %v10490_v60  ;;  %v7141_v37 = vor.u32 %v7414_v0, %v7138_v58  ;;  %v7112_v58 = vld [vmem:[%s11574_s8 + $0x80] sm:$0xf] }
 0x6b8   : > { %5172 = vmatpush.bf16.msrb.mxu1 %v7089_v41  ;;  %v7120_v41 = vld [vmem:[%s11574_s8 + $0x90] sm:$0xf] }
 0x6b9   : > { %v4453_v52 = vadd.f32 %v4452_v34, %v4404_v19  ;;  %5321 = vmatpush.bf16.msrb.mxu0 %v7141_v37  ;;  %v7409_v37 = vld [vmem:[%s11574_s8 + $0x84] sm:$0xf0] }
 0x6ba   : > { %v4457_v18 = vpop.f32.mrf.mxu0 }
 0x6bb   : > { %v4491_v23 = vmax.f32 %v4453_v52, 0.0  ;;  %v7396_v52 = vld [vmem:[%s11574_s8 + $0x24] sm:$0xf] }
 0x6be   : > { %v4405_v39 = vpop.f32.mrf.mxu2 }
 0x6bf   : > { %v4406_v33 = vadd.f32 %v4405_v39, %v10490_v60  ;;  %v7417_v39 = vld [vmem:[%s11574_s8 + $0xc4] sm:$0xf0] }
 0x6c1   : > { %v4455_v15 = vadd.f32 %v4454_v16, %v4406_v33  ;;  %v7077_v16 = vor.u32 %v7398_v27, %v7074_v1  ;;  %v7066_v33 = vld [vmem:[%s11574_s8 + $0x28] sm:$0xf0]  ;;  %v7128_v27 = vld [vmem:[%s11574_s8 + $0xa0] sm:$0xf]  ;;  %v7413_v1 = vld [vmem:[%s11574_s8 + $0xa4] sm:$0xf0] }
 0x6c2   : > { %v4459_v2 = vpop.f32.mrf.mxu0  ;;  %v7129_v45 = vor.u32 %v7413_v1, %v7128_v27 }
 0x6c3   : > { %v4493_v9 = vmax.f32 %v4455_v15, 0.0  ;;  %4849 = vmatmul.bf16.gmra.mxu2 %v10458_v43  ;;  %v7160_v43 = vld [vmem:[%s11574_s8 + $0xe0] sm:$0xf] }
 0x6c4   : > { %v7161_v29 = vor.u32 %v7421_v62, %v7160_v43  ;;  %5272 = vmatpush.bf16.msrb.mxu2 %v7077_v16  ;;  %v7080_v15 = vld [vmem:[%s11574_s8 + $0x40] sm:$0xf]  ;;  %v7412_v43 = vld [vmem:[%s11574_s8 + $0xa4] sm:$0xf]  ;;  %v7130_v62 = vld [vmem:[%s11574_s8 + $0xa8] sm:$0xf0] }
 0x6c5   : > { %v4519_v36 = vpack.c.bf16 %v4493_v9, %v4491_v23  ;;  %v7401_v23 = vld [vmem:[%s11574_s8 + $0x44] sm:$0xf0] }
 0x6c6   : > { %v4408_v12 = vpop.f32.mrf.mxu2  ;;  %5220 = vmatpush.bf16.msrb.mxu3 %v7161_v29  ;;  %v7081_v5 = vor.u32 %v7401_v23, %v7080_v15  ;;  %v7133_v29 = vor.u32 %v7412_v43, %v7130_v62  ;;  %v7395_v15 = vld [vmem:[%s11574_s8 + $0x14] sm:$0xf0] }
 0x6c7   : > { %4795 = vmatmul.bf16.gmra.mxu3 %v4519_v36  ;;  %4893 = vmatmul.bf16.gmra.mxu0 %v4519_v36  ;;  %v4409_v20 = vadd.f32 %v4408_v12, %v10490_v60 }
 0x6c8   : > { %5173 = vmatpush.bf16.msrb.mxu1 %v7081_v5  ;;  %5322 = vmatpush.bf16.msrb.mxu0 %v7133_v29  ;;  %v4562_v29 = vld [vmem:[%s11575_s19] sm:$0x3]  ;;  %s5988_s19 = sshll.u32 %s5985_s16, 4  ;;  %s11168_s19 = int_to_ptr.hbm [resolvable:$true] %s5988_s19 }
 0x6c9   : > { %v4458_v28 = vadd.f32 %v4457_v18, %v4409_v20 }
 0x6ca   : > { %v4462_v59 = vpop.f32.mrf.mxu0 }
 0x6cb   : > { %v4495_v11 = vmax.f32 %v4458_v28, 0.0 }
 0x6ce   : > { %v4410_v13 = vpop.f32.mrf.mxu2 }
 0x6cf   : > { %v4411_v31 = vadd.f32 %v4410_v13, %v10490_v60  ;;  %v7058_v13 = vld [vmem:[%s11574_s8 + $0x18] sm:$0xf0] }
 0x6d0   : > { %v7061_v40 = vor.u32 %v7394_v61, %v7058_v13 }
 0x6d1   : > { %v4460_v6 = vadd.f32 %v4459_v2, %v4411_v31  ;;  %v7069_v2 = vor.u32 %v7396_v52, %v7066_v33  ;;  %v7056_v33 = vld [vmem:[%s11574_s8 + $0x10] sm:$0xf] }
 0x6d2   : > { %v4464_v34 = vpop.f32.mrf.mxu0  ;;  %v7057_v23 = vor.u32 %v7395_v15, %v7056_v33 }
 0x6d3   : > { %v4497_v42 = vmax.f32 %v4460_v6, 0.0  ;;  %4854 = vmatmul.bf16.gmra.mxu2 %v10466_v38  ;;  %v7152_v38 = vld [vmem:[%s11574_s8 + $0xd0] sm:$0xf] }
 0x6d4   : > { %v7153_v63 = vor.u32 %v7419_v53, %v7152_v38  ;;  %5273 = vmatpush.bf16.msrb.mxu2 %v7069_v2  ;;  %v7072_v6 = vld [vmem:[%s11574_s8 + $0x30] sm:$0xf] }
 0x6d5   : > { %v4521_v7 = vpack.c.bf16 %v4497_v42, %v4495_v11  ;;  %v7399_v11 = vld [vmem:[%s11574_s8 + $0x34] sm:$0xf0] }
 0x6d6   : > { %v4413_v32 = vpop.f32.mrf.mxu2  ;;  %5221 = vmatpush.bf16.msrb.mxu3 %v7153_v63  ;;  %v7073_v26 = vor.u32 %v7399_v11, %v7072_v6 }
 0x6d7   : > { %4800 = vmatmul.bf16.gmra.mxu3 %v4521_v7  ;;  %4898 = vmatmul.bf16.gmra.mxu0 %v4521_v7  ;;  %v4414_v24 = vadd.f32 %v4413_v32, %v10490_v60  ;;  %v7122_v7 = vld [vmem:[%s11574_s8 + $0x98] sm:$0xf0] }
 0x6d8   : > { %5274 = vmatpush.bf16.msrb.mxu2 %v7061_v40  ;;  %5174 = vmatpush.bf16.msrb.mxu1 %v7073_v26  ;;  %v7125_v32 = vor.u32 %v7410_v22, %v7122_v7 }
 0x6d9   : > { %v4463_v14 = vadd.f32 %v4462_v59, %v4414_v24 }
 0x6da   : > { %v4467_v56 = vpop.f32.mrf.mxu0  ;;  %5323 = vmatpush.bf16.msrb.mxu0 %v7125_v32 }
 0x6db   : > { %v4499_v19 = vmax.f32 %v4463_v14, 0.0  ;;  %v7411_v14 = vld [vmem:[%s11574_s8 + $0x94] sm:$0xf0] }
 0x6de   : > { %v4415_v8 = vpop.f32.mrf.mxu2 }
 0x6df   : > { %v4416_v4 = vadd.f32 %v4415_v8, %v10490_v60 }
 0x6e1   : > { %v4465_v18 = vadd.f32 %v4464_v34, %v4416_v4  ;;  %v7121_v4 = vor.u32 %v7411_v14, %v7120_v41 }
 0x6e2   : > { %v4469_v47 = vpop.f32.mrf.mxu0 }
 0x6e3   : > { %v4501_v25 = vmax.f32 %v4465_v18, 0.0  ;;  %4859 = vmatmul.bf16.gmra.mxu2 %v10473_v46  ;;  %v7144_v46 = vld [vmem:[%s11574_s8 + $0xc0] sm:$0xf] }
 0x6e4   : > { %v7145_v51 = vor.u32 %v7417_v39, %v7144_v46  ;;  %v7114_v46 = vld [vmem:[%s11574_s8 + $0x88] sm:$0xf0] }
 0x6e5   : > { %v4523_v17 = vpack.c.bf16 %v4501_v25, %v4499_v19  ;;  %v7064_v19 = vld [vmem:[%s11574_s8 + $0x20] sm:$0xf]  ;;  %v7397_v25 = vld [vmem:[%s11574_s8 + $0x24] sm:$0xf0] }
 0x6e6   : > { %v4418_v30 = vpop.f32.mrf.mxu2  ;;  %5222 = vmatpush.bf16.msrb.mxu3 %v7145_v51  ;;  %v7065_v0 = vor.u32 %v7397_v25, %v7064_v19 }
 0x6e7   : > { %4805 = vmatmul.bf16.gmra.mxu3 %v4523_v17  ;;  %4903 = vmatmul.bf16.gmra.mxu0 %v4523_v17  ;;  %v4419_v49 = vadd.f32 %v4418_v30, %v10490_v60  ;;  %v7408_v17 = vld [vmem:[%s11574_s8 + $0x84] sm:$0xf]  ;;  %v4737_v30 = vpop.f32.mrf.mxu1 }
 0x6e8   : > { %5175 = vmatpush.bf16.msrb.mxu1 %v7065_v0  ;;  %v7117_v52 = vor.u32 %v7408_v17, %v7114_v46 }
 0x6e9   : > { %v4468_v54 = vadd.f32 %v4467_v56, %v4419_v49  ;;  %v7392_v56 = vld [vmem:[%s11574_s8 + $0x4] sm:$0xf]  ;;  %v7113_v49 = vor.u32 %v7409_v37, %v7112_v58 }
 0x6ea   : > { %v4472_v12 = vpop.f32.mrf.mxu0  ;;  %5324 = vmatpush.bf16.msrb.mxu0 %v7117_v52 }
 0x6eb   : > { %v4503_v59 = vmax.f32 %v4468_v54, 0.0 }
 0x6ec   : > { %5176 = vmatpush.bf16.msrb.mxu1 %v7057_v23 }
 0x6ee   : > { %v4420_v9 = vpop.f32.mrf.mxu2 }
 0x6ef   : > { %v4421_v35 = vadd.f32 %v4420_v9, %v10490_v60 }
 0x6f1   : > { %v4470_v36 = vadd.f32 %v4469_v47, %v4421_v35  ;;  %v7393_v35 = vld [vmem:[%s11574_s8 + $0x4] sm:$0xf0] }
 0x6f2   : > { %v4474_v31 = vpop.f32.mrf.mxu0 }
 0x6f3   : > { %v4505_v20 = vmax.f32 %v4470_v36, 0.0  ;;  %4864 = vmatmul.bf16.gmra.mxu2 %v10480_v48  ;;  %v7415_v48 = vld [vmem:[%s11574_s8 + $0xb4] sm:$0xf0] }
 0x6f4   : > { %v7137_v10 = vor.u32 %v7415_v48, %v7136_v21 }
 0x6f5   : > { %v4525_v57 = vpack.c.bf16 %v4505_v20, %v4503_v59  ;;  %v4739_v20 = vpop.f32.mrf.mxu1 }
 0x6f6   : > { %v4423_v44 = vpop.f32.mrf.mxu2  ;;  %5223 = vmatpush.bf16.msrb.mxu3 %v7137_v10  ;;  %v10714_v10 = vperm.slane %v4562_v29, 0 }
 0x6f7   : > { %4810 = vmatmul.bf16.gmra.mxu3 %v4525_v57  ;;  %4908 = vmatmul.bf16.gmra.mxu0 %v4525_v57  ;;  %v4424_v28 = vadd.f32 %v4423_v44, %v10490_v60  ;;  %v10711_v44 = vperm.slane %v4562_v29, 1 }
 0x6f9   : > { %v4473_v3 = vadd.f32 %v4472_v12, %v4424_v28 }
 0x6fa   : > { %v4477_v16 = vpop.f32.mrf.mxu0  ;;  %5224 = vmatpush.bf16.msrb.mxu3 %v7129_v45 }
 0x6fb   : > { %v4507_v38 = vmax.f32 %v4473_v3, 0.0 }
 0x6fd   : > { %v4742_v62 = vpop.f32.mrf.mxu1 }
 0x6fe   : > { %v4425_v42 = vpop.f32.mrf.mxu2  ;;  %5225 = vmatpush.bf16.msrb.mxu3 %v7121_v4  ;;  %v4743_v4 = vadd.f32 %v4742_v62, %v10714_v10 }
 0x6ff   : > { %v4426_v34 = vadd.f32 %v4425_v42, %v10490_v60  ;;  %v4738_v42 = vadd.f32 %v4737_v30, %v10714_v10 }
 0x701   : > { %v4475_v24 = vadd.f32 %v4474_v31, %v4426_v34  ;;  %v4740_v34 = vadd.f32 %v4739_v20, %v10714_v10 }
 0x702   : > { %v4479_v2 = vpop.f32.mrf.mxu0  ;;  %5226 = vmatpush.bf16.msrb.mxu3 %v7113_v49 }
 0x703   : > { %v4509_v53 = vmax.f32 %v4475_v24, 0.0  ;;  %4869 = vmatmul.bf16.gmra.mxu2 %v10487_v50  ;;  %v7050_v50 = vld [vmem:[%s11574_s8 + $0x8] sm:$0xf0] }
 0x704   : > { %v7053_v8 = vor.u32 %v7392_v56, %v7050_v50 }
 0x705   : > { %v4527_v63 = vpack.c.bf16 %v4509_v53, %v4507_v38  ;;  %v4744_v28 = vpop.f32.mrf.mxu1 }
 0x706   : > { %v4428_v55 = vpop.f32.mrf.mxu2  ;;  %5275 = vmatpush.bf16.msrb.mxu2 %v7053_v8  ;;  %v4745_v0 = vadd.f32 %v4744_v28, %v10714_v10 }
 0x707   : > { %4815 = vmatmul.bf16.gmra.mxu3 %v4527_v63  ;;  %4913 = vmatmul.bf16.gmra.mxu0 %v4527_v63  ;;  %v4429_v18 = vadd.f32 %v4428_v55, %v10490_v60 }
 0x709   : > { %v4478_v39 = vadd.f32 %v4477_v16, %v4429_v18 }
 0x70b   : > { %v4511_v5 = vmax.f32 %v4478_v39, 0.0 }
 0x70d   : > { %v4747_v27 = vpop.f32.mrf.mxu1 }
 0x70e   : > { %v4430_v47 = vpop.f32.mrf.mxu2 }
 0x70f   : > { %v4431_v51 = vadd.f32 %v4430_v47, %v10490_v60  ;;  %v7048_v60 = vld [vmem:[%s11574_s8] sm:$0xf] }
 0x710   : > { %v7049_v36 = vor.u32 %v7393_v35, %v7048_v60  ;;  %v4748_v60 = vadd.f32 %v4747_v27, %v10714_v10 }
 0x711   : > { %v4480_v9 = vadd.f32 %v4479_v2, %v4431_v51 }
 0x712   : > { %5177 = vmatpush.bf16.msrb.mxu1 %v7049_v36 }
 0x713   : > { %v4513_v54 = vmax.f32 %v4480_v9, 0.0 }
 0x715   : > { %v4529_v12 = vpack.c.bf16 %v4513_v54, %v4511_v5  ;;  %v4749_v25 = vpop.f32.mrf.mxu1 }
 0x716   : > { %v4835_v59 = vpop.f32.mrf.mxu2 }
 0x717   : > { %4820 = vmatmul.bf16.gmra.mxu3 %v4529_v12  ;;  %4918 = vmatmul.bf16.gmra.mxu0 %v4529_v12  ;;  %v4836_v48 = vadd.f32 %v4835_v59, %v10711_v44  ;;  %v4750_v12 = vadd.f32 %v4749_v25, %v10714_v10 }
 0x71d   : > { %v4752_v52 = vpop.f32.mrf.mxu1 }
 0x71e   : > { %v4837_v43 = vpop.f32.mrf.mxu2 }
 0x71f   : > { %v4838_v13 = vadd.f32 %v4837_v43, %v10711_v44 }
 0x724   : > { %v4884_v57 = vpop.f32.mrf.mxu0 }
 0x725   : > { %v4885_v40 = vadd.f32 %v4884_v57, %v4836_v48  ;;  %v4754_v43 = vpop.f32.mrf.mxu1 }
 0x726   : > { %v4840_v21 = vpop.f32.mrf.mxu2 }
 0x727   : > { %v4925_v26 = vmax.f32 %v4885_v40, 0.0  ;;  %v4841_v55 = vadd.f32 %v4840_v21, %v10711_v44 }
 0x72a   : > { %v4786_v61 = vpop.f32.mrf.mxu3 }
 0x72b   : > { %v4787_v22 = vadd.f32 %v4786_v61, %v4738_v42 }
 0x72c   : > { %v4886_v31 = vpop.f32.mrf.mxu0 }
 0x72d   : > { %v4887_v6 = vadd.f32 %v4886_v31, %v4838_v13  ;;  %v4924_v53 = vmax.f32 %v4787_v22, 0.0  ;;  %v4757_v28 = vpop.f32.mrf.mxu1 }
 0x72e   : > { %v4842_v11 = vpop.f32.mrf.mxu2  ;;  %v4758_v25 = vadd.f32 %v4757_v28, %v10714_v10 }
 0x72f   : > { %v4927_v3 = vmax.f32 %v4887_v6, 0.0  ;;  %v4843_v56 = vadd.f32 %v4842_v11, %v10711_v44 }
 0x731   : > { %v4957_v7 = vpack.c.bf16 %v4927_v3, %v4925_v26 }
 0x732   : > { %v4788_v32 = vpop.f32.mrf.mxu3 }
 0x733   : > { %v4789_v24 = vadd.f32 %v4788_v32, %v4740_v34  ;;  %5227 = vmatmul.bf16.vlgmr.msrb.gmra.mxu3 %v4957_v7  ;;  %5325 = vmatmul.bf16.vlgmr.msrb.gmra.mxu0 %v4957_v7  ;;  %v4753_v34 = vadd.f32 %v4752_v52, %v10714_v10  ;;  %v4755_v32 = vadd.f32 %v4754_v43, %v10714_v10 }
 0x734   : > { %v4889_v38 = vpop.f32.mrf.mxu0 }
 0x735   : > { %v4926_v63 = vmax.f32 %v4789_v24, 0.0  ;;  %v4890_v50 = vadd.f32 %v4889_v38, %v4841_v55  ;;  %v4759_v27 = vpop.f32.mrf.mxu1 }
 0x736   : > { %v4845_v1 = vpop.f32.mrf.mxu2 }
 0x737   : > { %v4956_v16 = vpack.c.bf16 %v4926_v63, %v4924_v53  ;;  %v4929_v18 = vmax.f32 %v4890_v50, 0.0  ;;  %v4846_v33 = vadd.f32 %v4845_v1, %v10711_v44 }
 0x739   : > { %5178 = vmatmul.bf16.vlgmr.msrb.gmra.mxu1 %v4956_v16  ;;  %5276 = vmatmul.bf16.vlgmr.msrb.gmra.mxu2 %v4956_v16 }
 0x73a   : > { %v4791_v45 = vpop.f32.mrf.mxu3 }
 0x73b   : > { %v4792_v58 = vadd.f32 %v4791_v45, %v4743_v4 }
 0x73c   : > { %v4891_v8 = vpop.f32.mrf.mxu0 }
 0x73d   : > { %v4892_v41 = vadd.f32 %v4891_v8, %v4843_v56  ;;  %v4928_v49 = vmax.f32 %v4792_v58, 0.0 }
 0x73e   : > { %v4847_v14 = vpop.f32.mrf.mxu2 }
 0x73f   : > { %v4931_v19 = vmax.f32 %v4892_v41, 0.0  ;;  %v4848_v2 = vadd.f32 %v4847_v14, %v10711_v44 }
 0x741   : > { %v4959_v37 = vpack.c.bf16 %v4931_v19, %v4929_v18  ;;  %v4762_v19 = vpop.f32.mrf.mxu1 }
 0x742   : > { %v4793_v17 = vpop.f32.mrf.mxu3 }
 0x743   : > { %v4794_v30 = vadd.f32 %v4793_v17, %v4745_v0  ;;  %5232 = vmatmul.bf16.gmra.mxu3 %v4959_v37  ;;  %5330 = vmatmul.bf16.gmra.mxu0 %v4959_v37  ;;  %v4760_v17 = vadd.f32 %v4759_v27, %v10714_v10 }
 0x744   : > { %v4894_v47 = vpop.f32.mrf.mxu0 }
 0x745   : > { %v4930_v46 = vmax.f32 %v4794_v30, 0.0  ;;  %v4895_v23 = vadd.f32 %v4894_v47, %v4846_v33 }
 0x746   : > { %v4850_v39 = vpop.f32.mrf.mxu2 }
 0x747   : > { %v4958_v51 = vpack.c.bf16 %v4930_v46, %v4928_v49  ;;  %v4933_v35 = vmax.f32 %v4895_v23, 0.0  ;;  %v4851_v40 = vadd.f32 %v4850_v39, %v10711_v44 }
 0x749   : > { %5183 = vmatmul.bf16.gmra.mxu1 %v4958_v51  ;;  %5281 = vmatmul.bf16.gmra.mxu2 %v4958_v51 }
 0x74a   : > { %v4796_v15 = vpop.f32.mrf.mxu3 }
 0x74b   : > { %v4797_v59 = vadd.f32 %v4796_v15, %v4748_v60  ;;  %v4764_v15 = vpop.f32.mrf.mxu1 }
 0x74c   : > { %v4896_v9 = vpop.f32.mrf.mxu0 }
 0x74d   : > { %v4897_v5 = vadd.f32 %v4896_v9, %v4848_v2  ;;  %v4932_v21 = vmax.f32 %v4797_v59, 0.0 }
 0x74e   : > { %v4852_v54 = vpop.f32.mrf.mxu2 }
 0x74f   : > { %v4935_v36 = vmax.f32 %v4897_v5, 0.0  ;;  %v4853_v6 = vadd.f32 %v4852_v54, %v10711_v44 }
 0x751   : > { %v4961_v20 = vpack.c.bf16 %v4935_v36, %v4933_v35  ;;  %v4763_v36 = vadd.f32 %v4762_v19, %v10714_v10 }
 0x752   : > { %v4798_v62 = vpop.f32.mrf.mxu3 }
 0x753   : > { %v4799_v29 = vadd.f32 %v4798_v62, %v4750_v12  ;;  %5237 = vmatmul.bf16.gmra.mxu3 %v4961_v20  ;;  %5335 = vmatmul.bf16.gmra.mxu0 %v4961_v20  ;;  %v4765_v20 = vadd.f32 %v4764_v15, %v10714_v10  ;;  %v5004_v15 = vld [vmem:[%s11576_s14] sm:$0x3]  ;;  %s7894_s14 = sshra.s32 %s11168_s19, 4  ;;  %s7895_s14 = int_to_ptr.hbm [resolvable:$true] %s7894_s14 }
 0x754   : > { %v4899_v57 = vpop.f32.mrf.mxu0  ;;  %s7896_s7 = scalar_lea.hbm %s7895_s14, 128  ;;  %p7901_p8 = scmp.lt.s32.totalorder %s7895_s14, %s11606_s17 }
 0x755   : > { %v4934_v48 = vmax.f32 %v4799_v29, 0.0  ;;  %v4900_v11 = vadd.f32 %v4899_v57, %v4851_v40  ;;  %v4767_v29 = vpop.f32.mrf.mxu1  ;;  %p7897_p4 = scmp.ne.s32.totalorder %s7895_s14, %s7896_s7 }
 0x756   : > { %v4855_v61 = vpop.f32.mrf.mxu2 }
 0x757   : > { %v4960_v13 = vpack.c.bf16 %v4934_v48, %v4932_v21  ;;  %v4937_v22 = vmax.f32 %v4900_v11, 0.0  ;;  %v4856_v50 = vadd.f32 %v4855_v61, %v10711_v44  ;;  %p7898_p6 = pnand %p7897_p4, %p8105_p5 }
 0x759   : > { %5188 = vmatmul.bf16.gmra.mxu1 %v4960_v13  ;;  %5286 = vmatmul.bf16.gmra.mxu2 %v4960_v13  ;;  %p7899_p7 = pneg %p7898_p6 }
 0x75a   : > { %v4801_v31 = vpop.f32.mrf.mxu3 }
 0x75b   : > { %v4802_v24 = vadd.f32 %v4801_v31, %v4753_v34 }
 0x75c   : > { %v4901_v42 = vpop.f32.mrf.mxu0 }
 0x75d   : > { %v4902_v26 = vadd.f32 %v4901_v42, %v4853_v6  ;;  %v4936_v16 = vmax.f32 %v4802_v24, 0.0 }
 0x75e   : > { %v4857_v3 = vpop.f32.mrf.mxu2 }
 0x75f   : > { %v4939_v7 = vmax.f32 %v4902_v26, 0.0  ;;  %v4858_v41 = vadd.f32 %v4857_v3, %v10711_v44  ;;  %v4769_v26 = vpop.f32.mrf.mxu1 }
 0x761   : > { %v4963_v38 = vpack.c.bf16 %v4939_v7, %v4937_v22  ;;  %v4768_v7 = vadd.f32 %v4767_v29, %v10714_v10 }
 0x762   : > { %v4803_v53 = vpop.f32.mrf.mxu3 }
 0x763   : > { %v4804_v63 = vadd.f32 %v4803_v53, %v4755_v32  ;;  %5242 = vmatmul.bf16.gmra.mxu3 %v4963_v38  ;;  %5340 = vmatmul.bf16.gmra.mxu0 %v4963_v38  ;;  %v4770_v38 = vadd.f32 %v4769_v26, %v10714_v10 }
 0x764   : > { %v4904_v1 = vpop.f32.mrf.mxu0 }
 0x765   : > { %v4938_v55 = vmax.f32 %v4804_v63, 0.0  ;;  %v4905_v14 = vadd.f32 %v4904_v1, %v4856_v50 }
 0x766   : > { %v4860_v45 = vpop.f32.mrf.mxu2 }
 0x767   : > { %v4962_v56 = vpack.c.bf16 %v4938_v55, %v4936_v16  ;;  %v4941_v0 = vmax.f32 %v4905_v14, 0.0  ;;  %v4861_v2 = vadd.f32 %v4860_v45, %v10711_v44  ;;  %v4772_v16 = vpop.f32.mrf.mxu1 }
 0x769   : > { %5193 = vmatmul.bf16.gmra.mxu1 %v4962_v56  ;;  %5291 = vmatmul.bf16.gmra.mxu2 %v4962_v56 }
 0x76a   : > { %v4806_v8 = vpop.f32.mrf.mxu3 }
 0x76b   : > { %v4807_v30 = vadd.f32 %v4806_v8, %v4758_v25 }
 0x76c   : > { %v4906_v4 = vpop.f32.mrf.mxu0 }
 0x76d   : > { %v4907_v18 = vadd.f32 %v4906_v4, %v4858_v41  ;;  %v4940_v51 = vmax.f32 %v4807_v30, 0.0 }
 0x76e   : > { %v4862_v37 = vpop.f32.mrf.mxu2 }
 0x76f   : > { %v4943_v58 = vmax.f32 %v4907_v18, 0.0  ;;  %v4863_v5 = vadd.f32 %v4862_v37, %v10711_v44 }
 0x771   : > { %v4965_v47 = vpack.c.bf16 %v4943_v58, %v4941_v0  ;;  %v4774_v0 = vpop.f32.mrf.mxu1  ;;  %v4773_v58 = vadd.f32 %v4772_v16, %v10714_v10 }
 0x772   : > { %v4808_v49 = vpop.f32.mrf.mxu3  ;;  %v4775_v30 = vadd.f32 %v4774_v0, %v10714_v10 }
 0x773   : > { %v4809_v46 = vadd.f32 %v4808_v49, %v4760_v17  ;;  %5247 = vmatmul.bf16.gmra.mxu3 %v4965_v47  ;;  %5345 = vmatmul.bf16.gmra.mxu0 %v4965_v47 }
 0x774   : > { %v4909_v39 = vpop.f32.mrf.mxu0 }
 0x775   : > { %v4942_v52 = vmax.f32 %v4809_v46, 0.0  ;;  %v4910_v54 = vadd.f32 %v4909_v39, %v4861_v2  ;;  %v10750_v2 = vperm.slane %v5004_v15, 0 }
 0x776   : > { %v4865_v23 = vpop.f32.mrf.mxu2 }
 0x777   : > { %v4964_v33 = vpack.c.bf16 %v4942_v52, %v4940_v51  ;;  %v4945_v12 = vmax.f32 %v4910_v54, 0.0  ;;  %v4866_v31 = vadd.f32 %v4865_v23, %v10711_v44 }
 0x779   : > { %5198 = vmatmul.bf16.gmra.mxu1 %v4964_v33  ;;  %5296 = vmatmul.bf16.gmra.mxu2 %v4964_v33 }
 0x77a   : > { %v4811_v9 = vpop.f32.mrf.mxu3 }
 0x77b   : > { %v4812_v43 = vadd.f32 %v4811_v9, %v4763_v36 }
 0x77c   : > { %v4911_v60 = vpop.f32.mrf.mxu0 }
 0x77d   : > { %v4912_v35 = vadd.f32 %v4911_v60, %v4863_v5  ;;  %v4944_v13 = vmax.f32 %v4812_v43, 0.0  ;;  %v10754_v60 = vperm.slane %v5004_v15, 1 }
 0x77e   : > { %v4867_v48 = vpop.f32.mrf.mxu2 }
 0x77f   : > { %v4947_v59 = vmax.f32 %v4912_v35, 0.0  ;;  %v4868_v11 = vadd.f32 %v4867_v48, %v10711_v44 }
 0x781   : > { %v4967_v62 = vpack.c.bf16 %v4947_v59, %v4945_v12 }
 0x782   : > { %v4813_v57 = vpop.f32.mrf.mxu3 }
 0x783   : > { %v4814_v21 = vadd.f32 %v4813_v57, %v4765_v20  ;;  %5252 = vmatmul.bf16.gmra.mxu3 %v4967_v62  ;;  %5350 = vmatmul.bf16.gmra.mxu0 %v4967_v62 }
 0x784   : > { %v4914_v61 = vpop.f32.mrf.mxu0 }
 0x785   : > { %v4946_v40 = vmax.f32 %v4814_v21, 0.0  ;;  %v4915_v42 = vadd.f32 %v4914_v61, %v4866_v31 }
 0x786   : > { %v4870_v22 = vpop.f32.mrf.mxu2 }
 0x787   : > { %v4966_v28 = vpack.c.bf16 %v4946_v40, %v4944_v13  ;;  %v4949_v32 = vmax.f32 %v4915_v42, 0.0  ;;  %v4871_v41 = vadd.f32 %v4870_v22, %v10711_v44 }
 0x789   : > { %5203 = vmatmul.bf16.gmra.mxu1 %v4966_v28  ;;  %5301 = vmatmul.bf16.gmra.mxu2 %v4966_v28 }
 0x78a   : > { %v4816_v6 = vpop.f32.mrf.mxu3 }
 0x78b   : > { %v4817_v53 = vadd.f32 %v4816_v6, %v4768_v7 }
 0x78c   : > { %v4916_v3 = vpop.f32.mrf.mxu0 }
 0x78d   : > { %v4917_v34 = vadd.f32 %v4916_v3, %v4868_v11  ;;  %v4948_v45 = vmax.f32 %v4817_v53, 0.0 }
 0x78e   : > { %v4872_v8 = vpop.f32.mrf.mxu2 }
 0x78f   : > { %v4951_v24 = vmax.f32 %v4917_v34, 0.0  ;;  %v4873_v4 = vadd.f32 %v4872_v8, %v10711_v44 }
 0x791   : > { %v4969_v63 = vpack.c.bf16 %v4951_v24, %v4949_v32 }
 0x792   : > { %v4818_v27 = vpop.f32.mrf.mxu3 }
 0x793   : > { %v4819_v1 = vadd.f32 %v4818_v27, %v4770_v38  ;;  %5257 = vmatmul.bf16.gmra.mxu3 %v4969_v63  ;;  %5355 = vmatmul.bf16.gmra.mxu0 %v4969_v63  ;;  %v5926_v27 = vlaneseq }
 0x794   : > { %v4919_v55 = vpop.f32.mrf.mxu0 }
 0x795   : > { %v4950_v56 = vmax.f32 %v4819_v1, 0.0  ;;  %v4920_v18 = vadd.f32 %v4919_v55, %v4871_v41  ;;  %v10781_v41 = vand.u32 127, %v5926_v27 }
 0x797   : > { %v4968_v50 = vpack.c.bf16 %v4950_v56, %v4948_v45  ;;  %v4953_v37 = vmax.f32 %v4920_v18, 0.0  ;;  %vm5928_vm4 = vcmp.lt.s32.totalorder %v10781_v41, 1 }
 0x799   : > { %5208 = vmatmul.bf16.gmra.mxu1 %v4968_v50  ;;  %5306 = vmatmul.bf16.gmra.mxu2 %v4968_v50 }
 0x79a   : > { %v4821_v14 = vpop.f32.mrf.mxu3 }
 0x79b   : > { %v4822_v47 = vadd.f32 %v4821_v14, %v4773_v58 }
 0x79c   : > { %v4921_v19 = vpop.f32.mrf.mxu0 }
 0x79d   : > { %v4922_v25 = vadd.f32 %v4921_v19, %v4873_v4  ;;  %v4952_v51 = vmax.f32 %v4822_v47, 0.0 }
 0x79f   : > { %v4955_v17 = vmax.f32 %v4922_v25, 0.0 }
 0x7a1   : > { %v4971_v49 = vpack.c.bf16 %v4955_v17, %v4953_v37 }
 0x7a2   : > { %v4823_v46 = vpop.f32.mrf.mxu3 }
 0x7a3   : > { %v4824_v39 = vadd.f32 %v4823_v46, %v4775_v30  ;;  %5262 = vmatmul.bf16.gmra.mxu3 %v4971_v49  ;;  %5360 = vmatmul.bf16.gmra.mxu0 %v4971_v49 }
 0x7a5   : > { %v4954_v52 = vmax.f32 %v4824_v39, 0.0 }
 0x7a7   : > { %v4970_v44 = vpack.c.bf16 %v4954_v52, %v4952_v51 }
 0x7a9   : > { %5213 = vmatmul.bf16.gmra.mxu1 %v4970_v44  ;;  %5311 = vmatmul.bf16.gmra.mxu2 %v4970_v44 }
 0x7b0   : > { %v5326_v33 = vpop.f32.mrf.mxu0 }
 0x7b6   : > { %v5179_v10 = vpop.f32.mrf.mxu1  ;;  %v5228_v23 = vpop.f32.mrf.mxu3 }
 0x7b7   : > { %v5180_v9 = vadd.f32 %v5179_v10, %v10750_v2 }
 0x7b8   : > { %v5328_v5 = vpop.f32.mrf.mxu0 }
 0x7b9   : > { %v5229_v54 = vadd.f32 %v5228_v23, %v5180_v9 }
 0x7bb   : > { %5366 = vst [vmem:[%s10756_s30] sm:$0xff] %v5229_v54 }
 0x7bc   : > { %v5277_v35 = vpop.f32.mrf.mxu2 }
 0x7bd   : > { %v5278_v36 = vadd.f32 %v5277_v35, %v10754_v60 }
 0x7be   : > { %v5181_v12 = vpop.f32.mrf.mxu1  ;;  %v5230_v59 = vpop.f32.mrf.mxu3 }
 0x7bf   : > { %v10760_v20 = vadd.f32 %v5326_v33, %v5278_v36  ;;  %v5182_v43 = vadd.f32 %v5181_v12, %v10750_v2 }
 0x7c0   : > { %v5331_v62 = vpop.f32.mrf.mxu0 }
 0x7c1   : > { %v5398_v29 = vand.u32 2147483647, %v10760_v20  ;;  %v5622_v57 = vsub.f32 0.0, %v10760_v20  ;;  %v5231_v21 = vadd.f32 %v5230_v59, %v5182_v43 }
 0x7c3   : > { %v5414_v48 = vsub.f32 0.0, %v5398_v29  ;;  %v5638_v61 = vmul.f32 1.442695, %v5622_v57  ;;  %5367 = vst [vmem:[%s10756_s30 + $0x8] sm:$0xff] %v5231_v21 }
 0x7c4   : > { %v5279_v13 = vpop.f32.mrf.mxu2 }
 0x7c5   : > { %v5430_v40 = vmul.f32 1.442695, %v5414_v48  ;;  %7662 = vpow2.f32 %v5638_v61  ;;  %v5280_v28 = vadd.f32 %v5279_v13, %v10754_v60 }
 0x7c6   : > { %v5184_v31 = vpop.f32.mrf.mxu1  ;;  %v5233_v6 = vpop.f32.mrf.mxu3 }
 0x7c7   : > { %7664 = vpow2.f32 %v5430_v40  ;;  %v10767_v11 = vadd.f32 %v5328_v5, %v5280_v28  ;;  %v5185_v42 = vadd.f32 %v5184_v31, %v10750_v2 }
 0x7c8   : > { %v10772_v22 = vpop.f32.mrf.mxu0 }
 0x7c9   : > { %v5399_v26 = vand.u32 2147483647, %v10767_v11  ;;  %v5623_v3 = vsub.f32 0.0, %v10767_v11  ;;  %v5234_v34 = vadd.f32 %v5233_v6, %v5185_v42 }
 0x7cb   : > { %v7663_v7 = vpop.eup %7662  ;;  %v5415_v32 = vsub.f32 0.0, %v5399_v26  ;;  %v5640_v24 = vmul.f32 1.442695, %v5623_v3  ;;  %5368 = vst [vmem:[%s10756_s30 + $0x10] sm:$0xff] %v5234_v34 }
 0x7cc   : > { %v10775_v38 = vadd.f32 1.0, %v7663_v7  ;;  %v5282_v53 = vpop.f32.mrf.mxu2 }
 0x7cd   : > { %v7665_v63 = vpop.eup %7664  ;;  %v5432_v1 = vmul.f32 1.442695, %v5415_v32  ;;  %7666 = vpow2.f32 %v5640_v24  ;;  %v5283_v16 = vadd.f32 %v5282_v53, %v10754_v60 }
 0x7ce   : > { %v5462_v55 = vadd.f32 1.0, %v7665_v63  ;;  %7668 = vrcp.f32 %v10775_v38  ;;  %v5186_v45 = vpop.f32.mrf.mxu1  ;;  %v5235_v56 = vpop.f32.mrf.mxu3  ;;  %v5465_v50 = vmul.f32 -0.5, %v7665_v63  ;;  %v5468_v49 = vand.u32 2147483647, %v7665_v63 }
 0x7cf   : > { %7670 = vpow2.f32 %v5432_v1  ;;  %v10779_v8 = vadd.f32 %v5331_v62, %v5283_v16  ;;  %v5187_v14 = vadd.f32 %v5186_v45, %v10750_v2  ;;  %v5695_v9 = vand.u32 2147483647, %v10775_v38 }
 0x7d0   : > { %7672 = vlog2.f32 %v5462_v55  ;;  %v10786_v0 = vpop.f32.mrf.mxu0  ;;  %v5466_v37 = vadd.f32 1.0, %v5465_v50  ;;  %v5697_v35 = vand.u32 2147483648, %v10775_v38  ;;  %vm10797_vm6 = vcmp.lt.f32.partialorder %v5468_v49, 0.0004427343 }
 0x7d1   : > { %v5400_v4 = vand.u32 2147483647, %v10779_v8  ;;  %v5624_v18 = vsub.f32 0.0, %v10779_v8  ;;  %v5236_v25 = vadd.f32 %v5235_v56, %v5187_v14  ;;  %v5382_v62 = vmax.f32 %v10760_v20, 0.0 }
 0x7d2   : > { %v5467_v54 = vmul.f32 %v7665_v63, %v5466_v37  ;;  %vm5691_vm8 = vweird.f32 %v10775_v38  ;;  %vm5696_vm10 = vcmp.eq.f32.partialorder %v5695_v9, 8.507059e+37  ;;  %v5698_v13 = vor.u32 1.1754944e-38, %v5697_v35 }
 0x7d3   : > { %v7667_v19 = vpop.eup %7666  ;;  %v5416_v39 = vsub.f32 0.0, %v5400_v4  ;;  %5369 = vst [vmem:[%s10756_s30 + $0x18] sm:$0xff] %v5236_v25  ;;  %v5642_v44 = vmul.f32 1.442695, %v5624_v18 }
 0x7d4   : > { %v7669_v58 = vpop.eup %7668  ;;  %v10788_v17 = vadd.f32 1.0, %v7667_v19  ;;  %v5284_v30 = vpop.f32.mrf.mxu2 }
 0x7d5   : > { %v7671_v47 = vpop.eup %7670  ;;  %v5687_v46 = vmul.f32 %v7669_v58, %v10775_v38  ;;  %v5285_v5 = vadd.f32 %v5284_v30, %v10754_v60  ;;  %vm5692_vm7 = vweird.f32 %v7669_v58  ;;  %v5434_v43 = vmul.f32 1.442695, %v5416_v39 }
 0x7d6   : > { %v7673_v51 = vpop.eup %7672  ;;  %v5471_v52 = vadd.f32 1.0, %v7671_v47  ;;  %7674 = vrcp.f32 %v10788_v17  ;;  %v5189_v33 = vpop.f32.mrf.mxu1  ;;  %v5474_v36 = vmul.f32 -0.5, %v7671_v47  ;;  %vm5693_vm9 = vmor %vm5691_vm8, %vm5692_vm7  ;;  %v5477_v28 = vand.u32 2147483647, %v7671_v47 }
 0x7d7   : > { %v5238_v15 = vpop.f32.mrf.mxu3  ;;  %v5464_v10 = vmul.f32 0.6931472, %v7673_v51  ;;  %v5688_v23 = vsub.f32 1.0, %v5687_v46  ;;  %v10807_v21 = vadd.f32 %v10772_v22, %v5285_v5  ;;  %v5190_v48 = vadd.f32 %v5189_v33, %v10750_v2 }
 0x7d8   : > { %7676 = vlog2.f32 %v5471_v52  ;;  %v5475_v40 = vadd.f32 1.0, %v5474_v36  ;;  %v5710_v26 = vand.u32 2147483647, %v10788_v17  ;;  %v10817_v3 = vpop.f32.mrf.mxu0  ;;  %vm10826_vm11 = vcmp.lt.f32.partialorder %v5477_v28, 0.0004427343 }
 0x7d9   : > { %v5689_v59 = vmul.f32 %v7669_v58, %v5688_v23  ;;  %v5470_v29 = vsel %vm10797_vm6, %v5467_v54, %v5464_v10  ;;  %7678 = vpow2.f32 %v5642_v44  ;;  %v5401_v7 = vand.u32 2147483647, %v10807_v21 }
 0x7da   : > { %7680 = vpow2.f32 %v5434_v43  ;;  %v5606_v31 = vadd.f32 %v5470_v29, %v5382_v62  ;;  %v5625_v32 = vsub.f32 0.0, %v10807_v21  ;;  %v5239_v24 = vadd.f32 %v5238_v15, %v5190_v48 }
 0x7db   : > { %v5690_v57 = vadd.f32 %v7669_v58, %v5689_v59  ;;  %v5476_v45 = vmul.f32 %v7671_v47, %v5475_v40  ;;  %v5712_v50 = vand.u32 2147483648, %v10788_v17  ;;  %v5417_v19 = vsub.f32 0.0, %v5401_v7 }
 0x7dc   : > { %v7675_v61 = vpop.eup %7674  ;;  %v5287_v20 = vpop.f32.mrf.mxu2  ;;  %v5644_v25 = vmul.f32 1.442695, %v5625_v32  ;;  %5370 = vst [vmem:[%s10756_s30 + $0x20] sm:$0xff] %v5239_v24  ;;  %vm5706_vm13 = vweird.f32 %v10788_v17  ;;  %vm5711_vm14 = vcmp.eq.f32.partialorder %v5710_v26, 8.507059e+37  ;;  %v5384_v48 = vmax.f32 %v10779_v8, 0.0 }
 0x7dd   : > { %v5694_v6 = vsel %vm5693_vm9, %v7669_v58, %v5690_v57  ;;  %v5702_v42 = vmul.f32 %v7675_v61, %v10788_v17  ;;  %v5288_v16 = vadd.f32 %v5287_v20, %v10754_v60  ;;  %vm5707_vm12 = vweird.f32 %v7675_v61 }
 0x7de   : > { %v7677_v34 = vpop.eup %7676  ;;  %v5699_v22 = vsel %vm5696_vm10, %v5698_v13, %v5694_v6  ;;  %v5191_v38 = vpop.f32.mrf.mxu1  ;;  %v5383_v58 = vmax.f32 %v10767_v11, 0.0  ;;  %vm5708_vm15 = vmor %vm5706_vm13, %vm5707_vm12  ;;  %v5713_v46 = vor.u32 1.1754944e-38, %v5712_v50  ;;  %v5436_v17 = vmul.f32 1.442695, %v5417_v19 }
 0x7df   : > { %v5240_v53 = vpop.f32.mrf.mxu3  ;;  %v5929_v63 = vsel %vm5928_vm4, %v5606_v31, %v5699_v22  ;;  %v5473_v27 = vmul.f32 0.6931472, %v7677_v34  ;;  %v5703_v1 = vsub.f32 1.0, %v5702_v42  ;;  %v7679_v55 = vpop.eup %7678  ;;  %v10840_v49 = vadd.f32 %v10786_v0, %v5288_v16 }
 0x7e0   : > { %5946 = vst.msk [vmem:[%s10813_s28] sm:$0xff] %vm5945_vm5, %v5929_v63  ;;  %v7681_v14 = vpop.eup %7680  ;;  %v10831_v18 = vadd.f32 1.0, %v7679_v55  ;;  %v5192_v11 = vadd.f32 %v5191_v38, %v10750_v2  ;;  %v10848_v5 = vpop.f32.mrf.mxu0 }
 0x7e1   : > { %v5704_v4 = vmul.f32 %v7675_v61, %v5703_v1  ;;  %v5479_v37 = vsel %vm10826_vm11, %v5476_v45, %v5473_v27  ;;  %v5480_v30 = vadd.f32 1.0, %v7681_v14  ;;  %v5483_v39 = vmul.f32 -0.5, %v7681_v14 }
 0x7e2   : > { %7682 = vrcp.f32 %v10831_v18  ;;  %v5607_v52 = vadd.f32 %v5479_v37, %v5383_v58  ;;  %v5402_v23 = vand.u32 2147483647, %v10840_v49  ;;  %v5626_v9 = vsub.f32 0.0, %v10840_v49 }
 0x7e3   : > { %v5705_v47 = vadd.f32 %v7675_v61, %v5704_v4  ;;  %7684 = vlog2.f32 %v5480_v30  ;;  %v5484_v54 = vadd.f32 1.0, %v5483_v39  ;;  %v5241_v35 = vadd.f32 %v5240_v53, %v5192_v11 }
 0x7e4   : > { %v5289_v51 = vpop.f32.mrf.mxu2  ;;  %7686 = vpow2.f32 %v5644_v25  ;;  %v5486_v43 = vand.u32 2147483647, %v7681_v14  ;;  %v5418_v62 = vsub.f32 0.0, %v5402_v23  ;;  %v5646_v29 = vmul.f32 1.442695, %v5626_v9 }
 0x7e5   : > { %v5709_v44 = vsel %vm5708_vm15, %v7675_v61, %v5705_v47  ;;  %7688 = vpow2.f32 %v5436_v17  ;;  %v5290_v36 = vadd.f32 %v5289_v51, %v10754_v60  ;;  %5371 = vst [vmem:[%s10756_s30 + $0x28] sm:$0xff] %v5241_v35  ;;  %v5725_v31 = vand.u32 2147483647, %v10831_v18 }
 0x7e6   : > { %v5714_v33 = vsel %vm5711_vm14, %v5713_v46, %v5709_v44  ;;  %v5194_v15 = vpop.f32.mrf.mxu1  ;;  %v5438_v6 = vmul.f32 1.442695, %v5418_v62  ;;  %7690 = vpow2.f32 %v5646_v29  ;;  %v5485_v42 = vmul.f32 %v7681_v14, %v5484_v54 }
 0x7e7   : > { %v5243_v10 = vpop.f32.mrf.mxu3  ;;  %v5930_v0 = vsel %vm5928_vm4, %v5607_v52, %v5714_v33  ;;  %v5195_v12 = vadd.f32 %v5194_v15, %v10750_v2  ;;  %v10858_v13 = vadd.f32 %v10817_v3, %v5290_v36  ;;  %v5727_v34 = vand.u32 2147483648, %v10831_v18 }
 0x7e8   : > { %5947 = vst.msk [vmem:[%s10813_s28 + $0x8] sm:$0xff] %vm5945_vm5, %v5930_v0  ;;  %v7683_v59 = vpop.eup %7682  ;;  %vm10865_vm0 = vcmp.lt.f32.partialorder %v5486_v43, 0.0004427343  ;;  %7692 = vpow2.f32 %v5438_v6  ;;  %vm5721_vm2 = vweird.f32 %v10831_v18  ;;  %v5385_v1 = vmax.f32 %v10807_v21, 0.0  ;;  %v10876_v25 = vpop.f32.mrf.mxu0 }
 0x7e9   : > { %v7685_v57 = vpop.eup %7684  ;;  %v5717_v61 = vmul.f32 %v7683_v59, %v10831_v18  ;;  %v5244_v40 = vadd.f32 %v5243_v10, %v5195_v12  ;;  %v5403_v3 = vand.u32 2147483647, %v10858_v13  ;;  %v5627_v24 = vsub.f32 0.0, %v10858_v13 }
 0x7ea   : > { %v7687_v28 = vpop.eup %7686  ;;  %v5482_v20 = vmul.f32 0.6931472, %v7685_v57  ;;  %vm5722_vm1 = vweird.f32 %v7683_v59  ;;  %vm5726_vm3 = vcmp.eq.f32.partialorder %v5725_v31, 8.507059e+37  ;;  %v5728_v56 = vor.u32 1.1754944e-38, %v5727_v34 }
 0x7eb   : > { %v5718_v26 = vsub.f32 1.0, %v5717_v61  ;;  %v10862_v22 = vadd.f32 1.0, %v7687_v28  ;;  %5372 = vst [vmem:[%s10756_s30 + $0x30] sm:$0xff] %v5244_v40  ;;  %v7689_v7 = vpop.eup %7688  ;;  %vm5723_vm6 = vmor %vm5721_vm2, %vm5722_vm1  ;;  %v5419_v4 = vsub.f32 0.0, %v5403_v3  ;;  %v5648_v19 = vmul.f32 1.442695, %v5627_v24 }
 0x7ec   : > { %v5292_v8 = vpop.f32.mrf.mxu2  ;;  %v5488_v38 = vsel %vm10865_vm0, %v5485_v42, %v5482_v20  ;;  %v5489_v63 = vadd.f32 1.0, %v7689_v7  ;;  %v5492_v16 = vmul.f32 -0.5, %v7689_v7  ;;  %v7691_v50 = vpop.eup %7690  ;;  %v5495_v37 = vand.u32 2147483647, %v7689_v7 }
 0x7ed   : > { %v5719_v53 = vmul.f32 %v7683_v59, %v5718_v26  ;;  %7694 = vrcp.f32 %v10862_v22  ;;  %v5608_v14 = vadd.f32 %v5488_v38, %v5384_v48  ;;  %v5293_v58 = vadd.f32 %v5292_v8, %v10754_v60 }
 0x7ee   : > { %v5196_v27 = vpop.f32.mrf.mxu1  ;;  %7696 = vlog2.f32 %v5489_v63  ;;  %v5740_v30 = vand.u32 2147483647, %v10862_v22  ;;  %v10880_v47 = vadd.f32 1.0, %v7691_v50  ;;  %v7693_v46 = vpop.eup %7692  ;;  %v5493_v11 = vadd.f32 1.0, %v5492_v16 }
 0x7ef   : > { %v5245_v55 = vpop.f32.mrf.mxu3  ;;  %v5720_v45 = vadd.f32 %v7683_v59, %v5719_v53  ;;  %v5742_v51 = vand.u32 2147483648, %v10862_v22  ;;  %7698 = vpow2.f32 %v5648_v19  ;;  %v5386_v44 = vmax.f32 %v10840_v49, 0.0 }
 0x7f0   : > { %v5498_v17 = vadd.f32 1.0, %v7693_v46  ;;  %v5440_v33 = vmul.f32 1.442695, %v5419_v4  ;;  %v5501_v0 = vmul.f32 -0.5, %v7693_v46  ;;  %7700 = vrcp.f32 %v10880_v47  ;;  %v10913_v38 = vpop.f32.mrf.mxu0 }
 0x7f1   : > { %v5724_v18 = vsel %vm5723_vm6, %v7683_v59, %v5720_v45  ;;  %v5387_v23 = vmax.f32 %v10858_v13, 0.0  ;;  %v10891_v9 = vadd.f32 %v10848_v5, %v5293_v58  ;;  %vm10893_vm7 = vcmp.lt.f32.partialorder %v5495_v37, 0.0004427343 }
 0x7f2   : > { %v5729_v39 = vsel %vm5726_vm3, %v5728_v56, %v5724_v18  ;;  %vm5736_vm8 = vweird.f32 %v10862_v22  ;;  %7702 = vlog2.f32 %v5498_v17  ;;  %v5494_v43 = vmul.f32 %v7689_v7, %v5493_v11 }
 0x7f3   : > { %v5931_v52 = vsel %vm5928_vm4, %v5608_v14, %v5729_v39  ;;  %v7695_v10 = vpop.eup %7694  ;;  %vm10899_vm9 = vcmp.eq.f32.partialorder %v5740_v30, 8.507059e+37  ;;  %v5743_v29 = vor.u32 1.1754944e-38, %v5742_v51  ;;  %v5504_v57 = vand.u32 2147483647, %v7693_v46 }
 0x7f4   : > { %v5294_v15 = vpop.f32.mrf.mxu2  ;;  %5948 = vst.msk [vmem:[%s10813_s28 + $0x10] sm:$0xff] %vm5945_vm5, %v5931_v52  ;;  %v7697_v54 = vpop.eup %7696  ;;  %v5732_v36 = vmul.f32 %v7695_v10, %v10862_v22  ;;  %v5755_v48 = vand.u32 2147483647, %v10880_v47  ;;  %7704 = vpow2.f32 %v5440_v33  ;;  %v5502_v40 = vadd.f32 1.0, %v5501_v0 }
 0x7f5   : > { %v5491_v59 = vmul.f32 0.6931472, %v7697_v54  ;;  %v7699_v61 = vpop.eup %7698  ;;  %v5404_v28 = vand.u32 2147483647, %v10891_v9  ;;  %v5628_v20 = vsub.f32 0.0, %v10891_v9  ;;  %v5197_v31 = vadd.f32 %v5196_v27, %v10750_v2 }
 0x7f6   : > { %v5199_v12 = vpop.f32.mrf.mxu1  ;;  %v5733_v5 = vsub.f32 1.0, %v5732_v36  ;;  %vm5737_vm10 = vweird.f32 %v7695_v10  ;;  %vm5751_vm11 = vweird.f32 %v10880_v47  ;;  %v10910_v34 = vadd.f32 1.0, %v7699_v61  ;;  %v7701_v8 = vpop.eup %7700 }
 0x7f7   : > { %v5248_v6 = vpop.f32.mrf.mxu3  ;;  %v5497_v42 = vsel %vm10893_vm7, %v5494_v43, %v5491_v59  ;;  %v5757_v7 = vand.u32 2147483648, %v10880_v47  ;;  %v5420_v32 = vsub.f32 0.0, %v5404_v28  ;;  %v5650_v3 = vmul.f32 1.442695, %v5628_v20  ;;  %vm5738_vm13 = vmor %vm5736_vm8, %vm5737_vm10 }
 0x7f8   : > { %v5734_v26 = vmul.f32 %v7695_v10, %v5733_v5  ;;  %v5246_v24 = vadd.f32 %v5245_v55, %v5197_v31  ;;  %v7703_v53 = vpop.eup %7702  ;;  %vm10915_vm12 = vcmp.lt.f32.partialorder %v5504_v57, 0.0004427343  ;;  %v5747_v16 = vmul.f32 %v7701_v8, %v10880_v47 }
 0x7f9   : > { %7706 = vrcp.f32 %v10910_v34  ;;  %v5609_v56 = vadd.f32 %v5497_v42, %v5385_v1  ;;  %v5500_v55 = vmul.f32 0.6931472, %v7703_v53  ;;  %v5503_v50 = vmul.f32 %v7693_v46, %v5502_v40  ;;  %v10959_v40 = vpop.f32.mrf.mxu0 }
 0x7fa   : > { %v5735_v63 = vadd.f32 %v7695_v10, %v5734_v26  ;;  %5373 = vst [vmem:[%s10756_s30 + $0x38] sm:$0xff] %v5246_v24  ;;  %v5295_v14 = vadd.f32 %v5294_v15, %v10754_v60  ;;  %v7705_v4 = vpop.eup %7704  ;;  %v5748_v58 = vsub.f32 1.0, %v5747_v16  ;;  %v5442_v18 = vmul.f32 1.442695, %v5420_v32 }
 0x7fb   : > { %7708 = vpow2.f32 %v5650_v3  ;;  %v5507_v1 = vadd.f32 1.0, %v7705_v4  ;;  %v5510_v30 = vmul.f32 -0.5, %v7705_v4  ;;  %v5200_v22 = vadd.f32 %v5199_v12, %v10750_v2 }
 0x7fc   : > { %v5297_v45 = vpop.f32.mrf.mxu2  ;;  %v5739_v19 = vsel %vm5738_vm13, %v7695_v10, %v5735_v63  ;;  %v5749_v39 = vmul.f32 %v7701_v8, %v5748_v58  ;;  %vm5752_vm14 = vweird.f32 %v7701_v8  ;;  %vm10933_vm15 = vcmp.eq.f32.partialorder %v5755_v48, 8.507059e+37 }
 0x7fd   : > { %v5744_v21 = vsel %vm10899_vm9, %v5743_v29, %v5739_v19  ;;  %v5506_v51 = vsel %vm10915_vm12, %v5503_v50, %v5500_v55  ;;  %v5758_v52 = vor.u32 1.1754944e-38, %v5757_v7  ;;  %7710 = vlog2.f32 %v5507_v1  ;;  %vm5753_vm1 = vmor %vm5751_vm11, %vm5752_vm14 }
 0x7fe   : > { %v5201_v37 = vpop.f32.mrf.mxu1  ;;  %v5932_v46 = vsel %vm5928_vm4, %v5609_v56, %v5744_v21  ;;  %vm5766_vm0 = vweird.f32 %v10910_v34  ;;  %v5750_v33 = vadd.f32 %v7701_v8, %v5749_v39  ;;  %v5511_v15 = vadd.f32 1.0, %v5510_v30 }
 0x7ff   : > { %5949 = vst.msk [vmem:[%s10813_s28 + $0x18] sm:$0xff] %vm5945_vm5, %v5932_v46  ;;  %v7707_v17 = vpop.eup %7706  ;;  %7712 = vpow2.f32 %v5442_v18  ;;  %v10943_v10 = vadd.f32 %v10876_v25, %v5295_v14  ;;  %v5770_v54 = vand.u32 2147483647, %v10910_v34  ;;  %v5772_v35 = vand.u32 2147483648, %v10910_v34  ;;  %v5250_v12 = vpop.f32.mrf.mxu3 }
 0x800   : > { %v5762_v0 = vmul.f32 %v7707_v17, %v10910_v34  ;;  %v5249_v36 = vadd.f32 %v5248_v6, %v5200_v22  ;;  %v5610_v43 = vadd.f32 %v5506_v51, %v5386_v44  ;;  %v5754_v62 = vsel %vm5753_vm1, %v7701_v8, %v5750_v33 }
 0x801   : > { %v7709_v59 = vpop.eup %7708  ;;  %v5405_v25 = vand.u32 2147483647, %v10943_v10  ;;  %v5629_v47 = vsub.f32 0.0, %v10943_v10  ;;  %v5759_v5 = vsel %vm10933_vm15, %v5758_v52, %v5754_v62  ;;  %v5513_v57 = vand.u32 2147483647, %v7705_v4 }
 0x802   : > { %v5763_v48 = vsub.f32 1.0, %v5762_v0  ;;  %v10956_v61 = vadd.f32 1.0, %v7709_v59  ;;  %5374 = vst [vmem:[%s10756_s30 + $0x40] sm:$0xff] %v5249_v36  ;;  %v5933_v49 = vsel %vm5928_vm4, %v5610_v43, %v5759_v5  ;;  %v5512_v44 = vmul.f32 %v7705_v4, %v5511_v15 }
 0x803   : > { %v5421_v28 = vsub.f32 0.0, %v5405_v25  ;;  %v5652_v20 = vmul.f32 1.442695, %v5629_v47  ;;  %v7711_v31 = vpop.eup %7710  ;;  %5950 = vst.msk [vmem:[%s10813_s28 + $0x20] sm:$0xff] %vm5945_vm5, %v5933_v49  ;;  %vm5767_vm2 = vweird.f32 %v7707_v17  ;;  %v5298_v42 = vadd.f32 %v5297_v45, %v10754_v60 }
 0x804   : > { %v5299_v29 = vpop.f32.mrf.mxu2  ;;  %v5764_v6 = vmul.f32 %v7707_v17, %v5763_v48  ;;  %7714 = vrcp.f32 %v10956_v61  ;;  %v5509_v8 = vmul.f32 0.6931472, %v7711_v31  ;;  %v5202_v32 = vadd.f32 %v5201_v37, %v10750_v2  ;;  %vm5768_vm6 = vmor %vm5766_vm0, %vm5767_vm2 }
 0x805   : > { %v7713_v26 = vpop.eup %7712  ;;  %v5444_v7 = vmul.f32 1.442695, %v5421_v28  ;;  %7716 = vpow2.f32 %v5652_v20  ;;  %vm5514_vm3 = vcmp.lt.f32.partialorder %v5513_v57, 0.0004427343  ;;  %vm5771_vm7 = vcmp.eq.f32.partialorder %v5770_v54, 8.507059e+37 }
 0x806   : > { %v5204_v3 = vpop.f32.mrf.mxu1  ;;  %v5765_v24 = vadd.f32 %v7707_v17, %v5764_v6  ;;  %v5516_v53 = vadd.f32 1.0, %v7713_v26  ;;  %v5519_v63 = vmul.f32 -0.5, %v7713_v26  ;;  %v5515_v27 = vsel %vm5514_vm3, %v5512_v44, %v5509_v8 }
 0x807   : > { %v5773_v16 = vor.u32 1.1754944e-38, %v5772_v35  ;;  %7718 = vpow2.f32 %v5444_v7  ;;  %v5611_v45 = vadd.f32 %v5515_v27, %v5387_v23  ;;  %v5785_v55 = vand.u32 2147483647, %v10956_v61  ;;  %v5253_v37 = vpop.f32.mrf.mxu3 }
 0x808   : > { %v5769_v56 = vsel %vm5768_vm6, %v7707_v17, %v5765_v24  ;;  %7720 = vlog2.f32 %v5516_v53  ;;  %v5520_v14 = vadd.f32 1.0, %v5519_v63  ;;  %v10974_v4 = vadd.f32 %v10913_v38, %v5298_v42 }
 0x809   : > { %v5774_v50 = vsel %vm5771_vm7, %v5773_v16, %v5769_v56  ;;  %v5251_v19 = vadd.f32 %v5250_v12, %v5202_v32  ;;  %v5388_v13 = vmax.f32 %v10891_v9, 0.0  ;;  %v5205_v23 = vadd.f32 %v5204_v3, %v10750_v2  ;;  %v5351_v9 = vpop.f32.mrf.mxu0 }
 0x80a   : > { %v7715_v58 = vpop.eup %7714  ;;  %v5934_v18 = vsel %vm5928_vm4, %v5611_v45, %v5774_v50  ;;  %vm5781_vm8 = vweird.f32 %v10956_v61  ;;  %v5406_v38 = vand.u32 2147483647, %v10974_v4  ;;  %v5300_v30 = vadd.f32 %v5299_v29, %v10754_v60 }
 0x80b   : > { %v7717_v21 = vpop.eup %7716  ;;  %5951 = vst.msk [vmem:[%s10813_s28 + $0x28] sm:$0xff] %vm5945_vm5, %v5934_v18  ;;  %v5777_v1 = vmul.f32 %v7715_v58, %v10956_v61  ;;  %v5522_v22 = vand.u32 2147483647, %v7713_v26  ;;  %v5787_v46 = vand.u32 2147483648, %v10956_v61  ;;  %v5254_v11 = vadd.f32 %v5253_v37, %v5205_v23 }
 0x80c   : > { %v5302_v34 = vpop.f32.mrf.mxu2  ;;  %v10987_v39 = vadd.f32 1.0, %v7717_v21  ;;  %5375 = vst [vmem:[%s10756_s30 + $0x48] sm:$0xff] %v5251_v19  ;;  %v5521_v52 = vmul.f32 %v7713_v26, %v5520_v14  ;;  %vm10990_vm9 = vcmp.eq.f32.partialorder %v5785_v55, 8.507059e+37  ;;  %v5422_v15 = vsub.f32 0.0, %v5406_v38 }
 0x80d   : > { %v7719_v51 = vpop.eup %7718  ;;  %v5778_v17 = vsub.f32 1.0, %v5777_v1  ;;  %v5630_v36 = vsub.f32 0.0, %v10974_v4  ;;  %5376 = vst [vmem:[%s10756_s30 + $0x50] sm:$0xff] %v5254_v11  ;;  %vm5782_vm10 = vweird.f32 %v7715_v58  ;;  %v10998_v43 = vadd.f32 %v10959_v40, %v5300_v30 }
 0x80e   : > { %v7721_v0 = vpop.eup %7720  ;;  %v5525_v54 = vadd.f32 1.0, %v7719_v51  ;;  %v5528_v35 = vmul.f32 -0.5, %v7719_v51  ;;  %7722 = vrcp.f32 %v10987_v39  ;;  %v5206_v62 = vpop.f32.mrf.mxu1  ;;  %vm5523_vm11 = vcmp.lt.f32.partialorder %v5522_v22, 0.0004427343  ;;  %vm5783_vm12 = vmor %vm5781_vm8, %vm5782_vm10 }
 0x80f   : > { %v5518_v12 = vmul.f32 0.6931472, %v7721_v0  ;;  %v5779_v59 = vmul.f32 %v7715_v58, %v5778_v17  ;;  %v5788_v25 = vor.u32 1.1754944e-38, %v5787_v46  ;;  %v5303_v47 = vadd.f32 %v5302_v34, %v10754_v60  ;;  %v5255_v32 = vpop.f32.mrf.mxu3 }
 0x810   : > { %7724 = vlog2.f32 %v5525_v54  ;;  %v5531_v57 = vand.u32 2147483647, %v7719_v51  ;;  %v5446_v48 = vmul.f32 1.442695, %v5422_v15  ;;  %v5529_v44 = vadd.f32 1.0, %v5528_v35 }
 0x811   : > { %v5524_v29 = vsel %vm5523_vm11, %v5521_v52, %v5518_v12  ;;  %v5780_v5 = vadd.f32 %v7715_v58, %v5779_v59  ;;  %v5800_v28 = vand.u32 2147483647, %v10987_v39  ;;  %v5654_v20 = vmul.f32 1.442695, %v5630_v36  ;;  %v5353_v56 = vpop.f32.mrf.mxu0 }
 0x812   : > { %v5207_v40 = vadd.f32 %v5206_v62, %v10750_v2  ;;  %v5612_v31 = vadd.f32 %v5524_v29, %v5388_v13  ;;  %7726 = vpow2.f32 %v5446_v48  ;;  %v5407_v42 = vand.u32 2147483647, %v10998_v43 }
 0x813   : > { %v5784_v6 = vsel %vm5783_vm12, %v7715_v58, %v5780_v5  ;;  %7728 = vpow2.f32 %v5654_v20  ;;  %v5631_v61 = vsub.f32 0.0, %v10998_v43  ;;  %v11009_v7 = vadd.f32 %v5351_v9, %v5303_v47 }
 0x814   : > { %v5304_v49 = vpop.f32.mrf.mxu2  ;;  %v7723_v26 = vpop.eup %7722  ;;  %v5789_v8 = vsel %vm10990_vm9, %v5788_v25, %v5784_v6  ;;  %vm11013_vm13 = vcmp.lt.f32.partialorder %v5531_v57, 0.0004427343  ;;  %v5423_v63 = vsub.f32 0.0, %v5407_v42  ;;  %v5389_v16 = vmax.f32 %v10943_v10, 0.0 }
 0x815   : > { %v5935_v3 = vsel %vm5928_vm4, %v5612_v31, %v5789_v8  ;;  %v5792_v53 = vmul.f32 %v7723_v26, %v10987_v39  ;;  %v5656_v45 = vmul.f32 1.442695, %v5631_v61  ;;  %v5408_v55 = vand.u32 2147483647, %v11009_v7 }
 0x816   : > { %v7725_v27 = vpop.eup %7724  ;;  %5952 = vst.msk [vmem:[%s10813_s28 + $0x30] sm:$0xff] %vm5945_vm5, %v5935_v3  ;;  %v5256_v50 = vadd.f32 %v5255_v32, %v5207_v40  ;;  %v5448_v34 = vmul.f32 1.442695, %v5423_v63  ;;  %v5632_v58 = vsub.f32 0.0, %v11009_v7  ;;  %v5530_v18 = vmul.f32 %v7719_v51, %v5529_v44  ;;  %v5209_v1 = vpop.f32.mrf.mxu1 }
 0x817   : > { %v5527_v14 = vmul.f32 0.6931472, %v7725_v27  ;;  %v5793_v19 = vsub.f32 1.0, %v5792_v53  ;;  %v5802_v13 = vand.u32 2147483648, %v10987_v39  ;;  %7730 = vpow2.f32 %v5656_v45  ;;  %v11036_v59 = vpop.f32.mrf.mxu3 }
 0x818   : > { %v5424_v23 = vsub.f32 0.0, %v5408_v55  ;;  %5377 = vst [vmem:[%s10756_s30 + $0x58] sm:$0xff] %v5256_v50  ;;  %v7727_v37 = vpop.eup %7726  ;;  %vm5797_vm14 = vweird.f32 %v7723_v26  ;;  %7732 = vpow2.f32 %v5448_v34  ;;  %v5658_v10 = vmul.f32 1.442695, %v5632_v58 }
 0x819   : > { %v5794_v21 = vmul.f32 %v7723_v26, %v5793_v19  ;;  %v7729_v38 = vpop.eup %7728  ;;  %v5533_v30 = vsel %vm11013_vm13, %v5530_v18, %v5527_v14  ;;  %vm5796_vm15 = vweird.f32 %v10987_v39  ;;  %v5534_v22 = vadd.f32 1.0, %v7727_v37 }
 0x81a   : > { %v5537_v46 = vmul.f32 -0.5, %v7727_v37  ;;  %v11030_v51 = vadd.f32 1.0, %v7729_v38  ;;  %v5450_v52 = vmul.f32 1.442695, %v5424_v23  ;;  %7734 = vpow2.f32 %v5658_v10  ;;  %vm5798_vm0 = vmor %vm5796_vm15, %vm5797_vm14 }
 0x81b   : > { %v5795_v11 = vadd.f32 %v7723_v26, %v5794_v21  ;;  %vm5801_vm1 = vcmp.eq.f32.partialorder %v5800_v28, 8.507059e+37  ;;  %v5803_v17 = vor.u32 1.1754944e-38, %v5802_v13  ;;  %7736 = vlog2.f32 %v5534_v22 }
 0x81c   : > { %v11028_v9 = vpop.f32.mrf.mxu2  ;;  %v5305_v33 = vadd.f32 %v5304_v49, %v10754_v60  ;;  %v5613_v15 = vadd.f32 %v5533_v30, %v5389_v16  ;;  %v5540_v54 = vand.u32 2147483647, %v7727_v37  ;;  %7738 = vrcp.f32 %v11030_v51  ;;  %v11046_v49 = vpop.f32.mrf.mxu0 }
 0x81d   : > { %v5799_v0 = vsel %vm5798_vm0, %v7723_v26, %v5795_v11  ;;  %v7731_v39 = vpop.eup %7730  ;;  %v5390_v36 = vmax.f32 %v10974_v4, 0.0  ;;  %v5391_v12 = vmax.f32 %v10998_v43, 0.0  ;;  %7740 = vpow2.f32 %v5450_v52 }
 0x81e   : > { %v5804_v35 = vsel %vm5801_vm1, %v5803_v17, %v5799_v0  ;;  %v7733_v62 = vpop.eup %7732  ;;  %v5538_v47 = vadd.f32 1.0, %v5537_v46  ;;  %v5817_v29 = vand.u32 2147483648, %v11030_v51  ;;  %v11041_v5 = vadd.f32 1.0, %v7731_v39  ;;  %v11061_v63 = vpop.f32.mrf.mxu1 }
 0x81f   : > { %v5936_v25 = vsel %vm5928_vm4, %v5613_v15, %v5804_v35  ;;  %v5815_v57 = vand.u32 2147483647, %v11030_v51  ;;  %v5543_v48 = vadd.f32 1.0, %v7733_v62  ;;  %v5546_v4 = vmul.f32 -0.5, %v7733_v62  ;;  %v5260_v17 = vpop.f32.mrf.mxu3 }
 0x820   : > { %5953 = vst.msk [vmem:[%s10813_s28 + $0x38] sm:$0xff] %vm5945_vm5, %v5936_v25  ;;  %v11048_v44 = vadd.f32 %v5353_v56, %v5305_v33  ;;  %v7735_v28 = vpop.eup %7734  ;;  %vm11050_vm2 = vcmp.lt.f32.partialorder %v5540_v54, 0.0004427343  ;;  %7742 = vrcp.f32 %v11041_v5  ;;  %v5392_v40 = vmax.f32 %v11009_v7, 0.0 }
 0x821   : > { %v5210_v31 = vadd.f32 %v5209_v1, %v10750_v2  ;;  %v7737_v6 = vpop.eup %7736  ;;  %vm5811_vm3 = vweird.f32 %v11030_v51  ;;  %7744 = vlog2.f32 %v5543_v48  ;;  %v5549_v42 = vand.u32 2147483647, %v7733_v62 }
 0x822   : > { %v5832_v26 = vand.u32 2147483648, %v11041_v5  ;;  %v11059_v8 = vadd.f32 1.0, %v7735_v28  ;;  %v7739_v61 = vpop.eup %7738  ;;  %v5536_v32 = vmul.f32 0.6931472, %v7737_v6  ;;  %v5539_v3 = vmul.f32 %v7727_v37, %v5538_v47 }
 0x823   : > { %v5818_v24 = vor.u32 1.1754944e-38, %v5817_v29  ;;  %v5547_v53 = vadd.f32 1.0, %v5546_v4  ;;  %v7741_v27 = vpop.eup %7740  ;;  %v5807_v16 = vmul.f32 %v7739_v61, %v11030_v51  ;;  %vm11064_vm6 = vcmp.eq.f32.partialorder %v5815_v57, 8.507059e+37 }
 0x824   : > { %v5830_v56 = vand.u32 2147483647, %v11041_v5  ;;  %7746 = vrcp.f32 %v11059_v8  ;;  %v5409_v55 = vand.u32 2147483647, %v11048_v44  ;;  %v11071_v50 = vpop.f32.mrf.mxu2  ;;  %v5542_v14 = vsel %vm11050_vm2, %v5539_v3, %v5536_v32  ;;  %v5358_v25 = vpop.f32.mrf.mxu0 }
 0x825   : > { %v5552_v19 = vadd.f32 1.0, %v7741_v27  ;;  %v5555_v34 = vmul.f32 -0.5, %v7741_v27  ;;  %v5558_v58 = vand.u32 2147483647, %v7741_v27  ;;  %v5808_v18 = vsub.f32 1.0, %v5807_v16 }
 0x826   : > { %vm5812_vm7 = vweird.f32 %v7739_v61  ;;  %vm11075_vm8 = vcmp.lt.f32.partialorder %v5549_v42, 0.0004427343  ;;  %vm5826_vm9 = vweird.f32 %v11041_v5  ;;  %v5833_v23 = vor.u32 1.1754944e-38, %v5832_v26  ;;  %v7743_v37 = vpop.eup %7742  ;;  %v5214_v42 = vpop.f32.mrf.mxu1 }
 0x827   : > { %v5614_v21 = vadd.f32 %v5542_v14, %v5390_v36  ;;  %v5548_v10 = vmul.f32 %v7733_v62, %v5547_v53  ;;  %7748 = vlog2.f32 %v5552_v19  ;;  %v5556_v1 = vadd.f32 1.0, %v5555_v34  ;;  %v7745_v38 = vpop.eup %7744  ;;  %vm5813_vm14 = vmor %vm5811_vm3, %vm5812_vm7  ;;  %v5263_v34 = vpop.f32.mrf.mxu3 }
 0x828   : > { %v5809_v30 = vmul.f32 %v7739_v61, %v5808_v18  ;;  %v5822_v22 = vmul.f32 %v7743_v37, %v11041_v5  ;;  %vm11081_vm10 = vcmp.eq.f32.partialorder %v5830_v56, 8.507059e+37  ;;  %vm11085_vm11 = vcmp.lt.f32.partialorder %v5558_v58, 0.0004427343 }
 0x829   : > { %v5845_v52 = vand.u32 2147483647, %v11059_v8  ;;  %v5545_v33 = vmul.f32 0.6931472, %v7745_v38  ;;  %vm5827_vm12 = vweird.f32 %v7743_v37  ;;  %vm5841_vm13 = vweird.f32 %v11059_v8 }
 0x82a   : > { %v5847_v15 = vand.u32 2147483648, %v11059_v8  ;;  %v5425_v0 = vsub.f32 0.0, %v5409_v55  ;;  %v7747_v54 = vpop.eup %7746  ;;  %v5810_v39 = vadd.f32 %v7739_v61, %v5809_v30  ;;  %v5823_v35 = vsub.f32 1.0, %v5822_v22  ;;  %vm5828_vm0 = vmor %vm5826_vm9, %vm5827_vm12 }
 0x82b   : > { %v5633_v36 = vsub.f32 0.0, %v11048_v44  ;;  %v5259_v62 = vadd.f32 %v11036_v59, %v5210_v31  ;;  %v5551_v47 = vsel %vm11075_vm8, %v5548_v10, %v5545_v33  ;;  %v5557_v29 = vmul.f32 %v7741_v27, %v5556_v1 }
 0x82c   : > { %v5837_v57 = vmul.f32 %v7747_v54, %v11059_v8  ;;  %v5452_v48 = vmul.f32 1.442695, %v5425_v0  ;;  %v5814_v4 = vsel %vm5813_vm14, %v7739_v61, %v5810_v39  ;;  %v5824_v28 = vmul.f32 %v7743_v37, %v5823_v35  ;;  %v5312_v3 = vpop.f32.mrf.mxu2  ;;  %v5361_v10 = vpop.f32.mrf.mxu0 }
 0x82d   : > { %vm5842_vm15 = vweird.f32 %v7747_v54  ;;  %v5660_v20 = vmul.f32 1.442695, %v5633_v36  ;;  %5378 = vst [vmem:[%s10756_s30 + $0x60] sm:$0xff] %v5259_v62  ;;  %v7749_v6 = vpop.eup %7748  ;;  %v5819_v59 = vsel %vm11064_vm6, %v5818_v24, %v5814_v4  ;;  %v5308_v51 = vadd.f32 %v11028_v9, %v10754_v60 }
 0x82e   : > { %v5838_v31 = vsub.f32 1.0, %v5837_v57  ;;  %7750 = vpow2.f32 %v5452_v48  ;;  %v5937_v26 = vsel %vm5928_vm4, %v5614_v21, %v5819_v59  ;;  %v5825_v32 = vadd.f32 %v7743_v37, %v5824_v28  ;;  %vm5843_vm1 = vmor %vm5841_vm13, %vm5842_vm15 }
 0x82f   : > { %v5554_v61 = vmul.f32 0.6931472, %v7749_v6  ;;  %7752 = vpow2.f32 %v5660_v20  ;;  %5954 = vst.msk [vmem:[%s10813_s28 + $0x40] sm:$0xff] %vm5945_vm5, %v5937_v26  ;;  %v5615_v53 = vadd.f32 %v5551_v47, %v5391_v12  ;;  %v11115_v9 = vadd.f32 %v11046_v49, %v5308_v51  ;;  %v5265_v48 = vpop.f32.mrf.mxu3 }
 0x830   : > { %v5839_v24 = vmul.f32 %v7747_v54, %v5838_v31  ;;  %v5212_v27 = vadd.f32 %v11061_v63, %v10750_v2  ;;  %v5829_v16 = vsel %vm5828_vm0, %v7743_v37, %v5825_v32  ;;  %v5310_v43 = vadd.f32 %v11071_v50, %v10754_v60 }
 0x831   : > { %v5560_v45 = vsel %vm11085_vm11, %v5557_v29, %v5554_v61  ;;  %v5215_v12 = vadd.f32 %v5214_v42, %v10750_v2  ;;  %v5834_v5 = vsel %vm11081_vm10, %v5833_v23, %v5829_v16  ;;  %v5848_v49 = vor.u32 1.1754944e-38, %v5847_v15 }
 0x832   : > { %v5840_v56 = vadd.f32 %v7747_v54, %v5839_v24  ;;  %v5313_v55 = vadd.f32 %v5312_v3, %v10754_v60  ;;  %v5938_v63 = vsel %vm5928_vm4, %v5615_v53, %v5834_v5  ;;  %v5410_v50 = vand.u32 2147483647, %v11115_v9 }
 0x833   : > { %v5634_v14 = vsub.f32 0.0, %v11115_v9  ;;  %v5261_v19 = vadd.f32 %v5260_v17, %v5212_v27  ;;  %5955 = vst.msk [vmem:[%s10813_s28 + $0x48] sm:$0xff] %vm5945_vm5, %v5938_v63  ;;  %v5616_v18 = vadd.f32 %v5560_v45, %v5392_v40  ;;  %vm5846_vm2 = vcmp.eq.f32.partialorder %v5845_v52, 8.507059e+37  ;;  %v5216_v52 = vpop.f32.mrf.mxu1 }
 0x834   : > { %v11134_v58 = vpop.eup %7750  ;;  %v5844_v13 = vsel %vm5843_vm1, %v7747_v54, %v5840_v56  ;;  %v5264_v8 = vadd.f32 %v5263_v34, %v5215_v12  ;;  %v11143_v1 = vadd.f32 %v5358_v25, %v5310_v43  ;;  %v5426_v7 = vsub.f32 0.0, %v5410_v50  ;;  %v5314_v17 = vpop.f32.mrf.mxu2 }
 0x835   : > { %v7753_v23 = vpop.eup %7752  ;;  %v5849_v37 = vsel %vm5846_vm2, %v5848_v49, %v5844_v13  ;;  %v5561_v21 = vadd.f32 1.0, %v11134_v58  ;;  %5379 = vst [vmem:[%s10756_s30 + $0x68] sm:$0xff] %v5261_v19  ;;  %v5662_v40 = vmul.f32 1.442695, %v5634_v14  ;;  %v11152_v22 = vadd.f32 %v5361_v10, %v5313_v55  ;;  %v5363_v59 = vpop.f32.mrf.mxu0 }
 0x836   : > { %v5939_v38 = vsel %vm5928_vm4, %v5616_v18, %v5849_v37  ;;  %v11147_v30 = vadd.f32 1.0, %v7753_v23  ;;  %5380 = vst [vmem:[%s10756_s30 + $0x70] sm:$0xff] %v5264_v8  ;;  %v5454_v46 = vmul.f32 1.442695, %v5426_v7  ;;  %v5411_v11 = vand.u32 2147483647, %v11143_v1 }
 0x837   : > { %5956 = vst.msk [vmem:[%s10813_s28 + $0x50] sm:$0xff] %vm5945_vm5, %v5939_v38  ;;  %7754 = vlog2.f32 %v5561_v21  ;;  %v5564_v33 = vmul.f32 -0.5, %v11134_v58  ;;  %v5635_v15 = vsub.f32 0.0, %v11143_v1  ;;  %v5412_v54 = vand.u32 2147483647, %v11152_v22 }
 0x838   : > { %7756 = vrcp.f32 %v11147_v30  ;;  %v5427_v0 = vsub.f32 0.0, %v5411_v11  ;;  %v5636_v39 = vsub.f32 0.0, %v11152_v22  ;;  %v5217_v36 = vadd.f32 %v5216_v52, %v10750_v2 }
 0x839   : > { %7758 = vpow2.f32 %v5662_v40  ;;  %v5664_v35 = vmul.f32 1.442695, %v5635_v15  ;;  %v5315_v62 = vadd.f32 %v5314_v17, %v10754_v60  ;;  %v5428_v29 = vsub.f32 0.0, %v5412_v54 }
 0x83a   : > { %7760 = vpow2.f32 %v5454_v46  ;;  %v5456_v47 = vmul.f32 1.442695, %v5427_v0  ;;  %v5666_v57 = vmul.f32 1.442695, %v5636_v39  ;;  %v5565_v28 = vadd.f32 1.0, %v5564_v33 }
 0x83b   : > { %7762 = vpow2.f32 %v5664_v35  ;;  %v5266_v20 = vadd.f32 %v5265_v48, %v5217_v36  ;;  %v5567_v2 = vand.u32 2147483647, %v11134_v58  ;;  %v5458_v31 = vmul.f32 1.442695, %v5428_v29 }
 0x83c   : > { %7764 = vpow2.f32 %v5456_v47  ;;  %v11178_v26 = vadd.f32 %v5363_v59, %v5315_v62  ;;  %v5860_v3 = vand.u32 2147483647, %v11147_v30 }
 0x83d   : > { %v7755_v25 = vpop.eup %7754  ;;  %7766 = vpow2.f32 %v5666_v57  ;;  %5381 = vst [vmem:[%s10756_s30 + $0x78] sm:$0xff] %v5266_v20  ;;  %s7900_s30 = scalar_lea.hbm %s11606_s17, 256 }
 0x83e   : > { %v11170_v4 = vpop.eup %7756  ;;  %v5563_v51 = vmul.f32 0.6931472, %v7755_v25  ;;  %7768 = vpow2.f32 %v5458_v31  ;;  %p7902_p9 = scmp.lt.s32.totalorder %s7900_s30, %s7896_s7 }
 0x83f   : > { %v7759_v6 = vpop.eup %7758  ;;  %v5852_v60 = vmul.f32 %v11170_v4, %v11147_v30 }
 0x840   : > { %v11175_v42 = vadd.f32 1.0, %v7759_v6  ;;  %v11180_v32 = vpop.eup %7760  ;;  %p7903_p10 = por %p7902_p9, %p7901_p8 }
 0x841   : > { %v5853_v61 = vsub.f32 1.0, %v5852_v60 }
 0x842   : > { %p7904_p12 = pnand %p7903_p10, %p7899_p7 }
 0x844   : > { %7907 = shalt.err (!%p7904_p12)
}
 0x845   : > { %s7975_s10 = smov 128   ;;  %s7976_s21 = smov 8   ;;  %v5566_v53 = vmul.f32 %v11134_v58, %v5565_v28  ;;  %v5862_v24 = vand.u32 2147483648, %v11147_v30  ;;  %v5570_v27 = vadd.f32 1.0, %v11180_v32  ;;  %7770 = vrcp.f32 %v11175_v42  ;;  %v7763_v43 = vpop.eup %7762 }
 0x846   : > { %7451 = dma.vmem_to_hbm [thread:$0]  (%p8105_p5), %s11166_s29, 2048, %s11168_s19, %s5963_s13, %s7975_s10, %s7975_s10, %s7976_s21   ;;  %vm11201_vm3 = vcmp.lt.f32.partialorder %v5567_v2, 0.0004427343  ;;  %v5854_v45 = vmul.f32 %v11170_v4, %v5853_v61  ;;  %vm5857_vm6 = vweird.f32 %v11170_v4  ;;  %v5573_v5 = vmul.f32 -0.5, %v11180_v32  ;;  %v7765_v49 = vpop.eup %7764 }
 0x847   : > { %v5569_v12 = vsel %vm11201_vm3, %v5566_v53, %v5563_v51  ;;  %7772 = vlog2.f32 %v5570_v27  ;;  %v5413_v56 = vand.u32 2147483647, %v11178_v26  ;;  %v5393_v55 = vmax.f32 %v11048_v44, 0.0  ;;  %v7767_v14 = vpop.eup %7766 }
 0x848   : > { %v5855_v63 = vadd.f32 %v11170_v4, %v5854_v45  ;;  %vm5856_vm7 = vweird.f32 %v11147_v30  ;;  %v11214_v50 = vadd.f32 1.0, %v7763_v43  ;;  %vm5861_vm9 = vcmp.eq.f32.partialorder %v5860_v3, 8.507059e+37  ;;  %v11216_v58 = vpop.eup %7768 }
 0x849   : > { %vm5858_vm8 = vmor %vm5856_vm7, %vm5857_vm6  ;;  %v5863_v19 = vor.u32 1.1754944e-38, %v5862_v24  ;;  %v5579_v34 = vadd.f32 1.0, %v7765_v49  ;;  %v5617_v18 = vadd.f32 %v5569_v12, %v5393_v55  ;;  %v5576_v8 = vand.u32 2147483647, %v11180_v32 }
 0x84a   : > { %v5859_v13 = vsel %vm5858_vm8, %v11170_v4, %v5855_v63  ;;  %7774 = vrcp.f32 %v11214_v50  ;;  %v5574_v37 = vadd.f32 1.0, %v5573_v5  ;;  %v5429_v21 = vsub.f32 0.0, %v5413_v56 }
 0x84b   : > { %v7771_v44 = vpop.eup %7770  ;;  %v5864_v23 = vsel %vm5861_vm9, %v5863_v19, %v5859_v13  ;;  %7776 = vlog2.f32 %v5579_v34  ;;  %v5394_v38 = vmax.f32 %v11115_v9, 0.0  ;;  %v5582_v7 = vmul.f32 -0.5, %v7765_v49 }
 0x84c   : > { %v5940_v10 = vsel %vm5928_vm4, %v5617_v18, %v5864_v23  ;;  %v5867_v30 = vmul.f32 %v7771_v44, %v11175_v42  ;;  %vm5871_vm10 = vweird.f32 %v11175_v42  ;;  %v5875_v46 = vand.u32 2147483647, %v11175_v42 }
 0x84d   : > { %v7773_v40 = vpop.eup %7772  ;;  %5957 = vst.msk [vmem:[%s10813_s28 + $0x58] sm:$0xff] %vm5945_vm5, %v5940_v10  ;;  %v5877_v11 = vand.u32 2147483648, %v11175_v42  ;;  %v5588_v52 = vadd.f32 1.0, %v11216_v58  ;;  %vm11231_vm11 = vcmp.lt.f32.partialorder %v5576_v8, 0.0004427343  ;;  %v11235_v15 = vadd.f32 1.0, %v7767_v14 }
 0x84e   : > { %v5572_v17 = vmul.f32 0.6931472, %v7773_v40  ;;  %v5868_v9 = vsub.f32 1.0, %v5867_v30  ;;  %v5575_v0 = vmul.f32 %v11180_v32, %v5574_v37  ;;  %v5585_v54 = vand.u32 2147483647, %v7765_v49 }
 0x84f   : > { %7778 = vlog2.f32 %v5588_v52  ;;  %v5460_v39 = vmul.f32 1.442695, %v5429_v21  ;;  %vm5872_vm12 = vweird.f32 %v7771_v44  ;;  %v5583_v62 = vadd.f32 1.0, %v5582_v7 }
 0x850   : > { %v7775_v35 = vpop.eup %7774  ;;  %v5869_v36 = vmul.f32 %v7771_v44, %v5868_v9  ;;  %7780 = vrcp.f32 %v11235_v15  ;;  %v5578_v47 = vsel %vm11231_vm11, %v5575_v0, %v5572_v17  ;;  %vm11241_vm13 = vcmp.eq.f32.partialorder %v5875_v46, 8.507059e+37  ;;  %vm5873_vm14 = vmor %vm5871_vm10, %vm5872_vm12 }
 0x851   : > { %v7777_v25 = vpop.eup %7776  ;;  %v5878_v57 = vor.u32 1.1754944e-38, %v5877_v11  ;;  %v5882_v48 = vmul.f32 %v7775_v35, %v11214_v50  ;;  %v5890_v20 = vand.u32 2147483647, %v11214_v50  ;;  %v5591_v6 = vmul.f32 -0.5, %v11216_v58 }
 0x852   : > { %v5870_v4 = vadd.f32 %v7771_v44, %v5869_v36  ;;  %v5581_v28 = vmul.f32 0.6931472, %v7777_v25  ;;  %vm11250_vm15 = vcmp.lt.f32.partialorder %v5585_v54, 0.0004427343  ;;  %7782 = vpow2.f32 %v5460_v39 }
 0x853   : > { %v5883_v60 = vsub.f32 1.0, %v5882_v48  ;;  %v5637_v59 = vsub.f32 0.0, %v11178_v26  ;;  %v5618_v31 = vadd.f32 %v5578_v47, %v5394_v38  ;;  %v5584_v32 = vmul.f32 %v7765_v49, %v5583_v62 }
 0x854   : > { %v5874_v51 = vsel %vm5873_vm14, %v7771_v44, %v5870_v4  ;;  %v5892_v61 = vand.u32 2147483648, %v11214_v50  ;;  %vm5887_vm0 = vweird.f32 %v7775_v35  ;;  %v5594_v24 = vand.u32 2147483647, %v11216_v58 }
 0x855   : > { %v7779_v3 = vpop.eup %7778  ;;  %v5879_v53 = vsel %vm11241_vm13, %v5878_v57, %v5874_v51  ;;  %v5884_v42 = vmul.f32 %v7775_v35, %v5883_v60  ;;  %v5587_v45 = vsel %vm11250_vm15, %v5584_v32, %v5581_v28  ;;  %v5592_v43 = vadd.f32 1.0, %v5591_v6 }
 0x856   : > { %v7781_v27 = vpop.eup %7780  ;;  %v5941_v16 = vsel %vm5928_vm4, %v5618_v31, %v5879_v53  ;;  %v5668_v12 = vmul.f32 1.442695, %v5637_v59  ;;  %v5395_v5 = vmax.f32 %v11143_v1, 0.0  ;;  %vm5886_vm1 = vweird.f32 %v11214_v50 }
 0x857   : > { %5958 = vst.msk [vmem:[%s10813_s28 + $0x60] sm:$0xff] %vm5945_vm5, %v5941_v16  ;;  %v5885_v56 = vadd.f32 %v7775_v35, %v5884_v42  ;;  %v5897_v49 = vmul.f32 %v7781_v27, %v11235_v15  ;;  %vm5888_vm2 = vmor %vm5886_vm1, %vm5887_vm0  ;;  %v5893_v55 = vor.u32 1.1754944e-38, %v5892_v61  ;;  %v5590_v63 = vmul.f32 0.6931472, %v7779_v3 }
 0x858   : > { %7784 = vpow2.f32 %v5668_v12  ;;  %v7783_v14 = vpop.eup %7782  ;;  %v5619_v19 = vadd.f32 %v5587_v45, %v5395_v5  ;;  %vm5891_vm3 = vcmp.eq.f32.partialorder %v5890_v20, 8.507059e+37  ;;  %v5593_v8 = vmul.f32 %v11216_v58, %v5592_v43 }
 0x859   : > { %v5889_v34 = vsel %vm5888_vm2, %v7775_v35, %v5885_v56  ;;  %v5898_v18 = vsub.f32 1.0, %v5897_v49  ;;  %vm5595_vm6 = vcmp.lt.f32.partialorder %v5594_v24, 0.0004427343  ;;  %v5907_v1 = vand.u32 2147483648, %v11235_v15 }
 0x85a   : > { %v5894_v13 = vsel %vm5891_vm3, %v5893_v55, %v5889_v34  ;;  %vm5902_vm7 = vweird.f32 %v7781_v27  ;;  %v5905_v23 = vand.u32 2147483647, %v11235_v15  ;;  %v5596_v37 = vsel %vm5595_vm6, %v5593_v8, %v5590_v63 }
 0x85b   : > { %v5942_v50 = vsel %vm5928_vm4, %v5619_v19, %v5894_v13  ;;  %v5899_v44 = vmul.f32 %v7781_v27, %v5898_v18  ;;  %v5597_v21 = vadd.f32 1.0, %v7783_v14  ;;  %v5396_v10 = vmax.f32 %v11152_v22, 0.0 }
 0x85c   : > { %5959 = vst.msk [vmem:[%s10813_s28 + $0x68] sm:$0xff] %vm5945_vm5, %v5942_v50  ;;  %vm5901_vm8 = vweird.f32 %v11235_v15  ;;  %v5908_v30 = vor.u32 1.1754944e-38, %v5907_v1  ;;  %vm5906_vm10 = vcmp.eq.f32.partialorder %v5905_v23, 8.507059e+37  ;;  %v5600_v17 = vmul.f32 -0.5, %v7783_v14 }
 0x85d   : > { %v5900_v38 = vadd.f32 %v7781_v27, %v5899_v44  ;;  %vm5903_vm9 = vmor %vm5901_vm8, %vm5902_vm7  ;;  %v5620_v7 = vadd.f32 %v5596_v37, %v5396_v10  ;;  %7786 = vlog2.f32 %v5597_v21  ;;  %v5603_v15 = vand.u32 2147483647, %v7783_v14 }
 0x85e   : > { %v7785_v58 = vpop.eup %7784  ;;  %v5601_v9 = vadd.f32 1.0, %v5600_v17  ;;  %v5397_v29 = vmax.f32 %v11178_v26, 0.0 }
 0x85f   : > { %v5904_v40 = vsel %vm5903_vm9, %v7781_v27, %v5900_v38  ;;  %v5685_v46 = vadd.f32 1.0, %v7785_v58  ;;  %vm5604_vm11 = vcmp.lt.f32.partialorder %v5603_v15, 0.0004427343 }
 0x860   : > { %v5909_v11 = vsel %vm5906_vm10, %v5908_v30, %v5904_v40  ;;  %v5602_v35 = vmul.f32 %v7783_v14, %v5601_v9 }
 0x861   : > { %v5943_v52 = vsel %vm5928_vm4, %v5620_v7, %v5909_v11  ;;  %7788 = vrcp.f32 %v5685_v46  ;;  %v5922_v36 = vand.u32 2147483648, %v5685_v46  ;;  %v5920_v25 = vand.u32 2147483647, %v5685_v46 }
 0x862   : > { %5960 = vst.msk [vmem:[%s10813_s28 + $0x70] sm:$0xff] %vm5945_vm5, %v5943_v52  ;;  %vm5916_vm13 = vweird.f32 %v5685_v46 }
 0x863   : > { %v7787_v22 = vpop.eup %7786  ;;  %v5923_v48 = vor.u32 1.1754944e-38, %v5922_v36  ;;  %vm5921_vm15 = vcmp.eq.f32.partialorder %v5920_v25, 8.507059e+37 }
 0x864   : > { %v5599_v54 = vmul.f32 0.6931472, %v7787_v22 }
 0x866   : > { %v5605_v47 = vsel %vm5604_vm11, %v5602_v35, %v5599_v54 }
 0x867   : > { %v7789_v33 = vpop.eup %7788  ;;  %v5621_v4 = vadd.f32 %v5605_v47, %v5397_v29 }
 0x868   : > { %v5912_v0 = vmul.f32 %v7789_v33, %v5685_v46  ;;  %vm5917_vm12 = vweird.f32 %v7789_v33 }
 0x869   : > { %vm5918_vm14 = vmor %vm5916_vm13, %vm5917_vm12 }
 0x86a   : > { %v5913_v39 = vsub.f32 1.0, %v5912_v0 }
 0x86c   : > { %v5914_v62 = vmul.f32 %v7789_v33, %v5913_v39 }
 0x86e   : > { %v5915_v57 = vadd.f32 %v7789_v33, %v5914_v62 }
 0x870   : > { %v5919_v28 = vsel %vm5918_vm14, %v7789_v33, %v5915_v57 }
 0x871   : > { %v5924_v20 = vsel %vm5921_vm15, %v5923_v48, %v5919_v28 }
 0x872   : > { %v5944_v6 = vsel %vm5928_vm4, %v5621_v4, %v5924_v20 }
 0x873   : > { %5961 = vst.msk [vmem:[%s10813_s28 + $0x78] sm:$0xff] %vm5945_vm5, %v5944_v6 }
 0x874 PF: > { %s11616_s24 = sld [smem:[#allocation13_spill]]  ;;  %p7464_p5 = pnand %p6170_p2, %p8118_p11 }
 0x876   : > { %p7465_p13 = pneg %p7464_p5 }
 0x87a   : > { %s6007_s16 = sand.u32 1, %s11616_s24  }
 0x87b   : > { %s6008_s29 = scalar_lea.sflag [#allocation5], %s6007_s16 }
 0x87c   : > { %7941 = dma.done.wait (%p7465_p13), %s6008_s29, 2048  }
 0x87d   : > { %7943 = vsyncadd (%p7465_p13), %s6008_s29, 4294965248  ;;  %s32_s26 = sadd.s32 1, %s7966_s26   ;;  %s11618_s19 = sld [smem:[#allocation16_spill]] }
 0x87e   : > { %p29_p0 = scmp.ge.s32.totalorder %s32_s26, 4   ;;  %s11619_s28 = sld [smem:[#allocation14_spill]] }
 0x87f   : > { %s11620_s21 = smov %s7950_s22  ;;  %s11621_s22 = smov %s7954_s23 }
 0x880   : > { %s11623_s24 = smov %s7962_s25  ;;  %31 = sbr.rel (!%p29_p0) target bundleno = 16 (0x10), region = 189 }
 0x883   : > { %s11622_s23 = smov %s11618_s19 }
 0x884   : > { %s11624_s25 = smov %s11619_s28 }
 0x885   :  { %6026 = vsyncpa [#allocation4], 1 }
 0x886   :  { %6028 = vsyncpa [#allocation4 + $0x1], 1 }
 0x887   :  { %6029 = vsyncpa [#allocation7], 1 }
 0x888   :  { %6030 = vsyncpa [#allocation5], 1 }
 0x889   :  { %6032 = vsyncpa [#allocation5 + $0x1], 1 }

</bundles_post_ra>
